<compile_context>
chip_gen: v6e
topology: v6e:2x2x1
jax: 0.10.0
libtpu: 0.0.40
codegen_flags: <defaults>
</compile_context>

<pallas_src>
import functools

import jax
import jax.numpy as jnp
from jax import lax
from jax.experimental import pallas as pl
from jax.experimental.pallas import tpu as pltpu


def _supcon_kernel(x_blk_ref, lab_blk_ref, ssim_blk_ref, slab_blk_ref,
                   xt_full_ref, lab_r_ref, ssim_r_ref, slab_r_ref,
                   out_ref, *, temperature, beta):
    T = x_blk_ref.shape[1]          # rows per view-half in this block
    M = xt_full_ref.shape[1]        # total rows/columns (= 2 * R)
    R = M // 2
    b = pl.program_id(0)

    xt_full = xt_full_ref[...]      # [C, M]  pre-transposed -> plain A @ B
    lab_r = lab_r_ref[...]          # [1, M]  labels (columns)
    ssim_r = ssim_r_ref[...]        # [1, M]  sqrt(cosine similarity)
    slab_r = slab_r_ref[...]        # [1, M]  sqrt(labels)
    col_g = lax.broadcasted_iota(jnp.int32, (1, M), 1)
    inv_temp = jnp.float32(1.0 / temperature)

    def half(v, row_base, neg_quad=None, w_quad_in=None):
        """One view-half of this row block; returns only reduced quantities."""
        # Scale the small [T, C] row block once instead of dividing [T, M] logits.
        x = x_blk_ref[v] * inv_temp          # [T, C]
        lab_c = lab_blk_ref[v]               # [T, 1]
        bssim_c = beta * ssim_blk_ref[v]     # [T, 1]  beta folded into row factor
        slab_c = slab_blk_ref[v]             # [T, 1]

        # logits tile = (X_rows / temp) @ Xt   -> [T, M]; no RHS relayout.
        logits = lax.dot_general(x, xt_full,
                                 dimension_numbers=(((1,), (0,)), ((), ())),
                                 preferred_element_type=jnp.float32)

        row_g = row_base + lax.broadcasted_iota(jnp.int32, (T, 1), 0)
        mask = jnp.logical_and(lab_c == lab_r, row_g != col_g).astype(jnp.float32)

        # W = label_matrix * mask (separable sqrt, labels >= 0).
        w = mask * (slab_c * slab_r)
        # One exp serves exp_logits AND the neg row-sum (exponent shift is 0
        # off-mask, incl. the diagonal).
        eb = jnp.exp(logits - mask * (bssim_c * ssim_r))

        msum = mask.sum(axis=1, keepdims=True)                       # [T, 1]
        neg = eb.sum(axis=1, keepdims=True) - (eb * mask).sum(axis=1, keepdims=True)
        a = (w * logits).sum(axis=1, keepdims=True)                  # [T, 1]
        wsum = w.sum(axis=1, keepdims=True)                          # [T, 1]
        log1n = jnp.log(1.0 + neg)                                   # [T, 1]
        nonbg = (lab_c != 0.0).astype(jnp.float32)                   # [T, 1]

        # Quadrant correction: only columns q < R carry non-trivial region
        # logits; the neg added is always the *top* row's neg.  The full-matrix
        # diagonal only ever appears where W is 0, so eb can be used directly.
        # Pairwise log-of-product: two [T, R] logs instead of two [T, M] logs.
        if v == 0:
            fold = jnp.log((eb[:, :R] + neg) * (eb[:, R:] + neg))    # [T, R]
            w_quad = w[:, :R]                                        # [T, R]
            wq_sum = w_quad.sum(axis=1, keepdims=True)               # [T, 1]
            c_part = (w_quad * fold).sum(axis=1, keepdims=True)      # [T, 1]
            return a, wsum, msum, log1n, nonbg, neg, w_quad, wq_sum, c_part
        else:
            fold = jnp.log((eb[:, :R] + neg_quad) * (eb[:, R:] + neg_quad))
            c_part = (w_quad_in * fold).sum(axis=1, keepdims=True)   # [T, 1]
            return a, wsum, msum, log1n, nonbg, c_part

    (a_t, wsum_t, msum_t, log1n_t, nonbg_t,
     neg_t, w_quad, wq_sum, c0) = half(0, b * T)
    (a_b, wsum_b, msum_b, log1n_b, nonbg_b, c1) = half(1, R + b * T, neg_t, w_quad)

    # Sum over the 4 (i, j) regions of mean_log_prob_pos * mask_sum.
    numer_t = 4.0 * a_t - 4.0 * (wsum_t - wq_sum) * log1n_t - (c0 + c1)
    numer_b = 4.0 * a_b - 4.0 * wsum_b * log1n_b

    # Rows with no same-label partner have W == 0 -> numer == 0; guard the 0/0.
    safe_t = jnp.where(msum_t > 0.0, msum_t, 1.0)
    safe_b = jnp.where(msum_b > 0.0, msum_b, 1.0)

    partial = ((-(numer_t / safe_t) * nonbg_t).sum()
               + (-(numer_b / safe_b) * nonbg_b).sum())

    # One (8,128)-aligned lane-dense tile per grid step (no masked stores);
    # the wrapper reads element [8*b, 0] and finishes the reduction.
    out_ref[...] = partial + jnp.zeros((8, 128), jnp.float32)


def _pick_block_rows(R, block_rows):
    """Largest T that is a multiple of 8, divides R and is <= block_rows;
    prefer >= 2 row blocks so 'parallel' can shard across v7x's two cores."""
    if R % 8 != 0:
        return R                       # single full-extent block
    limit = min(block_rows, R)
    if R >= 16:
        limit = min(limit, R // 2)     # keep G >= 2 when possible
    limit -= limit % 8
    for cand in range(limit, 7, -8):
        if R % cand == 0:
            return cand
    return R


def _vmem_limit_bytes():
    """~3/4 of this generation's VMEM (96 MiB on v5e/v6e, 48 MiB on v7x)."""
    try:
        cap = int(pltpu.get_tpu_info().vmem_capacity_bytes)
    except Exception:
        cap = 64 << 20                 # conservative (v7x per-TensorCore)
    return min(cap * 3 // 4, 112 << 20)


def contrast_ce_loss(features, labels, temperature=0.7, stride=1, beta=0.1,
                     block_rows=256):
    """JAX/Pallas equivalent of ContrastCELoss(temperature=0.7)(features, labels)."""
    features = features[:, :, :, ::stride, ::stride].astype(jnp.float32)
    labels_s = labels[:, :, ::stride, ::stride].astype(jnp.float32)

    B, V, C, H, W = features.shape
    assert V == 2, "SupConLoss region logic assumes exactly 2 views"
    R = B * H * W
    M = 2 * R

    # contrast_feature = cat(unbind(features, dim=1), dim=0) -> [2B, C, H, W];
    # X[k] = contrast_feature[n, :, h, w] with k = n*H*W + h*W + w.
    X = jnp.transpose(features, (1, 0, 3, 4, 2)).reshape(M, C)
    # Column operand pre-transposed to [C, M]: the kernel dot is a plain A @ B.
    Xt = jnp.transpose(features, (2, 1, 0, 3, 4)).reshape(C, M)

    lab = jnp.transpose(labels_s, (1, 0, 2, 3)).reshape(M)

    # torch.cosine_similarity(features1, features2) per pixel (O(M*C) glue).
    f1, f2 = X[:R], X[R:]
    dots = (f1 * f2).sum(axis=1)
    n1 = jnp.sqrt((f1 * f1).sum(axis=1))
    n2 = jnp.sqrt((f2 * f2).sum(axis=1))
    sim_half = dots / jnp.maximum(n1 * n2, 1e-8)
    sim = jnp.concatenate([sim_half, sim_half], axis=0)

    # Separable sqrt factors (labels >= 0; similarity assumed >= 0 as in the
    # reference, which takes sqrt of the similarity Gram matrix).
    ssim = jnp.sqrt(sim)
    slab = jnp.sqrt(lab)

    T = _pick_block_rows(R, block_rows)
    G = R // T

    # Pair row p with p + R: leading axis 0/1 selects the view-half.
    x_hw = X.reshape(2, R, C)
    lab_hw = lab.reshape(2, R, 1)
    ssim_hw = ssim.reshape(2, R, 1)
    slab_hw = slab.reshape(2, R, 1)
    lab_row = lab.reshape(1, M)
    ssim_row = ssim.reshape(1, M)
    slab_row = slab.reshape(1, M)

    kernel = functools.partial(_supcon_kernel, temperature=temperature, beta=beta)
    vmem_limit = _vmem_limit_bytes()

    def build(single_buffer_consts):
        const_kw = {}
        if single_buffer_consts:
            # Constant-index blocks never change across the grid -> single
            # buffer them (halves their VMEM residency; Xt is the big one).
            const_kw = dict(pipeline_mode=pl.Buffered(1))
        grid_spec = pltpu.PrefetchScalarGridSpec(
            num_scalar_prefetch=0,
            grid=(G,),
            in_specs=[
                pl.BlockSpec((2, T, C), lambda b: (0, b, 0)),   # X row block (both halves)
                pl.BlockSpec((2, T, 1), lambda b: (0, b, 0)),   # labels (rows)
                pl.BlockSpec((2, T, 1), lambda b: (0, b, 0)),   # sqrt(sim) (rows)
                pl.BlockSpec((2, T, 1), lambda b: (0, b, 0)),   # sqrt(lab) (rows)
                pl.BlockSpec((C, M), lambda b: (0, 0), **const_kw),  # Xt (columns side)
                pl.BlockSpec((1, M), lambda b: (0, 0), **const_kw),  # labels (columns)
                pl.BlockSpec((1, M), lambda b: (0, 0), **const_kw),  # sqrt(sim) (columns)
                pl.BlockSpec((1, M), lambda b: (0, 0), **const_kw),  # sqrt(lab) (columns)
            ],
            out_specs=pl.BlockSpec((8, 128), lambda b: (b, 0)),
        )
        return pl.pallas_call(
            kernel,
            out_shape=jax.ShapeDtypeStruct((8 * G, 128), jnp.float32),
            grid_spec=grid_spec,
            compiler_params=pltpu.CompilerParams(
                dimension_semantics=("parallel",),     # megacore-shard row blocks (v7x)
                vmem_limit_bytes=vmem_limit),
        )

    args = (x_hw, lab_hw, ssim_hw, slab_hw, Xt, lab_row, ssim_row, slab_row)
    try:
        partials = build(True)(*args)
    except Exception:
        # Fallback for jax builds without BlockSpec pipeline_mode support:
        # identical semantics, default double-buffered constant blocks.
        partials = build(False)(*args)

    nonbg_sum = (lab != 0.0).astype(jnp.float32).sum()
    block_vals = partials[0::8, 0]                 # one partial per row block
    loss = block_vals.sum() / (4.0 * jnp.maximum(nonbg_sum, 1.0))

    # ContrastCELoss: if labels.sum() == 0 -> loss = 0 (data-dependent branch
    # expressed as a select since JAX traces shapes, not values).
    return jnp.where(labels_s.sum() == 0.0, jnp.float32(0.0), loss)


if __name__ == "__main__":
    key = jax.random.PRNGKey(0)
    kf, kl = jax.random.split(key)
    B, V, C, H, W = 2, 2, 4, 8, 8
    # Positive features keep the per-pixel cosine similarity >= 0 (matches the
    # reference's implicit assumption; torch sqrt of a negative product -> NaN).
    features = jax.random.uniform(kf, (B, V, C, H, W), dtype=jnp.float32)
    labels = jax.random.randint(kl, (B, V, H, W), 0, 3).astype(jnp.int32)

    loss = contrast_ce_loss(features, labels)
    jax.block_until_ready(loss)
    print("KERNEL_OK")
</pallas_src>

<mosaic_0001>
module attributes {stable_mosaic.version = 11 : i64} {
  func.func @_supcon_kernel(%arg0: i32, %arg1: memref<2x64x4xf32, #tpu.memory_space<vmem>>, %arg2: memref<2x64x1xf32, #tpu.memory_space<vmem>>, %arg3: memref<2x64x1xf32, #tpu.memory_space<vmem>>, %arg4: memref<2x64x1xf32, #tpu.memory_space<vmem>>, %arg5: memref<4x256xf32, #tpu.memory_space<vmem>>, %arg6: memref<1x256xf32, #tpu.memory_space<vmem>>, %arg7: memref<1x256xf32, #tpu.memory_space<vmem>>, %arg8: memref<1x256xf32, #tpu.memory_space<vmem>>, %arg9: memref<8x128xf32, #tpu.memory_space<vmem>>) attributes {dimension_semantics = [#tpu.dimension_semantics<parallel>], iteration_bounds = array<i64: 2>, scalar_prefetch = 0 : i64, scratch_operands = 0 : i64, tpu.core_type = #tpu.core_type<tc>, window_params = [{transform_indices = @transform_0, window_bounds = array<i64: 2, 64, 4>}, {transform_indices = @transform_1, window_bounds = array<i64: 2, 64, 1>}, {transform_indices = @transform_2, window_bounds = array<i64: 2, 64, 1>}, {transform_indices = @transform_3, window_bounds = array<i64: 2, 64, 1>}, {pipeline_mode = #tpu.pipeline_mode<synchronous>, transform_indices = @transform_4, window_bounds = array<i64: 4, 256>}, {pipeline_mode = #tpu.pipeline_mode<synchronous>, transform_indices = @transform_5, window_bounds = array<i64: 1, 256>}, {pipeline_mode = #tpu.pipeline_mode<synchronous>, transform_indices = @transform_6, window_bounds = array<i64: 1, 256>}, {pipeline_mode = #tpu.pipeline_mode<synchronous>, transform_indices = @transform_7, window_bounds = array<i64: 1, 256>}, {transform_indices = @transform_8, window_bounds = array<i64: 8, 128>}]} {
    %c0 = arith.constant 0 : index
    %c0_0 = arith.constant 0 : index
    %0 = vector.load %arg5[%c0, %c0_0] : memref<4x256xf32, #tpu.memory_space<vmem>>, vector<4x256xf32>
    %c0_1 = arith.constant 0 : index
    %c0_2 = arith.constant 0 : index
    %1 = vector.load %arg6[%c0_1, %c0_2] : memref<1x256xf32, #tpu.memory_space<vmem>>, vector<1x256xf32>
    %c0_3 = arith.constant 0 : index
    %c0_4 = arith.constant 0 : index
    %2 = vector.load %arg7[%c0_3, %c0_4] : memref<1x256xf32, #tpu.memory_space<vmem>>, vector<1x256xf32>
    %c0_5 = arith.constant 0 : index
    %c0_6 = arith.constant 0 : index
    %3 = vector.load %arg8[%c0_5, %c0_6] : memref<1x256xf32, #tpu.memory_space<vmem>>, vector<1x256xf32>
    %4 = tpu.iota {dimensions = array<i32: 1>} : vector<1x256xi32>
    %c64_i32 = arith.constant 64 : i32
    %5 = arith.muli %arg0, %c64_i32 : i32
    %c0_7 = arith.constant 0 : index
    %c0_8 = arith.constant 0 : index
    %c0_9 = arith.constant 0 : index
    %6 = vector.load %arg1[%c0_7, %c0_8, %c0_9] : memref<2x64x4xf32, #tpu.memory_space<vmem>>, vector<1x64x4xf32>
    %7 = vector.shape_cast %6 : vector<1x64x4xf32> to vector<64x4xf32>
    %cst = arith.constant 1.42857146 : f32
    %8 = vector.broadcast %cst : f32 to vector<64x4xf32>
    %9 = arith.mulf %7, %8 : vector<64x4xf32>
    %c0_10 = arith.constant 0 : index
    %c0_11 = arith.constant 0 : index
    %c0_12 = arith.constant 0 : index
    %10 = vector.load %arg2[%c0_10, %c0_11, %c0_12] : memref<2x64x1xf32, #tpu.memory_space<vmem>>, vector<1x64x1xf32>
    %11 = vector.shape_cast %10 : vector<1x64x1xf32> to vector<64x1xf32>
    %c0_13 = arith.constant 0 : index
    %c0_14 = arith.constant 0 : index
    %c0_15 = arith.constant 0 : index
    %12 = vector.load %arg3[%c0_13, %c0_14, %c0_15] : memref<2x64x1xf32, #tpu.memory_space<vmem>>, vector<1x64x1xf32>
    %13 = vector.shape_cast %12 : vector<1x64x1xf32> to vector<64x1xf32>
    %cst_16 = arith.constant 1.000000e-01 : f32
    %14 = vector.broadcast %cst_16 : f32 to vector<64x1xf32>
    %15 = arith.mulf %14, %13 : vector<64x1xf32>
    %c0_17 = arith.constant 0 : index
    %c0_18 = arith.constant 0 : index
    %c0_19 = arith.constant 0 : index
    %16 = vector.load %arg4[%c0_17, %c0_18, %c0_19] : memref<2x64x1xf32, #tpu.memory_space<vmem>>, vector<1x64x1xf32>
    %17 = vector.shape_cast %16 : vector<1x64x1xf32> to vector<64x1xf32>
    %cst_20 = arith.constant dense<0.000000e+00> : vector<64x256xf32>
    %18 = tpu.matmul %9, %0, %cst_20 {dimension_numbers = #tpu.dot_dimension_numbers<[1], [0], [0], [1], [0, 0, 1, 1], [], []>} : vector<64x4xf32>, vector<4x256xf32>, vector<64x256xf32> -> vector<64x256xf32>
    %19 = tpu.iota {dimensions = array<i32: 0>} : vector<64x1xi32>
    %20 = vector.broadcast %5 : i32 to vector<64x1xi32>
    %21 = arith.addi %20, %19 : vector<64x1xi32>
    %22 = vector.broadcast %11 : vector<64x1xf32> to vector<64x256xf32>
    %23 = vector.broadcast %1 : vector<1x256xf32> to vector<64x256xf32>
    %24 = arith.cmpf oeq, %22, %23 : vector<64x256xf32>
    %25 = vector.broadcast %21 : vector<64x1xi32> to vector<64x256xi32>
    %26 = vector.broadcast %4 : vector<1x256xi32> to vector<64x256xi32>
    %27 = arith.cmpi ne, %25, %26 : vector<64x256xi32>
    %28 = arith.andi %24, %27 : vector<64x256xi1>
    %29 = arith.extui %28 : vector<64x256xi1> to vector<64x256xi32>
    %30 = arith.sitofp %29 : vector<64x256xi32> to vector<64x256xf32>
    %31 = vector.broadcast %17 : vector<64x1xf32> to vector<64x256xf32>
    %32 = vector.broadcast %3 : vector<1x256xf32> to vector<64x256xf32>
    %33 = arith.mulf %31, %32 : vector<64x256xf32>
    %34 = arith.mulf %30, %33 : vector<64x256xf32>
    %35 = vector.broadcast %15 : vector<64x1xf32> to vector<64x256xf32>
    %36 = vector.broadcast %2 : vector<1x256xf32> to vector<64x256xf32>
    %37 = arith.mulf %35, %36 : vector<64x256xf32>
    %38 = arith.mulf %30, %37 : vector<64x256xf32>
    %39 = arith.subf %18, %38 : vector<64x256xf32>
    %40 = math.exp %39 : vector<64x256xf32>
    %cst_21 = arith.constant dense<0.000000e+00> : vector<64xf32>
    %41 = vector.multi_reduction <add>, %30, %cst_21 [1] : vector<64x256xf32> to vector<64xf32>
    %42 = vector.shape_cast %41 : vector<64xf32> to vector<64x1xf32>
    %cst_22 = arith.constant dense<0.000000e+00> : vector<64xf32>
    %43 = vector.multi_reduction <add>, %40, %cst_22 [1] : vector<64x256xf32> to vector<64xf32>
    %44 = vector.shape_cast %43 : vector<64xf32> to vector<64x1xf32>
    %45 = arith.mulf %40, %30 : vector<64x256xf32>
    %cst_23 = arith.constant dense<0.000000e+00> : vector<64xf32>
    %46 = vector.multi_reduction <add>, %45, %cst_23 [1] : vector<64x256xf32> to vector<64xf32>
    %47 = vector.shape_cast %46 : vector<64xf32> to vector<64x1xf32>
    %48 = arith.subf %44, %47 : vector<64x1xf32>
    %49 = arith.mulf %34, %18 : vector<64x256xf32>
    %cst_24 = arith.constant dense<0.000000e+00> : vector<64xf32>
    %50 = vector.multi_reduction <add>, %49, %cst_24 [1] : vector<64x256xf32> to vector<64xf32>
    %51 = vector.shape_cast %50 : vector<64xf32> to vector<64x1xf32>
    %cst_25 = arith.constant dense<0.000000e+00> : vector<64xf32>
    %52 = vector.multi_reduction <add>, %34, %cst_25 [1] : vector<64x256xf32> to vector<64xf32>
    %53 = vector.shape_cast %52 : vector<64xf32> to vector<64x1xf32>
    %cst_26 = arith.constant 1.000000e+00 : f32
    %54 = vector.broadcast %cst_26 : f32 to vector<64x1xf32>
    %55 = arith.addf %54, %48 : vector<64x1xf32>
    %56 = math.log %55 : vector<64x1xf32>
    %cst_27 = arith.constant 0.000000e+00 : f32
    %57 = vector.broadcast %cst_27 : f32 to vector<64x1xf32>
    %58 = arith.cmpf one, %11, %57 : vector<64x1xf32>
    %59 = arith.extui %58 : vector<64x1xi1> to vector<64x1xi32>
    %60 = arith.sitofp %59 : vector<64x1xi32> to vector<64x1xf32>
    %61 = vector.extract_strided_slice %40 {offsets = [0, 0], sizes = [64, 128], strides = [1, 1]} : vector<64x256xf32> to vector<64x128xf32>
    %62 = vector.broadcast %48 : vector<64x1xf32> to vector<64x128xf32>
    %63 = arith.addf %61, %62 : vector<64x128xf32>
    %64 = vector.extract_strided_slice %40 {offsets = [0, 128], sizes = [64, 128], strides = [1, 1]} : vector<64x256xf32> to vector<64x128xf32>
    %65 = vector.broadcast %48 : vector<64x1xf32> to vector<64x128xf32>
    %66 = arith.addf %64, %65 : vector<64x128xf32>
    %67 = arith.mulf %63, %66 : vector<64x128xf32>
    %68 = math.log %67 : vector<64x128xf32>
    %69 = vector.extract_strided_slice %34 {offsets = [0, 0], sizes = [64, 128], strides = [1, 1]} : vector<64x256xf32> to vector<64x128xf32>
    %cst_28 = arith.constant dense<0.000000e+00> : vector<64xf32>
    %70 = vector.multi_reduction <add>, %69, %cst_28 [1] : vector<64x128xf32> to vector<64xf32>
    %71 = vector.shape_cast %70 : vector<64xf32> to vector<64x1xf32>
    %72 = arith.mulf %69, %68 : vector<64x128xf32>
    %cst_29 = arith.constant dense<0.000000e+00> : vector<64xf32>
    %73 = vector.multi_reduction <add>, %72, %cst_29 [1] : vector<64x128xf32> to vector<64xf32>
    %74 = vector.shape_cast %73 : vector<64xf32> to vector<64x1xf32>
    %c64_i32_30 = arith.constant 64 : i32
    %75 = arith.muli %arg0, %c64_i32_30 : i32
    %c128_i32 = arith.constant 128 : i32
    %76 = arith.addi %c128_i32, %75 : i32
    %c1 = arith.constant 1 : index
    %c0_31 = arith.constant 0 : index
    %c0_32 = arith.constant 0 : index
    %77 = vector.load %arg1[%c1, %c0_31, %c0_32] : memref<2x64x4xf32, #tpu.memory_space<vmem>>, vector<1x64x4xf32>
    %78 = vector.shape_cast %77 : vector<1x64x4xf32> to vector<64x4xf32>
    %cst_33 = arith.constant 1.42857146 : f32
    %79 = vector.broadcast %cst_33 : f32 to vector<64x4xf32>
    %80 = arith.mulf %78, %79 : vector<64x4xf32>
    %c1_34 = arith.constant 1 : index
    %c0_35 = arith.constant 0 : index
    %c0_36 = arith.constant 0 : index
    %81 = vector.load %arg2[%c1_34, %c0_35, %c0_36] : memref<2x64x1xf32, #tpu.memory_space<vmem>>, vector<1x64x1xf32>
    %82 = vector.shape_cast %81 : vector<1x64x1xf32> to vector<64x1xf32>
    %c1_37 = arith.constant 1 : index
    %c0_38 = arith.constant 0 : index
    %c0_39 = arith.constant 0 : index
    %83 = vector.load %arg3[%c1_37, %c0_38, %c0_39] : memref<2x64x1xf32, #tpu.memory_space<vmem>>, vector<1x64x1xf32>
    %84 = vector.shape_cast %83 : vector<1x64x1xf32> to vector<64x1xf32>
    %cst_40 = arith.constant 1.000000e-01 : f32
    %85 = vector.broadcast %cst_40 : f32 to vector<64x1xf32>
    %86 = arith.mulf %85, %84 : vector<64x1xf32>
    %c1_41 = arith.constant 1 : index
    %c0_42 = arith.constant 0 : index
    %c0_43 = arith.constant 0 : index
    %87 = vector.load %arg4[%c1_41, %c0_42, %c0_43] : memref<2x64x1xf32, #tpu.memory_space<vmem>>, vector<1x64x1xf32>
    %88 = vector.shape_cast %87 : vector<1x64x1xf32> to vector<64x1xf32>
    %cst_44 = arith.constant dense<0.000000e+00> : vector<64x256xf32>
    %89 = tpu.matmul %80, %0, %cst_44 {dimension_numbers = #tpu.dot_dimension_numbers<[1], [0], [0], [1], [0, 0, 1, 1], [], []>} : vector<64x4xf32>, vector<4x256xf32>, vector<64x256xf32> -> vector<64x256xf32>
    %90 = tpu.iota {dimensions = array<i32: 0>} : vector<64x1xi32>
    %91 = vector.broadcast %76 : i32 to vector<64x1xi32>
    %92 = arith.addi %91, %90 : vector<64x1xi32>
    %93 = vector.broadcast %82 : vector<64x1xf32> to vector<64x256xf32>
    %94 = vector.broadcast %1 : vector<1x256xf32> to vector<64x256xf32>
    %95 = arith.cmpf oeq, %93, %94 : vector<64x256xf32>
    %96 = vector.broadcast %92 : vector<64x1xi32> to vector<64x256xi32>
    %97 = vector.broadcast %4 : vector<1x256xi32> to vector<64x256xi32>
    %98 = arith.cmpi ne, %96, %97 : vector<64x256xi32>
    %99 = arith.andi %95, %98 : vector<64x256xi1>
    %100 = arith.extui %99 : vector<64x256xi1> to vector<64x256xi32>
    %101 = arith.sitofp %100 : vector<64x256xi32> to vector<64x256xf32>
    %102 = vector.broadcast %88 : vector<64x1xf32> to vector<64x256xf32>
    %103 = vector.broadcast %3 : vector<1x256xf32> to vector<64x256xf32>
    %104 = arith.mulf %102, %103 : vector<64x256xf32>
    %105 = arith.mulf %101, %104 : vector<64x256xf32>
    %106 = vector.broadcast %86 : vector<64x1xf32> to vector<64x256xf32>
    %107 = vector.broadcast %2 : vector<1x256xf32> to vector<64x256xf32>
    %108 = arith.mulf %106, %107 : vector<64x256xf32>
    %109 = arith.mulf %101, %108 : vector<64x256xf32>
    %110 = arith.subf %89, %109 : vector<64x256xf32>
    %111 = math.exp %110 : vector<64x256xf32>
    %cst_45 = arith.constant dense<0.000000e+00> : vector<64xf32>
    %112 = vector.multi_reduction <add>, %101, %cst_45 [1] : vector<64x256xf32> to vector<64xf32>
    %113 = vector.shape_cast %112 : vector<64xf32> to vector<64x1xf32>
    %cst_46 = arith.constant dense<0.000000e+00> : vector<64xf32>
    %114 = vector.multi_reduction <add>, %111, %cst_46 [1] : vector<64x256xf32> to vector<64xf32>
    %115 = vector.shape_cast %114 : vector<64xf32> to vector<64x1xf32>
    %116 = arith.mulf %111, %101 : vector<64x256xf32>
    %cst_47 = arith.constant dense<0.000000e+00> : vector<64xf32>
    %117 = vector.multi_reduction <add>, %116, %cst_47 [1] : vector<64x256xf32> to vector<64xf32>
    %118 = vector.shape_cast %117 : vector<64xf32> to vector<64x1xf32>
    %119 = arith.subf %115, %118 : vector<64x1xf32>
    %120 = arith.mulf %105, %89 : vector<64x256xf32>
    %cst_48 = arith.constant dense<0.000000e+00> : vector<64xf32>
    %121 = vector.multi_reduction <add>, %120, %cst_48 [1] : vector<64x256xf32> to vector<64xf32>
    %122 = vector.shape_cast %121 : vector<64xf32> to vector<64x1xf32>
    %cst_49 = arith.constant dense<0.000000e+00> : vector<64xf32>
    %123 = vector.multi_reduction <add>, %105, %cst_49 [1] : vector<64x256xf32> to vector<64xf32>
    %124 = vector.shape_cast %123 : vector<64xf32> to vector<64x1xf32>
    %cst_50 = arith.constant 1.000000e+00 : f32
    %125 = vector.broadcast %cst_50 : f32 to vector<64x1xf32>
    %126 = arith.addf %125, %119 : vector<64x1xf32>
    %127 = math.log %126 : vector<64x1xf32>
    %cst_51 = arith.constant 0.000000e+00 : f32
    %128 = vector.broadcast %cst_51 : f32 to vector<64x1xf32>
    %129 = arith.cmpf one, %82, %128 : vector<64x1xf32>
    %130 = arith.extui %129 : vector<64x1xi1> to vector<64x1xi32>
    %131 = arith.sitofp %130 : vector<64x1xi32> to vector<64x1xf32>
    %132 = vector.extract_strided_slice %111 {offsets = [0, 0], sizes = [64, 128], strides = [1, 1]} : vector<64x256xf32> to vector<64x128xf32>
    %133 = vector.broadcast %48 : vector<64x1xf32> to vector<64x128xf32>
    %134 = arith.addf %132, %133 : vector<64x128xf32>
    %135 = vector.extract_strided_slice %111 {offsets = [0, 128], sizes = [64, 128], strides = [1, 1]} : vector<64x256xf32> to vector<64x128xf32>
    %136 = vector.broadcast %48 : vector<64x1xf32> to vector<64x128xf32>
    %137 = arith.addf %135, %136 : vector<64x128xf32>
    %138 = arith.mulf %134, %137 : vector<64x128xf32>
    %139 = math.log %138 : vector<64x128xf32>
    %140 = arith.mulf %69, %139 : vector<64x128xf32>
    %cst_52 = arith.constant dense<0.000000e+00> : vector<64xf32>
    %141 = vector.multi_reduction <add>, %140, %cst_52 [1] : vector<64x128xf32> to vector<64xf32>
    %142 = vector.shape_cast %141 : vector<64xf32> to vector<64x1xf32>
    %cst_53 = arith.constant 4.000000e+00 : f32
    %143 = vector.broadcast %cst_53 : f32 to vector<64x1xf32>
    %144 = arith.mulf %143, %51 : vector<64x1xf32>
    %145 = arith.subf %53, %71 : vector<64x1xf32>
    %cst_54 = arith.constant 4.000000e+00 : f32
    %146 = vector.broadcast %cst_54 : f32 to vector<64x1xf32>
    %147 = arith.mulf %146, %145 : vector<64x1xf32>
    %148 = arith.mulf %147, %56 : vector<64x1xf32>
    %149 = arith.subf %144, %148 : vector<64x1xf32>
    %150 = arith.addf %74, %142 : vector<64x1xf32>
    %151 = arith.subf %149, %150 : vector<64x1xf32>
    %cst_55 = arith.constant 4.000000e+00 : f32
    %152 = vector.broadcast %cst_55 : f32 to vector<64x1xf32>
    %153 = arith.mulf %152, %122 : vector<64x1xf32>
    %cst_56 = arith.constant 4.000000e+00 : f32
    %154 = vector.broadcast %cst_56 : f32 to vector<64x1xf32>
    %155 = arith.mulf %154, %124 : vector<64x1xf32>
    %156 = arith.mulf %155, %127 : vector<64x1xf32>
    %157 = arith.subf %153, %156 : vector<64x1xf32>
    %cst_57 = arith.constant 0.000000e+00 : f32
    %158 = vector.broadcast %cst_57 : f32 to vector<64x1xf32>
    %159 = arith.cmpf ogt, %42, %158 : vector<64x1xf32>
    %cst_58 = arith.constant 1.000000e+00 : f32
    %160 = vector.broadcast %cst_58 : f32 to vector<64x1xf32>
    %161 = arith.select %159, %42, %160 : vector<64x1xi1>, vector<64x1xf32>
    %cst_59 = arith.constant 0.000000e+00 : f32
    %162 = vector.broadcast %cst_59 : f32 to vector<64x1xf32>
    %163 = arith.cmpf ogt, %113, %162 : vector<64x1xf32>
    %cst_60 = arith.constant 1.000000e+00 : f32
    %164 = vector.broadcast %cst_60 : f32 to vector<64x1xf32>
    %165 = arith.select %163, %113, %164 : vector<64x1xi1>, vector<64x1xf32>
    %166 = arith.divf %151, %161 : vector<64x1xf32>
    %cst_61 = arith.constant 0.000000e+00 : f32
    %167 = vector.broadcast %cst_61 : f32 to vector<64x1xf32>
    %168 = arith.subf %167, %166 : vector<64x1xf32>
    %169 = arith.mulf %168, %60 : vector<64x1xf32>
    %170 = vector.shape_cast %169 : vector<64x1xf32> to vector<1x64x1xf32>
    %cst_62 = arith.constant dense<0.000000e+00> : vector<1xf32>
    %171 = vector.multi_reduction <add>, %170, %cst_62 [1, 2] : vector<1x64x1xf32> to vector<1xf32>
    %172 = vector.shape_cast %171 : vector<1xf32> to vector<1x1x1xf32>
    %173 = vector.extract %172[0, 0, 0] : f32 from vector<1x1x1xf32>
    %174 = arith.divf %157, %165 : vector<64x1xf32>
    %cst_63 = arith.constant 0.000000e+00 : f32
    %175 = vector.broadcast %cst_63 : f32 to vector<64x1xf32>
    %176 = arith.subf %175, %174 : vector<64x1xf32>
    %177 = arith.mulf %176, %131 : vector<64x1xf32>
    %178 = vector.shape_cast %177 : vector<64x1xf32> to vector<1x64x1xf32>
    %cst_64 = arith.constant dense<0.000000e+00> : vector<1xf32>
    %179 = vector.multi_reduction <add>, %178, %cst_64 [1, 2] : vector<1x64x1xf32> to vector<1xf32>
    %180 = vector.shape_cast %179 : vector<1xf32> to vector<1x1x1xf32>
    %181 = vector.extract %180[0, 0, 0] : f32 from vector<1x1x1xf32>
    %182 = arith.addf %173, %181 : f32
    %cst_65 = arith.constant 0.000000e+00 : f32
    %183 = vector.broadcast %cst_65 : f32 to vector<8x128xf32>
    %184 = vector.broadcast %182 : f32 to vector<8x128xf32>
    %185 = arith.addf %184, %183 : vector<8x128xf32>
    %c0_66 = arith.constant 0 : index
    %c0_67 = arith.constant 0 : index
    %186 = vector.load %arg9[%c0_66, %c0_67] : memref<8x128xf32, #tpu.memory_space<vmem>>, vector<8x128xf32>
    tpu.vector_store %arg9[%c0_66, %c0_67], %185 {strides = array<i32>} : memref<8x128xf32, #tpu.memory_space<vmem>>, vector<8x128xf32>,
    return
  }
  func.func @transform_0(%arg0: i32) -> (i32, i32, i32) {
    %c0_i32 = arith.constant 0 : i32
    %c0_i32_0 = arith.constant 0 : i32
    %c0_i32_1 = arith.constant 0 : i32
    return %c0_i32, %arg0, %c0_i32_0 : i32, i32, i32
  }
  func.func @transform_1(%arg0: i32) -> (i32, i32, i32) {
    %c0_i32 = arith.constant 0 : i32
    %c0_i32_0 = arith.constant 0 : i32
    %c0_i32_1 = arith.constant 0 : i32
    return %c0_i32, %arg0, %c0_i32_0 : i32, i32, i32
  }
  func.func @transform_2(%arg0: i32) -> (i32, i32, i32) {
    %c0_i32 = arith.constant 0 : i32
    %c0_i32_0 = arith.constant 0 : i32
    %c0_i32_1 = arith.constant 0 : i32
    return %c0_i32, %arg0, %c0_i32_0 : i32, i32, i32
  }
  func.func @transform_3(%arg0: i32) -> (i32, i32, i32) {
    %c0_i32 = arith.constant 0 : i32
    %c0_i32_0 = arith.constant 0 : i32
    %c0_i32_1 = arith.constant 0 : i32
    return %c0_i32, %arg0, %c0_i32_0 : i32, i32, i32
  }
  func.func @transform_4(%arg0: i32) -> (i32, i32) {
    %c0_i32 = arith.constant 0 : i32
    %c0_i32_0 = arith.constant 0 : i32
    %c0_i32_1 = arith.constant 0 : i32
    return %c0_i32, %c0_i32_0 : i32, i32
  }
  func.func @transform_5(%arg0: i32) -> (i32, i32) {
    %c0_i32 = arith.constant 0 : i32
    %c0_i32_0 = arith.constant 0 : i32
    %c0_i32_1 = arith.constant 0 : i32
    return %c0_i32, %c0_i32_0 : i32, i32
  }
  func.func @transform_6(%arg0: i32) -> (i32, i32) {
    %c0_i32 = arith.constant 0 : i32
    %c0_i32_0 = arith.constant 0 : i32
    %c0_i32_1 = arith.constant 0 : i32
    return %c0_i32, %c0_i32_0 : i32, i32
  }
  func.func @transform_7(%arg0: i32) -> (i32, i32) {
    %c0_i32 = arith.constant 0 : i32
    %c0_i32_0 = arith.constant 0 : i32
    %c0_i32_1 = arith.constant 0 : i32
    return %c0_i32, %c0_i32_0 : i32, i32
  }
  func.func @transform_8(%arg0: i32) -> (i32, i32) {
    %c0_i32 = arith.constant 0 : i32
    %c0_i32_0 = arith.constant 0 : i32
    return %arg0, %c0_i32 : i32, i32
  }
}

module attributes {stable_mosaic.version = 11 : i64} {
  func.func @_supcon_kernel(%arg0: i32, %arg1: memref<2x64x4xf32, #tpu.memory_space<vmem>>, %arg2: memref<2x64x1xf32, #tpu.memory_space<vmem>>, %arg3: memref<2x64x1xf32, #tpu.memory_space<vmem>>, %arg4: memref<2x64x1xf32, #tpu.memory_space<vmem>>, %arg5: memref<4x256xf32, #tpu.memory_space<vmem>>, %arg6: memref<1x256xf32, #tpu.memory_space<vmem>>, %arg7: memref<1x256xf32, #tpu.memory_space<vmem>>, %arg8: memref<1x256xf32, #tpu.memory_space<vmem>>, %arg9: memref<8x128xf32, #tpu.memory_space<vmem>>) attributes {dimension_semantics = [#tpu.dimension_semantics<parallel>], iteration_bounds = array<i64: 2>, scalar_prefetch = 0 : i64, scratch_operands = 0 : i64, tpu.core_type = #tpu.core_type<tc>, window_params = [{transform_indices = @transform_0, window_bounds = array<i64: 2, 64, 4>}, {transform_indices = @transform_1, window_bounds = array<i64: 2, 64, 1>}, {transform_indices = @transform_2, window_bounds = array<i64: 2, 64, 1>}, {transform_indices = @transform_3, window_bounds = array<i64: 2, 64, 1>}, {pipeline_mode = #tpu.pipeline_mode<synchronous>, transform_indices = @transform_4, window_bounds = array<i64: 4, 256>}, {pipeline_mode = #tpu.pipeline_mode<synchronous>, transform_indices = @transform_5, window_bounds = array<i64: 1, 256>}, {pipeline_mode = #tpu.pipeline_mode<synchronous>, transform_indices = @transform_6, window_bounds = array<i64: 1, 256>}, {pipeline_mode = #tpu.pipeline_mode<synchronous>, transform_indices = @transform_7, window_bounds = array<i64: 1, 256>}, {transform_indices = @transform_8, window_bounds = array<i64: 8, 128>}]} {
    %c0 = arith.constant 0 : index
    %c0_0 = arith.constant 0 : index
    %0 = vector.load %arg5[%c0, %c0_0] : memref<4x256xf32, #tpu.memory_space<vmem>>, vector<4x256xf32>
    %c0_1 = arith.constant 0 : index
    %c0_2 = arith.constant 0 : index
    %1 = vector.load %arg6[%c0_1, %c0_2] : memref<1x256xf32, #tpu.memory_space<vmem>>, vector<1x256xf32>
    %c0_3 = arith.constant 0 : index
    %c0_4 = arith.constant 0 : index
    %2 = vector.load %arg7[%c0_3, %c0_4] : memref<1x256xf32, #tpu.memory_space<vmem>>, vector<1x256xf32>
    %c0_5 = arith.constant 0 : index
    %c0_6 = arith.constant 0 : index
    %3 = vector.load %arg8[%c0_5, %c0_6] : memref<1x256xf32, #tpu.memory_space<vmem>>, vector<1x256xf32>
    %4 = tpu.iota {dimensions = array<i32: 1>} : vector<1x256xi32>
    %c64_i32 = arith.constant 64 : i32
    %5 = arith.muli %arg0, %c64_i32 : i32
    %c0_7 = arith.constant 0 : index
    %c0_8 = arith.constant 0 : index
    %c0_9 = arith.constant 0 : index
    %6 = vector.load %arg1[%c0_7, %c0_8, %c0_9] : memref<2x64x4xf32, #tpu.memory_space<vmem>>, vector<1x64x4xf32>
    %7 = vector.shape_cast %6 : vector<1x64x4xf32> to vector<64x4xf32>
    %cst = arith.constant 1.42857146 : f32
    %8 = vector.broadcast %cst : f32 to vector<64x4xf32>
    %9 = arith.mulf %7, %8 : vector<64x4xf32>
    %c0_10 = arith.constant 0 : index
    %c0_11 = arith.constant 0 : index
    %c0_12 = arith.constant 0 : index
    %10 = vector.load %arg2[%c0_10, %c0_11, %c0_12] : memref<2x64x1xf32, #tpu.memory_space<vmem>>, vector<1x64x1xf32>
    %11 = vector.shape_cast %10 : vector<1x64x1xf32> to vector<64x1xf32>
    %c0_13 = arith.constant 0 : index
    %c0_14 = arith.constant 0 : index
    %c0_15 = arith.constant 0 : index
    %12 = vector.load %arg3[%c0_13, %c0_14, %c0_15] : memref<2x64x1xf32, #tpu.memory_space<vmem>>, vector<1x64x1xf32>
    %13 = vector.shape_cast %12 : vector<1x64x1xf32> to vector<64x1xf32>
    %cst_16 = arith.constant 1.000000e-01 : f32
    %14 = vector.broadcast %cst_16 : f32 to vector<64x1xf32>
    %15 = arith.mulf %14, %13 : vector<64x1xf32>
    %c0_17 = arith.constant 0 : index
    %c0_18 = arith.constant 0 : index
    %c0_19 = arith.constant 0 : index
    %16 = vector.load %arg4[%c0_17, %c0_18, %c0_19] : memref<2x64x1xf32, #tpu.memory_space<vmem>>, vector<1x64x1xf32>
    %17 = vector.shape_cast %16 : vector<1x64x1xf32> to vector<64x1xf32>
    %cst_20 = arith.constant dense<0.000000e+00> : vector<64x256xf32>
    %18 = tpu.matmul %9, %0, %cst_20 {dimension_numbers = #tpu.dot_dimension_numbers<[1], [0], [0], [1], [0, 0, 1, 1], [], []>} : vector<64x4xf32>, vector<4x256xf32>, vector<64x256xf32> -> vector<64x256xf32>
    %19 = tpu.iota {dimensions = array<i32: 0>} : vector<64x1xi32>
    %20 = vector.broadcast %5 : i32 to vector<64x1xi32>
    %21 = arith.addi %20, %19 : vector<64x1xi32>
    %22 = vector.broadcast %11 : vector<64x1xf32> to vector<64x256xf32>
    %23 = vector.broadcast %1 : vector<1x256xf32> to vector<64x256xf32>
    %24 = arith.cmpf oeq, %22, %23 : vector<64x256xf32>
    %25 = vector.broadcast %21 : vector<64x1xi32> to vector<64x256xi32>
    %26 = vector.broadcast %4 : vector<1x256xi32> to vector<64x256xi32>
    %27 = arith.cmpi ne, %25, %26 : vector<64x256xi32>
    %28 = arith.andi %24, %27 : vector<64x256xi1>
    %29 = arith.extui %28 : vector<64x256xi1> to vector<64x256xi32>
    %30 = arith.sitofp %29 : vector<64x256xi32> to vector<64x256xf32>
    %31 = vector.broadcast %17 : vector<64x1xf32> to vector<64x256xf32>
    %32 = vector.broadcast %3 : vector<1x256xf32> to vector<64x256xf32>
    %33 = arith.mulf %31, %32 : vector<64x256xf32>
    %34 = arith.mulf %30, %33 : vector<64x256xf32>
    %35 = vector.broadcast %15 : vector<64x1xf32> to vector<64x256xf32>
    %36 = vector.broadcast %2 : vector<1x256xf32> to vector<64x256xf32>
    %37 = arith.mulf %35, %36 : vector<64x256xf32>
    %38 = arith.mulf %30, %37 : vector<64x256xf32>
    %39 = arith.subf %18, %38 : vector<64x256xf32>
    %40 = math.exp %39 : vector<64x256xf32>
    %cst_21 = arith.constant dense<0.000000e+00> : vector<64xf32>
    %41 = vector.multi_reduction <add>, %30, %cst_21 [1] : vector<64x256xf32> to vector<64xf32>
    %42 = vector.shape_cast %41 : vector<64xf32> to vector<64x1xf32>
    %cst_22 = arith.constant dense<0.000000e+00> : vector<64xf32>
    %43 = vector.multi_reduction <add>, %40, %cst_22 [1] : vector<64x256xf32> to vector<64xf32>
    %44 = vector.shape_cast %43 : vector<64xf32> to vector<64x1xf32>
    %45 = arith.mulf %40, %30 : vector<64x256xf32>
    %cst_23 = arith.constant dense<0.000000e+00> : vector<64xf32>
    %46 = vector.multi_reduction <add>, %45, %cst_23 [1] : vector<64x256xf32> to vector<64xf32>
    %47 = vector.shape_cast %46 : vector<64xf32> to vector<64x1xf32>
    %48 = arith.subf %44, %47 : vector<64x1xf32>
    %49 = arith.mulf %34, %18 : vector<64x256xf32>
    %cst_24 = arith.constant dense<0.000000e+00> : vector<64xf32>
    %50 = vector.multi_reduction <add>, %49, %cst_24 [1] : vector<64x256xf32> to vector<64xf32>
    %51 = vector.shape_cast %50 : vector<64xf32> to vector<64x1xf32>
    %cst_25 = arith.constant dense<0.000000e+00> : vector<64xf32>
    %52 = vector.multi_reduction <add>, %34, %cst_25 [1] : vector<64x256xf32> to vector<64xf32>
    %53 = vector.shape_cast %52 : vector<64xf32> to vector<64x1xf32>
    %cst_26 = arith.constant 1.000000e+00 : f32
    %54 = vector.broadcast %cst_26 : f32 to vector<64x1xf32>
    %55 = arith.addf %54, %48 : vector<64x1xf32>
    %56 = math.log %55 : vector<64x1xf32>
    %cst_27 = arith.constant 0.000000e+00 : f32
    %57 = vector.broadcast %cst_27 : f32 to vector<64x1xf32>
    %58 = arith.cmpf one, %11, %57 : vector<64x1xf32>
    %59 = arith.extui %58 : vector<64x1xi1> to vector<64x1xi32>
    %60 = arith.sitofp %59 : vector<64x1xi32> to vector<64x1xf32>
    %61 = vector.extract_strided_slice %40 {offsets = [0, 0], sizes = [64, 128], strides = [1, 1]} : vector<64x256xf32> to vector<64x128xf32>
    %62 = vector.broadcast %48 : vector<64x1xf32> to vector<64x128xf32>
    %63 = arith.addf %61, %62 : vector<64x128xf32>
    %64 = vector.extract_strided_slice %40 {offsets = [0, 128], sizes = [64, 128], strides = [1, 1]} : vector<64x256xf32> to vector<64x128xf32>
    %65 = vector.broadcast %48 : vector<64x1xf32> to vector<64x128xf32>
    %66 = arith.addf %64, %65 : vector<64x128xf32>
    %67 = arith.mulf %63, %66 : vector<64x128xf32>
    %68 = math.log %67 : vector<64x128xf32>
    %69 = vector.extract_strided_slice %34 {offsets = [0, 0], sizes = [64, 128], strides = [1, 1]} : vector<64x256xf32> to vector<64x128xf32>
    %cst_28 = arith.constant dense<0.000000e+00> : vector<64xf32>
    %70 = vector.multi_reduction <add>, %69, %cst_28 [1] : vector<64x128xf32> to vector<64xf32>
    %71 = vector.shape_cast %70 : vector<64xf32> to vector<64x1xf32>
    %72 = arith.mulf %69, %68 : vector<64x128xf32>
    %cst_29 = arith.constant dense<0.000000e+00> : vector<64xf32>
    %73 = vector.multi_reduction <add>, %72, %cst_29 [1] : vector<64x128xf32> to vector<64xf32>
    %74 = vector.shape_cast %73 : vector<64xf32> to vector<64x1xf32>
    %c64_i32_30 = arith.constant 64 : i32
    %75 = arith.muli %arg0, %c64_i32_30 : i32
    %c128_i32 = arith.constant 128 : i32
    %76 = arith.addi %c128_i32, %75 : i32
    %c1 = arith.constant 1 : index
    %c0_31 = arith.constant 0 : index
    %c0_32 = arith.constant 0 : index
    %77 = vector.load %arg1[%c1, %c0_31, %c0_32] : memref<2x64x4xf32, #tpu.memory_space<vmem>>, vector<1x64x4xf32>
    %78 = vector.shape_cast %77 : vector<1x64x4xf32> to vector<64x4xf32>
    %cst_33 = arith.constant 1.42857146 : f32
    %79 = vector.broadcast %cst_33 : f32 to vector<64x4xf32>
    %80 = arith.mulf %78, %79 : vector<64x4xf32>
    %c1_34 = arith.constant 1 : index
    %c0_35 = arith.constant 0 : index
    %c0_36 = arith.constant 0 : index
    %81 = vector.load %arg2[%c1_34, %c0_35, %c0_36] : memref<2x64x1xf32, #tpu.memory_space<vmem>>, vector<1x64x1xf32>
    %82 = vector.shape_cast %81 : vector<1x64x1xf32> to vector<64x1xf32>
    %c1_37 = arith.constant 1 : index
    %c0_38 = arith.constant 0 : index
    %c0_39 = arith.constant 0 : index
    %83 = vector.load %arg3[%c1_37, %c0_38, %c0_39] : memref<2x64x1xf32, #tpu.memory_space<vmem>>, vector<1x64x1xf32>
    %84 = vector.shape_cast %83 : vector<1x64x1xf32> to vector<64x1xf32>
    %cst_40 = arith.constant 1.000000e-01 : f32
    %85 = vector.broadcast %cst_40 : f32 to vector<64x1xf32>
    %86 = arith.mulf %85, %84 : vector<64x1xf32>
    %c1_41 = arith.constant 1 : index
    %c0_42 = arith.constant 0 : index
    %c0_43 = arith.constant 0 : index
    %87 = vector.load %arg4[%c1_41, %c0_42, %c0_43] : memref<2x64x1xf32, #tpu.memory_space<vmem>>, vector<1x64x1xf32>
    %88 = vector.shape_cast %87 : vector<1x64x1xf32> to vector<64x1xf32>
    %cst_44 = arith.constant dense<0.000000e+00> : vector<64x256xf32>
    %89 = tpu.matmul %80, %0, %cst_44 {dimension_numbers = #tpu.dot_dimension_numbers<[1], [0], [0], [1], [0, 0, 1, 1], [], []>} : vector<64x4xf32>, vector<4x256xf32>, vector<64x256xf32> -> vector<64x256xf32>
    %90 = tpu.iota {dimensions = array<i32: 0>} : vector<64x1xi32>
    %91 = vector.broadcast %76 : i32 to vector<64x1xi32>
    %92 = arith.addi %91, %90 : vector<64x1xi32>
    %93 = vector.broadcast %82 : vector<64x1xf32> to vector<64x256xf32>
    %94 = vector.broadcast %1 : vector<1x256xf32> to vector<64x256xf32>
    %95 = arith.cmpf oeq, %93, %94 : vector<64x256xf32>
    %96 = vector.broadcast %92 : vector<64x1xi32> to vector<64x256xi32>
    %97 = vector.broadcast %4 : vector<1x256xi32> to vector<64x256xi32>
    %98 = arith.cmpi ne, %96, %97 : vector<64x256xi32>
    %99 = arith.andi %95, %98 : vector<64x256xi1>
    %100 = arith.extui %99 : vector<64x256xi1> to vector<64x256xi32>
    %101 = arith.sitofp %100 : vector<64x256xi32> to vector<64x256xf32>
    %102 = vector.broadcast %88 : vector<64x1xf32> to vector<64x256xf32>
    %103 = vector.broadcast %3 : vector<1x256xf32> to vector<64x256xf32>
    %104 = arith.mulf %102, %103 : vector<64x256xf32>
    %105 = arith.mulf %101, %104 : vector<64x256xf32>
    %106 = vector.broadcast %86 : vector<64x1xf32> to vector<64x256xf32>
    %107 = vector.broadcast %2 : vector<1x256xf32> to vector<64x256xf32>
    %108 = arith.mulf %106, %107 : vector<64x256xf32>
    %109 = arith.mulf %101, %108 : vector<64x256xf32>
    %110 = arith.subf %89, %109 : vector<64x256xf32>
    %111 = math.exp %110 : vector<64x256xf32>
    %cst_45 = arith.constant dense<0.000000e+00> : vector<64xf32>
    %112 = vector.multi_reduction <add>, %101, %cst_45 [1] : vector<64x256xf32> to vector<64xf32>
    %113 = vector.shape_cast %112 : vector<64xf32> to vector<64x1xf32>
    %cst_46 = arith.constant dense<0.000000e+00> : vector<64xf32>
    %114 = vector.multi_reduction <add>, %111, %cst_46 [1] : vector<64x256xf32> to vector<64xf32>
    %115 = vector.shape_cast %114 : vector<64xf32> to vector<64x1xf32>
    %116 = arith.mulf %111, %101 : vector<64x256xf32>
    %cst_47 = arith.constant dense<0.000000e+00> : vector<64xf32>
    %117 = vector.multi_reduction <add>, %116, %cst_47 [1] : vector<64x256xf32> to vector<64xf32>
    %118 = vector.shape_cast %117 : vector<64xf32> to vector<64x1xf32>
    %119 = arith.subf %115, %118 : vector<64x1xf32>
    %120 = arith.mulf %105, %89 : vector<64x256xf32>
    %cst_48 = arith.constant dense<0.000000e+00> : vector<64xf32>
    %121 = vector.multi_reduction <add>, %120, %cst_48 [1] : vector<64x256xf32> to vector<64xf32>
    %122 = vector.shape_cast %121 : vector<64xf32> to vector<64x1xf32>
    %cst_49 = arith.constant dense<0.000000e+00> : vector<64xf32>
    %123 = vector.multi_reduction <add>, %105, %cst_49 [1] : vector<64x256xf32> to vector<64xf32>
    %124 = vector.shape_cast %123 : vector<64xf32> to vector<64x1xf32>
    %cst_50 = arith.constant 1.000000e+00 : f32
    %125 = vector.broadcast %cst_50 : f32 to vector<64x1xf32>
    %126 = arith.addf %125, %119 : vector<64x1xf32>
    %127 = math.log %126 : vector<64x1xf32>
    %cst_51 = arith.constant 0.000000e+00 : f32
    %128 = vector.broadcast %cst_51 : f32 to vector<64x1xf32>
    %129 = arith.cmpf one, %82, %128 : vector<64x1xf32>
    %130 = arith.extui %129 : vector<64x1xi1> to vector<64x1xi32>
    %131 = arith.sitofp %130 : vector<64x1xi32> to vector<64x1xf32>
    %132 = vector.extract_strided_slice %111 {offsets = [0, 0], sizes = [64, 128], strides = [1, 1]} : vector<64x256xf32> to vector<64x128xf32>
    %133 = vector.broadcast %48 : vector<64x1xf32> to vector<64x128xf32>
    %134 = arith.addf %132, %133 : vector<64x128xf32>
    %135 = vector.extract_strided_slice %111 {offsets = [0, 128], sizes = [64, 128], strides = [1, 1]} : vector<64x256xf32> to vector<64x128xf32>
    %136 = vector.broadcast %48 : vector<64x1xf32> to vector<64x128xf32>
    %137 = arith.addf %135, %136 : vector<64x128xf32>
    %138 = arith.mulf %134, %137 : vector<64x128xf32>
    %139 = math.log %138 : vector<64x128xf32>
    %140 = arith.mulf %69, %139 : vector<64x128xf32>
    %cst_52 = arith.constant dense<0.000000e+00> : vector<64xf32>
    %141 = vector.multi_reduction <add>, %140, %cst_52 [1] : vector<64x128xf32> to vector<64xf32>
    %142 = vector.shape_cast %141 : vector<64xf32> to vector<64x1xf32>
    %cst_53 = arith.constant 4.000000e+00 : f32
    %143 = vector.broadcast %cst_53 : f32 to vector<64x1xf32>
    %144 = arith.mulf %143, %51 : vector<64x1xf32>
    %145 = arith.subf %53, %71 : vector<64x1xf32>
    %cst_54 = arith.constant 4.000000e+00 : f32
    %146 = vector.broadcast %cst_54 : f32 to vector<64x1xf32>
    %147 = arith.mulf %146, %145 : vector<64x1xf32>
    %148 = arith.mulf %147, %56 : vector<64x1xf32>
    %149 = arith.subf %144, %148 : vector<64x1xf32>
    %150 = arith.addf %74, %142 : vector<64x1xf32>
    %151 = arith.subf %149, %150 : vector<64x1xf32>
    %cst_55 = arith.constant 4.000000e+00 : f32
    %152 = vector.broadcast %cst_55 : f32 to vector<64x1xf32>
    %153 = arith.mulf %152, %122 : vector<64x1xf32>
    %cst_56 = arith.constant 4.000000e+00 : f32
    %154 = vector.broadcast %cst_56 : f32 to vector<64x1xf32>
    %155 = arith.mulf %154, %124 : vector<64x1xf32>
    %156 = arith.mulf %155, %127 : vector<64x1xf32>
    %157 = arith.subf %153, %156 : vector<64x1xf32>
    %cst_57 = arith.constant 0.000000e+00 : f32
    %158 = vector.broadcast %cst_57 : f32 to vector<64x1xf32>
    %159 = arith.cmpf ogt, %42, %158 : vector<64x1xf32>
    %cst_58 = arith.constant 1.000000e+00 : f32
    %160 = vector.broadcast %cst_58 : f32 to vector<64x1xf32>
    %161 = arith.select %159, %42, %160 : vector<64x1xi1>, vector<64x1xf32>
    %cst_59 = arith.constant 0.000000e+00 : f32
    %162 = vector.broadcast %cst_59 : f32 to vector<64x1xf32>
    %163 = arith.cmpf ogt, %113, %162 : vector<64x1xf32>
    %cst_60 = arith.constant 1.000000e+00 : f32
    %164 = vector.broadcast %cst_60 : f32 to vector<64x1xf32>
    %165 = arith.select %163, %113, %164 : vector<64x1xi1>, vector<64x1xf32>
    %166 = arith.divf %151, %161 : vector<64x1xf32>
    %cst_61 = arith.constant 0.000000e+00 : f32
    %167 = vector.broadcast %cst_61 : f32 to vector<64x1xf32>
    %168 = arith.subf %167, %166 : vector<64x1xf32>
    %169 = arith.mulf %168, %60 : vector<64x1xf32>
    %170 = vector.shape_cast %169 : vector<64x1xf32> to vector<1x64x1xf32>
    %cst_62 = arith.constant dense<0.000000e+00> : vector<1xf32>
    %171 = vector.multi_reduction <add>, %170, %cst_62 [1, 2] : vector<1x64x1xf32> to vector<1xf32>
    %172 = vector.shape_cast %171 : vector<1xf32> to vector<1x1x1xf32>
    %173 = vector.extract %172[0, 0, 0] : f32 from vector<1x1x1xf32>
    %174 = arith.divf %157, %165 : vector<64x1xf32>
    %cst_63 = arith.constant 0.000000e+00 : f32
    %175 = vector.broadcast %cst_63 : f32 to vector<64x1xf32>
    %176 = arith.subf %175, %174 : vector<64x1xf32>
    %177 = arith.mulf %176, %131 : vector<64x1xf32>
    %178 = vector.shape_cast %177 : vector<64x1xf32> to vector<1x64x1xf32>
    %cst_64 = arith.constant dense<0.000000e+00> : vector<1xf32>
    %179 = vector.multi_reduction <add>, %178, %cst_64 [1, 2] : vector<1x64x1xf32> to vector<1xf32>
    %180 = vector.shape_cast %179 : vector<1xf32> to vector<1x1x1xf32>
    %181 = vector.extract %180[0, 0, 0] : f32 from vector<1x1x1xf32>
    %182 = arith.addf %173, %181 : f32
    %cst_65 = arith.constant 0.000000e+00 : f32
    %183 = vector.broadcast %cst_65 : f32 to vector<8x128xf32>
    %184 = vector.broadcast %182 : f32 to vector<8x128xf32>
    %185 = arith.addf %184, %183 : vector<8x128xf32>
    %c0_66 = arith.constant 0 : index
    %c0_67 = arith.constant 0 : index
    %186 = vector.load %arg9[%c0_66, %c0_67] : memref<8x128xf32, #tpu.memory_space<vmem>>, vector<8x128xf32>
    tpu.vector_store %arg9[%c0_66, %c0_67], %185 {strides = array<i32>} : memref<8x128xf32, #tpu.memory_space<vmem>>, vector<8x128xf32>,
    return
  }
  func.func @transform_0(%arg0: i32) -> (i32, i32, i32) {
    %c0_i32 = arith.constant 0 : i32
    %c0_i32_0 = arith.constant 0 : i32
    %c0_i32_1 = arith.constant 0 : i32
    return %c0_i32, %arg0, %c0_i32_0 : i32, i32, i32
  }
  func.func @transform_1(%arg0: i32) -> (i32, i32, i32) {
    %c0_i32 = arith.constant 0 : i32
    %c0_i32_0 = arith.constant 0 : i32
    %c0_i32_1 = arith.constant 0 : i32
    return %c0_i32, %arg0, %c0_i32_0 : i32, i32, i32
  }
  func.func @transform_2(%arg0: i32) -> (i32, i32, i32) {
    %c0_i32 = arith.constant 0 : i32
    %c0_i32_0 = arith.constant 0 : i32
    %c0_i32_1 = arith.constant 0 : i32
    return %c0_i32, %arg0, %c0_i32_0 : i32, i32, i32
  }
  func.func @transform_3(%arg0: i32) -> (i32, i32, i32) {
    %c0_i32 = arith.constant 0 : i32
    %c0_i32_0 = arith.constant 0 : i32
    %c0_i32_1 = arith.constant 0 : i32
    return %c0_i32, %arg0, %c0_i32_0 : i32, i32, i32
  }
  func.func @transform_4(%arg0: i32) -> (i32, i32) {
    %c0_i32 = arith.constant 0 : i32
    %c0_i32_0 = arith.constant 0 : i32
    %c0_i32_1 = arith.constant 0 : i32
    return %c0_i32, %c0_i32_0 : i32, i32
  }
  func.func @transform_5(%arg0: i32) -> (i32, i32) {
    %c0_i32 = arith.constant 0 : i32
    %c0_i32_0 = arith.constant 0 : i32
    %c0_i32_1 = arith.constant 0 : i32
    return %c0_i32, %c0_i32_0 : i32, i32
  }
  func.func @transform_6(%arg0: i32) -> (i32, i32) {
    %c0_i32 = arith.constant 0 : i32
    %c0_i32_0 = arith.constant 0 : i32
    %c0_i32_1 = arith.constant 0 : i32
    return %c0_i32, %c0_i32_0 : i32, i32
  }
  func.func @transform_7(%arg0: i32) -> (i32, i32) {
    %c0_i32 = arith.constant 0 : i32
    %c0_i32_0 = arith.constant 0 : i32
    %c0_i32_1 = arith.constant 0 : i32
    return %c0_i32, %c0_i32_0 : i32, i32
  }
  func.func @transform_8(%arg0: i32) -> (i32, i32) {
    %c0_i32 = arith.constant 0 : i32
    %c0_i32_0 = arith.constant 0 : i32
    return %arg0, %c0_i32 : i32, i32
  }
}

</mosaic_0001>

<bundles_post_ra>
// kernel: tpu_custom_call.1
= control target key start
LH: loop header
LB: loop body
LE: loop exit
PB: predicated region body
PF: predicated region fallthrough
CT: control target
= control target key end

     0   :  { %s5229_s0 = inlined_call_operand.vmem [shape: f32[2,128,4], index: 0, kind: input, shape index: {}]   ;;  %s5230_s1 = inlined_call_operand.vmem [shape: f32[2,128,1], index: 1, kind: input, shape index: {}]   ;;  %s5231_s2 = inlined_call_operand.vmem [shape: f32[2,128,1], index: 2, kind: input, shape index: {}]   ;;  %s5232_s3 = inlined_call_operand.vmem [shape: f32[2,128,1], index: 3, kind: input, shape index: {}]   ;;  %s5233_s4 = inlined_call_operand.vmem [shape: f32[4,256], index: 4, kind: input, shape index: {}]   ;;  %s5234_s5 = inlined_call_operand.vmem [shape: f32[1,256], index: 5, kind: input, shape index: {}]   ;;  %s5235_s6 = inlined_call_operand.vmem [shape: f32[1,256], index: 6, kind: input, shape index: {}]   ;;  %s5236_s7 = inlined_call_operand.vmem [shape: f32[1,256], index: 7, kind: input, shape index: {}]   ;;  %s5237_s8 = inlined_call_operand.hbm [shape: f32[16,128], index: 8, kind: output, shape index: {}]  }
   0x1   :  { %5336 = sst [smem:[#allocation82_spill]] %s5229_s0 }
   0x2   :  { %13 = vsyncpa [#allocation7], 0 }
   0x3   :  { %15 = vsyncpa [#allocation7 + $0x1], 0  ;;  %s3221_s27 = smov 0   ;;  %s3223_s28 = smov 0  }
   0x4   :  { %s3225_s29 = smov 0   ;;  %s3227_s30 = smov 0  }
   0x5 LB: > { %s3242_s9 = sadd.s32 4294967295, %s3171_s30   ;;  %s2757_s10 = sadd.s32 4294967294, %s3171_s30   ;;  %s3171_s30 = sphi %s3227_s30, %s5575_s30   ;;  %s3167_s29 = sphi %s3225_s29, %s5574_s29   ;;  %s3163_s28 = sphi %s3223_s28, %s5573_s28   ;;  %s3159_s27 = sphi %s3221_s27, %s5572_s27  }
   0x6   : > { %s3246_s11 = sadd.s32 1, %s3171_s30   ;;  %s28_s12 = sadd.s32 1, %s3167_s29 }
   0x7   : > { %s25_s13 = ssub.s32 %s3171_s30, %s3246_s11  ;;  %p35_p0 = scmp.ne.s32.totalorder %s3167_s29, %s3163_s28 }
   0x8   : > { %p26_p1 = scmp.eq.s32.totalorder %s25_s13, 0  ;;  %p36_p2 = scmp.eq.s32.totalorder %s3171_s30, 0 }
   0x9   : > { %p227_p3 = scmp.eq.s32.totalorder %s3242_s9, 1  ;;  %p232_p4 = scmp.ne.s32.totalorder %s3163_s28, %s3159_s27 }
   0xa   : > { %s3258_s14 = scalar_select %p26_p1, %s3167_s29, %s28_s12  }
   0xb   : > { %p3260_p5 = por %p36_p2, %p35_p0  ;;  %p3264_p6 = por %p227_p3, %p35_p0 }
   0xc   : > { %p233_p7 = scmp.eq.s32.totalorder %s2757_s10, 1  ;;  %p2759_p9 = scmp.ge.s32.totalorder %s3171_s30, 2 }
   0xe   : > { %p3268_p8 = por %p233_p7, %p232_p4  ;;  %261 = sbr.rel (%p2759_p9) target bundleno = 73 (0x49), region = 32 }
  0x13   : > { %264 = sbr.rel (!%p3260_p5) target bundleno = 37 (0x25), region = 36  ;;  %s266_s18 = sand.u32 (%p3260_p5), 1, %s3167_s29  }
  0x14   : > { %s2883_s19 = sshll.u32 (%p3260_p5), %s3171_s30, 6  ;;  %s2760_s20 = sshll.u32 (%p3260_p5), %s266_s18, 7 }
  0x15   : > { %s5340_s0 = sld [smem:[#allocation82_spill]] (%p3260_p5)  ;;  %s268_s24 = scalar_lea.vmem (%p3260_p5), [#allocation2], %s2760_s20 }
  0x1b   : > { %s3282_s23 = scalar_lea.vmem %s5340_s0, %s2883_s19 }
  0x1c   : > { %v330_v0 = vld [vmem:[%s3282_s23] sm:$0xff]  ;;  %v332_v1 = vld [vmem:[%s3282_s23 + $0x8] sm:$0xff]  ;;  %v334_v2 = vld [vmem:[%s3282_s23 + $0x10] sm:$0xff] }
  0x1d   : > { %331 = vst [vmem:[%s268_s24] sm:$0xff] %v330_v0  ;;  %333 = vst [vmem:[%s268_s24 + $0x8] sm:$0xff] %v332_v1  ;;  %v336_v3 = vld [vmem:[%s3282_s23 + $0x18] sm:$0xff]  ;;  %v338_v4 = vld [vmem:[%s3282_s23 + $0x20] sm:$0xff] }
  0x1e   : > { %335 = vst [vmem:[%s268_s24 + $0x10] sm:$0xff] %v334_v2  ;;  %v340_v5 = vld [vmem:[%s3282_s23 + $0x28] sm:$0xff]  ;;  %337 = vst [vmem:[%s268_s24 + $0x18] sm:$0xff] %v336_v3  ;;  %v342_v6 = vld [vmem:[%s3282_s23 + $0x30] sm:$0xff] }
  0x1f   : > { %339 = vst [vmem:[%s268_s24 + $0x20] sm:$0xff] %v338_v4  ;;  %341 = vst [vmem:[%s268_s24 + $0x28] sm:$0xff] %v340_v5  ;;  %v344_v7 = vld [vmem:[%s3282_s23 + $0x38] sm:$0xff]  ;;  %v346_v8 = vld [vmem:[%s3282_s23 + $0x80] sm:$0xff] }
  0x20   : > { %343 = vst [vmem:[%s268_s24 + $0x30] sm:$0xff] %v342_v6  ;;  %345 = vst [vmem:[%s268_s24 + $0x38] sm:$0xff] %v344_v7  ;;  %v348_v9 = vld [vmem:[%s3282_s23 + $0x88] sm:$0xff]  ;;  %v350_v10 = vld [vmem:[%s3282_s23 + $0x90] sm:$0xff] }
  0x21   : > { %347 = vst [vmem:[%s268_s24 + $0x40] sm:$0xff] %v346_v8  ;;  %v352_v11 = vld [vmem:[%s3282_s23 + $0x98] sm:$0xff]  ;;  %349 = vst [vmem:[%s268_s24 + $0x48] sm:$0xff] %v348_v9  ;;  %v354_v12 = vld [vmem:[%s3282_s23 + $0xa0] sm:$0xff] }
  0x22   : > { %351 = vst [vmem:[%s268_s24 + $0x50] sm:$0xff] %v350_v10  ;;  %353 = vst [vmem:[%s268_s24 + $0x58] sm:$0xff] %v352_v11  ;;  %v356_v13 = vld [vmem:[%s3282_s23 + $0xa8] sm:$0xff]  ;;  %v358_v14 = vld [vmem:[%s3282_s23 + $0xb0] sm:$0xff] }
  0x23   : > { %355 = vst [vmem:[%s268_s24 + $0x60] sm:$0xff] %v354_v12  ;;  %357 = vst [vmem:[%s268_s24 + $0x68] sm:$0xff] %v356_v13  ;;  %v360_v15 = vld [vmem:[%s3282_s23 + $0xb8] sm:$0xff] }
  0x24   : > { %359 = vst [vmem:[%s268_s24 + $0x70] sm:$0xff] %v358_v14  ;;  %361 = vst [vmem:[%s268_s24 + $0x78] sm:$0xff] %v360_v15 }
  0x25 PF: > { %367 = sbr.rel (!%p3260_p5) target bundleno = 49 (0x31), region = 74  ;;  %s369_s25 = sand.u32 (%p3260_p5), 1, %s3167_s29  }
  0x26   : > { %s2884_s26 = sshll.u32 (%p3260_p5), %s3171_s30, 6  ;;  %s2763_s10 = sshll.u32 (%p3260_p5), %s369_s25, 7 }
  0x27   : > { %s3307_s18 = scalar_lea.vmem (%p3260_p5), %s5230_s1, %s2884_s26  ;;  %s371_s19 = scalar_lea.vmem (%p3260_p5), [#allocation3], %s2763_s10 }
  0x28   : > { %v433_v16 = vld [vmem:[%s3307_s18] sm:$0xff] (%p3260_p5)  ;;  %v435_v17 = vld [vmem:[%s3307_s18 + $0x8] sm:$0xff] (%p3260_p5)  ;;  %v437_v18 = vld [vmem:[%s3307_s18 + $0x10] sm:$0xff] (%p3260_p5) }
  0x29   : > { %434 = vst [vmem:[%s371_s19] sm:$0xff] (%p3260_p5), %v433_v16  ;;  %436 = vst [vmem:[%s371_s19 + $0x8] sm:$0xff] (%p3260_p5), %v435_v17  ;;  %v439_v19 = vld [vmem:[%s3307_s18 + $0x18] sm:$0xff] (%p3260_p5)  ;;  %v441_v20 = vld [vmem:[%s3307_s18 + $0x20] sm:$0xff] (%p3260_p5) }
  0x2a   : > { %438 = vst [vmem:[%s371_s19 + $0x10] sm:$0xff] %v437_v18  ;;  %v443_v21 = vld [vmem:[%s3307_s18 + $0x28] sm:$0xff]  ;;  %440 = vst [vmem:[%s371_s19 + $0x18] sm:$0xff] %v439_v19  ;;  %v445_v22 = vld [vmem:[%s3307_s18 + $0x30] sm:$0xff] }
  0x2b   : > { %442 = vst [vmem:[%s371_s19 + $0x20] sm:$0xff] %v441_v20  ;;  %444 = vst [vmem:[%s371_s19 + $0x28] sm:$0xff] %v443_v21  ;;  %v447_v23 = vld [vmem:[%s3307_s18 + $0x38] sm:$0xff]  ;;  %v449_v24 = vld [vmem:[%s3307_s18 + $0x80] sm:$0xff] }
  0x2c   : > { %446 = vst [vmem:[%s371_s19 + $0x30] sm:$0xff] %v445_v22  ;;  %448 = vst [vmem:[%s371_s19 + $0x38] sm:$0xff] %v447_v23  ;;  %v451_v25 = vld [vmem:[%s3307_s18 + $0x88] sm:$0xff]  ;;  %v453_v26 = vld [vmem:[%s3307_s18 + $0x90] sm:$0xff] }
  0x2d   : > { %450 = vst [vmem:[%s371_s19 + $0x40] sm:$0xff] %v449_v24  ;;  %v455_v27 = vld [vmem:[%s3307_s18 + $0x98] sm:$0xff]  ;;  %452 = vst [vmem:[%s371_s19 + $0x48] sm:$0xff] %v451_v25  ;;  %v457_v28 = vld [vmem:[%s3307_s18 + $0xa0] sm:$0xff] }
  0x2e   : > { %454 = vst [vmem:[%s371_s19 + $0x50] sm:$0xff] %v453_v26  ;;  %456 = vst [vmem:[%s371_s19 + $0x58] sm:$0xff] %v455_v27  ;;  %v459_v29 = vld [vmem:[%s3307_s18 + $0xa8] sm:$0xff]  ;;  %v461_v30 = vld [vmem:[%s3307_s18 + $0xb0] sm:$0xff] }
  0x2f   : > { %458 = vst [vmem:[%s371_s19 + $0x60] sm:$0xff] %v457_v28  ;;  %460 = vst [vmem:[%s371_s19 + $0x68] sm:$0xff] %v459_v29  ;;  %v463_v31 = vld [vmem:[%s3307_s18 + $0xb8] sm:$0xff] }
  0x30   : > { %462 = vst [vmem:[%s371_s19 + $0x70] sm:$0xff] %v461_v30  ;;  %464 = vst [vmem:[%s371_s19 + $0x78] sm:$0xff] %v463_v31 }
  0x31 PF: > { %470 = sbr.rel (!%p3260_p5) target bundleno = 61 (0x3d), region = 112  ;;  %s472_s20 = sand.u32 (%p3260_p5), 1, %s3167_s29  }
  0x32   : > { %s2885_s21 = sshll.u32 (%p3260_p5), %s3171_s30, 6  ;;  %s2766_s22 = sshll.u32 (%p3260_p5), %s472_s20, 7 }
  0x33   : > { %s3332_s25 = scalar_lea.vmem (%p3260_p5), %s5231_s2, %s2885_s21  ;;  %s474_s26 = scalar_lea.vmem (%p3260_p5), [#allocation4], %s2766_s22 }
  0x34   : > { %v536_v32 = vld [vmem:[%s3332_s25] sm:$0xff] (%p3260_p5)  ;;  %v538_v33 = vld [vmem:[%s3332_s25 + $0x8] sm:$0xff] (%p3260_p5)  ;;  %v540_v34 = vld [vmem:[%s3332_s25 + $0x10] sm:$0xff] (%p3260_p5) }
  0x35   : > { %537 = vst [vmem:[%s474_s26] sm:$0xff] (%p3260_p5), %v536_v32  ;;  %539 = vst [vmem:[%s474_s26 + $0x8] sm:$0xff] (%p3260_p5), %v538_v33  ;;  %v542_v35 = vld [vmem:[%s3332_s25 + $0x18] sm:$0xff] (%p3260_p5)  ;;  %v544_v36 = vld [vmem:[%s3332_s25 + $0x20] sm:$0xff] (%p3260_p5) }
  0x36   : > { %541 = vst [vmem:[%s474_s26 + $0x10] sm:$0xff] %v540_v34  ;;  %v546_v37 = vld [vmem:[%s3332_s25 + $0x28] sm:$0xff]  ;;  %543 = vst [vmem:[%s474_s26 + $0x18] sm:$0xff] %v542_v35  ;;  %v548_v38 = vld [vmem:[%s3332_s25 + $0x30] sm:$0xff] }
  0x37   : > { %545 = vst [vmem:[%s474_s26 + $0x20] sm:$0xff] %v544_v36  ;;  %547 = vst [vmem:[%s474_s26 + $0x28] sm:$0xff] %v546_v37  ;;  %v550_v39 = vld [vmem:[%s3332_s25 + $0x38] sm:$0xff]  ;;  %v552_v40 = vld [vmem:[%s3332_s25 + $0x80] sm:$0xff] }
  0x38   : > { %549 = vst [vmem:[%s474_s26 + $0x30] sm:$0xff] %v548_v38  ;;  %551 = vst [vmem:[%s474_s26 + $0x38] sm:$0xff] %v550_v39  ;;  %v554_v41 = vld [vmem:[%s3332_s25 + $0x88] sm:$0xff]  ;;  %v556_v42 = vld [vmem:[%s3332_s25 + $0x90] sm:$0xff] }
  0x39   : > { %553 = vst [vmem:[%s474_s26 + $0x40] sm:$0xff] %v552_v40  ;;  %v558_v43 = vld [vmem:[%s3332_s25 + $0x98] sm:$0xff]  ;;  %555 = vst [vmem:[%s474_s26 + $0x48] sm:$0xff] %v554_v41  ;;  %v560_v44 = vld [vmem:[%s3332_s25 + $0xa0] sm:$0xff] }
  0x3a   : > { %557 = vst [vmem:[%s474_s26 + $0x50] sm:$0xff] %v556_v42  ;;  %559 = vst [vmem:[%s474_s26 + $0x58] sm:$0xff] %v558_v43  ;;  %v562_v45 = vld [vmem:[%s3332_s25 + $0xa8] sm:$0xff]  ;;  %v564_v46 = vld [vmem:[%s3332_s25 + $0xb0] sm:$0xff] }
  0x3b   : > { %561 = vst [vmem:[%s474_s26 + $0x60] sm:$0xff] %v560_v44  ;;  %563 = vst [vmem:[%s474_s26 + $0x68] sm:$0xff] %v562_v45  ;;  %v566_v47 = vld [vmem:[%s3332_s25 + $0xb8] sm:$0xff] }
  0x3c   : > { %565 = vst [vmem:[%s474_s26 + $0x70] sm:$0xff] %v564_v46  ;;  %567 = vst [vmem:[%s474_s26 + $0x78] sm:$0xff] %v566_v47 }
  0x3d PF: > { %573 = sbr.rel (!%p3260_p5) target bundleno = 73 (0x49), region = 150  ;;  %s575_s10 = sand.u32 (%p3260_p5), 1, %s3167_s29  }
  0x3e   : > { %s2886_s12 = sshll.u32 (%p3260_p5), %s3171_s30, 6  ;;  %s2769_s13 = sshll.u32 (%p3260_p5), %s575_s10, 7 }
  0x3f   : > { %s3357_s20 = scalar_lea.vmem (%p3260_p5), %s5232_s3, %s2886_s12  ;;  %s577_s15 = scalar_lea.vmem (%p3260_p5), [#allocation5], %s2769_s13 }
  0x40   : > { %v639_v48 = vld [vmem:[%s3357_s20] sm:$0xff] (%p3260_p5)  ;;  %v641_v49 = vld [vmem:[%s3357_s20 + $0x8] sm:$0xff] (%p3260_p5)  ;;  %v643_v50 = vld [vmem:[%s3357_s20 + $0x10] sm:$0xff] (%p3260_p5) }
  0x41   : > { %640 = vst [vmem:[%s577_s15] sm:$0xff] (%p3260_p5), %v639_v48  ;;  %642 = vst [vmem:[%s577_s15 + $0x8] sm:$0xff] (%p3260_p5), %v641_v49  ;;  %v645_v51 = vld [vmem:[%s3357_s20 + $0x18] sm:$0xff] (%p3260_p5)  ;;  %v647_v52 = vld [vmem:[%s3357_s20 + $0x20] sm:$0xff] (%p3260_p5) }
  0x42   : > { %644 = vst [vmem:[%s577_s15 + $0x10] sm:$0xff] %v643_v50  ;;  %v649_v53 = vld [vmem:[%s3357_s20 + $0x28] sm:$0xff]  ;;  %646 = vst [vmem:[%s577_s15 + $0x18] sm:$0xff] %v645_v51  ;;  %v651_v54 = vld [vmem:[%s3357_s20 + $0x30] sm:$0xff] }
  0x43   : > { %648 = vst [vmem:[%s577_s15 + $0x20] sm:$0xff] %v647_v52  ;;  %650 = vst [vmem:[%s577_s15 + $0x28] sm:$0xff] %v649_v53  ;;  %v653_v55 = vld [vmem:[%s3357_s20 + $0x38] sm:$0xff]  ;;  %v655_v56 = vld [vmem:[%s3357_s20 + $0x80] sm:$0xff] }
  0x44   : > { %652 = vst [vmem:[%s577_s15 + $0x30] sm:$0xff] %v651_v54  ;;  %654 = vst [vmem:[%s577_s15 + $0x38] sm:$0xff] %v653_v55  ;;  %v657_v57 = vld [vmem:[%s3357_s20 + $0x88] sm:$0xff]  ;;  %v659_v58 = vld [vmem:[%s3357_s20 + $0x90] sm:$0xff] }
  0x45   : > { %656 = vst [vmem:[%s577_s15 + $0x40] sm:$0xff] %v655_v56  ;;  %v661_v59 = vld [vmem:[%s3357_s20 + $0x98] sm:$0xff]  ;;  %658 = vst [vmem:[%s577_s15 + $0x48] sm:$0xff] %v657_v57  ;;  %v663_v60 = vld [vmem:[%s3357_s20 + $0xa0] sm:$0xff] }
  0x46   : > { %660 = vst [vmem:[%s577_s15 + $0x50] sm:$0xff] %v659_v58  ;;  %662 = vst [vmem:[%s577_s15 + $0x58] sm:$0xff] %v661_v59  ;;  %v665_v61 = vld [vmem:[%s3357_s20 + $0xa8] sm:$0xff]  ;;  %v667_v62 = vld [vmem:[%s3357_s20 + $0xb0] sm:$0xff] }
  0x47   : > { %664 = vst [vmem:[%s577_s15 + $0x60] sm:$0xff] %v663_v60  ;;  %666 = vst [vmem:[%s577_s15 + $0x68] sm:$0xff] %v665_v61  ;;  %v669_v63 = vld [vmem:[%s3357_s20 + $0xb8] sm:$0xff] }
  0x48   : > { %668 = vst [vmem:[%s577_s15 + $0x70] sm:$0xff] %v667_v62  ;;  %670 = vst [vmem:[%s577_s15 + $0x78] sm:$0xff] %v669_v63 }
  0x49 PF: > { %p2772_p10 = scmp.ge.s32.totalorder %s3171_s30, 1  ;;  %p675_p11 = scmp.lt.s32.totalorder %s3171_s30, 3 }
  0x4b   : > { %p676_p12 = pnand %p2772_p10, %p675_p11 }
  0x4d   : > { %679 = sbr.rel (%p676_p12) target bundleno = 911 (0x38f), region = 188 }
  0x52   : > { %v752_v0 = vld [vmem:[%s5233_s4] sm:$0xff]  ;;  %vm835_vm0 = vcmask 1043456   ;;  %s3381_s23 = sand.u32 1, %s3163_s28   ;;  %v3173_v1 = vmov 0   ;;  %v5238_v3 = vmov 0.0   ;;  %vm810_vm1 = vcmask 31744  }
  0x53   : > { %2933 = vset.pattern.permute.xlu1 %v3173_v1  ;;  %2932 = vset.pattern.permute.xlu0 %v3173_v1  ;;  %v809_v2 = vcombine.high %v752_v0, %v752_v0  ;;  %s3384_s24 = sshll.u32 %s3381_s23, 7  ;;  %v756_v9 = vlaneseq  ;;  %s2778_s10 = sshll.u32 %s3242_s9, 6 }
  0x54   : > { %904 = vmatprep.mubr.f32.mxu0 %v5238_v3  ;;  %1745 = vmatprep.mubr.f32.mxu1 %v5238_v3  ;;  %s3391_s25 = scalar_lea.vmem [#allocation3], %s3384_s24  ;;  %s3396_s26 = scalar_lea.vmem [#allocation2], %s3384_s24  ;;  %v3420_v22 = vstv %s2778_s10 }
  0x55   : > { %2779 = vmatprep.subr.msk.mxu0 %vm835_vm0, %v809_v2  ;;  %2845 = vmatprep.subr.msk.mxu1 %vm835_vm0, %v809_v2  ;;  %v778_v4 = vld [vmem:[%s3391_s25 + $0x10] sm:$0xff]  ;;  %v776_v5 = vld [vmem:[%s3391_s25] sm:$0xff]  ;;  %v779_v11 = vld [vmem:[%s3391_s25 + $0x18] sm:$0xff]  ;;  %v3413_v19 = vshrl.u32 %v756_v9, 7  ;;  %s3438_s12 = scalar_lea.vmem [#allocation4], %s3384_s24  ;;  %s3448_s13 = scalar_lea.vmem [#allocation5], %s3384_s24 }
  0x56   : > { %v760_v6 = vld [vmem:[%s3396_s26] sm:$0xff]  ;;  %983 = vperm.xlu1 %2933, %v778_v4   ;;  %973 = vperm.xlu0 %2932, %v776_v5   ;;  %v777_v12 = vld [vmem:[%s3391_s25 + $0x8] sm:$0xff]  ;;  %v762_v17 = vld [vmem:[%s3396_s26 + $0x10] sm:$0xff]  ;;  %s1604_s18 = sadd.s32 128, %s2778_s10  ;;  %s2625_s22 = scalar_lea.sflag [#allocation7], %s3381_s23 }
  0x57   : > { %v768_v7 = vmul.f32 1.4285715, %v760_v6  ;;  %v2813_v8 = vld [vmem:[%s3396_s26 + $0x40] sm:$0xff]  ;;  %2780 = vmatpush1.msk.msra.mxu0 %vm835_vm0, %v752_v0  ;;  %2846 = vmatpush1.msk.msra.mxu1 %vm835_vm0, %v752_v0  ;;  %v761_v13 = vld [vmem:[%s3396_s26 + $0x8] sm:$0xff]  ;;  %v2815_v18 = vld [vmem:[%s3396_s26 + $0x50] sm:$0xff]  ;;  %v3424_v24 = vadd.s32 16, %v3413_v19 }
  0x58   : > { %v1614_v10 = vmul.f32 1.4285715, %v2813_v8  ;;  %v2814_v14 = vld [vmem:[%s3396_s26 + $0x48] sm:$0xff]  ;;  %v769_v15 = vmul.f32 1.4285715, %v761_v13  ;;  %v780_v21 = vld [vmem:[%s3391_s25 + $0x20] sm:$0xff] }
  0x59   : > { %2781 = vmatmul.mubr.msk.f32.vlgmr.msra.gmra.mxu0 %vm810_vm1, %v768_v7  ;;  %v1615_v16 = vmul.f32 1.4285715, %v2814_v14  ;;  %v781_v20 = vld [vmem:[%s3391_s25 + $0x28] sm:$0xff]  ;;  %v770_v23 = vmul.f32 1.4285715, %v762_v17  ;;  %v763_v26 = vld [vmem:[%s3396_s26 + $0x18] sm:$0xff]  ;;  %v3432_v28 = vadd.s32 %v3420_v22, %v3424_v24 }
  0x5a   : > { %2847 = vmatmul.mubr.msk.f32.vlgmr.msra.gmra.mxu1 %vm810_vm1, %v1614_v10  ;;  %910 = vmatprep.mubr.f32.mxu0 %v5238_v3  ;;  %v1616_v25 = vmul.f32 1.4285715, %v2815_v18  ;;  %v2816_v27 = vld [vmem:[%s3396_s26 + $0x58] sm:$0xff]  ;;  %v782_v30 = vld [vmem:[%s3391_s25 + $0x30] sm:$0xff]  ;;  %v784_v31 = vld [vmem:[%s3438_s12] sm:$0xff]  ;;  %v3459_v46 = vadd.s32 24, %v3413_v19 }
  0x5b   : > { %988 = vperm.xlu1 %2933, %v779_v11   ;;  %978 = vperm.xlu0 %2932, %v777_v12   ;;  %v783_v29 = vld [vmem:[%s3391_s25 + $0x38] sm:$0xff]  ;;  %v771_v32 = vmul.f32 1.4285715, %v763_v26  ;;  %v1617_v33 = vmul.f32 1.4285715, %v2816_v27  ;;  %v764_v34 = vld [vmem:[%s3396_s26 + $0x20] sm:$0xff] }
  0x5c   : > { %1751 = vmatprep.mubr.f32.mxu1 %v5238_v3  ;;  %v792_v35 = vmul.f32 0.1, %v784_v31  ;;  %v2817_v36 = vld [vmem:[%s3396_s26 + $0x60] sm:$0xff]  ;;  %v786_v38 = vld [vmem:[%s3438_s12 + $0x10] sm:$0xff]  ;;  %v785_v39 = vld [vmem:[%s3438_s12 + $0x8] sm:$0xff]  ;;  %v3467_v50 = vadd.s32 %v3420_v22, %v3459_v46  ;;  %v3473_v53 = vadd.s32 40, %v3413_v19 }
  0x5d   : > { %2782 = vmatmul.mubr.msk.f32.gmra.mxu0 %vm810_vm1, %v769_v15  ;;  %v800_v37 = vld [vmem:[%s3448_s13] sm:$0xff]  ;;  %v772_v40 = vmul.f32 1.4285715, %v764_v34  ;;  %v1618_v41 = vmul.f32 1.4285715, %v2817_v36  ;;  %v765_v42 = vld [vmem:[%s3396_s26 + $0x28] sm:$0xff] }
  0x5e   : > { %2848 = vmatmul.mubr.msk.f32.gmra.mxu1 %vm810_vm1, %v1615_v16  ;;  %916 = vmatprep.mubr.f32.mxu0 %v5238_v3  ;;  %v794_v43 = vmul.f32 0.1, %v786_v38  ;;  %v793_v44 = vmul.f32 0.1, %v785_v39  ;;  %v2818_v45 = vld [vmem:[%s3396_s26 + $0x68] sm:$0xff]  ;;  %v788_v47 = vld [vmem:[%s3438_s12 + $0x20] sm:$0xff]  ;;  %v3491_v0 = vadd.s32 %v3420_v22, %v3473_v53 }
  0x5f   : > { %998 = vperm.xlu1 %2933, %v781_v20   ;;  %993 = vperm.xlu0 %2932, %v780_v21   ;;  %v787_v48 = vld [vmem:[%s3438_s12 + $0x18] sm:$0xff]  ;;  %v773_v49 = vmul.f32 1.4285715, %v765_v42  ;;  %v1619_v51 = vmul.f32 1.4285715, %v2818_v45  ;;  %v766_v52 = vld [vmem:[%s3396_s26 + $0x30] sm:$0xff] }
  0x60   : > { %1757 = vmatprep.mubr.f32.mxu1 %v5238_v3  ;;  %v796_v54 = vmul.f32 0.1, %v788_v47  ;;  %v795_v55 = vmul.f32 0.1, %v787_v48  ;;  %v2819_v56 = vld [vmem:[%s3396_s26 + $0x70] sm:$0xff]  ;;  %v3477_v57 = vadd.s32 32, %v3413_v19 }
  0x61   : > { %2783 = vmatmul.mubr.msk.f32.gmra.mxu0 %vm810_vm1, %v770_v23  ;;  %v790_v58 = vld [vmem:[%s3438_s12 + $0x30] sm:$0xff]  ;;  %v789_v59 = vld [vmem:[%s3438_s12 + $0x28] sm:$0xff]  ;;  %v3483_v60 = vadd.s32 56, %v3413_v19  ;;  %v774_v61 = vmul.f32 1.4285715, %v766_v52  ;;  %v767_v63 = vld [vmem:[%s3396_s26 + $0x38] sm:$0xff] }
  0x62   : > { %2849 = vmatmul.mubr.msk.f32.gmra.mxu1 %vm810_vm1, %v1616_v25  ;;  %922 = vmatprep.mubr.f32.mxu0 %v5238_v3  ;;  %v1620_v62 = vmul.f32 1.4285715, %v2819_v56  ;;  %v798_v1 = vmul.f32 0.1, %v790_v58  ;;  %v797_v2 = vmul.f32 0.1, %v789_v59  ;;  %v3496_v5 = vadd.s32 %v3420_v22, %v3477_v57 }
  0x63   : > { %1008 = vperm.xlu1 %2933, %v783_v29   ;;  %1003 = vperm.xlu0 %2932, %v782_v30   ;;  %v2820_v4 = vld [vmem:[%s3396_s26 + $0x78] sm:$0xff]  ;;  %v3499_v6 = vadd.s32 48, %v3413_v19  ;;  %v3505_v8 = vadd.s32 %v3420_v22, %v3483_v60  ;;  %v775_v10 = vmul.f32 1.4285715, %v767_v63  ;;  %v801_v14 = vld [vmem:[%s3448_s13 + $0x8] sm:$0xff]  ;;  %v802_v16 = vld [vmem:[%s3448_s13 + $0x10] sm:$0xff] }
  0x64   : > { %1763 = vmatprep.mubr.f32.mxu1 %v5238_v3  ;;  %v791_v7 = vld [vmem:[%s3438_s12 + $0x38] sm:$0xff]  ;;  %v1621_v11 = vmul.f32 1.4285715, %v2820_v4  ;;  %v805_v17 = vld [vmem:[%s3448_s13 + $0x28] sm:$0xff]  ;;  %v804_v18 = vld [vmem:[%s3448_s13 + $0x20] sm:$0xff]  ;;  %s2880_s26 = sshll.u32 %s3242_s9, 7 }
  0x65   : > { %2784 = vmatmul.mubr.msk.f32.gmra.mxu0 %vm810_vm1, %v771_v32  ;;  %v799_v12 = vmul.f32 0.1, %v791_v7  ;;  %v3512_v13 = vadd.s32 %v3420_v22, %v3499_v6  ;;  %v803_v15 = vld [vmem:[%s3448_s13 + $0x18] sm:$0xff]  ;;  %v806_v21 = vld [vmem:[%s3448_s13 + $0x30] sm:$0xff]  ;;  %v2821_v23 = vld [vmem:[%s3391_s25 + $0x40] sm:$0xff]  ;;  %v3574_v7 = vsub.s32 1, %v3413_v19  ;;  %s5192_s21 = scalar_lea.hbm %s5237_s8, %s2880_s26 }
  0x66   : > { %2850 = vmatmul.mubr.msk.f32.gmra.mxu1 %vm810_vm1, %v1617_v33  ;;  %928 = vmatprep.mubr.f32.mxu0 %v5238_v3  ;;  %v807_v20 = vld [vmem:[%s3448_s13 + $0x38] sm:$0xff]  ;;  %v2825_v25 = vld [vmem:[%s3391_s25 + $0x60] sm:$0xff]  ;;  %v2822_v29 = vld [vmem:[%s3391_s25 + $0x48] sm:$0xff]  ;;  %s3175_s9 = smov [#allocation6]  }
  0x67   : > { %1187 = vperm.xlu1 %2933, %v792_v35   ;;  %1104 = vperm.xlu0 %2932, %v800_v37   ;;  %v2836_v26 = vld [vmem:[%s3438_s12 + $0x78] sm:$0xff]  ;;  %v2829_v30 = vld [vmem:[%s3438_s12 + $0x40] sm:$0xff]  ;;  %v2838_v32 = vld [vmem:[%s3448_s13 + $0x48] sm:$0xff]  ;;  %s3115_s0 = sshll.u32 %s3175_s9, 4  ;;  %s3116_s0 = int_to_ptr.vmem [resolvable:$false] %s3115_s0 }
  0x68   : > { %1769 = vmatprep.mubr.f32.mxu1 %v5238_v3  ;;  %v1647_v27 = vmul.f32 0.1, %v2836_v26  ;;  %v1640_v31 = vmul.f32 0.1, %v2829_v30  ;;  %v2830_v33 = vld [vmem:[%s3438_s12 + $0x48] sm:$0xff]  ;;  %v2823_v36 = vld [vmem:[%s3391_s25 + $0x50] sm:$0xff] }
  0x69   : > { %2785 = vmatmul.mubr.msk.f32.gmra.mxu0 %vm810_vm1, %v772_v40  ;;  %v1641_v34 = vmul.f32 0.1, %v2830_v33  ;;  %v2842_v35 = vld [vmem:[%s3448_s13 + $0x68] sm:$0xff]  ;;  %v2844_v37 = vld [vmem:[%s3448_s13 + $0x78] sm:$0xff]  ;;  %v2831_v38 = vld [vmem:[%s3438_s12 + $0x50] sm:$0xff] }
  0x6a   : > { %2851 = vmatmul.mubr.msk.f32.gmra.mxu1 %vm810_vm1, %v1618_v41  ;;  %934 = vmatprep.mubr.f32.mxu0 %v5238_v3  ;;  %v1642_v39 = vmul.f32 0.1, %v2831_v38  ;;  %v2824_v40 = vld [vmem:[%s3391_s25 + $0x58] sm:$0xff]  ;;  %v2826_v45 = vld [vmem:[%s3391_s25 + $0x68] sm:$0xff]  ;;  %v2827_v52 = vld [vmem:[%s3391_s25 + $0x70] sm:$0xff] }
  0x6b   : > { %1197 = vperm.xlu1 %2933, %v794_v43   ;;  %1192 = vperm.xlu0 %2932, %v793_v44   ;;  %v2832_v41 = vld [vmem:[%s3438_s12 + $0x58] sm:$0xff]  ;;  %v2833_v43 = vld [vmem:[%s3438_s12 + $0x60] sm:$0xff]  ;;  %v2834_v47 = vld [vmem:[%s3438_s12 + $0x68] sm:$0xff] }
  0x6c   : > { %1775 = vmatprep.mubr.f32.mxu1 %v5238_v3  ;;  %v1643_v42 = vmul.f32 0.1, %v2832_v41  ;;  %v1644_v44 = vmul.f32 0.1, %v2833_v43  ;;  %v1645_v48 = vmul.f32 0.1, %v2834_v47 }
  0x6d   : > { %2786 = vmatmul.mubr.msk.f32.gmra.mxu0 %vm810_vm1, %v773_v49  ;;  %v3542_v49 = vstv %s1604_s18  ;;  %v2828_v56 = vld [vmem:[%s3391_s25 + $0x78] sm:$0xff]  ;;  %v2837_v59 = vld [vmem:[%s3448_s13 + $0x40] sm:$0xff] }
  0x6e   : > { %2852 = vmatmul.mubr.msk.f32.gmra.mxu1 %vm810_vm1, %v1619_v51  ;;  %940 = vmatprep.mubr.f32.mxu0 %v5238_v3  ;;  %v3546_v51 = vadd.s32 %v3542_v49, %v3473_v53  ;;  %v3553_v58 = vadd.s32 %v3542_v49, %v3499_v6  ;;  %v3559_v53 = vadd.s32 %v3542_v49, %v3483_v60  ;;  %v2841_v63 = vld [vmem:[%s3448_s13 + $0x60] sm:$0xff]  ;;  %v3571_v6 = vand.u32 127, %v756_v9 }
  0x6f   : > { %1207 = vperm.xlu1 %2933, %v796_v54   ;;  %1202 = vperm.xlu0 %2932, %v795_v55   ;;  %v2835_v54 = vld [vmem:[%s3438_s12 + $0x70] sm:$0xff]  ;;  %v753_v4 = vld [vmem:[%s5234_s5] sm:$0x3] }
  0x70   : > { %1781 = vmatprep.mubr.f32.mxu1 %v5238_v3  ;;  %v1646_v55 = vmul.f32 0.1, %v2835_v54  ;;  %5341 = vst [vmem:[#allocation9_spill] sm:$0xff] %v3553_v58  ;;  %5342 = vst [vmem:[#allocation10_spill] sm:$0xff] %v3559_v53  ;;  %vm1042_vm14 = vcmp.ne.s32.totalorder %v3432_v28, %v3571_v6 }
  0x71   : > { %2787 = vmatmul.mubr.msk.f32.gmra.mxu0 %vm810_vm1, %v774_v61  ;;  %v2839_v61 = vld [vmem:[%s3448_s13 + $0x50] sm:$0xff] }
  0x72   : > { %946 = vmatprep.mubr.f32.mxu0 %v5238_v3  ;;  %2853 = vmatmul.mubr.msk.f32.gmra.mxu1 %vm810_vm1, %v1620_v62  ;;  %v2840_v62 = vld [vmem:[%s3448_s13 + $0x58] sm:$0xff] }
  0x73   : > { %1217 = vperm.xlu1 %2933, %v798_v1   ;;  %1212 = vperm.xlu0 %2932, %v797_v2   ;;  %v3564_v1 = vsub.s32 0, %v3413_v19  ;;  %v2843_v2 = vld [vmem:[%s3448_s13 + $0x70] sm:$0xff] }
  0x74   : > { %1787 = vmatprep.mubr.f32.mxu1 %v5238_v3 }
  0x75   : > { %2788 = vmatmul.mubr.msk.f32.gmra.mxu0 %vm810_vm1, %v775_v10  ;;  %v3577_v60 = vrot.slane %v753_v4, %v3564_v1  ;;  %v963_v10 = vadd.s32 %v3420_v22, %v3413_v19 }
  0x76   : > { %2854 = vmatmul.mubr.msk.f32.gmra.mxu1 %vm810_vm1, %v1621_v11  ;;  %v3582_v11 = vadd.s32 128, %v3571_v6  ;;  %vm1044_vm1 = vcmp.ne.s32.totalorder %v3467_v50, %v3571_v6 }
  0x77   : > { %1109 = vperm.xlu1 %2933, %v801_v14   ;;  %1222 = vperm.xlu0 %2932, %v799_v12   ;;  %v3585_v12 = vrot.slane %v753_v4, %v3574_v7  ;;  %vm1038_vm2 = vcmp.ne.s32.totalorder %v963_v10, %v3571_v6 }
  0x78   : > { %vm1039_vm4 = vcmp.ne.s32.totalorder %v963_v10, %v3582_v11  ;;  %vm1043_vm15 = vcmp.ne.s32.totalorder %v3432_v28, %v3582_v11  ;;  %v5348_v28 = vmov 0 }
  0x7b   : > { %1119 = vperm.xlu1 %2933, %v803_v15   ;;  %1114 = vperm.xlu0 %2932, %v802_v16  }
  0x7f   : > { %1129 = vperm.xlu1 %2933, %v805_v17   ;;  %1124 = vperm.xlu0 %2932, %v804_v18  }
  0x83   : > { %1139 = vperm.xlu1 %2933, %v807_v20   ;;  %1134 = vperm.xlu0 %2932, %v806_v21  }
  0x87   : > { %1805 = vperm.xlu1 %2933, %v2821_v23   ;;  %1825 = vperm.xlu0 %2932, %v2825_v25  }
  0x8b   : > { %1810 = vperm.xlu1 %2933, %v2822_v29   ;;  %2032 = vperm.xlu0 %2932, %v1647_v27   ;;  %v955_v27 = vadd.s32 8, %v3413_v19 }
  0x8f   : > { %1997 = vperm.xlu1 %2933, %v1640_v31   ;;  %1930 = vperm.xlu0 %2932, %v2838_v32   ;;  %v964_v31 = vadd.s32 %v3420_v22, %v955_v27 }
  0x91   : > { %vm1040_vm8 = vcmp.ne.s32.totalorder %v964_v31, %v3571_v6  ;;  %vm1041_vm10 = vcmp.ne.s32.totalorder %v964_v31, %v3582_v11 }
  0x93   : > { %2002 = vperm.xlu1 %2933, %v1641_v34   ;;  %1950 = vperm.xlu0 %2932, %v2842_v35  }
  0x97   : > { %1815 = vperm.xlu1 %2933, %v2823_v36   ;;  %1960 = vperm.xlu0 %2932, %v2844_v37  }
  0x9b   : > { %2007 = vperm.xlu1 %2933, %v1642_v39  }
  0x9f   : > { %1820 = vperm.xlu1 %2933, %v2824_v40  }
  0xa3   : > { %2012 = vperm.xlu1 %2933, %v1643_v42  }
  0xa7   : > { %2017 = vperm.xlu1 %2933, %v1644_v44  }
  0xab   : > { %1830 = vperm.xlu1 %2933, %v2826_v45  }
  0xaf   : > { %2022 = vperm.xlu1 %2933, %v1645_v48  }
  0xb3   : > { %1835 = vperm.xlu1 %2933, %v2827_v52  }
  0xb7   : > { %2027 = vperm.xlu1 %2933, %v1646_v55  }
  0xbb   : > { %1840 = vperm.xlu1 %2933, %v2828_v56   ;;  %v5362_v56 = vmov 0 }
  0xbf   : > { %1925 = vperm.xlu1 %2933, %v2837_v59   ;;  %v754_v59 = vld [vmem:[%s5235_s6] sm:$0x3] }
  0xc3   : > { %1935 = vperm.xlu1 %2933, %v2839_v61  }
  0xc7   : > { %1940 = vperm.xlu1 %2933, %v2840_v62   ;;  %v5364_v62 = vmov 0 }
  0xcb   : > { %1945 = vperm.xlu1 %2933, %v2841_v63   ;;  %v755_v63 = vld [vmem:[%s5236_s7] sm:$0x3] }
  0xcf   : > { %1955 = vperm.xlu1 %2933, %v2843_v2   ;;  %v3737_v2 = vrot.slane %v754_v59, %v3564_v1 }
  0xd1   : > { %v984_v14 = vpop.permute.xlu1 %983  ;;  %v974_v15 = vpop.permute.xlu0 %973 }
  0xd2   : > { %vm1022_vm3 = vcmp.eq.f32.partialorder %v974_v15, %v3577_v60  ;;  %vm1023_vm5 = vcmp.eq.f32.partialorder %v974_v15, %v3585_v12  ;;  %vm1026_vm0 = vcmp.eq.f32.partialorder %v984_v14, %v3577_v60 }
  0xd3   : > { %vm1054_vm6 = vmand %vm1022_vm3, %vm1038_vm2  ;;  %vm1027_vm2 = vcmp.eq.f32.partialorder %v984_v14, %v3585_v12  ;;  %vm1045_vm3 = vcmp.ne.s32.totalorder %v3467_v50, %v3582_v11  ;;  %v1795_v50 = vadd.s32 %v3542_v49, %v3413_v19  ;;  %v3747_v14 = vadd.s32 %v3542_v49, %v3424_v24 }
  0xd4   : > { %vm1055_vm7 = vmand %vm1023_vm5, %vm1039_vm4  ;;  %v3592_v17 = vsel %vm1054_vm6, 1.0, %v5238_v3  ;;  %vm1048_vm6 = vcmp.ne.s32.totalorder %v3491_v0, %v3571_v6 }
  0xd5   : > { %5343 = vst [vmem:[#allocation11_spill] sm:$0xff] %v3592_v17  ;;  %v3595_v18 = vsel %vm1055_vm7, 1.0, %v5238_v3 }
  0xd6   : > { %v989_v9 = vpop.permute.xlu1 %988  ;;  %v979_v16 = vpop.permute.xlu0 %978  ;;  %5344 = vst [vmem:[#allocation12_spill] sm:$0xff] %v3595_v18  ;;  %v1316_v20 = vadd.f32 %v3595_v18, %v3592_v17 }
  0xd7   : > { %vm1024_vm9 = vcmp.eq.f32.partialorder %v979_v16, %v3577_v60  ;;  %vm1025_vm11 = vcmp.eq.f32.partialorder %v979_v16, %v3585_v12  ;;  %vm1028_vm4 = vcmp.eq.f32.partialorder %v989_v9, %v3577_v60  ;;  %vm1029_vm5 = vcmp.eq.f32.partialorder %v989_v9, %v3585_v12 }
  0xd8   : > { %1317 = vadd.xlane.f32.xlu0 %v1316_v20  ;;  %vm1056_vm12 = vmand %vm1024_vm9, %vm1040_vm8  ;;  %vm1049_vm9 = vcmp.ne.s32.totalorder %v3491_v0, %v3582_v11  ;;  %v3760_v9 = vrot.slane %v754_v59, %v3574_v7  ;;  %v3763_v16 = vrot.slane %v755_v63, %v3564_v1  ;;  %v3782_v1 = vrot.slane %v755_v63, %v3574_v7 }
  0xd9   : > { %vm1057_vm13 = vmand %vm1025_vm11, %vm1041_vm10  ;;  %v3622_v22 = vsel %vm1056_vm12, 1.0, %v5238_v3 }
  0xda   : > { %v999_v21 = vpop.permute.xlu1 %998  ;;  %v994_v23 = vpop.permute.xlu0 %993  ;;  %5345 = vst [vmem:[#allocation13_spill] sm:$0xff] %v3622_v22  ;;  %v3629_v38 = vsel %vm1057_vm13, 1.0, %v5238_v3  ;;  %vm3658_vm8 = vmand %vm1026_vm0, %vm1042_vm14  ;;  %vm1046_vm14 = vcmp.ne.s32.totalorder %v3496_v5, %v3571_v6 }
  0xdb   : > { %5346 = vst [vmem:[#allocation14_spill] sm:$0xff] %v3629_v38  ;;  %v1319_v39 = vadd.f32 %v3629_v38, %v3622_v22  ;;  %vm1032_vm7 = vcmp.eq.f32.partialorder %v999_v21, %v3577_v60  ;;  %v5349_v28 = vsel %vm3658_vm8, 4294967295, %v5348_v28  ;;  %vm1033_vm10 = vcmp.eq.f32.partialorder %v999_v21, %v3585_v12  ;;  %vm3667_vm11 = vmand %vm1027_vm2, %vm1043_vm15 }
  0xdc   : > { %vm3671_vm12 = vmand %vm1028_vm4, %vm1044_vm1  ;;  %vm1030_vm0 = vcmp.eq.f32.partialorder %v994_v23, %v3577_v60  ;;  %vm1047_vm15 = vcmp.ne.s32.totalorder %v3496_v5, %v3582_v11  ;;  %vm1031_vm1 = vcmp.eq.f32.partialorder %v994_v23, %v3585_v12  ;;  %v1796_v5 = vadd.s32 %v3542_v49, %v955_v27 }
  0xdd   : > { %vm3675_vm13 = vmand %vm1029_vm5, %vm1045_vm3  ;;  %vm1052_vm3 = vcmp.ne.s32.totalorder %v3505_v8, %v3571_v6  ;;  %v3793_v23 = vadd.s32 %v3542_v49, %v3477_v57  ;;  %v3806_v27 = vsel %vm3667_vm11, 1.0, %v5238_v3  ;;  %v3811_v57 = vsel %vm3671_vm12, 1.0, %v5238_v3 }
  0xde   : > { %v3599_v25 = vpop.permute.xlu1 %1008  ;;  %v3601_v26 = vpop.permute.xlu0 %1003  ;;  %vm3684_vm8 = vmand %vm1032_vm7, %vm1048_vm6  ;;  %vm1050_vm6 = vcmp.ne.s32.totalorder %v3512_v13, %v3571_v6  ;;  %5376 = vst [vmem:[#allocation18_spill] sm:$0xff] %v3806_v27  ;;  %v3816_v31 = vsel %vm3675_vm13, 1.0, %v5238_v3  ;;  %vm1863_vm11 = vcmp.ne.s32.totalorder %v3747_v14, %v3571_v6  ;;  %vm5382_vm12 = vcmp.ne.s32.totalorder %v3512_v13, %v3582_v11 }
  0xdf   : > { %vm3693_vm2 = vmand %vm1033_vm10, %vm1049_vm9  ;;  %vm1036_vm4 = vcmp.eq.f32.partialorder %v3599_v25, %v3577_v60  ;;  %vm1860_vm9 = vcmp.ne.s32.totalorder %v1795_v50, %v3582_v11  ;;  %vm5367_vm10 = vcmp.ne.s32.totalorder %v3505_v8, %v3582_v11  ;;  %5377 = vst [vmem:[#allocation19_spill] sm:$0xff] %v3811_v57 }
  0xe0   : > { %vm3701_vm5 = vmand %vm1030_vm0, %vm1046_vm14  ;;  %5378 = vst [vmem:[#allocation20_spill] sm:$0xff] %v3816_v31 }
  0xe1   : > { %vm3707_vm7 = vmand %vm1031_vm1, %vm1047_vm15 }
  0xe2   : > { %v3604_v29 = vpop.permute.xlu1 %1187  ;;  %v3606_v30 = vpop.permute.xlu0 %1104  ;;  %v5363_v56 = vsel %vm3707_vm7, 4294967295, %v5362_v56  ;;  %vm3719_vm0 = vmand %vm1036_vm4, %vm1052_vm3  ;;  %vm1034_vm3 = vcmp.eq.f32.partialorder %v3601_v26, %v3577_v60  ;;  %vm5366_vm4 = vcmp.ne.s32.totalorder %v1795_v50, %v3571_v6  ;;  %vm1861_vm7 = vcmp.ne.s32.totalorder %v1796_v5, %v3571_v6 }
  0xe3   : > { %v5365_v62 = vsel %vm3719_vm0, 4294967295, %v5364_v62  ;;  %v1153_v48 = vmul.f32 %v3763_v16, %v3606_v30  ;;  %v1237_v55 = vmul.f32 %v3760_v9, %v3604_v29 }
  0xe6   : > { %v3609_v32 = vpop.permute.xlu1 %1197  ;;  %v3611_v33 = vpop.permute.xlu0 %1192 }
  0xe7   : > { %v1241_v63 = vmul.f32 %v3760_v9, %v3609_v32 }
  0xea   : > { %v3617_v34 = vpop.permute.xlu1 %1207  ;;  %v3619_v35 = vpop.permute.xlu0 %1202 }
  0xeb   : > { %v1242_v15 = vmul.f32 %v3737_v2, %v3619_v35 }
  0xee   : > { %v3624_v36 = vpop.permute.xlu1 %1217  ;;  %v3626_v37 = vpop.permute.xlu0 %1212 }
  0xef   : > { %v1246_v53 = vmul.f32 %v3737_v2, %v3626_v37  ;;  %v1248_v58 = vmul.f32 %v3737_v2, %v3624_v36 }
  0xf2   : > { %v3633_v40 = vpop.permute.xlu1 %1109  ;;  %v3635_v41 = vpop.permute.xlu0 %1222 }
  0xf3   : > { %5347 = vst [vmem:[#allocation15_spill] sm:$0xff] %v3633_v40  ;;  %1320 = vadd.xlane.f32.xlu1 %v1319_v39  ;;  %v3833_v39 = vsel %vm3693_vm2, 1.0, %v5238_v3  ;;  %vm5383_vm2 = vnez %v5363_v56 }
  0xf4   : > { %5380 = vst [vmem:[#allocation22_spill] sm:$0xff] %v3833_v39  ;;  %v3856_v47 = vsel %vm5383_vm2, 1.0, %v5238_v3 }
  0xf5   : > { %5384 = vst [vmem:[#allocation24_spill] sm:$0xff] %v3856_v47 }
  0xf6   : > { %v3637_v42 = vpop.permute.xlu1 %1119  ;;  %v3639_v43 = vpop.permute.xlu0 %1114 }
  0xfa   : > { %v3648_v44 = vpop.permute.xlu1 %1129  ;;  %v3691_v52 = vpop.permute.xlu0 %1124 }
  0xfe   : > { %v3682_v0 = vpop.permute.xlu1 %1139  ;;  %v3739_v4 = vpop.permute.xlu0 %1134 }
 0x102   : > { %v1806_v61 = vpop.permute.xlu1 %1805  ;;  %v3867_v19 = vpop.permute.xlu0 %1825 }
 0x103   : > { %vm1843_vm15 = vcmp.eq.f32.partialorder %v1806_v61, %v3577_v60  ;;  %vm1844_vm1 = vcmp.eq.f32.partialorder %v1806_v61, %v3585_v12  ;;  %vm1852_vm2 = vcmp.eq.f32.partialorder %v3867_v19, %v3585_v12 }
 0x104   : > { %vm1875_vm14 = vmand %vm1843_vm15, %vm5366_vm4  ;;  %vm5368_vm15 = vcmp.eq.f32.partialorder %v3599_v25, %v3585_v12  ;;  %v3801_v25 = vadd.s32 %v3542_v49, %v3459_v46  ;;  %v3828_v49 = vsel %vm3684_vm8, 1.0, %v5238_v3  ;;  %vm1864_vm8 = vcmp.ne.s32.totalorder %v3747_v14, %v3582_v11 }
 0x105   : > { %vm1876_vm0 = vmand %vm1844_vm1, %vm1860_vm9  ;;  %v3743_v10 = vsel %vm1875_vm14, 1.0, %v5238_v3  ;;  %vm1862_vm9 = vcmp.ne.s32.totalorder %v1796_v5, %v3582_v11  ;;  %vm1035_vm14 = vcmp.eq.f32.partialorder %v3601_v26, %v3585_v12  ;;  %5379 = vst [vmem:[#allocation21_spill] sm:$0xff] %v3828_v49  ;;  %v1236_v26 = vmul.f32 %v3737_v2, %v3604_v29 }
 0x106   : > { %vm3755_vm4 = vmand %vm5368_vm15, %vm5367_vm10  ;;  %v1811_v24 = vpop.permute.xlu1 %1810  ;;  %v3767_v20 = vsel %vm1876_vm0, 1.0, %v5238_v3  ;;  %vm5374_vm15 = vnez %v5349_v28  ;;  %v3838_v28 = vsel %vm3701_vm5, 1.0, %v5238_v3  ;;  %vm5385_vm5 = vnez %v5365_v62 }
 0x107   : > { %5371 = vst [vmem:[#allocation16_spill] sm:$0xff] %v3767_v20  ;;  %vm3777_vm10 = vmand %vm1034_vm3, %vm1050_vm6  ;;  %vm1845_vm1 = vcmp.eq.f32.partialorder %v1811_v24, %v3577_v60  ;;  %vm1846_vm0 = vcmp.eq.f32.partialorder %v1811_v24, %v3585_v12  ;;  %v3789_v21 = vsel %vm5374_vm15, 1.0, %v5238_v3  ;;  %v2115_v7 = vadd.f32 %v3767_v20, %v3743_v10 }
 0x108   : > { %5375 = vst [vmem:[#allocation17_spill] sm:$0xff] %v3789_v21  ;;  %vm1877_vm6 = vmand %vm1845_vm1, %vm1861_vm7  ;;  %v3861_v13 = vsel %vm5385_vm5, 1.0, %v5238_v3  ;;  %v3872_v54 = vsel %vm3755_vm4, 1.0, %v5238_v3  ;;  %v1154_v5 = vmul.f32 %v3782_v1, %v3606_v30  ;;  %v3883_v59 = vsel %vm3777_vm10, 1.0, %v5238_v3 }
 0x109   : > { %vm1878_vm7 = vmand %vm1846_vm0, %vm1862_vm9  ;;  %v3821_v46 = vsel %vm1877_vm6, 1.0, %v5238_v3  ;;  %5381 = vst [vmem:[#allocation23_spill] sm:$0xff] %v3838_v28  ;;  %2116 = vadd.xlane.f32.xlu0 %v2115_v7  ;;  %v1238_v62 = vmul.f32 %v3737_v2, %v3611_v33  ;;  %v1239_v29 = vmul.f32 %v3760_v9, %v3611_v33  ;;  %v1240_v30 = vmul.f32 %v3737_v2, %v3609_v32 }
 0x10a   : > { %vm1067_vm13 = vmand %vm1035_vm14, %vm5382_vm12  ;;  %v3846_v50 = vpop.permute.xlu1 %1997  ;;  %v3849_v45 = vsel %vm1878_vm7, 1.0, %v5238_v3  ;;  %5386 = vst [vmem:[#allocation25_spill] sm:$0xff] %v3861_v13  ;;  %v1243_v24 = vmul.f32 %v3760_v9, %v3619_v35  ;;  %v3903_v7 = vmul.f32 %v3592_v17, %v1153_v48  ;;  %v1244_v33 = vmul.f32 %v3737_v2, %v3617_v34 }
 0x10b   : > { %5387 = vst [vmem:[#allocation26_spill] sm:$0xff] %v3872_v54  ;;  %v2118_v56 = vadd.f32 %v3849_v45, %v3821_v46  ;;  %5388 = vst [vmem:[#allocation27_spill] sm:$0xff] %v3883_v59  ;;  %v3886_v61 = vsel %vm1067_vm13, 1.0, %v5238_v3  ;;  %v1245_v3 = vmul.f32 %v3760_v9, %v3617_v34  ;;  %v3910_v32 = vmul.f32 %v3592_v17, %v1236_v26  ;;  %v3926_v26 = vpop.permute.xlu0 %2032 }
 0x10c   : > { %5389 = vst [vmem:[#allocation28_spill] sm:$0xff] %v3886_v61  ;;  %5390 = vst [vmem:[#allocation29_spill] sm:$0xff] %v3903_v7  ;;  %v1247_v35 = vmul.f32 %v3760_v9, %v3626_v37  ;;  %v3920_v48 = vmul.f32 %v3595_v18, %v1237_v55  ;;  %v1249_v34 = vmul.f32 %v3760_v9, %v3624_v36 }
 0x10d   : > { %2119 = vadd.xlane.f32.xlu1 %v2118_v56  ;;  %v3917_v56 = vmul.f32 %v3595_v18, %v1154_v5  ;;  %v3929_v17 = vmul.f32 %v3622_v22, %v1238_v62  ;;  %v3932_v54 = vmul.f32 %v3629_v38, %v1239_v29  ;;  %v3935_v5 = vmul.f32 %v3789_v21, %v1240_v30 }
 0x10e   : > { %v3900_v8 = vpop.permute.xlu1 %2002  ;;  %v3938_v55 = vmul.f32 %v3806_v27, %v1241_v63  ;;  %v3941_v18 = vmul.f32 %v3811_v57, %v1242_v15  ;;  %v3944_v36 = vmul.f32 %v3816_v31, %v1243_v24  ;;  %v3949_v62 = vmul.f32 %v3838_v28, %v1244_v33 }
 0x10f   : > { %5391 = vst [vmem:[#allocation30_spill] sm:$0xff] %v3917_v56  ;;  %v3952_v29 = vmul.f32 %v3856_v47, %v1245_v3  ;;  %v1250_v30 = vmul.f32 %v3737_v2, %v3635_v41  ;;  %v1159_v63 = vmul.f32 %v3763_v16, %v3637_v42  ;;  %v3966_v24 = vmul.f32 %v3828_v49, %v1246_v53 }
 0x110   : > { %5392 = vst [vmem:[#allocation31_spill] sm:$0xff] %v3949_v62  ;;  %v3969_v33 = vmul.f32 %v3833_v39, %v1247_v35  ;;  %v3973_v3 = vmul.f32 %v3763_v16, %v3633_v40  ;;  %v3985_v53 = vmul.f32 %v3883_v59, %v1248_v58  ;;  %v3988_v35 = vmul.f32 %v3886_v61, %v1249_v34 }
 0x111   : > { %5395 = vst [vmem:[#allocation32_spill] sm:$0xff] %v3966_v24  ;;  %v3992_v40 = vmul.f32 %v3760_v9, %v3635_v41  ;;  %v1158_v14 = vmul.f32 %v3782_v1, %v3639_v43  ;;  %v1163_v38 = vmul.f32 %v3763_v16, %v3648_v44  ;;  %vm1867_vm10 = vcmp.ne.s32.totalorder %v3793_v23, %v3571_v6 }
 0x112   : > { %v1816_v37 = vpop.permute.xlu1 %1815  ;;  %5396 = vst [vmem:[#allocation33_spill] sm:$0xff] %v3969_v33  ;;  %5397 = vst [vmem:[#allocation34_spill] sm:$0xff] %v3973_v3  ;;  %v1160_v3 = vmul.f32 %v3782_v1, %v3637_v42  ;;  %v1161_v34 = vmul.f32 %v3763_v16, %v3691_v52  ;;  %v1162_v41 = vmul.f32 %v3782_v1, %v3691_v52  ;;  %v5404_v24 = vmov 0.0  }
 0x113   : > { %vm1847_vm3 = vcmp.eq.f32.partialorder %v1816_v37, %v3577_v60  ;;  %vm1848_vm4 = vcmp.eq.f32.partialorder %v1816_v37, %v3585_v12  ;;  %v1157_v37 = vmul.f32 %v3763_v16, %v3639_v43  ;;  %5400 = vst [vmem:[#allocation35_spill] sm:$0xff] %v3985_v53  ;;  %5401 = vst [vmem:[#allocation36_spill] sm:$0xff] %v3988_v35 }
 0x114   : > { %vm3961_vm9 = vmand %vm1847_vm3, %vm1863_vm11  ;;  %5402 = vst [vmem:[#allocation37_spill] sm:$0xff] %v3992_v40  ;;  %v1931_v40 = vpop.permute.xlu0 %1930  ;;  %vm1865_vm1 = vcmp.ne.s32.totalorder %v3801_v25, %v3571_v6  ;;  %v4011_v43 = vmul.f32 %v3811_v57, %v1159_v63  ;;  %v4024_v33 = vmul.f32 %v3861_v13, %v1250_v30  ;;  %v1164_v63 = vmul.f32 %v3782_v1, %v3648_v44 }
 0x115   : > { %vm3980_vm14 = vmand %vm1848_vm4, %vm1864_vm8  ;;  %v4016_v35 = vsel %vm3961_vm9, 1.0, %v5404_v24  ;;  %vm1866_vm0 = vcmp.ne.s32.totalorder %v3801_v25, %v3582_v11  ;;  %v4040_v62 = vmul.f32 %v3828_v49, %v1163_v38  ;;  %v1965_v30 = vmul.f32 %v1931_v40, %v3763_v16 }
 0x116   : > { %v2008_v58 = vpop.permute.xlu1 %2007  ;;  %5403 = vst [vmem:[#allocation38_spill] sm:$0xff] %v4011_v43  ;;  %5405 = vst [vmem:[#allocation39_spill] sm:$0xff] %v4016_v35  ;;  %v4021_v52 = vsel %vm3980_vm14, 1.0, %v5404_v24  ;;  %v4046_v44 = vmul.f32 %v3806_v27, %v1158_v14  ;;  %v2035_v38 = vmul.f32 %v3846_v50, %v3737_v2  ;;  %v1165_v14 = vmul.f32 %v3763_v16, %v3739_v4 }
 0x117   : > { %v2039_v53 = vmul.f32 %v2008_v58, %v3737_v2  ;;  %v2040_v42 = vmul.f32 %v2008_v58, %v3760_v9  ;;  %5406 = vst [vmem:[#allocation40_spill] sm:$0xff] %v4021_v52  ;;  %5407 = vst [vmem:[#allocation41_spill] sm:$0xff] %v4024_v33  ;;  %v4027_v58 = vmul.f32 %v3789_v21, %v1157_v37 }
 0x118   : > { %5409 = vst [vmem:[#allocation43_spill] sm:$0xff] %v4040_v62  ;;  %5411 = vst [vmem:[#allocation45_spill] sm:$0xff] %v4046_v44  ;;  %v4049_v33 = vmul.f32 %v3816_v31, %v1160_v3  ;;  %v1168_v31 = vmul.f32 %v3782_v1, %v3682_v0  ;;  %v1166_v27 = vmul.f32 %v3782_v1, %v3739_v4 }
 0x119   : > { %5408 = vst [vmem:[#allocation42_spill] sm:$0xff] %v4027_v58  ;;  %v906_v57 = vpop.f32.mrf.mxu0  ;;  %v4034_v15 = vmul.f32 %v4016_v35, %v2039_v53  ;;  %v4037_v22 = vmul.f32 %v4021_v52, %v2040_v42  ;;  %v4052_v53 = vmul.f32 %v3838_v28, %v1161_v34  ;;  %v1167_v42 = vmul.f32 %v3763_v16, %v3682_v0 }
 0x11a   : > { %v4043_v37 = vpop.f32.mrf.mxu1  ;;  %v1821_v21 = vpop.permute.xlu1 %1820  ;;  %5412 = vst [vmem:[#allocation46_spill] sm:$0xff] %v4049_v33  ;;  %v4059_v35 = vmul.f32 %v3856_v47, %v1162_v41  ;;  %v1966_v52 = vmul.f32 %v1931_v40, %v3782_v1  ;;  %v1412_v3 = vmul.f32 %v3903_v7, %v906_v57  ;;  %v2036_v41 = vmul.f32 %v3846_v50, %v3760_v9 }
 0x11b   : > { %5410 = vst [vmem:[#allocation44_spill] sm:$0xff] %v4043_v37  ;;  %5413 = vst [vmem:[#allocation47_spill] sm:$0xff] %v4052_v53  ;;  %v908_v49 = vpop.f32.mrf.mxu0  ;;  %v4077_v62 = vmul.f32 %v3833_v39, %v1164_v63  ;;  %vm1868_vm15 = vcmp.ne.s32.totalorder %v3793_v23, %v3582_v11  ;;  %vm1851_vm6 = vcmp.eq.f32.partialorder %v3867_v19, %v3577_v60 }
 0x11c   : > { %5414 = vst [vmem:[#allocation48_spill] sm:$0xff] %v4059_v35  ;;  %v1413_v34 = vmul.f32 %v3917_v56, %v908_v49  ;;  %v4066_v28 = vpop.f32.mrf.mxu1  ;;  %v1268_v40 = vsub.f32 %v906_v57, %v3910_v32  ;;  %v4089_v4 = vmul.f32 %v3821_v46, %v1965_v30  ;;  %v2037_v63 = vmul.f32 %v3900_v8, %v3737_v2  ;;  %vm4117_vm11 = vmand %vm1851_vm6, %vm1867_vm10 }
 0x11d   : > { %5415 = vst [vmem:[#allocation49_spill] sm:$0xff] %v4066_v28  ;;  %v4074_v47 = vpop.f32.mrf.mxu0  ;;  %5417 = vst [vmem:[#allocation51_spill] sm:$0xff] %v4077_v62  ;;  %v2051_v7 = vmul.f32 %v3743_v10, %v2035_v38  ;;  %vm1849_vm7 = vcmp.eq.f32.partialorder %v1821_v21, %v3577_v60  ;;  %v1269_v39 = vsub.f32 %v908_v49, %v3920_v48 }
 0x11e   : > { %5416 = vst [vmem:[#allocation50_spill] sm:$0xff] %v4074_v47  ;;  %v4084_v0 = vadd.f32 %v1413_v34, %v1412_v3  ;;  %v4086_v56 = vpop.f32.mrf.mxu1  ;;  %5419 = vst [vmem:[#allocation53_spill] sm:$0xff] %v4089_v4  ;;  %v2013_v50 = vpop.permute.xlu1 %2012  ;;  %v4099_v57 = vmul.f32 %v3861_v13, %v1167_v42  ;;  %v4102_v32 = vmul.f32 %v3883_v59, %v1165_v14  ;;  %v1284_v14 = vmul.f32 1.442695, %v1268_v40  ;;  %v5430_v40 = vld [vmem:[#allocation26_spill] sm:$0xff] }
 0x11f   : > { %v4096_v62 = vpop.f32.mrf.mxu0  ;;  %v2213_v30 = vmul.f32 %v4089_v4, %v4086_v56  ;;  %v4109_v34 = vmul.f32 %v3849_v45, %v1966_v52  ;;  %v2038_v48 = vmul.f32 %v3900_v8, %v3760_v9  ;;  %v2067_v42 = vsub.f32 %v4043_v37, %v2051_v7  ;;  %vm4135_vm8 = vmand %vm1849_vm7, %vm1865_vm1 }
 0x120   : > { %5418 = vst [vmem:[#allocation52_spill] sm:$0xff] %v4084_v0  ;;  %5420 = vst [vmem:[#allocation54_spill] sm:$0xff] %v4096_v62  ;;  %v4106_v3 = vpop.f32.mrf.mxu1  ;;  %vm1850_vm12 = vcmp.eq.f32.partialorder %v1821_v21, %v3585_v12  ;;  %v2052_v52 = vmul.f32 %v3767_v20, %v2036_v41  ;;  %vm1869_vm13 = vcmp.ne.s32.totalorder %v3546_v51, %v3571_v6  ;;  %v1286_v59 = vmul.f32 1.442695, %v1269_v39 }
 0x121   : > { %5421 = vst [vmem:[#allocation55_spill] sm:$0xff] %v4099_v57  ;;  %5422 = vst [vmem:[#allocation56_spill] sm:$0xff] %v4102_v32  ;;  %v4126_v38 = vpop.f32.mrf.mxu0  ;;  %v2214_v8 = vmul.f32 %v4109_v34, %v4106_v3  ;;  %v4146_v0 = vmul.f32 %v3886_v61, %v1166_v27  ;;  %v4149_v13 = vmul.f32 %v5430_v40, %v1168_v31  ;;  %v2083_v49 = vmul.f32 1.442695, %v2067_v42 }
 0x122   : > { %5423 = vst [vmem:[#allocation57_spill] sm:$0xff] %v4109_v34  ;;  %v4141_v7 = vpop.f32.mrf.mxu1  ;;  %v4143_v41 = vpop.permute.xlu1 %2017  ;;  %v2068_v37 = vsub.f32 %v4066_v28, %v2052_v52  ;;  %v2053_v57 = vmul.f32 %v3821_v46, %v2037_v63  ;;  %v4158_v34 = vsel %vm4117_vm11, 1.0, %v5404_v24  ;;  %vm4165_vm5 = vmand %vm1850_vm12, %vm1866_vm0  ;;  %v1270_v31 = vsub.f32 %v4074_v47, %v3929_v17 }
 0x123   : > { %5428 = vst [vmem:[#allocation58_spill] sm:$0xff] %v4141_v7  ;;  %5429 = vst [vmem:[#allocation59_spill] sm:$0xff] %v4146_v0  ;;  %v920_v20 = vpop.f32.mrf.mxu0  ;;  %v2041_v39 = vmul.f32 %v2013_v50, %v3737_v2  ;;  %v4172_v63 = vadd.f32 %v2214_v8, %v2213_v30  ;;  %v4179_v25 = vsel %vm4135_vm8, 1.0, %v5404_v24  ;;  %v2054_v61 = vmul.f32 %v3849_v45, %v2038_v48 }
 0x124   : > { %5431 = vst [vmem:[#allocation26_spill] sm:$0xff] %v4149_v13  ;;  %v4174_v52 = vpop.f32.mrf.mxu1  ;;  %5436 = vst [vmem:[#allocation62_spill] sm:$0xff] %v4179_v25  ;;  %v2069_v21 = vsub.f32 %v4086_v56, %v2053_v57  ;;  %vm1870_vm3 = vcmp.ne.s32.totalorder %v3546_v51, %v3582_v11  ;;  %2935 = vpow2.f32 %v1284_v14  ;;  %v1271_v17 = vsub.f32 %v4096_v62, %v3932_v54  ;;  %v1951_v54 = vpop.permute.xlu0 %1950 }
 0x125   : > { %5434 = vst [vmem:[#allocation60_spill] sm:$0xff] %v4172_v63  ;;  %5435 = vst [vmem:[#allocation61_spill] sm:$0xff] %v4174_v52  ;;  %v4183_v28 = vpop.f32.mrf.mxu0  ;;  %v1416_v30 = vmul.f32 %v4027_v58, %v4126_v38  ;;  %v1417_v4 = vmul.f32 %v4046_v44, %v920_v20  ;;  %v4197_v56 = vsel %vm4165_vm5, 1.0, %v5404_v24  ;;  %2937 = vpow2.f32 %v1286_v59 }
 0x126   : > { %v4192_v42 = vpop.f32.mrf.mxu1  ;;  %v1831_v8 = vpop.permute.xlu1 %1830  ;;  %5438 = vst [vmem:[#allocation64_spill] sm:$0xff] %v4197_v56  ;;  %v2085_v57 = vmul.f32 1.442695, %v2068_v37  ;;  %v2042_v48 = vmul.f32 %v2013_v50, %v3760_v9  ;;  %v1288_v63 = vmul.f32 1.442695, %v1270_v31  ;;  %v2070_v58 = vsub.f32 %v4106_v3, %v2054_v61  ;;  %vm4216_vm4 = vmand %vm1852_vm2, %vm1868_vm15 }
 0x127   : > { %5437 = vst [vmem:[#allocation63_spill] sm:$0xff] %v4192_v42  ;;  %v4200_v14 = vpop.f32.mrf.mxu0  ;;  %v4203_v62 = vadd.f32 %v1417_v4, %v1416_v30  ;;  %v4206_v44 = vmul.f32 %v4179_v25, %v2041_v39  ;;  %2939 = vpow2.f32 %v2083_v49  ;;  %v2087_v37 = vmul.f32 1.442695, %v2069_v21  ;;  %v5467_v25 = vld [vmem:[#allocation12_spill] sm:$0xff] }
 0x128   : > { %v4208_v47 = vpop.f32.mrf.mxu1  ;;  %v1272_v61 = vsub.f32 %v4126_v38, %v3935_v5  ;;  %vm1853_vm9 = vcmp.eq.f32.partialorder %v1831_v8, %v3577_v60  ;;  %v1290_v3 = vmul.f32 1.442695, %v1271_v17  ;;  %v2071_v23 = vsub.f32 %v4141_v7, %v4034_v15  ;;  %v5443_v17 = vld [vmem:[#allocation9_spill] sm:$0xff]  ;;  %v5458_v7 = vld [vmem:[#allocation31_spill] sm:$0xff] }
 0x129   : > { %5439 = vst [vmem:[#allocation65_spill] sm:$0xff] %v4203_v62  ;;  %5440 = vst [vmem:[#allocation66_spill] sm:$0xff] %v4208_v47  ;;  %v4223_v50 = vpop.f32.mrf.mxu0  ;;  %v1273_v27 = vsub.f32 %v920_v20, %v3938_v55  ;;  %v1419_v19 = vmul.f32 %v4049_v33, %v4200_v14  ;;  %v4234_v49 = vmul.f32 %v3926_v26, %v3737_v2  ;;  %2941 = vpow2.f32 %v2085_v57 }
 0x12a   : > { %v4230_v31 = vpop.f32.mrf.mxu1  ;;  %v2023_v39 = vpop.permute.xlu1 %2022  ;;  %v1418_v5 = vmul.f32 %v4011_v43, %v4183_v28  ;;  %v4239_v38 = vmul.f32 %v4197_v56, %v2042_v48  ;;  %v4246_v20 = vsel %vm4216_vm4, 1.0, %v5404_v24  ;;  %v4250_v55 = vmul.f32 %v3926_v26, %v3760_v9  ;;  %vm1885_vm14 = vmand %vm1853_vm9, %vm1869_vm13 }
 0x12b   : > { %v4241_v15 = vpop.f32.mrf.mxu0  ;;  %2943 = vpow2.f32 %v1288_v63  ;;  %v2089_v21 = vmul.f32 1.442695, %v2070_v58  ;;  %vm1871_vm10 = vcmp.ne.s32.totalorder %v5443_v17, %v3571_v6  ;;  %v1292_v30 = vmul.f32 1.442695, %v1272_v61  ;;  %v4266_v58 = vpop.permute.xlu0 %1960 }
 0x12c   : > { %2945 = vpow2.f32 %v2087_v37  ;;  %vm1854_vm1 = vcmp.eq.f32.partialorder %v1831_v8, %v3585_v12  ;;  %v4260_v4 = vadd.f32 %v1419_v19, %v1418_v5  ;;  %v4262_v57 = vpop.f32.mrf.mxu1  ;;  %v2091_v63 = vmul.f32 1.442695, %v2071_v23 }
 0x12d   : > { %v4264_v26 = vpop.f32.mrf.mxu0  ;;  %2947 = vpow2.f32 %v1290_v3  ;;  %v1294_v48 = vmul.f32 1.442695, %v1273_v27  ;;  %v2072_v59 = vsub.f32 %v4174_v52, %v4037_v22  ;;  %v4273_v37 = vsel %vm1885_vm14, 1.0, %v5404_v24  ;;  %vm4289_vm0 = vmand %vm1854_vm1, %vm1870_vm3 }
 0x12e   : > { %5444 = vst [vmem:[#allocation9_spill] sm:$0xff] %v4260_v4  ;;  %v4270_v62 = vpop.permute.xlu1 %1835  ;;  %5445 = vst [vmem:[#allocation67_spill] sm:$0xff] %v4273_v37  ;;  %v1420_v61 = vmul.f32 %v4052_v53, %v4223_v50  ;;  %v2045_v19 = vmul.f32 %v2023_v39, %v3737_v2  ;;  %v1421_v5 = vmul.f32 %v4059_v35, %v4241_v15  ;;  %2949 = vpow2.f32 %v2089_v21  ;;  %v4305_v8 = vpop.f32.mrf.mxu1 }
 0x12f   : > { %v4280_v4 = vpop.f32.mrf.mxu0  ;;  %v1973_v3 = vmul.f32 %v1951_v54, %v3763_v16  ;;  %v1974_v23 = vmul.f32 %v1951_v54, %v3782_v1  ;;  %v1275_v27 = vsub.f32 %v4200_v14, %v3944_v36  ;;  %vm1872_vm15 = vcmp.ne.s32.totalorder %v5443_v17, %v3582_v11 }
 0x130   : > { %v4299_v35 = vmul.f32 %v4266_v58, %v3763_v16  ;;  %2951 = vpow2.f32 %v1292_v30  ;;  %v2044_v51 = vmul.f32 %v4143_v41, %v3760_v9  ;;  %v4303_v54 = vadd.f32 %v1421_v5, %v1420_v61 }
 0x131   : > { %2953 = vpow2.f32 %v1294_v48  ;;  %v2093_v21 = vmul.f32 1.442695, %v2072_v59  ;;  %v1274_v36 = vsub.f32 %v4183_v28, %v3941_v18  ;;  %v4310_v14 = vmul.f32 %v4273_v37, %v1973_v3  ;;  %v4312_v53 = vpop.f32.mrf.mxu0  ;;  %v4314_v43 = vpop.eup %2935  ;;  %v5454_v3 = vld [vmem:[#allocation43_spill] sm:$0xff] }
 0x132   : > { %5448 = vst [vmem:[#allocation68_spill] sm:$0xff] %v4303_v54  ;;  %v2028_v33 = vpop.permute.xlu1 %2027  ;;  %5450 = vst [vmem:[#allocation70_spill] sm:$0xff] %v4314_v43  ;;  %2955 = vpow2.f32 %v2091_v63  ;;  %v4319_v30 = vsel %vm4289_vm0, 1.0, %v5404_v24  ;;  %v2046_v48 = vmul.f32 %v2023_v39, %v3760_v9  ;;  %v4323_v59 = vmul.f32 %v4273_v37, %v2045_v19  ;;  %v4325_v18 = vpop.eup %2937  ;;  %v5453_v63 = vld [vmem:[#allocation10_spill] sm:$0xff] }
 0x133   : > { %5449 = vst [vmem:[#allocation69_spill] sm:$0xff] %v4310_v14  ;;  %5451 = vst [vmem:[#allocation71_spill] sm:$0xff] %v4319_v30  ;;  %v2073_v28 = vsub.f32 %v4192_v42, %v4206_v44  ;;  %v1298_v61 = vmul.f32 1.442695, %v1275_v27  ;;  %v2221_v5 = vmul.f32 %v4310_v14, %v4305_v8  ;;  %vm1855_vm6 = vcmp.eq.f32.partialorder %v4270_v62, %v3577_v60  ;;  %v5455_v44 = vld [vmem:[#allocation51_spill] sm:$0xff]  ;;  %v4343_v54 = vpop.f32.mrf.mxu1  ;;  %v5477_v14 = vld [vmem:[#allocation33_spill] sm:$0xff] }
 0x134   : > { %5452 = vst [vmem:[#allocation72_spill] sm:$0xff] %v4325_v18  ;;  %vm1873_vm7 = vcmp.ne.s32.totalorder %v5453_v63, %v3571_v6  ;;  %v2074_v39 = vsub.f32 %v4208_v47, %v4239_v38  ;;  %v1277_v19 = vsub.f32 %v4241_v15, %v3952_v29  ;;  %v1422_v22 = vmul.f32 %v5454_v3, %v4264_v26  ;;  %v4347_v37 = vpop.eup %2939  ;;  %v4354_v15 = vpop.f32.mrf.mxu0  ;;  %vm4364_vm12 = vmand %vm1855_vm6, %vm1871_vm10 }
 0x135   : > { %v1423_v27 = vmul.f32 %v5455_v44, %v4280_v4  ;;  %vm1874_vm11 = vcmp.ne.s32.totalorder %v5453_v63, %v3582_v11  ;;  %5456 = vst [vmem:[#allocation10_spill] sm:$0xff] %v4347_v37  ;;  %v2043_v52 = vmul.f32 %v4143_v41, %v3737_v2  ;;  %2957 = vpow2.f32 %v2093_v21  ;;  %v4381_v47 = vpop.f32.mrf.mxu1  ;;  %v5479_v63 = vld [vmem:[#allocation55_spill] sm:$0xff] }
 0x136   : > { %v1296_v38 = vmul.f32 1.442695, %v1274_v36  ;;  %v4352_v29 = vmul.f32 %v4319_v30, %v1974_v23  ;;  %v1841_v3 = vpop.permute.xlu1 %1840  ;;  %v1276_v44 = vsub.f32 %v4223_v50, %v5458_v7  ;;  %v4371_v23 = vmul.f32 %v4319_v30, %v2046_v48  ;;  %v4375_v36 = vpop.eup %2941 }
 0x137   : > { %v4368_v41 = vadd.f32 %v1423_v27, %v1422_v22  ;;  %v1340_v21 = vadd.f32 %v4325_v18, %v4314_v43  ;;  %5462 = vst [vmem:[#allocation74_spill] sm:$0xff] %v4375_v36  ;;  %v2095_v7 = vmul.f32 1.442695, %v2073_v28  ;;  %2959 = vpow2.f32 %v1298_v61 }
 0x138   : > { %5457 = vst [vmem:[#allocation73_spill] sm:$0xff] %v4352_v29  ;;  %vm1856_vm13 = vcmp.eq.f32.partialorder %v4270_v62, %v3585_v12  ;;  %v2222_v50 = vmul.f32 %v4352_v29, %v4343_v54  ;;  %v4383_v22 = vpop.eup %2943  ;;  %v2097_v27 = vmul.f32 1.442695, %v2074_v39  ;;  %v1302_v48 = vmul.f32 1.442695, %v1277_v19  ;;  %v5466_v29 = vld [vmem:[#allocation11_spill] sm:$0xff]  ;;  %v4400_v19 = vpop.f32.mrf.mxu0 }
 0x139   : > { %5461 = vst [vmem:[#allocation31_spill] sm:$0xff] %v4368_v41  ;;  %5463 = vst [vmem:[#allocation75_spill] sm:$0xff] %v4383_v22  ;;  %v2060_v41 = vmul.f32 %v4246_v20, %v2044_v51  ;;  %1341 = vadd.xlane.f32.xlu1 %v1340_v21  ;;  %v2047_v30 = vmul.f32 %v2028_v33, %v3737_v2  ;;  %v4387_v42 = vpop.eup %2945  ;;  %v4392_v28 = vsel %vm4364_vm12, 1.0, %v5404_v24  ;;  %2961 = vpow2.f32 %v1296_v38 }
 0x13a   : > { %5464 = vst [vmem:[#allocation76_spill] sm:$0xff] %v4387_v42  ;;  %v4394_v61 = vadd.f32 %v2222_v50, %v2221_v5  ;;  %v1364_v56 = vmul.f32 %v4314_v43, %v5466_v29  ;;  %v1365_v39 = vmul.f32 %v4325_v18, %v5467_v25  ;;  %v4402_v51 = vpop.permute.xlu1 %1925  ;;  %v4404_v2 = vpop.eup %2947  ;;  %vm4412_vm8 = vmand %vm1856_vm13, %vm1872_vm15  ;;  %v1424_v5 = vmul.f32 %v4102_v32, %v4312_v53 }
 0x13b   : > { %5468 = vst [vmem:[#allocation11_spill] sm:$0xff] %v4404_v2  ;;  %v2048_v25 = vmul.f32 %v2028_v33, %v3760_v9  ;;  %v1425_v29 = vmul.f32 %v4146_v0, %v4354_v15  ;;  %v4422_v21 = vmul.f32 %v4392_v28, %v2047_v30  ;;  %v2076_v17 = vsub.f32 %v4262_v57, %v2060_v41  ;;  %v4427_v18 = vpop.f32.mrf.mxu1  ;;  %v4429_v43 = vpop.eup %2949 }
 0x13c   : > { %5465 = vst [vmem:[#allocation77_spill] sm:$0xff] %v4394_v61  ;;  %v1380_v50 = vadd.f32 %v1365_v39, %v1364_v56  ;;  %v2139_v62 = vadd.f32 %v4375_v36, %v4347_v37  ;;  %5471 = vst [vmem:[#allocation12_spill] sm:$0xff] %v4429_v43  ;;  %v1978_v9 = vmul.f32 %v4266_v58, %v3782_v1  ;;  %2963 = vpow2.f32 %v2095_v7  ;;  %v4445_v58 = vpop.f32.mrf.mxu0 }
 0x13d   : > { %v2059_v33 = vmul.f32 %v4158_v34, %v2043_v52  ;;  %v4434_v61 = vadd.f32 %v1425_v29, %v1424_v5  ;;  %v4436_v30 = vpop.eup %2951  ;;  %2965 = vpow2.f32 %v2097_v27  ;;  %v4441_v56 = vsel %vm4412_vm8, 1.0, %v5404_v24 }
 0x13e   : > { %5473 = vst [vmem:[#allocation79_spill] sm:$0xff] %v4436_v30  ;;  %1381 = vadd.xlane.f32.xlu0 %v1380_v50  ;;  %2140 = vadd.xlane.f32.xlu1 %v2139_v62  ;;  %vm1857_vm2 = vcmp.eq.f32.partialorder %v1841_v3, %v3577_v60  ;;  %vm1858_vm5 = vcmp.eq.f32.partialorder %v1841_v3, %v3585_v12  ;;  %v4447_v38 = vpop.eup %2953  ;;  %v1300_v52 = vmul.f32 1.442695, %v1276_v44  ;;  %2967 = vpow2.f32 %v1302_v48  ;;  %v5476_v44 = vld [vmem:[#allocation16_spill] sm:$0xff]  ;;  %v4468_v48 = vpop.f32.mrf.mxu1 }
 0x13f   : > { %5472 = vst [vmem:[#allocation78_spill] sm:$0xff] %v4434_v61  ;;  %5474 = vst [vmem:[#allocation80_spill] sm:$0xff] %v4447_v38  ;;  %v2075_v41 = vsub.f32 %v4230_v31, %v2059_v33  ;;  %v4454_v7 = vmul.f32 %v4441_v56, %v2048_v25  ;;  %v4456_v27 = vpop.eup %2955  ;;  %v2101_v60 = vmul.f32 1.442695, %v2076_v17  ;;  %v2163_v3 = vmul.f32 %v4347_v37, %v3743_v10  ;;  %v4470_v39 = vpop.permute.xlu1 %1935  ;;  %v5478_v25 = vld [vmem:[#allocation36_spill] sm:$0xff]  ;;  %v5483_v37 = vld [vmem:[#allocation35_spill] sm:$0xff] }
 0x140   : > { %vm1889_vm3 = vmand %vm1857_vm2, %vm1873_vm7  ;;  %5475 = vst [vmem:[#allocation81_spill] sm:$0xff] %v4456_v27  ;;  %v2164_v6 = vmul.f32 %v4375_v36, %v5476_v44  ;;  %v1279_v5 = vsub.f32 %v4280_v4, %v5477_v14  ;;  %v1281_v11 = vsub.f32 %v4354_v15, %v5478_v25  ;;  %v1426_v29 = vmul.f32 %v5479_v63, %v4400_v19  ;;  %v5481_v15 = vld [vmem:[#allocation32_spill] sm:$0xff]  ;;  %v4505_v0 = vpop.f32.mrf.mxu1  ;;  %v5507_v61 = vld [vmem:[#allocation49_spill] sm:$0xff] }
 0x141   : > { %vm1890_vm4 = vmand %vm1858_vm5, %vm1874_vm11  ;;  %v4462_v12 = vsel %vm1889_vm3, 1.0, %v5404_v24  ;;  %v1427_v17 = vmul.f32 %v4149_v13, %v4445_v58  ;;  %v1346_v33 = vadd.f32 %v4447_v38, %v4436_v30  ;;  %2969 = vpow2.f32 %v1300_v52 }
 0x142   : > { %v4481_v50 = vsel %vm1890_vm4, 1.0, %v5404_v24  ;;  %v2179_v62 = vadd.f32 %v2164_v6, %v2163_v3  ;;  %v4487_v36 = vmul.f32 %v4462_v12, %v4299_v35  ;;  %v4489_v4 = vpop.eup %2957  ;;  %v1278_v14 = vsub.f32 %v4264_v26, %v5481_v15 }
 0x143   : > { %5480 = vst [vmem:[#allocation16_spill] sm:$0xff] %v4489_v4  ;;  %v4493_v25 = vadd.f32 %v1427_v17, %v1426_v29  ;;  %v4497_v24 = vmul.f32 %v4462_v12, %v4234_v49  ;;  %v2099_v3 = vmul.f32 1.442695, %v2075_v41  ;;  %v2077_v6 = vsub.f32 %v4305_v8, %v4323_v59  ;;  %1347 = vadd.xlane.f32.xlu1 %v1346_v33  ;;  %v4522_v17 = vpop.permute.xlu1 %1940 }
 0x144   : > { %v1280_v35 = vsub.f32 %v4312_v53, %v5483_v37  ;;  %2180 = vadd.xlane.f32.xlu0 %v2179_v62  ;;  %v2225_v52 = vmul.f32 %v4487_v36, %v4468_v48  ;;  %v4507_v26 = vpop.eup %2959  ;;  %2971 = vpow2.f32 %v2101_v60  ;;  %v1306_v29 = vmul.f32 1.442695, %v1279_v5  ;;  %v5485_v5 = vld [vmem:[#allocation41_spill] sm:$0xff] }
 0x145   : > { %5482 = vst [vmem:[#allocation33_spill] sm:$0xff] %v4493_v25  ;;  %5484 = vst [vmem:[#allocation36_spill] sm:$0xff] %v4507_v26  ;;  %v2078_v49 = vsub.f32 %v4343_v54, %v4371_v23  ;;  %v4512_v41 = vmul.f32 %v4481_v50, %v1978_v9  ;;  %v1310_v8 = vmul.f32 1.442695, %v1281_v11  ;;  %v1343_v53 = vadd.f32 %v4404_v2, %v4383_v22  ;;  %v5486_v23 = vld [vmem:[#allocation37_spill] sm:$0xff] }
 0x146   : > { %v4518_v37 = vmul.f32 %v4481_v50, %v4250_v55  ;;  %v2145_v59 = vadd.f32 %v4489_v4, %v4456_v27  ;;  %v1304_v60 = vmul.f32 1.442695, %v1278_v14  ;;  %v1282_v54 = vsub.f32 %v4400_v19, %v5485_v5  ;;  %v4532_v15 = vpop.eup %2961 }
 0x147   : > { %v1267_v9 = vmul.f32 %v5430_v40, %v5486_v23  ;;  %v2226_v11 = vmul.f32 %v4512_v41, %v4505_v0  ;;  %2973 = vpow2.f32 %v2099_v3  ;;  %v2103_v62 = vmul.f32 1.442695, %v2077_v6  ;;  %5487 = vst [vmem:[#allocation32_spill] sm:$0xff] %v4532_v15 }
 0x148   : > { %v1308_v33 = vmul.f32 1.442695, %v1280_v35  ;;  %v2079_v55 = vsub.f32 %v4381_v47, %v4422_v21  ;;  %1344 = vadd.xlane.f32.xlu0 %v1343_v53  ;;  %2146 = vadd.xlane.f32.xlu1 %v2145_v59  ;;  %2975 = vpow2.f32 %v1306_v29  ;;  %v2105_v14 = vmul.f32 1.442695, %v2078_v49  ;;  %v5489_v21 = vld [vmem:[#allocation14_spill] sm:$0xff]  ;;  %v5491_v29 = vld [vmem:[#allocation15_spill] sm:$0xff] }
 0x149   : > { %v1283_v19 = vsub.f32 %v4445_v58, %v1267_v9  ;;  %v4535_v5 = vadd.f32 %v2226_v11, %v2225_v52  ;;  %v4537_v23 = vpop.eup %2963  ;;  %2977 = vpow2.f32 %v1310_v8  ;;  %v2142_v3 = vadd.f32 %v4429_v43, %v4387_v42  ;;  %v5492_v9 = vld [vmem:[#allocation13_spill] sm:$0xff] }
 0x14a   : > { %v1349_v6 = vadd.f32 %v4532_v15, %v4507_v26  ;;  %v1367_v35 = vmul.f32 %v4404_v2, %v5489_v21  ;;  %v4545_v53 = vpop.eup %2965  ;;  %v1156_v49 = vmul.f32 %v3782_v1, %v5491_v29  ;;  %2979 = vpow2.f32 %v1304_v60 }
 0x14b   : > { %5488 = vst [vmem:[#allocation35_spill] sm:$0xff] %v4535_v5  ;;  %5490 = vst [vmem:[#allocation41_spill] sm:$0xff] %v4545_v53  ;;  %v1312_v58 = vmul.f32 1.442695, %v1282_v54  ;;  %v2080_v52 = vsub.f32 %v4427_v18, %v4454_v7  ;;  %v4551_v8 = vpop.eup %2967  ;;  %2981 = vpow2.f32 %v1308_v33  ;;  %v2107_v59 = vmul.f32 1.442695, %v2079_v55  ;;  %v1946_v5 = vpop.permute.xlu1 %1945 }
 0x14c   : > { %2143 = vadd.xlane.f32.xlu0 %v2142_v3  ;;  %1350 = vadd.xlane.f32.xlu1 %v1349_v6  ;;  %v1366_v11 = vmul.f32 %v4383_v22, %v5492_v9  ;;  %2983 = vpow2.f32 %v2103_v62  ;;  %v1314_v25 = vmul.f32 1.442695, %v1283_v19  ;;  %v2148_v60 = vadd.f32 %v4545_v53, %v4537_v23  ;;  %v5493_v54 = vld [vmem:[#allocation34_spill] sm:$0xff] }
 0x14d   : > { %2985 = vpow2.f32 %v2105_v14  ;;  %v2166_v7 = vmul.f32 %v4429_v43, %v3849_v45  ;;  %v4561_v33 = vmul.f32 %v5492_v9, %v5493_v54  ;;  %v4564_v55 = vmul.f32 %v5489_v21, %v1156_v49  ;;  %v5496_v19 = vld [vmem:[#allocation50_spill] sm:$0xff] }
 0x14e   : > { %v1383_v2 = vadd.f32 %v1367_v35, %v1366_v11  ;;  %2987 = vpow2.f32 %v1312_v58  ;;  %v2109_v3 = vmul.f32 1.442695, %v2080_v52  ;;  %v4566_v6 = vpop.eup %2969  ;;  %v2081_v62 = vsub.f32 %v4468_v48, %v4497_v24  ;;  %v5497_v35 = vld [vmem:[#allocation54_spill] sm:$0xff] }
 0x14f   : > { %5494 = vst [vmem:[#allocation37_spill] sm:$0xff] %v4561_v33  ;;  %5495 = vst [vmem:[#allocation14_spill] sm:$0xff] %v4564_v55  ;;  %2989 = vpow2.f32 %v2107_v59  ;;  %v1963_v14 = vmul.f32 %v4402_v51, %v3763_v16  ;;  %v2165_v45 = vmul.f32 %v4387_v42, %v3821_v46  ;;  %v1414_v21 = vmul.f32 %v4561_v33, %v5496_v19  ;;  %v1956_v58 = vpop.permute.xlu1 %1955  ;;  %v5498_v52 = vld [vmem:[#allocation18_spill] sm:$0xff] }
 0x150   : > { %1384 = vadd.xlane.f32.xlu0 %v1383_v2  ;;  %2149 = vadd.xlane.f32.xlu1 %v2148_v60  ;;  %v1415_v29 = vmul.f32 %v4564_v55, %v5497_v35  ;;  %2991 = vpow2.f32 %v1314_v25  ;;  %v1964_v24 = vmul.f32 %v4402_v51, %v3782_v1  ;;  %v1352_v2 = vadd.f32 %v4566_v6, %v4551_v8 }
 0x151   : > { %v4578_v49 = vpop.eup %2971  ;;  %v2182_v48 = vadd.f32 %v2166_v7, %v2165_v45  ;;  %v1369_v46 = vmul.f32 %v4447_v38, %v5498_v52  ;;  %2993 = vpow2.f32 %v2109_v3  ;;  %v1967_v59 = vmul.f32 %v4470_v39, %v3763_v16  ;;  %v5499_v7 = vld [vmem:[#allocation17_spill] sm:$0xff] }
 0x152   : > { %v1968_v25 = vmul.f32 %v4470_v39, %v3782_v1  ;;  %v1969_v9 = vmul.f32 %v4522_v17, %v3763_v16  ;;  %v2111_v11 = vmul.f32 1.442695, %v2081_v62  ;;  %v1979_v51 = vmul.f32 %v3743_v10, %v1963_v14 }
 0x153   : > { %v1970_v60 = vmul.f32 %v4522_v17, %v3782_v1  ;;  %v1368_v54 = vmul.f32 %v4436_v30, %v5499_v7  ;;  %v1971_v45 = vmul.f32 %v1946_v5, %v3763_v16  ;;  %v1972_v39 = vmul.f32 %v1946_v5, %v3782_v1  ;;  %v5501_v30 = vld [vmem:[#allocation39_spill] sm:$0xff] }
 0x154   : > { %2183 = vadd.xlane.f32.xlu0 %v2182_v48  ;;  %1353 = vadd.xlane.f32.xlu1 %v1352_v2  ;;  %v4597_v3 = vpop.eup %2973  ;;  %v1975_v19 = vmul.f32 %v1956_v58, %v3763_v16  ;;  %v1976_v62 = vmul.f32 %v1956_v58, %v3782_v1  ;;  %v1980_v10 = vmul.f32 %v5476_v44, %v1964_v24  ;;  %v5500_v48 = vld [vmem:[#allocation40_spill] sm:$0xff]  ;;  %v5502_v58 = vld [vmem:[#allocation62_spill] sm:$0xff]  ;;  %2995 = vpow2.f32 %v2111_v11 }
 0x155   : > { %v4603_v35 = vpop.eup %2975  ;;  %v1386_v17 = vadd.f32 %v1369_v46, %v1368_v54  ;;  %v2151_v14 = vadd.f32 %v4597_v3, %v4578_v49  ;;  %v2168_v2 = vmul.f32 %v4489_v4, %v5500_v48  ;;  %v2082_v5 = vsub.f32 %v4505_v0, %v4518_v37  ;;  %v5503_v44 = vld [vmem:[#allocation64_spill] sm:$0xff] }
 0x156   : > { %v4610_v38 = vpop.eup %2977  ;;  %v1983_v16 = vmul.f32 %v5501_v30, %v1967_v59  ;;  %v1984_v1 = vmul.f32 %v5500_v48, %v1968_v25  ;;  %v1985_v43 = vmul.f32 %v5502_v58, %v1969_v9  ;;  %v1986_v24 = vmul.f32 %v5503_v44, %v1970_v60  ;;  %v5504_v54 = vld [vmem:[#allocation20_spill] sm:$0xff] }
 0x157   : > { %v4617_v42 = vpop.eup %2979  ;;  %v2167_v46 = vmul.f32 %v4456_v27, %v5501_v30  ;;  %v1371_v4 = vmul.f32 %v4507_v26, %v5504_v54  ;;  %v4627_v37 = vmul.f32 %v4158_v34, %v1971_v45  ;;  %v4630_v59 = vmul.f32 %v4246_v20, %v1972_v39 }
 0x158   : > { %1387 = vadd.xlane.f32.xlu0 %v1386_v17  ;;  %2152 = vadd.xlane.f32.xlu1 %v2151_v14  ;;  %v4624_v0 = vpop.eup %2981  ;;  %v1991_v25 = vmul.f32 %v4392_v28, %v1975_v19  ;;  %v1992_v9 = vmul.f32 %v4441_v56, %v1976_v62  ;;  %v1355_v17 = vadd.f32 %v4617_v42, %v4603_v35  ;;  %v5505_v14 = vld [vmem:[#allocation19_spill] sm:$0xff]  ;;  %v5506_v62 = vld [vmem:[#allocation44_spill] sm:$0xff]  ;;  %v2113_v13 = vmul.f32 1.442695, %v2082_v5 }
 0x159   : > { %v4634_v11 = vpop.eup %2983  ;;  %v2185_v60 = vadd.f32 %v2168_v2, %v2167_v46  ;;  %v1370_v26 = vmul.f32 %v4532_v15, %v5505_v14  ;;  %v1358_v45 = vadd.f32 %v4624_v0, %v4610_v38  ;;  %v2170_v39 = vmul.f32 %v4545_v53, %v5503_v44 }
 0x15a   : > { %v4642_v27 = vpop.eup %2985  ;;  %v4646_v19 = vadd.f32 %v1415_v29, %v1414_v21  ;;  %v2211_v22 = vmul.f32 %v1979_v51, %v5506_v62  ;;  %v2212_v2 = vmul.f32 %v1980_v10, %v5507_v61  ;;  %v4652_v63 = vadd.f32 %v1984_v1, %v1983_v16  ;;  %v5510_v61 = vld [vmem:[#allocation63_spill] sm:$0xff] }
 0x15b   : > { %v4650_v46 = vpop.eup %2987  ;;  %v1389_v15 = vadd.f32 %v1371_v4, %v1370_v26  ;;  %v4654_v32 = vadd.f32 %v1980_v10, %v1979_v51  ;;  %v4660_v21 = vadd.f32 %v1986_v24, %v1985_v43  ;;  %v4664_v29 = vadd.f32 %v4481_v50, %v4462_v12  ;;  %v5512_v26 = vld [vmem:[#allocation69_spill] sm:$0xff]  ;;  %v5514_v10 = vld [vmem:[#allocation58_spill] sm:$0xff] }
 0x15c   : > { %2186 = vadd.xlane.f32.xlu0 %v2185_v60  ;;  %1356 = vadd.xlane.f32.xlu1 %v1355_v17  ;;  %v4656_v55 = vpop.eup %2989  ;;  %v4658_v33 = vadd.f32 %v2212_v2, %v2211_v22  ;;  %v2217_v62 = vmul.f32 %v1985_v43, %v5510_v61  ;;  %v5511_v60 = vld [vmem:[#allocation66_spill] sm:$0xff]  ;;  %v5513_v17 = vld [vmem:[#allocation73_spill] sm:$0xff]  ;;  %v2215_v53 = vmul.f32 %v1983_v16, %v5514_v10  ;;  %2997 = vpow2.f32 %v2113_v13  ;;  %v5519_v10 = vld [vmem:[#allocation23_spill] sm:$0xff] }
 0x15d   : > { %5508 = vst [vmem:[#allocation15_spill] sm:$0xff] %v4660_v21  ;;  %5509 = vst [vmem:[#allocation13_spill] sm:$0xff] %v4664_v29  ;;  %v4667_v5 = vpop.eup %2991  ;;  %v2218_v4 = vmul.f32 %v1986_v24, %v5511_v60  ;;  %v4672_v51 = vadd.f32 %v5513_v17, %v5512_v26  ;;  %v5515_v22 = vld [vmem:[#allocation61_spill] sm:$0xff]  ;;  %v2169_v21 = vmul.f32 %v4537_v23, %v5502_v58  ;;  %v5516_v17 = vld [vmem:[#allocation24_spill] sm:$0xff]  ;;  %vm2539_vm11 = vcmask 7168  }
 0x15e   : > { %v2216_v2 = vmul.f32 %v1984_v1, %v5515_v22  ;;  %v4680_v29 = vadd.f32 %v4512_v41, %v4487_v36  ;;  %v2219_v43 = vmul.f32 %v4627_v37, %v4230_v31  ;;  %v2220_v24 = vmul.f32 %v4630_v59, %v4262_v57  ;;  %v4686_v61 = vpop.eup %2993 }
 0x15f   : > { %v4688_v16 = vadd.f32 %v2218_v4, %v2217_v62  ;;  %v4692_v60 = vadd.f32 %v1992_v9, %v1991_v25  ;;  %v1361_v36 = vadd.f32 %v4667_v5, %v4650_v46  ;;  %v2223_v31 = vmul.f32 %v1991_v25, %v4381_v47 }
 0x160   : > { %1390 = vadd.xlane.f32.xlu0 %v1389_v15  ;;  %1359 = vadd.xlane.f32.xlu1 %v1358_v45  ;;  %v4690_v1 = vadd.f32 %v2216_v2, %v2215_v53  ;;  %v4696_v41 = vadd.f32 %v2220_v24, %v2219_v43  ;;  %v2224_v57 = vmul.f32 %v1992_v9, %v4427_v18  ;;  %v5517_v15 = vld [vmem:[#allocation67_spill] sm:$0xff]  ;;  %v5520_v43 = vld [vmem:[#allocation22_spill] sm:$0xff] }
 0x161   : > { %v2188_v26 = vadd.f32 %v2170_v39, %v2169_v21  ;;  %v1373_v13 = vmul.f32 %v4551_v8, %v5516_v17  ;;  %v2173_v45 = vmul.f32 %v4634_v11, %v5517_v15  ;;  %v5518_v53 = vld [vmem:[#allocation71_spill] sm:$0xff]  ;;  %v1372_v22 = vmul.f32 %v4566_v6, %v5519_v10  ;;  %v4710_v47 = vpop.eup %2995 }
 0x162   : > { %v2174_v62 = vmul.f32 %v4642_v27, %v5518_v53  ;;  %v4706_v4 = vadd.f32 %v2224_v57, %v2223_v31  ;;  %v2172_v9 = vmul.f32 %v4578_v49, %v4246_v20  ;;  %v2171_v39 = vmul.f32 %v4597_v3, %v4158_v34  ;;  %v5521_v57 = vld [vmem:[#allocation21_spill] sm:$0xff] }
 0x163   : > { %v1392_v18 = vadd.f32 %v1373_v13, %v1372_v22  ;;  %v2121_v21 = vadd.f32 %v5500_v48, %v5501_v30  ;;  %v1375_v24 = vmul.f32 %v4603_v35, %v5520_v43  ;;  %v2176_v31 = vmul.f32 %v4686_v61, %v4441_v56  ;;  %v5522_v30 = vld [vmem:[#allocation28_spill] sm:$0xff]  ;;  %v5523_v22 = vld [vmem:[#allocation27_spill] sm:$0xff] }
 0x164   : > { %2189 = vadd.xlane.f32.xlu0 %v2188_v26  ;;  %1362 = vadd.xlane.f32.xlu1 %v1361_v36  ;;  %v2194_v25 = vadd.f32 %v2174_v62, %v2173_v45  ;;  %v2191_v2 = vadd.f32 %v2172_v9, %v2171_v39  ;;  %v2175_v36 = vmul.f32 %v4656_v55, %v4392_v28 }
 0x165   : > { %v1374_v26 = vmul.f32 %v4617_v42, %v5521_v57  ;;  %v1377_v48 = vmul.f32 %v4610_v38, %v5522_v30  ;;  %v1379_v39 = vmul.f32 %v4667_v5, %v5430_v40 }
 0x166   : > { %v2197_v62 = vadd.f32 %v2176_v31, %v2175_v36 }
 0x167   : > { %v1395_v45 = vadd.f32 %v1375_v24, %v1374_v26  ;;  %v5524_v24 = vld [vmem:[#allocation25_spill] sm:$0xff] }
 0x168   : > { %1393 = vadd.xlane.f32.xlu0 %v1392_v18  ;;  %2195 = vadd.xlane.f32.xlu1 %v2194_v25  ;;  %v1376_v18 = vmul.f32 %v4624_v0, %v5523_v22  ;;  %v2124_v25 = vadd.f32 %v5503_v44, %v5502_v58  ;;  %v1378_v36 = vmul.f32 %v4650_v46, %v5524_v24  ;;  %v5525_v44 = vld [vmem:[#allocation29_spill] sm:$0xff] }
 0x169   : > { %v4726_v13 = vpop.eup %2997  ;;  %v2154_v58 = vadd.f32 %v4642_v27, %v4634_v11 }
 0x16a   : > { %v1398_v9 = vadd.f32 %v1377_v48, %v1376_v18  ;;  %v1401_v31 = vadd.f32 %v1379_v39, %v1378_v36  ;;  %v2127_v48 = vadd.f32 %v4246_v20, %v4158_v34  ;;  %v1325_v18 = vadd.f32 %v5504_v54, %v5505_v14  ;;  %v5529_v20 = vld [vmem:[#allocation52_spill] sm:$0xff]  ;;  %v5530_v54 = vld [vmem:[#allocation37_spill] sm:$0xff]  ;;  %v5531_v14 = vld [vmem:[#allocation14_spill] sm:$0xff] }
 0x16b   : > { %v1328_v34 = vadd.f32 %v5516_v17, %v5519_v10  ;;  %v5533_v36 = vld [vmem:[#allocation46_spill] sm:$0xff]  ;;  %v1331_v17 = vadd.f32 %v5520_v43, %v5521_v57  ;;  %v5539_v43 = vld [vmem:[#allocation51_spill] sm:$0xff] }
 0x16c   : > { %2192 = vadd.xlane.f32.xlu0 %v2191_v2  ;;  %2122 = vadd.xlane.f32.xlu1 %v2121_v21  ;;  %v2177_v21 = vmul.f32 %v4710_v47, %v4462_v12  ;;  %v2178_v2 = vmul.f32 %v4726_v13, %v4481_v50  ;;  %v1322_v12 = vadd.f32 %v5498_v52, %v5499_v7 }
 0x16d   : > { %v2157_v50 = vadd.f32 %v4686_v61, %v4656_v55  ;;  %v2160_v52 = vadd.f32 %v4726_v13, %v4710_v47  ;;  %v2130_v7 = vadd.f32 %v5518_v53, %v5517_v15  ;;  %v5534_v15 = vld [vmem:[#allocation53_spill] sm:$0xff] }
 0x16e   : > { %v2200_v26 = vadd.f32 %v2178_v2, %v2177_v21  ;;  %v1455_v21 = vadd.f32 %v5531_v14, %v5530_v54  ;;  %v5532_v2 = vld [vmem:[#allocation38_spill] sm:$0xff]  ;;  %v5535_v53 = vld [vmem:[#allocation57_spill] sm:$0xff] }
 0x16f   : > { %v2254_v10 = vadd.f32 %v5535_v53, %v5534_v15  ;;  %v5549_v14 = vld [vmem:[#allocation78_spill] sm:$0xff] }
 0x170   : > { %1396 = vadd.xlane.f32.xlu0 %v1395_v45  ;;  %2198 = vadd.xlane.f32.xlu1 %v2197_v62  ;;  %v5526_v45 = vld [vmem:[#allocation30_spill] sm:$0xff] }
 0x171   : > { %v1452_v62 = vadd.f32 %v5526_v45, %v5525_v44  ;;  %v1334_v45 = vadd.f32 %v5522_v30, %v5523_v22  ;;  %v1337_v30 = vadd.f32 %v5430_v40, %v5524_v24  ;;  %v5540_v22 = vld [vmem:[#allocation15_spill] sm:$0xff]  ;;  %v5545_v40 = vld [vmem:[#allocation60_spill] sm:$0xff] }
 0x172   : > { %v5546_v24 = vld [vmem:[#allocation55_spill] sm:$0xff] }
 0x174   : > { %1399 = vadd.xlane.f32.xlu0 %v1398_v9  ;;  %2125 = vadd.xlane.f32.xlu1 %v2124_v25  ;;  %v5527_v25 = vld [vmem:[#allocation42_spill] sm:$0xff]  ;;  %v5528_v9 = vld [vmem:[#allocation45_spill] sm:$0xff] }
 0x175   : > { %v1458_v39 = vadd.f32 %v5528_v9, %v5527_v25 }
 0x178   : > { %1402 = vadd.xlane.f32.xlu0 %v1401_v31  ;;  %2201 = vadd.xlane.f32.xlu1 %v2200_v26  ;;  %v1461_v31 = vadd.f32 %v5533_v36, %v5532_v2  ;;  %v2133_v26 = vadd.f32 %v4441_v56, %v4392_v28  ;;  %v5537_v28 = vld [vmem:[#allocation47_spill] sm:$0xff] }
 0x179   : > { %v5538_v56 = vld [vmem:[#allocation43_spill] sm:$0xff] }
 0x17a   : > { %v1467_v57 = vadd.f32 %v5539_v43, %v5538_v56 }
 0x17c   : > { %2155 = vadd.xlane.f32.xlu0 %v2154_v58  ;;  %1453 = vadd.xlane.f32.xlu1 %v1452_v62  ;;  %v5536_v58 = vld [vmem:[#allocation65_spill] sm:$0xff] }
 0x180   : > { %1323 = vadd.xlane.f32.xlu0 %v1322_v12  ;;  %1564 = vadd.xlane.f32.xlu1 %v5525_v44  ;;  %v5542_v12 = vld [vmem:[#allocation68_spill] sm:$0xff] }
 0x184   : > { %2158 = vadd.xlane.f32.xlu0 %v2157_v50  ;;  %2128 = vadd.xlane.f32.xlu1 %v2127_v48  ;;  %v5544_v50 = vld [vmem:[#allocation56_spill] sm:$0xff] }
 0x188   : > { %1326 = vadd.xlane.f32.xlu0 %v1325_v18  ;;  %1459 = vadd.xlane.f32.xlu1 %v1458_v39  ;;  %v5547_v18 = vld [vmem:[#allocation26_spill] sm:$0xff] }
 0x189   : > { %v1473_v9 = vadd.f32 %v5547_v18, %v5546_v24 }
 0x18c   : > { %2161 = vadd.xlane.f32.xlu0 %v2160_v52  ;;  %2131 = vadd.xlane.f32.xlu1 %v2130_v7  ;;  %v5548_v7 = vld [vmem:[#allocation9_spill] sm:$0xff] }
 0x190   : > { %1329 = vadd.xlane.f32.xlu0 %v1328_v34  ;;  %1429 = vadd.xlane.f32.xlu1 %v5529_v20 }
 0x194   : > { %1456 = vadd.xlane.f32.xlu0 %v1455_v21  ;;  %1462 = vadd.xlane.f32.xlu1 %v1461_v31  ;;  %v5550_v31 = vld [vmem:[#allocation59_spill] sm:$0xff] }
 0x198   : > { %1566 = vadd.xlane.f32.xlu0 %v5530_v54  ;;  %2134 = vadd.xlane.f32.xlu1 %v2133_v26  ;;  %v1470_v26 = vadd.f32 %v5550_v31, %v5544_v50 }
 0x19c   : > { %1332 = vadd.xlane.f32.xlu0 %v1331_v17  ;;  %2255 = vadd.xlane.f32.xlu1 %v2254_v10  ;;  %v5551_v17 = vld [vmem:[#allocation77_spill] sm:$0xff] }
 0x1a0   : > { %1568 = vadd.xlane.f32.xlu0 %v5527_v25  ;;  %1435 = vadd.xlane.f32.xlu1 %v5536_v58 }
 0x1a4   : > { %1335 = vadd.xlane.f32.xlu0 %v1334_v45  ;;  %1572 = vadd.xlane.f32.xlu1 %v5537_v28  ;;  %v2263_v45 = vadd.f32 %v4630_v59, %v4627_v37 }
 0x1a8   : > { %1432 = vadd.xlane.f32.xlu0 %v4646_v19  ;;  %2228 = vadd.xlane.f32.xlu1 %v4658_v33  ;;  %v5541_v19 = vld [vmem:[#allocation48_spill] sm:$0xff]  ;;  %v4792_v33 = vpop.xlane.xlu1 %1320 }
 0x1a9   : > { %v1464_v62 = vadd.f32 %v5541_v19, %v5537_v28  ;;  %vm2476_vm4 = vcmp.gt.f32.partialorder %v4792_v33, 0.0 }
 0x1ac   : > { %1570 = vadd.xlane.f32.xlu0 %v5532_v2  ;;  %2258 = vadd.xlane.f32.xlu1 %v4652_v63  ;;  %v5543_v63 = vld [vmem:[#allocation13_spill] sm:$0xff]  ;;  %v4799_v48 = vpop.xlane.xlu1 %2119 }
 0x1ad   : > { %vm2492_vm14 = vcmp.gt.f32.partialorder %v4799_v48, 0.0 }
 0x1b0   : > { %2252 = vadd.xlane.f32.xlu0 %v4654_v32  ;;  %1468 = vadd.xlane.f32.xlu1 %v1467_v57  ;;  %v4797_v32 = vpop.xlane.xlu0 %1317 }
 0x1b1   : > { %vm2475_vm3 = vcmp.gt.f32.partialorder %v4797_v32, 0.0 }
 0x1b4   : > { %1338 = vadd.xlane.f32.xlu0 %v1337_v30  ;;  %2261 = vadd.xlane.f32.xlu1 %v5540_v22  ;;  %v4805_v52 = vpop.xlane.xlu0 %2116  ;;  %v5554_v22 = vld [vmem:[#allocation10_spill] sm:$0xff] }
 0x1b5   : > { %vm2491_vm9 = vcmp.gt.f32.partialorder %v4805_v52, 0.0 }
 0x1b8   : > { %1465 = vadd.xlane.f32.xlu0 %v1464_v62  ;;  %1441 = vadd.xlane.f32.xlu1 %v5542_v12  ;;  %v5555_v62 = vld [vmem:[#allocation74_spill] sm:$0xff] }
 0x1bc   : > { %2137 = vadd.xlane.f32.xlu0 %v5543_v63  ;;  %1576 = vadd.xlane.f32.xlu1 %v5544_v50  ;;  %v5556_v63 = vld [vmem:[#allocation31_spill] sm:$0xff] }
 0x1c0   : > { %2231 = vadd.xlane.f32.xlu0 %v5545_v40  ;;  %2237 = vadd.xlane.f32.xlu1 %v4688_v16 }
 0x1c2   : > { %v1342_v39 = vpop.xlane.xlu1 %1341 }
 0x1c4   : > { %1438 = vadd.xlane.f32.xlu0 %v5548_v7  ;;  %1474 = vadd.xlane.f32.xlu1 %v1473_v9 }
 0x1c7   : > { %v1382_v34 = vpop.xlane.xlu0 %1381  ;;  %v4808_v20 = vpop.xlane.xlu1 %2140 }
 0x1c8   : > { %1574 = vadd.xlane.f32.xlu0 %v5538_v56  ;;  %2267 = vadd.xlane.f32.xlu1 %v4672_v51  ;;  %v4814_v16 = vsub.f32 %v1342_v39, %v1382_v34  ;;  %v5552_v51 = vld [vmem:[#allocation70_spill] sm:$0xff]  ;;  %v5558_v39 = vld [vmem:[#allocation11_spill] sm:$0xff]  ;;  %v5559_v34 = vld [vmem:[#allocation76_spill] sm:$0xff] }
 0x1ca   : > { %v1524_v10 = vadd.f32 %v5552_v51, %v4814_v16  ;;  %v2323_v19 = vadd.f32 %v5554_v22, %v4814_v16  ;;  %v2331_v12 = vadd.f32 %v5555_v62, %v4814_v16 }
 0x1cc   : > { %2234 = vadd.xlane.f32.xlu0 %v4690_v1  ;;  %1447 = vadd.xlane.f32.xlu1 %v5549_v14  ;;  %v1348_v36 = vpop.xlane.xlu1 %1347  ;;  %v5553_v1 = vld [vmem:[#allocation72_spill] sm:$0xff]  ;;  %v2339_v37 = vmul.f32 %v2331_v12, %v2323_v19  ;;  %v5563_v12 = vld [vmem:[#allocation79_spill] sm:$0xff] }
 0x1cd   : > { %v4816_v21 = vpop.xlane.xlu0 %2180  ;;  %v1532_v58 = vadd.f32 %v5553_v1, %v4814_v16  ;;  %v5562_v19 = vld [vmem:[#allocation16_spill] sm:$0xff] }
 0x1cf   : > { %v1540_v30 = vmul.f32 %v1532_v58, %v1524_v10 }
 0x1d0   : > { %1471 = vadd.xlane.f32.xlu0 %v1470_v26  ;;  %2243 = vadd.xlane.f32.xlu1 %v5551_v17  ;;  %v5560_v17 = vld [vmem:[#allocation12_spill] sm:$0xff] }
 0x1d1   : > { %v1345_v15 = vpop.xlane.xlu0 %1344  ;;  %v4821_v53 = vpop.xlane.xlu1 %2146  ;;  %2999 = vlog2.f32 %v1540_v30  ;;  %v5561_v30 = vld [vmem:[#allocation81_spill] sm:$0xff] }
 0x1d2   : > { %3001 = vlog2.f32 %v2339_v37 }
 0x1d4   : > { %2264 = vadd.xlane.f32.xlu0 %v2263_v45  ;;  %2273 = vadd.xlane.f32.xlu1 %v4680_v29  ;;  %v5557_v29 = vld [vmem:[#allocation75_spill] sm:$0xff] }
 0x1d5   : > { %v4830_v43 = vpop.xlane.xlu0 %2143  ;;  %v1351_v57 = vpop.xlane.xlu1 %1350 }
 0x1d8   : > { %1444 = vadd.xlane.f32.xlu0 %v5556_v63 }
 0x1d9   : > { %v1385_v40 = vpop.xlane.xlu0 %1384  ;;  %v4837_v18 = vpop.xlane.xlu1 %2149 }
 0x1da   : > { %v4839_v59 = vsub.f32 %v1345_v15, %v1385_v40 }
 0x1dc   : > { %1578 = vadd.xlane.f32.xlu0 %v5546_v24  ;;  %v1525_v9 = vadd.f32 %v5557_v29, %v4839_v59  ;;  %v1533_v7 = vadd.f32 %v5558_v39, %v4839_v59  ;;  %v2324_v14 = vadd.f32 %v5559_v34, %v4839_v59  ;;  %v2332_v51 = vadd.f32 %v5560_v17, %v4839_v59 }
 0x1dd   : > { %v4848_v31 = vpop.xlane.xlu0 %2183  ;;  %v1354_v26 = vpop.xlane.xlu1 %1353 }
 0x1de   : > { %v1541_v15 = vmul.f32 %v1533_v7, %v1525_v9  ;;  %v2340_v10 = vmul.f32 %v2332_v51, %v2324_v14  ;;  %v3000_v9 = vpop.eup %2999  ;;  %v5565_v7 = vld [vmem:[#allocation33_spill] sm:$0xff] }
 0x1df   : > { %v1549_v17 = vmul.f32 0.6931472, %v3000_v9  ;;  %v3002_v51 = vpop.eup %3001 }
 0x1e0   : > { %2240 = vadd.xlane.f32.xlu0 %v4696_v41  ;;  %3003 = vlog2.f32 %v1541_v15  ;;  %v5564_v41 = vld [vmem:[#allocation80_spill] sm:$0xff] }
 0x1e1   : > { %v1388_v1 = vpop.xlane.xlu0 %1387  ;;  %v4853_v58 = vpop.xlane.xlu1 %2152  ;;  %3005 = vlog2.f32 %v2340_v10  ;;  %v5566_v10 = vld [vmem:[#allocation32_spill] sm:$0xff] }
 0x1e2   : > { %v4855_v45 = vsub.f32 %v1348_v36, %v1388_v1 }
 0x1e4   : > { %2270 = vadd.xlane.f32.xlu0 %v4692_v60  ;;  %v2325_v22 = vadd.f32 %v5561_v30, %v4855_v45  ;;  %v2333_v62 = vadd.f32 %v5562_v19, %v4855_v45  ;;  %v1526_v63 = vadd.f32 %v5563_v12, %v4855_v45  ;;  %v1534_v40 = vadd.f32 %v5564_v41, %v4855_v45  ;;  %v5567_v30 = vld [vmem:[#allocation36_spill] sm:$0xff] }
 0x1e5   : > { %v4866_v37 = vpop.xlane.xlu0 %2186  ;;  %v1357_v29 = vpop.xlane.xlu1 %1356 }
 0x1e6   : > { %v2341_v60 = vmul.f32 %v2333_v62, %v2325_v22  ;;  %v1542_v39 = vmul.f32 %v1534_v40, %v1526_v63  ;;  %v5568_v62 = vld [vmem:[#allocation41_spill] sm:$0xff] }
 0x1e8   : > { %1450 = vadd.xlane.f32.xlu0 %v5565_v7  ;;  %3007 = vlog2.f32 %v2341_v60 }
 0x1e9   : > { %v1391_v34 = vpop.xlane.xlu0 %1390  ;;  %v4871_v14 = vpop.xlane.xlu1 %1359  ;;  %3009 = vlog2.f32 %v1542_v39 }
 0x1ea   : > { %v4873_v15 = vsub.f32 %v1351_v57, %v1391_v34  ;;  %v1580_v57 = vmul.f32 %v1549_v17, %v5525_v44 }
 0x1ec   : > { %2246 = vadd.xlane.f32.xlu0 %v4706_v4  ;;  %v1527_v1 = vadd.f32 %v5566_v10, %v4873_v15  ;;  %v1535_v22 = vadd.f32 %v5567_v30, %v4873_v15  ;;  %v2326_v19 = vadd.f32 %v4537_v23, %v4873_v15  ;;  %v2334_v12 = vadd.f32 %v5568_v62, %v4873_v15 }
 0x1ed   : > { %v3004_v63 = vpop.eup %3003  ;;  %v4884_v41 = vpop.xlane.xlu0 %2189  ;;  %v2348_v4 = vmul.f32 0.6931472, %v3002_v51 }
 0x1ee   : > { %v4886_v40 = vpop.xlane.xlu1 %1362  ;;  %v3006_v9 = vpop.eup %3005  ;;  %v2206_v60 = vsub.f32 %v4837_v18, %v4884_v41  ;;  %v1551_v39 = vmul.f32 0.6931472, %v3004_v63  ;;  %v1543_v7 = vmul.f32 %v1535_v22, %v1527_v1  ;;  %v2342_v34 = vmul.f32 %v2334_v12, %v2326_v19 }
 0x1ef   : > { %v2350_v10 = vmul.f32 0.6931472, %v3006_v9  ;;  %v2363_v17 = vmul.f32 %v2348_v4, %v5525_v44 }
 0x1f0   : > { %1588 = vadd.xlane.f32.xlu0 %v1580_v57  ;;  %v1581_v23 = vmul.f32 %v1551_v39, %v5530_v54  ;;  %3011 = vlog2.f32 %v1543_v7 }
 0x1f1   : > { %v1394_v30 = vpop.xlane.xlu0 %1393  ;;  %3013 = vlog2.f32 %v2342_v34  ;;  %v2364_v51 = vmul.f32 %v2350_v10, %v5530_v54 }
 0x1f2   : > { %v4892_v62 = vpop.xlane.xlu1 %2195  ;;  %v4894_v36 = vsub.f32 %v1354_v26, %v1394_v30  ;;  %1590 = vadd.xlane.f32.xlu1 %v1581_v23 }
 0x1f4   : > { %2371 = vadd.xlane.f32.xlu0 %v2363_v17  ;;  %v2327_v1 = vadd.f32 %v4597_v3, %v4894_v36  ;;  %v2335_v22 = vadd.f32 %v4578_v49, %v4894_v36  ;;  %v1528_v19 = vadd.f32 %v4566_v6, %v4894_v36  ;;  %v1536_v12 = vadd.f32 %v4551_v8, %v4894_v36 }
 0x1f5   : > { %v3008_v26 = vpop.eup %3007  ;;  %v4906_v63 = vpop.xlane.xlu0 %2192  ;;  %v1476_v49 = vadd.f32 1.0, %v4814_v16 }
 0x1f6   : > { %v4908_v57 = vpop.xlane.xlu1 %2122  ;;  %v3010_v44 = vpop.eup %3009  ;;  %v2207_v54 = vsub.f32 %v4853_v58, %v4906_v63  ;;  %2373 = vadd.xlane.f32.xlu1 %v2364_v51  ;;  %v2352_v3 = vmul.f32 0.6931472, %v3008_v26  ;;  %v2343_v4 = vmul.f32 %v2335_v22, %v2327_v1  ;;  %v1544_v39 = vmul.f32 %v1536_v12, %v1528_v19 }
 0x1f7   : > { %v1553_v9 = vmul.f32 0.6931472, %v3010_v44  ;;  %vm2493_vm0 = vcmp.gt.f32.partialorder %v4908_v57, 0.0 }
 0x1f8   : > { %v2365_v6 = vmul.f32 %v2352_v3, %v5527_v25  ;;  %3015 = vlog2.f32 %v2343_v4 }
 0x1f9   : > { %v1397_v7 = vpop.xlane.xlu0 %1396  ;;  %v1582_v8 = vmul.f32 %v1553_v9, %v5527_v25  ;;  %3017 = vlog2.f32 %v1476_v49 }
 0x1fa   : > { %v4915_v34 = vpop.xlane.xlu1 %2198  ;;  %v4917_v10 = vsub.f32 %v1357_v29, %v1397_v7  ;;  %2375 = vadd.xlane.f32.xlu0 %v2365_v6  ;;  %3019 = vlog2.f32 %v1544_v39 }
 0x1fb   : > { %1592 = vadd.xlane.f32.xlu1 %v1582_v8 }
 0x1fc   : > { %v1529_v23 = vadd.f32 %v4617_v42, %v4917_v10  ;;  %v1537_v16 = vadd.f32 %v4603_v35, %v4917_v10  ;;  %v2328_v30 = vadd.f32 %v4634_v11, %v4917_v10  ;;  %v2336_v25 = vadd.f32 %v4642_v27, %v4917_v10 }
 0x1fd   : > { %v3012_v17 = vpop.eup %3011  ;;  %v1400_v51 = vpop.xlane.xlu0 %1399 }
 0x1fe   : > { %v4927_v29 = vpop.xlane.xlu1 %2125  ;;  %v3014_v1 = vpop.eup %3013  ;;  %v4930_v22 = vsub.f32 %v4871_v14, %v1400_v51  ;;  %v1555_v19 = vmul.f32 0.6931472, %v3012_v17  ;;  %v1545_v12 = vmul.f32 %v1537_v16, %v1529_v23  ;;  %v2344_v26 = vmul.f32 %v2336_v25, %v2328_v30 }
 0x1ff   : > { %v2354_v42 = vmul.f32 0.6931472, %v3014_v1  ;;  %vm2494_vm10 = vcmp.gt.f32.partialorder %v4927_v29, 0.0 }
 0x200   : > { %v1583_v35 = vmul.f32 %v1555_v19, %v5532_v2  ;;  %v2329_v11 = vadd.f32 %v4656_v55, %v4930_v22  ;;  %v2337_v27 = vadd.f32 %v4686_v61, %v4930_v22  ;;  %3021 = vlog2.f32 %v1545_v12 }
 0x201   : > { %v1403_v44 = vpop.xlane.xlu0 %1402  ;;  %v2366_v3 = vmul.f32 %v2354_v42, %v5532_v2  ;;  %v1530_v14 = vadd.f32 %v4624_v0, %v4930_v22  ;;  %v1538_v49 = vadd.f32 %v4610_v38, %v4930_v22  ;;  %3023 = vlog2.f32 %v2344_v26 }
 0x202   : > { %v4938_v4 = vpop.xlane.xlu1 %2201  ;;  %v4945_v9 = vsub.f32 %v4886_v40, %v1403_v44  ;;  %1594 = vadd.xlane.f32.xlu0 %v1583_v35  ;;  %v2345_v55 = vmul.f32 %v2337_v27, %v2329_v11  ;;  %v2204_v11 = vsub.f32 %v4830_v43, %v4848_v31 }
 0x203   : > { %2377 = vadd.xlane.f32.xlu1 %v2366_v3  ;;  %v1546_v61 = vmul.f32 %v1538_v49, %v1530_v14 }
 0x204   : > { %3025 = vlog2.f32 %v2345_v55  ;;  %v1531_v2 = vadd.f32 %v4650_v46, %v4945_v9  ;;  %v1539_v39 = vadd.f32 %v4667_v5, %v4945_v9  ;;  %v2330_v0 = vadd.f32 %v4710_v47, %v4945_v9 }
 0x205   : > { %v4953_v6 = vpop.xlane.xlu0 %2155  ;;  %3027 = vlog2.f32 %v1546_v61  ;;  %v2338_v40 = vadd.f32 %v4726_v13, %v4945_v9  ;;  %v3016_v7 = vpop.eup %3015 }
 0x206   : > { %v1454_v38 = vpop.xlane.xlu1 %1453  ;;  %v2208_v8 = vsub.f32 %v4953_v6, %v4892_v62  ;;  %v1547_v23 = vmul.f32 %v1539_v39, %v1531_v2  ;;  %v3018_v16 = vpop.eup %3017  ;;  %v2356_v46 = vmul.f32 0.6931472, %v3016_v7  ;;  %v2501_v62 = vsel %vm2493_vm0, %v4908_v57, 1.0 }
 0x207   : > { %v2346_v30 = vmul.f32 %v2338_v40, %v2330_v0  ;;  %v3020_v25 = vpop.eup %3019  ;;  %v1485_v19 = vmul.f32 0.6931472, %v3018_v16 }
 0x208   : > { %3029 = vlog2.f32 %v1547_v23  ;;  %v2367_v47 = vmul.f32 %v2356_v46, %v5537_v28  ;;  %v1557_v17 = vmul.f32 0.6931472, %v3020_v25 }
 0x209   : > { %v4959_v5 = vpop.xlane.xlu0 %1323  ;;  %3031 = vlog2.f32 %v2346_v30 }
 0x20a   : > { %v1565_v51 = vpop.xlane.xlu1 %1564  ;;  %2379 = vadd.xlane.f32.xlu0 %v2367_v47  ;;  %v1584_v13 = vmul.f32 %v1557_v17, %v5537_v28  ;;  %v1477_v28 = vadd.f32 1.0, %v4839_v59  ;;  %v1478_v17 = vadd.f32 1.0, %v4855_v45 }
 0x20b   : > { %v2395_v1 = vsub.f32 %v1454_v38, %v1565_v51  ;;  %v2276_v38 = vadd.f32 1.0, %v2204_v11 }
 0x20c   : > { %1596 = vadd.xlane.f32.xlu1 %v1584_v13  ;;  %3033 = vlog2.f32 %v1477_v28  ;;  %v2203_v28 = vsub.f32 %v4808_v20, %v4816_v21 }
 0x20d   : > { %v2403_v12 = vmul.f32 4.0, %v2395_v1  ;;  %v4963_v42 = vpop.xlane.xlu0 %2158  ;;  %v3022_v35 = vpop.eup %3021  ;;  %3035 = vlog2.f32 %v2276_v38 }
 0x20e   : > { %v4965_v26 = vpop.xlane.xlu1 %2128  ;;  %v2209_v44 = vsub.f32 %v4963_v42, %v4915_v34  ;;  %v3024_v3 = vpop.eup %3023  ;;  %v1559_v14 = vmul.f32 0.6931472, %v3022_v35  ;;  %3037 = vlog2.f32 %v1478_v17 }
 0x20f   : > { %v4969_v27 = vmul.f32 %v2403_v12, %v1485_v19  ;;  %v2358_v49 = vmul.f32 0.6931472, %v3024_v3  ;;  %v5569_v19 = vld [vmem:[#allocation35_spill] sm:$0xff]  ;;  %vm2495_vm13 = vcmp.gt.f32.partialorder %v4965_v26, 0.0 }
 0x210   : > { %v1585_v2 = vmul.f32 %v1559_v14, %v5538_v56 }
 0x211   : > { %v3026_v55 = vpop.eup %3025  ;;  %v4974_v61 = vpop.xlane.xlu0 %1326  ;;  %v2368_v43 = vmul.f32 %v2358_v49, %v5538_v56 }
 0x212   : > { %v1460_v39 = vpop.xlane.xlu1 %1459  ;;  %v3028_v0 = vpop.eup %3027  ;;  %v2360_v31 = vmul.f32 0.6931472, %v3026_v55  ;;  %1598 = vadd.xlane.f32.xlu0 %v1585_v2 }
 0x213   : > { %v1561_v40 = vmul.f32 0.6931472, %v3028_v0  ;;  %2381 = vadd.xlane.f32.xlu1 %v2368_v43  ;;  %v1479_v43 = vadd.f32 1.0, %v4873_v15 }
 0x214   : > { %v2369_v7 = vmul.f32 %v2360_v31, %v5544_v50 }
 0x215   : > { %v3030_v23 = vpop.eup %3029  ;;  %v4979_v16 = vpop.xlane.xlu0 %2161  ;;  %v1586_v59 = vmul.f32 %v1561_v40, %v5544_v50  ;;  %3039 = vlog2.f32 %v1479_v43 }
 0x216   : > { %v4982_v46 = vpop.xlane.xlu1 %2131  ;;  %v2210_v30 = vsub.f32 %v4979_v16, %v4938_v4  ;;  %v1563_v25 = vmul.f32 0.6931472, %v3030_v23  ;;  %v3032_v56 = vpop.eup %3031  ;;  %2383 = vadd.xlane.f32.xlu0 %v2369_v7  ;;  %v2275_v7 = vadd.f32 1.0, %v2203_v28 }
 0x217   : > { %1600 = vadd.xlane.f32.xlu1 %v1586_v59  ;;  %v2362_v50 = vmul.f32 0.6931472, %v3032_v56  ;;  %vm2496_vm15 = vcmp.gt.f32.partialorder %v4982_v46, 0.0 }
 0x218   : > { %v1587_v47 = vmul.f32 %v1563_v25, %v5546_v24  ;;  %3041 = vlog2.f32 %v2275_v7 }
 0x219   : > { %v4988_v51 = vpop.xlane.xlu0 %1329  ;;  %v2370_v3 = vmul.f32 %v2362_v50, %v5546_v24  ;;  %v3034_v14 = vpop.eup %3033 }
 0x21a   : > { %v1430_v1 = vpop.xlane.xlu1 %1429  ;;  %2249 = vadd.xlane.f32.xlu0 %v5569_v19  ;;  %v3036_v2 = vpop.eup %3035  ;;  %v1487_v0 = vmul.f32 0.6931472, %v3034_v14 }
 0x21b   : > { %v4990_v13 = vmul.f32 4.0, %v1430_v1  ;;  %1602 = vadd.xlane.f32.xlu1 %v1587_v47  ;;  %v2286_v24 = vmul.f32 0.6931472, %v3036_v2  ;;  %v3038_v56 = vpop.eup %3037  ;;  %v2278_v2 = vadd.f32 1.0, %v2206_v60 }
 0x21c   : > { %v1489_v17 = vmul.f32 0.6931472, %v3038_v56 }
 0x21d   : > { %v2419_v12 = vsub.f32 %v4990_v13, %v4969_v27  ;;  %v1457_v35 = vpop.xlane.xlu0 %1456 }
 0x21e   : > { %v1463_v11 = vpop.xlane.xlu1 %1462 }
 0x21f   : > { %2385 = vadd.xlane.f32.xlu1 %v2370_v3  ;;  %v2499_v3 = vsel %vm2491_vm9, %v4805_v52, 1.0  ;;  %vm2477_vm9 = vcmp.gt.f32.partialorder %v4959_v5, 0.0 }
 0x220   : > { %3043 = vrcp.f32 %v2499_v3  ;;  %v3095_v3 = vld [vmem:[%s3391_s25 + $0x40] sm:$0xff] }
 0x221   : > { %v1567_v45 = vpop.xlane.xlu0 %1566  ;;  %vm2299_vm1 = vcmp.ne.f32.partialorder %v3095_v3, 0.0 }
 0x222   : > { %v4996_v49 = vpop.xlane.xlu1 %2134  ;;  %v2396_v55 = vsub.f32 %v1457_v35, %v1567_v45  ;;  %v1480_v45 = vadd.f32 1.0, %v4894_v36 }
 0x223   : > { %vm2497_vm2 = vcmp.gt.f32.partialorder %v4996_v49, 0.0 }
 0x224   : > { %v2404_v38 = vmul.f32 4.0, %v2396_v55  ;;  %3045 = vlog2.f32 %v1480_v45 }
 0x225   : > { %v5001_v31 = vpop.xlane.xlu0 %1332  ;;  %3047 = vlog2.f32 %v2278_v2  ;;  %v5570_v2 = vsub.f32 %v4821_v53, %v4866_v37 }
 0x226   : > { %v2256_v40 = vpop.xlane.xlu1 %2255  ;;  %v5003_v23 = vmul.f32 %v2404_v38, %v1487_v0  ;;  %v3040_v38 = vpop.eup %3039 }
 0x227   : > { %v2452_v59 = vmul.f32 4.0, %v2256_v40  ;;  %v3042_v7 = vpop.eup %3041  ;;  %v1491_v36 = vmul.f32 0.6931472, %v3040_v38  ;;  %v2277_v38 = vadd.f32 1.0, %v5570_v2  ;;  %v3096_v2 = vld [vmem:[%s3391_s25 + $0x48] sm:$0xff] }
 0x228   : > { %v2284_v41 = vmul.f32 0.6931472, %v3042_v7  ;;  %vm2300_vm6 = vcmp.ne.f32.partialorder %v3096_v2, 0.0 }
 0x229   : > { %v5005_v25 = vmul.f32 %v2452_v59, %v2286_v24  ;;  %v1569_v47 = vpop.xlane.xlu0 %1568 }
 0x22a   : > { %v1436_v20 = vpop.xlane.xlu1 %1435  ;;  %v2397_v21 = vsub.f32 %v1460_v39, %v1569_v47  ;;  %v2500_v47 = vsel %vm2492_vm14, %v4799_v48, 1.0  ;;  %v5571_v48 = vmov 0.0  }
 0x22b   : > { %v5012_v35 = vmul.f32 4.0, %v1436_v20  ;;  %3049 = vrcp.f32 %v2500_v47 }
 0x22c   : > { %v2405_v15 = vmul.f32 4.0, %v2397_v21  ;;  %v2502_v21 = vsel %vm2494_vm10, %v4927_v29, 1.0  ;;  %vm2478_vm10 = vcmp.gt.f32.partialorder %v4974_v61, 0.0 }
 0x22d   : > { %v5008_v1 = vpop.xlane.xlu0 %1335  ;;  %3051 = vrcp.f32 %v2502_v21 }
 0x22e   : > { %v1573_v50 = vpop.xlane.xlu1 %1572  ;;  %v5010_v19 = vmul.f32 %v2405_v15, %v1489_v17  ;;  %3053 = vlog2.f32 %v2277_v38 }
 0x230   : > { %v2421_v14 = vsub.f32 %v5012_v35, %v5010_v19 }
 0x231   : > { %v1433_v28 = vpop.xlane.xlu0 %1432 }
 0x232   : > { %v2229_v39 = vpop.xlane.xlu1 %2228  ;;  %v5018_v55 = vmul.f32 4.0, %v1433_v28  ;;  %v3044_v28 = vpop.eup %3043 }
 0x233   : > { %v2443_v20 = vmul.f32 4.0, %v2229_v39  ;;  %v2871_v39 = vsel %vm2299_vm1, 1.0, %v5571_v48 }
 0x234   : > { %v2420_v0 = vsub.f32 %v5018_v55, %v5003_v23 }
 0x235   : > { %v1571_v52 = vpop.xlane.xlu0 %1570 }
 0x236   : > { %v5025_v43 = vpop.xlane.xlu1 %2258  ;;  %v2398_v40 = vsub.f32 %v1463_v11, %v1571_v52 }
 0x238   : > { %v2406_v24 = vmul.f32 4.0, %v2398_v40  ;;  %v3046_v40 = vpop.eup %3045 }
 0x239   : > { %v2253_v59 = vpop.xlane.xlu0 %2252  ;;  %v3048_v53 = vpop.eup %3047 }
 0x23a   : > { %v5028_v56 = vpop.xlane.xlu1 %1468  ;;  %v5031_v18 = vmul.f32 %v2406_v24, %v1491_v36  ;;  %v2451_v60 = vmul.f32 4.0, %v2253_v59  ;;  %v2280_v59 = vadd.f32 1.0, %v2208_v8  ;;  %v3050_v38 = vpop.eup %3049 }
 0x23c   : > { %v2459_v11 = vmul.f32 %v2451_v60, %v2284_v41  ;;  %v1493_v60 = vmul.f32 0.6931472, %v3046_v40  ;;  %3055 = vlog2.f32 %v2280_v59 }
 0x23d   : > { %v5035_v17 = vpop.xlane.xlu0 %1338  ;;  %3057 = vrcp.f32 %v2501_v62 }
 0x23e   : > { %v2262_v15 = vpop.xlane.xlu1 %2261  ;;  %v2467_v45 = vsub.f32 %v2443_v20, %v2459_v11 }
 0x23f   : > { %v2454_v11 = vmul.f32 4.0, %v2262_v15 }
 0x240   : > { %v2565_v52 = vmul.f32 %v3044_v28, %v2467_v45 }
 0x241   : > { %v1466_v7 = vpop.xlane.xlu0 %1465 }
 0x242   : > { %v5042_v36 = vpop.xlane.xlu1 %1441  ;;  %v2580_v29 = vsub.f32 0.0, %v2565_v52  ;;  %v2399_v24 = vsub.f32 %v1466_v7, %v1573_v50  ;;  %v2290_v50 = vmul.f32 0.6931472, %v3048_v53  ;;  %v3097_v52 = vld [vmem:[%s3391_s25 + $0x58] sm:$0xff]  ;;  %v2504_v7 = vsel %vm2496_vm15, %v4982_v46, 1.0 }
 0x243   : > { %vm2302_vm7 = vcmp.ne.f32.partialorder %v3097_v52, 0.0  ;;  %3059 = vrcp.f32 %v2504_v7 }
 0x244   : > { %v2588_v41 = vmul.f32 %v2871_v39, %v2580_v29  ;;  %v2407_v47 = vmul.f32 4.0, %v2399_v24  ;;  %v2462_v3 = vmul.f32 %v2454_v11, %v2290_v50  ;;  %v3052_v39 = vpop.eup %3051  ;;  %v2874_v53 = vsel %vm2302_vm7, 1.0, %v5571_v48 }
 0x245   : > { %v5047_v37 = vpop.xlane.xlu0 %2137  ;;  %v3054_v11 = vpop.eup %3053  ;;  %vm2480_vm7 = vcmp.gt.f32.partialorder %v5001_v31, 0.0 }
 0x246   : > { %v5049_v20 = vpop.xlane.xlu1 %1576  ;;  %v5052_v21 = vmul.f32 %v2407_v47, %v1493_v60  ;;  %v2872_v47 = vsel %vm2300_vm6, 1.0, %v5571_v48  ;;  %v2288_v2 = vmul.f32 0.6931472, %v3054_v11  ;;  %vm2479_vm6 = vcmp.gt.f32.partialorder %v4988_v51, 0.0 }
 0x249   : > { %v2232_v6 = vpop.xlane.xlu0 %2231 }
 0x24a   : > { %v2238_v8 = vpop.xlane.xlu1 %2237  ;;  %v2444_v45 = vmul.f32 4.0, %v2232_v6 }
 0x24b   : > { %v2446_v28 = vmul.f32 4.0, %v2238_v8  ;;  %v2453_v8 = vmul.f32 4.0, %v5025_v43 }
 0x24c   : > { %v2468_v15 = vsub.f32 %v2444_v45, %v5005_v25 }
 0x24d   : > { %v2470_v40 = vsub.f32 %v2446_v28, %v2462_v3  ;;  %v1439_v57 = vpop.xlane.xlu0 %1438  ;;  %v2279_v28 = vadd.f32 1.0, %v2207_v54 }
 0x24e   : > { %v5060_v29 = vpop.xlane.xlu1 %1474  ;;  %v2567_v24 = vmul.f32 %v3050_v38, %v2468_v15  ;;  %v5062_v60 = vmul.f32 4.0, %v1439_v57  ;;  %v2596_v38 = vsel %vm2539_vm11, %v2588_v41, 0.0  ;;  %v3056_v15 = vpop.eup %3055  ;;  %v2461_v57 = vmul.f32 %v2453_v8, %v2288_v2  ;;  %v3099_v8 = vld [vmem:[%s3391_s25 + $0x68] sm:$0xff] }
 0x24f   : > { %v2571_v59 = vmul.f32 %v3052_v39, %v2470_v40  ;;  %3061 = vlog2.f32 %v2279_v28  ;;  %v3058_v63 = vpop.eup %3057  ;;  %vm2304_vm8 = vcmp.ne.f32.partialorder %v3099_v8, 0.0  ;;  %v2503_v28 = vsel %vm2495_vm13, %v4965_v26, 1.0 }
 0x250   : > { %v2581_v50 = vsub.f32 0.0, %v2567_v24  ;;  %v2422_v25 = vsub.f32 %v5062_v60, %v5031_v18  ;;  %v3060_v2 = vpop.eup %3059  ;;  %3063 = vrcp.f32 %v2503_v28  ;;  %vm2481_vm13 = vcmp.gt.f32.partialorder %v5008_v1, 0.0 }
 0x251   : > { %v2583_v62 = vsub.f32 0.0, %v2571_v59  ;;  %v5068_v46 = vpop.xlane.xlu0 %1574  ;;  %v3098_v59 = vld [vmem:[%s3391_s25 + $0x50] sm:$0xff]  ;;  %v2489_v18 = vsel %vm2481_vm13, %v5008_v1, 1.0  ;;  %v2391_v60 = vmul.f32 4.0, %v5042_v36 }
 0x252   : > { %v2268_v6 = vpop.xlane.xlu1 %2267  ;;  %v2589_v3 = vmul.f32 %v2872_v47, %v2581_v50  ;;  %vm2301_vm12 = vcmp.ne.f32.partialorder %v3098_v59, 0.0  ;;  %v2294_v47 = vmul.f32 0.6931472, %v3056_v15  ;;  %v2400_v16 = vsub.f32 %v5028_v56, %v5068_v46 }
 0x253   : > { %v2591_v45 = vmul.f32 %v2874_v53, %v2583_v62  ;;  %v2456_v24 = vmul.f32 4.0, %v2268_v6  ;;  %v2873_v62 = vsel %vm2301_vm12, 1.0, %v5571_v48 }
 0x254   : > { %v2597_v52 = vsel %vm2539_vm11, %v2589_v3, 0.0  ;;  %v2408_v46 = vmul.f32 4.0, %v2400_v16 }
 0x255   : > { %v2598_v40 = vadd.f32 %v2597_v52, %v2596_v38  ;;  %v2235_v39 = vpop.xlane.xlu0 %2234  ;;  %v2464_v53 = vmul.f32 %v2456_v24, %v2294_v47 }
 0x256   : > { %v5076_v7 = vpop.xlane.xlu1 %1447  ;;  %v2445_v43 = vmul.f32 4.0, %v2235_v39  ;;  %v2876_v39 = vsel %vm2304_vm8, 1.0, %v5571_v48  ;;  %vm2498_vm8 = vcmp.gt.f32.partialorder %v5047_v37, 0.0 }
 0x257   : > { %v2506_v1 = vsel %vm2498_vm8, %v5047_v37, 1.0 }
 0x258   : > { %v2469_v58 = vsub.f32 %v2445_v43, %v2461_v57  ;;  %v2281_v57 = vadd.f32 1.0, %v2209_v44  ;;  %v2505_v44 = vsel %vm2497_vm2, %v4996_v49, 1.0  ;;  %v2483_v49 = vsel %vm2475_vm3, %v4797_v32, 1.0 }
 0x259   : > { %v5079_v54 = vpop.xlane.xlu0 %1471 }
 0x25a   : > { %v2244_v41 = vpop.xlane.xlu1 %2243  ;;  %v2569_v11 = vmul.f32 %v3058_v63, %v2469_v58  ;;  %v2601_v58 = vsel %vm2539_vm11, %v2591_v45, 0.0  ;;  %3065 = vlog2.f32 %v2281_v57  ;;  %v2484_v57 = vsel %vm2476_vm4, %v4792_v33, 1.0 }
 0x25b   : > { %v2448_v50 = vmul.f32 4.0, %v2244_v41  ;;  %3067 = vrcp.f32 %v2505_v44  ;;  %v2485_v33 = vsel %vm2477_vm9, %v4959_v5, 1.0  ;;  %v2486_v5 = vsel %vm2478_vm10, %v4974_v61, 1.0 }
 0x25c   : > { %v2582_v6 = vsub.f32 0.0, %v2569_v11  ;;  %v3062_v41 = vpop.eup %3061  ;;  %3069 = vrcp.f32 %v2483_v49 }
 0x25d   : > { %v2472_v3 = vsub.f32 %v2448_v50, %v2464_v53  ;;  %v2265_v38 = vpop.xlane.xlu0 %2264  ;;  %v2292_v42 = vmul.f32 0.6931472, %v3062_v41  ;;  %v3064_v45 = vpop.eup %3063  ;;  %3071 = vrcp.f32 %v2484_v57 }
 0x25e   : > { %v2590_v52 = vmul.f32 %v2873_v62, %v2582_v6  ;;  %v2455_v34 = vmul.f32 4.0, %v2265_v38  ;;  %3073 = vrcp.f32 %v2485_v33  ;;  %v1481_v33 = vadd.f32 1.0, %v4917_v10 }
 0x25f   : > { %v2575_v15 = vmul.f32 %v3060_v2, %v2472_v3  ;;  %3075 = vrcp.f32 %v2486_v5 }
 0x260   : > { %v2599_v24 = vsel %vm2539_vm11, %v2590_v52, 0.0  ;;  %v2463_v50 = vmul.f32 %v2455_v34, %v2292_v42  ;;  %v5108_v42 = vpop.xlane.xlu1 %2273  ;;  %3077 = vlog2.f32 %v1481_v33 }
 0x261   : > { %v2585_v43 = vsub.f32 0.0, %v2575_v15  ;;  %v2600_v59 = vadd.f32 %v2599_v24, %v2598_v40  ;;  %v5090_v47 = vpop.xlane.xlu0 %1444  ;;  %v3100_v40 = vld [vmem:[%s3391_s25 + $0x60] sm:$0xff] }
 0x262   : > { %vm2303_vm5 = vcmp.ne.f32.partialorder %v3100_v40, 0.0 }
 0x263   : > { %v2593_v26 = vmul.f32 %v2876_v39, %v2585_v43  ;;  %v2602_v63 = vadd.f32 %v2601_v58, %v2600_v59  ;;  %v2875_v2 = vsel %vm2303_vm5, 1.0, %v5571_v48  ;;  %vm2482_vm5 = vcmp.gt.f32.partialorder %v5035_v17, 0.0 }
 0x264   : > { %v2490_v33 = vsel %vm2482_vm5, %v5035_v17, 1.0  ;;  %v2458_v17 = vmul.f32 4.0, %v5108_v42 }
 0x265   : > { %v5093_v53 = vpop.xlane.xlu0 %1578  ;;  %v2605_v32 = vsel %vm2539_vm11, %v2593_v26, 0.0 }
 0x267   : > { %v3066_v38 = vpop.eup %3065 }
 0x268   : > { %v2296_v43 = vmul.f32 0.6931472, %v3066_v38 }
 0x269   : > { %v2241_v11 = vpop.xlane.xlu0 %2240 }
 0x26a   : > { %v2447_v62 = vmul.f32 4.0, %v2241_v11  ;;  %v3101_v11 = vld [vmem:[%s3391_s25 + $0x70] sm:$0xff] }
 0x26b   : > { %vm2305_vm14 = vcmp.ne.f32.partialorder %v3101_v11, 0.0 }
 0x26c   : > { %v2471_v8 = vsub.f32 %v2447_v62, %v2463_v50  ;;  %v3068_v62 = vpop.eup %3067 }
 0x26d   : > { %v2271_v6 = vpop.xlane.xlu0 %2270  ;;  %v3070_v57 = vpop.eup %3069 }
 0x26e   : > { %v2573_v3 = vmul.f32 %v3064_v45, %v2471_v8  ;;  %v2457_v39 = vmul.f32 4.0, %v2271_v6  ;;  %v2877_v45 = vsel %vm2305_vm14, 1.0, %v5571_v48 }
 0x270   : > { %v2584_v28 = vsub.f32 0.0, %v2573_v3  ;;  %v2465_v41 = vmul.f32 %v2457_v39, %v2296_v43  ;;  %v3103_v43 = vld [vmem:[%s3391_s25 + $0x8] sm:$0xff] }
 0x271   : > { %v5102_v52 = vpop.xlane.xlu0 %1450  ;;  %vm1501_vm0 = vcmp.ne.f32.partialorder %v3103_v43, 0.0  ;;  %v1483_v43 = vadd.f32 1.0, %v4945_v9 }
 0x272   : > { %v2592_v15 = vmul.f32 %v2875_v2, %v2584_v28  ;;  %v3102_v28 = vld [vmem:[%s3391_s25] sm:$0xff] }
 0x273   : > { %vm1500_vm1 = vcmp.ne.f32.partialorder %v3102_v28, 0.0 }
 0x274   : > { %v2603_v24 = vsel %vm2539_vm11, %v2592_v15, 0.0  ;;  %v2805_v61 = vsel %vm1500_vm1, 1.0, %v5571_v48 }
 0x275   : > { %v2247_v59 = vpop.xlane.xlu0 %2246  ;;  %v2604_v58 = vadd.f32 %v2603_v24, %v2602_v63 }
 0x276   : > { %v2449_v34 = vmul.f32 4.0, %v2247_v59 }
 0x277   : > { %v2606_v44 = vadd.f32 %v2605_v32, %v2604_v58  ;;  %v2806_v32 = vsel %vm1501_vm0, 1.0, %v5571_v48 }
 0x278   : > { %v2473_v50 = vsub.f32 %v2449_v34, %v2465_v41  ;;  %v3072_v41 = vpop.eup %3071 }
 0x279   : > { %v1589_v40 = vpop.xlane.xlu0 %1588  ;;  %v3074_v55 = vpop.eup %3073 }
 0x27a   : > { %v2577_v8 = vmul.f32 %v3068_v62, %v2473_v50  ;;  %v3076_v5 = vpop.eup %3075 }
 0x27b   : > { %v1591_v63 = vpop.xlane.xlu1 %1590 }
 0x27c   : > { %v2586_v6 = vsub.f32 0.0, %v2577_v8 }
 0x27d   : > { %v2372_v26 = vpop.xlane.xlu0 %2371 }
 0x27e   : > { %v2594_v3 = vmul.f32 %v2877_v45, %v2586_v6  ;;  %v2427_v2 = vadd.f32 %v2372_v26, %v1589_v40 }
 0x27f   : > { %v2374_v38 = vpop.xlane.xlu1 %2373 }
 0x280   : > { %v2435_v49 = vsub.f32 %v2419_v12, %v2427_v2  ;;  %v2428_v15 = vadd.f32 %v2374_v38, %v1591_v63  ;;  %v2607_v39 = vsel %vm2539_vm11, %v2594_v3, 0.0  ;;  %v2487_v63 = vsel %vm2479_vm6, %v4988_v51, 1.0 }
 0x281   : > { %v5120_v24 = vadd.f32 %v2607_v39, %v2606_v44  ;;  %v3104_v44 = vld [vmem:[%s3391_s25 + $0x10] sm:$0xff]  ;;  %v2282_v51 = vadd.f32 1.0, %v2210_v30 }
 0x282   : > { %v2508_v59 = vmul.f32 %v3070_v57, %v2435_v49  ;;  %v2436_v58 = vsub.f32 %v2420_v0, %v2428_v15  ;;  %vm1502_vm15 = vcmp.ne.f32.partialorder %v3104_v44, 0.0  ;;  %v1482_v0 = vadd.f32 1.0, %v4930_v22 }
 0x283   : > { %v2376_v27 = vpop.xlane.xlu0 %2375  ;;  %v2807_v8 = vsel %vm1502_vm15, 1.0, %v5571_v48  ;;  %v2488_v15 = vsel %vm2480_vm7, %v5001_v31, 1.0 }
 0x284   : > { %v2523_v13 = vsub.f32 0.0, %v2508_v59  ;;  %v2510_v12 = vmul.f32 %v3072_v41, %v2436_v58  ;;  %v1593_v34 = vpop.xlane.xlu1 %1592  ;;  %3079 = vlog2.f32 %v1482_v0  ;;  %v3078_v59 = vpop.eup %3077  ;;  %v2423_v58 = vsub.f32 %v2391_v60, %v5052_v21  ;;  %v3109_v60 = vld [vmem:[%s3391_s25 + $0x78] sm:$0xff] }
 0x285   : > { %v2429_v11 = vadd.f32 %v2376_v27, %v1593_v34  ;;  %3081 = vrcp.f32 %v2487_v63  ;;  %v3106_v27 = vld [vmem:[%s3391_s25 + $0x20] sm:$0xff]  ;;  %v2392_v21 = vmul.f32 4.0, %v5090_v47  ;;  %v2393_v47 = vmul.f32 4.0, %v5076_v7 }
 0x286   : > { %v2531_v50 = vmul.f32 %v2805_v61, %v2523_v13  ;;  %v2524_v62 = vsub.f32 0.0, %v2510_v12  ;;  %3083 = vlog2.f32 %v2282_v51  ;;  %vm1504_vm2 = vcmp.ne.f32.partialorder %v3106_v27, 0.0 }
 0x287   : > { %v2437_v23 = vsub.f32 %v2421_v14, %v2429_v11  ;;  %v3105_v14 = vld [vmem:[%s3391_s25 + $0x18] sm:$0xff]  ;;  %3085 = vrcp.f32 %v2488_v15  ;;  %v2402_v63 = vsub.f32 %v5060_v29, %v5093_v53  ;;  %vm2306_vm9 = vcmp.ne.f32.partialorder %v3109_v60, 0.0 }
 0x288   : > { %v2532_v40 = vmul.f32 %v2806_v32, %v2524_v62  ;;  %v2540_v10 = vsel %vm2539_vm11, %v2531_v50, 0.0  ;;  %vm1503_vm12 = vcmp.ne.f32.partialorder %v3105_v14, 0.0  ;;  %3087 = vlog2.f32 %v1483_v43 }
 0x289   : > { %v2512_v45 = vmul.f32 %v3074_v55, %v2437_v23  ;;  %v2808_v57 = vsel %vm1503_vm12, 1.0, %v5571_v48  ;;  %3089 = vrcp.f32 %v2489_v18  ;;  %v2809_v32 = vsel %vm1504_vm2, 1.0, %v5571_v48 }
 0x28a   : > { %v2541_v6 = vsel %vm2539_vm11, %v2532_v40, 0.0  ;;  %3091 = vrcp.f32 %v2506_v1  ;;  %v3107_v40 = vld [vmem:[%s3391_s25 + $0x28] sm:$0xff]  ;;  %v2410_v29 = vmul.f32 4.0, %v2402_v63 }
 0x28b   : > { %v2542_v26 = vadd.f32 %v2541_v6, %v2540_v10  ;;  %v2525_v3 = vsub.f32 0.0, %v2512_v45  ;;  %v1595_v2 = vpop.xlane.xlu0 %1594  ;;  %vm1505_vm3 = vcmp.ne.f32.partialorder %v3107_v40, 0.0  ;;  %3093 = vrcp.f32 %v2490_v33 }
 0x28c   : > { %v2378_v19 = vpop.xlane.xlu1 %2377 }
 0x28d   : > { %v2533_v35 = vmul.f32 %v2807_v8, %v2525_v3  ;;  %v2430_v22 = vadd.f32 %v2378_v19, %v1595_v2 }
 0x28f   : > { %v2543_v28 = vsel %vm2539_vm11, %v2533_v35, 0.0  ;;  %v2438_v38 = vsub.f32 %v2422_v25, %v2430_v22  ;;  %v2401_v25 = vsub.f32 %v5079_v54, %v5049_v20  ;;  %v1495_v20 = vmul.f32 0.6931472, %v3078_v59 }
 0x290   : > { %v2544_v49 = vadd.f32 %v2543_v28, %v2542_v26  ;;  %v2810_v28 = vsel %vm1505_vm3, 1.0, %v5571_v48 }
 0x291   : > { %v2514_v39 = vmul.f32 %v3076_v5, %v2438_v38  ;;  %v3080_v36 = vpop.eup %3079  ;;  %v2409_v54 = vmul.f32 4.0, %v2401_v25  ;;  %v2416_v11 = vmul.f32 %v2408_v46, %v1495_v20  ;;  %v3108_v38 = vld [vmem:[%s3391_s25 + $0x30] sm:$0xff]  ;;  %v2878_v46 = vsel %vm2306_vm9, 1.0, %v5571_v48 }
 0x292   : > { %v3082_v12 = vpop.eup %3081  ;;  %v1497_v37 = vmul.f32 0.6931472, %v3080_v36  ;;  %vm1506_vm4 = vcmp.ne.f32.partialorder %v3108_v38, 0.0 }
 0x293   : > { %v2526_v4 = vsub.f32 0.0, %v2514_v39  ;;  %v2380_v30 = vpop.xlane.xlu0 %2379  ;;  %v2424_v55 = vsub.f32 %v2392_v21, %v2416_v11  ;;  %v3084_v45 = vpop.eup %3083  ;;  %v2811_v18 = vsel %vm1506_vm4, 1.0, %v5571_v48 }
 0x294   : > { %v2417_v23 = vmul.f32 %v2409_v54, %v1497_v37  ;;  %v3086_v26 = vpop.eup %3085  ;;  %v2298_v7 = vmul.f32 0.6931472, %v3084_v45 }
 0x295   : > { %v2534_v31 = vmul.f32 %v2808_v57, %v2526_v4  ;;  %v1597_v9 = vpop.xlane.xlu1 %1596  ;;  %v3088_v51 = vpop.eup %3087  ;;  %v2394_v4 = vmul.f32 4.0, %v5102_v52 }
 0x296   : > { %v2431_v56 = vadd.f32 %v2380_v30, %v1597_v9  ;;  %v2425_v35 = vsub.f32 %v2393_v47, %v2417_v23  ;;  %v3090_v42 = vpop.eup %3089  ;;  %v2466_v15 = vmul.f32 %v2458_v17, %v2298_v7  ;;  %v1499_v43 = vmul.f32 0.6931472, %v3088_v51 }
 0x297   : > { %v2545_v41 = vsel %vm2539_vm11, %v2534_v31, 0.0  ;;  %v3092_v25 = vpop.eup %3091 }
 0x298   : > { %v2546_v61 = vadd.f32 %v2545_v41, %v2544_v49  ;;  %v2439_v13 = vsub.f32 %v2423_v58, %v2431_v56  ;;  %v2418_v9 = vmul.f32 %v2410_v29, %v1499_v43  ;;  %v3094_v54 = vpop.eup %3093 }
 0x29a   : > { %v2516_v34 = vmul.f32 %v3082_v12, %v2439_v13  ;;  %v3110_v13 = vld [vmem:[%s3391_s25 + $0x38] sm:$0xff]  ;;  %s2777_s25 = sshll.u32 %s3381_s23, 3 }
 0x29b   : > { %v1599_v44 = vpop.xlane.xlu0 %1598  ;;  %vm1507_vm14 = vcmp.ne.f32.partialorder %v3110_v13, 0.0  ;;  %s747_s12 = scalar_lea.vmem [#allocation6], %s2777_s25  ;;  %s3117_s25 = scalar_lea.vmem %s3116_s0, 256 }
 0x29c   : > { %v2527_v50 = vsub.f32 0.0, %v2516_v34  ;;  %v2382_v62 = vpop.xlane.xlu1 %2381  ;;  %v2812_v11 = vsel %vm1507_vm14, 1.0, %v5571_v48  ;;  %s2638_s13 = sshll.u32 %s747_s12, 4  ;;  %s2639_s13 = int_to_ptr.vmem [resolvable:$true] %s2638_s13 }
 0x29d   : > { %v2432_v0 = vadd.f32 %v2382_v62, %v1599_v44  ;;  %s3111_s24 = scalar_lea.vmem %s2639_s13, 128  ;;  %p3118_p2 = scmp.lt.s32.totalorder %s2639_s13, %s3116_s0 }
 0x29e   : > { %v2535_v8 = vmul.f32 %v2809_v32, %v2527_v50  ;;  %p3112_p13 = scmp.ne.s32.totalorder %s2639_s13, %s3111_s24  ;;  %p3119_p3 = scmp.lt.s32.totalorder %s3117_s25, %s3111_s24 }
 0x29f   : > { %v2440_v10 = vsub.f32 %v2424_v55, %v2432_v0  ;;  %v2384_v6 = vpop.xlane.xlu0 %2383 }
 0x2a0   : > { %v2547_v3 = vsel %vm2539_vm11, %v2535_v8, 0.0  ;;  %v1601_v2 = vpop.xlane.xlu1 %1600  ;;  %p3113_p0 = pnand %p3112_p13, %p3264_p6  ;;  %p3120_p4 = por %p3119_p3, %p3118_p2 }
 0x2a1   : > { %v2518_v19 = vmul.f32 %v3086_v26, %v2440_v10  ;;  %v2433_v22 = vadd.f32 %v2384_v6, %v1601_v2  ;;  %v2548_v14 = vadd.f32 %v2547_v3, %v2546_v61  ;;  %v2426_v61 = vsub.f32 %v2394_v4, %v2418_v9 }
 0x2a2   : > { %p3114_p1 = pneg %p3113_p0 }
 0x2a3   : > { %v2528_v53 = vsub.f32 0.0, %v2518_v19  ;;  %v2441_v5 = vsub.f32 %v2425_v35, %v2433_v22  ;;  %v2250_v49 = vpop.xlane.xlu0 %2249 }
 0x2a4   : > { %v2450_v39 = vmul.f32 4.0, %v2250_v49  ;;  %v1603_v57 = vpop.xlane.xlu1 %1602  ;;  %p3121_p5 = pnand %p3120_p4, %p3114_p1 }
 0x2a5   : > { %v2536_v16 = vmul.f32 %v2810_v28, %v2528_v53  ;;  %v2520_v30 = vmul.f32 %v3090_v42, %v2441_v5 }
 0x2a6   : > { %v2474_v31 = vsub.f32 %v2450_v39, %v2466_v15 }
 0x2a7   : > { %v2529_v59 = vsub.f32 0.0, %v2520_v30  ;;  %v2549_v58 = vsel %vm2539_vm11, %v2536_v16, 0.0 }
 0x2a8   : > { %v2579_v41 = vmul.f32 %v3092_v25, %v2474_v31  ;;  %v2386_v56 = vpop.xlane.xlu1 %2385  ;;  %v2550_v1 = vadd.f32 %v2549_v58, %v2548_v14 }
 0x2a9   : > { %v2537_v52 = vmul.f32 %v2811_v18, %v2529_v59  ;;  %v2434_v36 = vadd.f32 %v2386_v56, %v1603_v57 }
 0x2aa   : > { %v2587_v27 = vsub.f32 0.0, %v2579_v41 }
 0x2ab   : > { %v2442_v12 = vsub.f32 %v2426_v61, %v2434_v36  ;;  %v2551_v20 = vsel %vm2539_vm11, %v2537_v52, 0.0 }
 0x2ac   : > { %v2595_v21 = vmul.f32 %v2878_v46, %v2587_v27  ;;  %v2552_v34 = vadd.f32 %v2551_v20, %v2550_v1 }
 0x2ad   : > { %v2522_v32 = vmul.f32 %v3094_v54, %v2442_v12 }
 0x2ae   : > { %v2609_v37 = vsel %vm2539_vm11, %v2595_v21, 0.0 }
 0x2af   : > { %v2530_v44 = vsub.f32 0.0, %v2522_v32  ;;  %v2610_v33 = vadd.f32 %v2609_v37, %v5120_v24 }
 0x2b1   : > { %2611 = vadd.xlane.f32.xlu1 %v2610_v33  ;;  %v2538_v50 = vmul.f32 %v2812_v11, %v2530_v44 }
 0x2b3   : > { %v2553_v62 = vsel %vm2539_vm11, %v2538_v50, 0.0 }
 0x2b4   : > { %v2554_v23 = vadd.f32 %v2553_v62, %v2552_v34 }
 0x2b6   : > { %2555 = vadd.xlane.f32.xlu0 %v2554_v23 }
 0x33a   : > { %v2612_v55 = vpop.xlane.xlu1 %2611 }
 0x33b   : > { %v2613_v0 = vrot.slane %v2612_v55, 4 }
 0x33d   : > { %v2614_v40 = vadd.f32 %v2613_v0, %v2612_v55 }
 0x33f   : > { %v2615_v8 = vrot.slane %v2614_v40, 2  ;;  %v2556_v45 = vpop.xlane.xlu0 %2555 }
 0x340   : > { %v2557_v47 = vrot.slane %v2556_v45, 4 }
 0x341   : > { %v2616_v63 = vadd.f32 %v2615_v8, %v2614_v40 }
 0x342   : > { %v2558_v48 = vadd.f32 %v2557_v47, %v2556_v45 }
 0x343   : > { %v2617_v26 = vrot.slane %v2616_v63, 1 }
 0x344   : > { %v2559_v10 = vrot.slane %v2558_v48, 2 }
 0x345   : > { %v2618_v3 = vadd.f32 %v2617_v26, %v2616_v63 }
 0x346   : > { %v2560_v6 = vadd.f32 %v2559_v10, %v2558_v48 }
 0x348   : > { %v2561_v24 = vrot.slane %v2560_v6, 1 }
 0x34a   : > { %v2562_v17 = vadd.f32 %v2561_v24, %v2560_v6 }
 0x34c   : > { %2887 = vpush %v2562_v17 }
 0x34d   : > { %2889 = vpush %v2618_v3 }
 0x37d   : > { %s2888_s10 = spop %2887 }
 0x37e   : > { %s2890_s18 = spop %2889 }
 0x37f   : > { %s2620_s19 = sadd.f32 %s2890_s18, %s2888_s10 }
 0x381   : > { %v2621_v2 = vstv %s2620_s19 }
 0x382   : > { %2623 = vst [vmem:[%s747_s12] sm:$0xff] %v2621_v2 }
 0x383   : > { %3124 = shalt.err (!%p3121_p5)
}
 0x384   : > { %s3125_s26 = scalar_lea.hbm %s5192_s21, 128  ;;  %s3129_s12 = scalar_lea.hbm %s5237_s8, 256 }
 0x385   : > { %p3126_p7 = scmp.ne.s32.totalorder %s5192_s21, %s3125_s26  ;;  %p3130_p12 = scmp.lt.s32.totalorder %s5192_s21, %s5237_s8 }
 0x386   : > { %p3131_p13 = scmp.lt.s32.totalorder %s3129_s12, %s3125_s26 }
 0x387   : > { %p3127_p10 = pnand %p3126_p7, %p3264_p6 }
 0x388   : > { %p3132_p0 = por %p3131_p13, %p3130_p12 }
 0x389   : > { %p3128_p11 = pneg %p3127_p10 }
 0x38b   : > { %p3133_p1 = pnand %p3132_p0, %p3128_p11 }
 0x38d   : > { %3136 = shalt.err (!%p3133_p1)
}
 0x38e   : > { %2891 = dma.vmem_to_hbm [thread:$0]  (%p3264_p6), %s2639_s13, 128, %s5192_s21, %s2625_s22  }
 0x38f PF: > { %s2650_s0 = sand.u32 1, %s3159_s27   ;;  %p2894_p2 = pnand %p2759_p9, %p3268_p8 }
 0x390   : > { %s2651_s20 = scalar_lea.sflag [#allocation7], %s2650_s0 }
 0x391   : > { %p2895_p3 = pneg %p2894_p2 }
 0x393   : > { %3154 = dma.done.wait (%p2895_p3), %s2651_s20, 128  }
 0x394   : > { %3156 = vsyncadd (%p2895_p3), %s2651_s20, 4294967168  ;;  %p18_p4 = scmp.ge.s32.totalorder %s3246_s11, 4   ;;  %s5572_s27 = smov %s3163_s28 }
 0x395   : > { %s5573_s28 = smov %s3167_s29  ;;  %s5574_s29 = smov %s3258_s14 }
 0x396   : > { %s5575_s30 = smov %s3246_s11  ;;  %20 = sbr.rel (!%p18_p4) target bundleno = 5 (0x5), region = 272 }
 0x39b   :  { %2656 = vsyncpa [#allocation7], 1 }
 0x39c   :  { %2658 = vsyncpa [#allocation7 + $0x1], 1 }

// kernel: tpu_custom_call.1
= control target key start
LH: loop header
LB: loop body
LE: loop exit
PB: predicated region body
PF: predicated region fallthrough
CT: control target
= control target key end

     0   :  { %s5229_s0 = inlined_call_operand.vmem [shape: f32[2,128,4], index: 0, kind: input, shape index: {}]   ;;  %s5230_s1 = inlined_call_operand.vmem [shape: f32[2,128,1], index: 1, kind: input, shape index: {}]   ;;  %s5231_s2 = inlined_call_operand.vmem [shape: f32[2,128,1], index: 2, kind: input, shape index: {}]   ;;  %s5232_s3 = inlined_call_operand.vmem [shape: f32[2,128,1], index: 3, kind: input, shape index: {}]   ;;  %s5233_s4 = inlined_call_operand.vmem [shape: f32[4,256], index: 4, kind: input, shape index: {}]   ;;  %s5234_s5 = inlined_call_operand.vmem [shape: f32[1,256], index: 5, kind: input, shape index: {}]   ;;  %s5235_s6 = inlined_call_operand.vmem [shape: f32[1,256], index: 6, kind: input, shape index: {}]   ;;  %s5236_s7 = inlined_call_operand.vmem [shape: f32[1,256], index: 7, kind: input, shape index: {}]   ;;  %s5237_s8 = inlined_call_operand.hbm [shape: f32[16,128], index: 8, kind: output, shape index: {}]  }
   0x1   :  { %5336 = sst [smem:[#allocation82_spill]] %s5229_s0 }
   0x2   :  { %13 = vsyncpa [#allocation7], 0 }
   0x3   :  { %15 = vsyncpa [#allocation7 + $0x1], 0  ;;  %s3221_s27 = smov 0   ;;  %s3223_s28 = smov 0  }
   0x4   :  { %s3225_s29 = smov 0   ;;  %s3227_s30 = smov 0  }
   0x5 LB: > { %s3242_s9 = sadd.s32 4294967295, %s3171_s30   ;;  %s2757_s10 = sadd.s32 4294967294, %s3171_s30   ;;  %s3171_s30 = sphi %s3227_s30, %s5575_s30   ;;  %s3167_s29 = sphi %s3225_s29, %s5574_s29   ;;  %s3163_s28 = sphi %s3223_s28, %s5573_s28   ;;  %s3159_s27 = sphi %s3221_s27, %s5572_s27  }
   0x6   : > { %s3246_s11 = sadd.s32 1, %s3171_s30   ;;  %s28_s12 = sadd.s32 1, %s3167_s29 }
   0x7   : > { %s25_s13 = ssub.s32 %s3171_s30, %s3246_s11  ;;  %p35_p0 = scmp.ne.s32.totalorder %s3167_s29, %s3163_s28 }
   0x8   : > { %p26_p1 = scmp.eq.s32.totalorder %s25_s13, 0  ;;  %p36_p2 = scmp.eq.s32.totalorder %s3171_s30, 0 }
   0x9   : > { %p227_p3 = scmp.eq.s32.totalorder %s3242_s9, 1  ;;  %p232_p4 = scmp.ne.s32.totalorder %s3163_s28, %s3159_s27 }
   0xa   : > { %s3258_s14 = scalar_select %p26_p1, %s3167_s29, %s28_s12  }
   0xb   : > { %p3260_p5 = por %p36_p2, %p35_p0  ;;  %p3264_p6 = por %p227_p3, %p35_p0 }
   0xc   : > { %p233_p7 = scmp.eq.s32.totalorder %s2757_s10, 1  ;;  %p2759_p9 = scmp.ge.s32.totalorder %s3171_s30, 2 }
   0xe   : > { %p3268_p8 = por %p233_p7, %p232_p4  ;;  %261 = sbr.rel (%p2759_p9) target bundleno = 73 (0x49), region = 32 }
  0x13   : > { %264 = sbr.rel (!%p3260_p5) target bundleno = 37 (0x25), region = 36  ;;  %s266_s18 = sand.u32 (%p3260_p5), 1, %s3167_s29  }
  0x14   : > { %s2883_s19 = sshll.u32 (%p3260_p5), %s3171_s30, 6  ;;  %s2760_s20 = sshll.u32 (%p3260_p5), %s266_s18, 7 }
  0x15   : > { %s5340_s0 = sld [smem:[#allocation82_spill]] (%p3260_p5)  ;;  %s268_s24 = scalar_lea.vmem (%p3260_p5), [#allocation2], %s2760_s20 }
  0x1b   : > { %s3282_s23 = scalar_lea.vmem %s5340_s0, %s2883_s19 }
  0x1c   : > { %v330_v0 = vld [vmem:[%s3282_s23] sm:$0xff]  ;;  %v332_v1 = vld [vmem:[%s3282_s23 + $0x8] sm:$0xff]  ;;  %v334_v2 = vld [vmem:[%s3282_s23 + $0x10] sm:$0xff] }
  0x1d   : > { %331 = vst [vmem:[%s268_s24] sm:$0xff] %v330_v0  ;;  %333 = vst [vmem:[%s268_s24 + $0x8] sm:$0xff] %v332_v1  ;;  %v336_v3 = vld [vmem:[%s3282_s23 + $0x18] sm:$0xff]  ;;  %v338_v4 = vld [vmem:[%s3282_s23 + $0x20] sm:$0xff] }
  0x1e   : > { %335 = vst [vmem:[%s268_s24 + $0x10] sm:$0xff] %v334_v2  ;;  %v340_v5 = vld [vmem:[%s3282_s23 + $0x28] sm:$0xff]  ;;  %337 = vst [vmem:[%s268_s24 + $0x18] sm:$0xff] %v336_v3  ;;  %v342_v6 = vld [vmem:[%s3282_s23 + $0x30] sm:$0xff] }
  0x1f   : > { %339 = vst [vmem:[%s268_s24 + $0x20] sm:$0xff] %v338_v4  ;;  %341 = vst [vmem:[%s268_s24 + $0x28] sm:$0xff] %v340_v5  ;;  %v344_v7 = vld [vmem:[%s3282_s23 + $0x38] sm:$0xff]  ;;  %v346_v8 = vld [vmem:[%s3282_s23 + $0x80] sm:$0xff] }
  0x20   : > { %343 = vst [vmem:[%s268_s24 + $0x30] sm:$0xff] %v342_v6  ;;  %345 = vst [vmem:[%s268_s24 + $0x38] sm:$0xff] %v344_v7  ;;  %v348_v9 = vld [vmem:[%s3282_s23 + $0x88] sm:$0xff]  ;;  %v350_v10 = vld [vmem:[%s3282_s23 + $0x90] sm:$0xff] }
  0x21   : > { %347 = vst [vmem:[%s268_s24 + $0x40] sm:$0xff] %v346_v8  ;;  %v352_v11 = vld [vmem:[%s3282_s23 + $0x98] sm:$0xff]  ;;  %349 = vst [vmem:[%s268_s24 + $0x48] sm:$0xff] %v348_v9  ;;  %v354_v12 = vld [vmem:[%s3282_s23 + $0xa0] sm:$0xff] }
  0x22   : > { %351 = vst [vmem:[%s268_s24 + $0x50] sm:$0xff] %v350_v10  ;;  %353 = vst [vmem:[%s268_s24 + $0x58] sm:$0xff] %v352_v11  ;;  %v356_v13 = vld [vmem:[%s3282_s23 + $0xa8] sm:$0xff]  ;;  %v358_v14 = vld [vmem:[%s3282_s23 + $0xb0] sm:$0xff] }
  0x23   : > { %355 = vst [vmem:[%s268_s24 + $0x60] sm:$0xff] %v354_v12  ;;  %357 = vst [vmem:[%s268_s24 + $0x68] sm:$0xff] %v356_v13  ;;  %v360_v15 = vld [vmem:[%s3282_s23 + $0xb8] sm:$0xff] }
  0x24   : > { %359 = vst [vmem:[%s268_s24 + $0x70] sm:$0xff] %v358_v14  ;;  %361 = vst [vmem:[%s268_s24 + $0x78] sm:$0xff] %v360_v15 }
  0x25 PF: > { %367 = sbr.rel (!%p3260_p5) target bundleno = 49 (0x31), region = 74  ;;  %s369_s25 = sand.u32 (%p3260_p5), 1, %s3167_s29  }
  0x26   : > { %s2884_s26 = sshll.u32 (%p3260_p5), %s3171_s30, 6  ;;  %s2763_s10 = sshll.u32 (%p3260_p5), %s369_s25, 7 }
  0x27   : > { %s3307_s18 = scalar_lea.vmem (%p3260_p5), %s5230_s1, %s2884_s26  ;;  %s371_s19 = scalar_lea.vmem (%p3260_p5), [#allocation3], %s2763_s10 }
  0x28   : > { %v433_v16 = vld [vmem:[%s3307_s18] sm:$0xff] (%p3260_p5)  ;;  %v435_v17 = vld [vmem:[%s3307_s18 + $0x8] sm:$0xff] (%p3260_p5)  ;;  %v437_v18 = vld [vmem:[%s3307_s18 + $0x10] sm:$0xff] (%p3260_p5) }
  0x29   : > { %434 = vst [vmem:[%s371_s19] sm:$0xff] (%p3260_p5), %v433_v16  ;;  %436 = vst [vmem:[%s371_s19 + $0x8] sm:$0xff] (%p3260_p5), %v435_v17  ;;  %v439_v19 = vld [vmem:[%s3307_s18 + $0x18] sm:$0xff] (%p3260_p5)  ;;  %v441_v20 = vld [vmem:[%s3307_s18 + $0x20] sm:$0xff] (%p3260_p5) }
  0x2a   : > { %438 = vst [vmem:[%s371_s19 + $0x10] sm:$0xff] %v437_v18  ;;  %v443_v21 = vld [vmem:[%s3307_s18 + $0x28] sm:$0xff]  ;;  %440 = vst [vmem:[%s371_s19 + $0x18] sm:$0xff] %v439_v19  ;;  %v445_v22 = vld [vmem:[%s3307_s18 + $0x30] sm:$0xff] }
  0x2b   : > { %442 = vst [vmem:[%s371_s19 + $0x20] sm:$0xff] %v441_v20  ;;  %444 = vst [vmem:[%s371_s19 + $0x28] sm:$0xff] %v443_v21  ;;  %v447_v23 = vld [vmem:[%s3307_s18 + $0x38] sm:$0xff]  ;;  %v449_v24 = vld [vmem:[%s3307_s18 + $0x80] sm:$0xff] }
  0x2c   : > { %446 = vst [vmem:[%s371_s19 + $0x30] sm:$0xff] %v445_v22  ;;  %448 = vst [vmem:[%s371_s19 + $0x38] sm:$0xff] %v447_v23  ;;  %v451_v25 = vld [vmem:[%s3307_s18 + $0x88] sm:$0xff]  ;;  %v453_v26 = vld [vmem:[%s3307_s18 + $0x90] sm:$0xff] }
  0x2d   : > { %450 = vst [vmem:[%s371_s19 + $0x40] sm:$0xff] %v449_v24  ;;  %v455_v27 = vld [vmem:[%s3307_s18 + $0x98] sm:$0xff]  ;;  %452 = vst [vmem:[%s371_s19 + $0x48] sm:$0xff] %v451_v25  ;;  %v457_v28 = vld [vmem:[%s3307_s18 + $0xa0] sm:$0xff] }
  0x2e   : > { %454 = vst [vmem:[%s371_s19 + $0x50] sm:$0xff] %v453_v26  ;;  %456 = vst [vmem:[%s371_s19 + $0x58] sm:$0xff] %v455_v27  ;;  %v459_v29 = vld [vmem:[%s3307_s18 + $0xa8] sm:$0xff]  ;;  %v461_v30 = vld [vmem:[%s3307_s18 + $0xb0] sm:$0xff] }
  0x2f   : > { %458 = vst [vmem:[%s371_s19 + $0x60] sm:$0xff] %v457_v28  ;;  %460 = vst [vmem:[%s371_s19 + $0x68] sm:$0xff] %v459_v29  ;;  %v463_v31 = vld [vmem:[%s3307_s18 + $0xb8] sm:$0xff] }
  0x30   : > { %462 = vst [vmem:[%s371_s19 + $0x70] sm:$0xff] %v461_v30  ;;  %464 = vst [vmem:[%s371_s19 + $0x78] sm:$0xff] %v463_v31 }
  0x31 PF: > { %470 = sbr.rel (!%p3260_p5) target bundleno = 61 (0x3d), region = 112  ;;  %s472_s20 = sand.u32 (%p3260_p5), 1, %s3167_s29  }
  0x32   : > { %s2885_s21 = sshll.u32 (%p3260_p5), %s3171_s30, 6  ;;  %s2766_s22 = sshll.u32 (%p3260_p5), %s472_s20, 7 }
  0x33   : > { %s3332_s25 = scalar_lea.vmem (%p3260_p5), %s5231_s2, %s2885_s21  ;;  %s474_s26 = scalar_lea.vmem (%p3260_p5), [#allocation4], %s2766_s22 }
  0x34   : > { %v536_v32 = vld [vmem:[%s3332_s25] sm:$0xff] (%p3260_p5)  ;;  %v538_v33 = vld [vmem:[%s3332_s25 + $0x8] sm:$0xff] (%p3260_p5)  ;;  %v540_v34 = vld [vmem:[%s3332_s25 + $0x10] sm:$0xff] (%p3260_p5) }
  0x35   : > { %537 = vst [vmem:[%s474_s26] sm:$0xff] (%p3260_p5), %v536_v32  ;;  %539 = vst [vmem:[%s474_s26 + $0x8] sm:$0xff] (%p3260_p5), %v538_v33  ;;  %v542_v35 = vld [vmem:[%s3332_s25 + $0x18] sm:$0xff] (%p3260_p5)  ;;  %v544_v36 = vld [vmem:[%s3332_s25 + $0x20] sm:$0xff] (%p3260_p5) }
  0x36   : > { %541 = vst [vmem:[%s474_s26 + $0x10] sm:$0xff] %v540_v34  ;;  %v546_v37 = vld [vmem:[%s3332_s25 + $0x28] sm:$0xff]  ;;  %543 = vst [vmem:[%s474_s26 + $0x18] sm:$0xff] %v542_v35  ;;  %v548_v38 = vld [vmem:[%s3332_s25 + $0x30] sm:$0xff] }
  0x37   : > { %545 = vst [vmem:[%s474_s26 + $0x20] sm:$0xff] %v544_v36  ;;  %547 = vst [vmem:[%s474_s26 + $0x28] sm:$0xff] %v546_v37  ;;  %v550_v39 = vld [vmem:[%s3332_s25 + $0x38] sm:$0xff]  ;;  %v552_v40 = vld [vmem:[%s3332_s25 + $0x80] sm:$0xff] }
  0x38   : > { %549 = vst [vmem:[%s474_s26 + $0x30] sm:$0xff] %v548_v38  ;;  %551 = vst [vmem:[%s474_s26 + $0x38] sm:$0xff] %v550_v39  ;;  %v554_v41 = vld [vmem:[%s3332_s25 + $0x88] sm:$0xff]  ;;  %v556_v42 = vld [vmem:[%s3332_s25 + $0x90] sm:$0xff] }
  0x39   : > { %553 = vst [vmem:[%s474_s26 + $0x40] sm:$0xff] %v552_v40  ;;  %v558_v43 = vld [vmem:[%s3332_s25 + $0x98] sm:$0xff]  ;;  %555 = vst [vmem:[%s474_s26 + $0x48] sm:$0xff] %v554_v41  ;;  %v560_v44 = vld [vmem:[%s3332_s25 + $0xa0] sm:$0xff] }
  0x3a   : > { %557 = vst [vmem:[%s474_s26 + $0x50] sm:$0xff] %v556_v42  ;;  %559 = vst [vmem:[%s474_s26 + $0x58] sm:$0xff] %v558_v43  ;;  %v562_v45 = vld [vmem:[%s3332_s25 + $0xa8] sm:$0xff]  ;;  %v564_v46 = vld [vmem:[%s3332_s25 + $0xb0] sm:$0xff] }
  0x3b   : > { %561 = vst [vmem:[%s474_s26 + $0x60] sm:$0xff] %v560_v44  ;;  %563 = vst [vmem:[%s474_s26 + $0x68] sm:$0xff] %v562_v45  ;;  %v566_v47 = vld [vmem:[%s3332_s25 + $0xb8] sm:$0xff] }
  0x3c   : > { %565 = vst [vmem:[%s474_s26 + $0x70] sm:$0xff] %v564_v46  ;;  %567 = vst [vmem:[%s474_s26 + $0x78] sm:$0xff] %v566_v47 }
  0x3d PF: > { %573 = sbr.rel (!%p3260_p5) target bundleno = 73 (0x49), region = 150  ;;  %s575_s10 = sand.u32 (%p3260_p5), 1, %s3167_s29  }
  0x3e   : > { %s2886_s12 = sshll.u32 (%p3260_p5), %s3171_s30, 6  ;;  %s2769_s13 = sshll.u32 (%p3260_p5), %s575_s10, 7 }
  0x3f   : > { %s3357_s20 = scalar_lea.vmem (%p3260_p5), %s5232_s3, %s2886_s12  ;;  %s577_s15 = scalar_lea.vmem (%p3260_p5), [#allocation5], %s2769_s13 }
  0x40   : > { %v639_v48 = vld [vmem:[%s3357_s20] sm:$0xff] (%p3260_p5)  ;;  %v641_v49 = vld [vmem:[%s3357_s20 + $0x8] sm:$0xff] (%p3260_p5)  ;;  %v643_v50 = vld [vmem:[%s3357_s20 + $0x10] sm:$0xff] (%p3260_p5) }
  0x41   : > { %640 = vst [vmem:[%s577_s15] sm:$0xff] (%p3260_p5), %v639_v48  ;;  %642 = vst [vmem:[%s577_s15 + $0x8] sm:$0xff] (%p3260_p5), %v641_v49  ;;  %v645_v51 = vld [vmem:[%s3357_s20 + $0x18] sm:$0xff] (%p3260_p5)  ;;  %v647_v52 = vld [vmem:[%s3357_s20 + $0x20] sm:$0xff] (%p3260_p5) }
  0x42   : > { %644 = vst [vmem:[%s577_s15 + $0x10] sm:$0xff] %v643_v50  ;;  %v649_v53 = vld [vmem:[%s3357_s20 + $0x28] sm:$0xff]  ;;  %646 = vst [vmem:[%s577_s15 + $0x18] sm:$0xff] %v645_v51  ;;  %v651_v54 = vld [vmem:[%s3357_s20 + $0x30] sm:$0xff] }
  0x43   : > { %648 = vst [vmem:[%s577_s15 + $0x20] sm:$0xff] %v647_v52  ;;  %650 = vst [vmem:[%s577_s15 + $0x28] sm:$0xff] %v649_v53  ;;  %v653_v55 = vld [vmem:[%s3357_s20 + $0x38] sm:$0xff]  ;;  %v655_v56 = vld [vmem:[%s3357_s20 + $0x80] sm:$0xff] }
  0x44   : > { %652 = vst [vmem:[%s577_s15 + $0x30] sm:$0xff] %v651_v54  ;;  %654 = vst [vmem:[%s577_s15 + $0x38] sm:$0xff] %v653_v55  ;;  %v657_v57 = vld [vmem:[%s3357_s20 + $0x88] sm:$0xff]  ;;  %v659_v58 = vld [vmem:[%s3357_s20 + $0x90] sm:$0xff] }
  0x45   : > { %656 = vst [vmem:[%s577_s15 + $0x40] sm:$0xff] %v655_v56  ;;  %v661_v59 = vld [vmem:[%s3357_s20 + $0x98] sm:$0xff]  ;;  %658 = vst [vmem:[%s577_s15 + $0x48] sm:$0xff] %v657_v57  ;;  %v663_v60 = vld [vmem:[%s3357_s20 + $0xa0] sm:$0xff] }
  0x46   : > { %660 = vst [vmem:[%s577_s15 + $0x50] sm:$0xff] %v659_v58  ;;  %662 = vst [vmem:[%s577_s15 + $0x58] sm:$0xff] %v661_v59  ;;  %v665_v61 = vld [vmem:[%s3357_s20 + $0xa8] sm:$0xff]  ;;  %v667_v62 = vld [vmem:[%s3357_s20 + $0xb0] sm:$0xff] }
  0x47   : > { %664 = vst [vmem:[%s577_s15 + $0x60] sm:$0xff] %v663_v60  ;;  %666 = vst [vmem:[%s577_s15 + $0x68] sm:$0xff] %v665_v61  ;;  %v669_v63 = vld [vmem:[%s3357_s20 + $0xb8] sm:$0xff] }
  0x48   : > { %668 = vst [vmem:[%s577_s15 + $0x70] sm:$0xff] %v667_v62  ;;  %670 = vst [vmem:[%s577_s15 + $0x78] sm:$0xff] %v669_v63 }
  0x49 PF: > { %p2772_p10 = scmp.ge.s32.totalorder %s3171_s30, 1  ;;  %p675_p11 = scmp.lt.s32.totalorder %s3171_s30, 3 }
  0x4b   : > { %p676_p12 = pnand %p2772_p10, %p675_p11 }
  0x4d   : > { %679 = sbr.rel (%p676_p12) target bundleno = 911 (0x38f), region = 188 }
  0x52   : > { %v752_v0 = vld [vmem:[%s5233_s4] sm:$0xff]  ;;  %vm835_vm0 = vcmask 1043456   ;;  %s3381_s23 = sand.u32 1, %s3163_s28   ;;  %v3173_v1 = vmov 0   ;;  %v5238_v3 = vmov 0.0   ;;  %vm810_vm1 = vcmask 31744  }
  0x53   : > { %2933 = vset.pattern.permute.xlu1 %v3173_v1  ;;  %2932 = vset.pattern.permute.xlu0 %v3173_v1  ;;  %v809_v2 = vcombine.high %v752_v0, %v752_v0  ;;  %s3384_s24 = sshll.u32 %s3381_s23, 7  ;;  %v756_v9 = vlaneseq  ;;  %s2778_s10 = sshll.u32 %s3242_s9, 6 }
  0x54   : > { %904 = vmatprep.mubr.f32.mxu0 %v5238_v3  ;;  %1745 = vmatprep.mubr.f32.mxu1 %v5238_v3  ;;  %s3391_s25 = scalar_lea.vmem [#allocation3], %s3384_s24  ;;  %s3396_s26 = scalar_lea.vmem [#allocation2], %s3384_s24  ;;  %v3420_v22 = vstv %s2778_s10 }
  0x55   : > { %2779 = vmatprep.subr.msk.mxu0 %vm835_vm0, %v809_v2  ;;  %2845 = vmatprep.subr.msk.mxu1 %vm835_vm0, %v809_v2  ;;  %v778_v4 = vld [vmem:[%s3391_s25 + $0x10] sm:$0xff]  ;;  %v776_v5 = vld [vmem:[%s3391_s25] sm:$0xff]  ;;  %v779_v11 = vld [vmem:[%s3391_s25 + $0x18] sm:$0xff]  ;;  %v3413_v19 = vshrl.u32 %v756_v9, 7  ;;  %s3438_s12 = scalar_lea.vmem [#allocation4], %s3384_s24  ;;  %s3448_s13 = scalar_lea.vmem [#allocation5], %s3384_s24 }
  0x56   : > { %v760_v6 = vld [vmem:[%s3396_s26] sm:$0xff]  ;;  %983 = vperm.xlu1 %2933, %v778_v4   ;;  %973 = vperm.xlu0 %2932, %v776_v5   ;;  %v777_v12 = vld [vmem:[%s3391_s25 + $0x8] sm:$0xff]  ;;  %v762_v17 = vld [vmem:[%s3396_s26 + $0x10] sm:$0xff]  ;;  %s1604_s18 = sadd.s32 128, %s2778_s10  ;;  %s2625_s22 = scalar_lea.sflag [#allocation7], %s3381_s23 }
  0x57   : > { %v768_v7 = vmul.f32 1.4285715, %v760_v6  ;;  %v2813_v8 = vld [vmem:[%s3396_s26 + $0x40] sm:$0xff]  ;;  %2780 = vmatpush1.msk.msra.mxu0 %vm835_vm0, %v752_v0  ;;  %2846 = vmatpush1.msk.msra.mxu1 %vm835_vm0, %v752_v0  ;;  %v761_v13 = vld [vmem:[%s3396_s26 + $0x8] sm:$0xff]  ;;  %v2815_v18 = vld [vmem:[%s3396_s26 + $0x50] sm:$0xff]  ;;  %v3424_v24 = vadd.s32 16, %v3413_v19 }
  0x58   : > { %v1614_v10 = vmul.f32 1.4285715, %v2813_v8  ;;  %v2814_v14 = vld [vmem:[%s3396_s26 + $0x48] sm:$0xff]  ;;  %v769_v15 = vmul.f32 1.4285715, %v761_v13  ;;  %v780_v21 = vld [vmem:[%s3391_s25 + $0x20] sm:$0xff] }
  0x59   : > { %2781 = vmatmul.mubr.msk.f32.vlgmr.msra.gmra.mxu0 %vm810_vm1, %v768_v7  ;;  %v1615_v16 = vmul.f32 1.4285715, %v2814_v14  ;;  %v781_v20 = vld [vmem:[%s3391_s25 + $0x28] sm:$0xff]  ;;  %v770_v23 = vmul.f32 1.4285715, %v762_v17  ;;  %v763_v26 = vld [vmem:[%s3396_s26 + $0x18] sm:$0xff]  ;;  %v3432_v28 = vadd.s32 %v3420_v22, %v3424_v24 }
  0x5a   : > { %2847 = vmatmul.mubr.msk.f32.vlgmr.msra.gmra.mxu1 %vm810_vm1, %v1614_v10  ;;  %910 = vmatprep.mubr.f32.mxu0 %v5238_v3  ;;  %v1616_v25 = vmul.f32 1.4285715, %v2815_v18  ;;  %v2816_v27 = vld [vmem:[%s3396_s26 + $0x58] sm:$0xff]  ;;  %v782_v30 = vld [vmem:[%s3391_s25 + $0x30] sm:$0xff]  ;;  %v784_v31 = vld [vmem:[%s3438_s12] sm:$0xff]  ;;  %v3459_v46 = vadd.s32 24, %v3413_v19 }
  0x5b   : > { %988 = vperm.xlu1 %2933, %v779_v11   ;;  %978 = vperm.xlu0 %2932, %v777_v12   ;;  %v783_v29 = vld [vmem:[%s3391_s25 + $0x38] sm:$0xff]  ;;  %v771_v32 = vmul.f32 1.4285715, %v763_v26  ;;  %v1617_v33 = vmul.f32 1.4285715, %v2816_v27  ;;  %v764_v34 = vld [vmem:[%s3396_s26 + $0x20] sm:$0xff] }
  0x5c   : > { %1751 = vmatprep.mubr.f32.mxu1 %v5238_v3  ;;  %v792_v35 = vmul.f32 0.1, %v784_v31  ;;  %v2817_v36 = vld [vmem:[%s3396_s26 + $0x60] sm:$0xff]  ;;  %v786_v38 = vld [vmem:[%s3438_s12 + $0x10] sm:$0xff]  ;;  %v785_v39 = vld [vmem:[%s3438_s12 + $0x8] sm:$0xff]  ;;  %v3467_v50 = vadd.s32 %v3420_v22, %v3459_v46  ;;  %v3473_v53 = vadd.s32 40, %v3413_v19 }
  0x5d   : > { %2782 = vmatmul.mubr.msk.f32.gmra.mxu0 %vm810_vm1, %v769_v15  ;;  %v800_v37 = vld [vmem:[%s3448_s13] sm:$0xff]  ;;  %v772_v40 = vmul.f32 1.4285715, %v764_v34  ;;  %v1618_v41 = vmul.f32 1.4285715, %v2817_v36  ;;  %v765_v42 = vld [vmem:[%s3396_s26 + $0x28] sm:$0xff] }
  0x5e   : > { %2848 = vmatmul.mubr.msk.f32.gmra.mxu1 %vm810_vm1, %v1615_v16  ;;  %916 = vmatprep.mubr.f32.mxu0 %v5238_v3  ;;  %v794_v43 = vmul.f32 0.1, %v786_v38  ;;  %v793_v44 = vmul.f32 0.1, %v785_v39  ;;  %v2818_v45 = vld [vmem:[%s3396_s26 + $0x68] sm:$0xff]  ;;  %v788_v47 = vld [vmem:[%s3438_s12 + $0x20] sm:$0xff]  ;;  %v3491_v0 = vadd.s32 %v3420_v22, %v3473_v53 }
  0x5f   : > { %998 = vperm.xlu1 %2933, %v781_v20   ;;  %993 = vperm.xlu0 %2932, %v780_v21   ;;  %v787_v48 = vld [vmem:[%s3438_s12 + $0x18] sm:$0xff]  ;;  %v773_v49 = vmul.f32 1.4285715, %v765_v42  ;;  %v1619_v51 = vmul.f32 1.4285715, %v2818_v45  ;;  %v766_v52 = vld [vmem:[%s3396_s26 + $0x30] sm:$0xff] }
  0x60   : > { %1757 = vmatprep.mubr.f32.mxu1 %v5238_v3  ;;  %v796_v54 = vmul.f32 0.1, %v788_v47  ;;  %v795_v55 = vmul.f32 0.1, %v787_v48  ;;  %v2819_v56 = vld [vmem:[%s3396_s26 + $0x70] sm:$0xff]  ;;  %v3477_v57 = vadd.s32 32, %v3413_v19 }
  0x61   : > { %2783 = vmatmul.mubr.msk.f32.gmra.mxu0 %vm810_vm1, %v770_v23  ;;  %v790_v58 = vld [vmem:[%s3438_s12 + $0x30] sm:$0xff]  ;;  %v789_v59 = vld [vmem:[%s3438_s12 + $0x28] sm:$0xff]  ;;  %v3483_v60 = vadd.s32 56, %v3413_v19  ;;  %v774_v61 = vmul.f32 1.4285715, %v766_v52  ;;  %v767_v63 = vld [vmem:[%s3396_s26 + $0x38] sm:$0xff] }
  0x62   : > { %2849 = vmatmul.mubr.msk.f32.gmra.mxu1 %vm810_vm1, %v1616_v25  ;;  %922 = vmatprep.mubr.f32.mxu0 %v5238_v3  ;;  %v1620_v62 = vmul.f32 1.4285715, %v2819_v56  ;;  %v798_v1 = vmul.f32 0.1, %v790_v58  ;;  %v797_v2 = vmul.f32 0.1, %v789_v59  ;;  %v3496_v5 = vadd.s32 %v3420_v22, %v3477_v57 }
  0x63   : > { %1008 = vperm.xlu1 %2933, %v783_v29   ;;  %1003 = vperm.xlu0 %2932, %v782_v30   ;;  %v2820_v4 = vld [vmem:[%s3396_s26 + $0x78] sm:$0xff]  ;;  %v3499_v6 = vadd.s32 48, %v3413_v19  ;;  %v3505_v8 = vadd.s32 %v3420_v22, %v3483_v60  ;;  %v775_v10 = vmul.f32 1.4285715, %v767_v63  ;;  %v801_v14 = vld [vmem:[%s3448_s13 + $0x8] sm:$0xff]  ;;  %v802_v16 = vld [vmem:[%s3448_s13 + $0x10] sm:$0xff] }
  0x64   : > { %1763 = vmatprep.mubr.f32.mxu1 %v5238_v3  ;;  %v791_v7 = vld [vmem:[%s3438_s12 + $0x38] sm:$0xff]  ;;  %v1621_v11 = vmul.f32 1.4285715, %v2820_v4  ;;  %v805_v17 = vld [vmem:[%s3448_s13 + $0x28] sm:$0xff]  ;;  %v804_v18 = vld [vmem:[%s3448_s13 + $0x20] sm:$0xff]  ;;  %s2880_s26 = sshll.u32 %s3242_s9, 7 }
  0x65   : > { %2784 = vmatmul.mubr.msk.f32.gmra.mxu0 %vm810_vm1, %v771_v32  ;;  %v799_v12 = vmul.f32 0.1, %v791_v7  ;;  %v3512_v13 = vadd.s32 %v3420_v22, %v3499_v6  ;;  %v803_v15 = vld [vmem:[%s3448_s13 + $0x18] sm:$0xff]  ;;  %v806_v21 = vld [vmem:[%s3448_s13 + $0x30] sm:$0xff]  ;;  %v2821_v23 = vld [vmem:[%s3391_s25 + $0x40] sm:$0xff]  ;;  %v3574_v7 = vsub.s32 1, %v3413_v19  ;;  %s5192_s21 = scalar_lea.hbm %s5237_s8, %s2880_s26 }
  0x66   : > { %2850 = vmatmul.mubr.msk.f32.gmra.mxu1 %vm810_vm1, %v1617_v33  ;;  %928 = vmatprep.mubr.f32.mxu0 %v5238_v3  ;;  %v807_v20 = vld [vmem:[%s3448_s13 + $0x38] sm:$0xff]  ;;  %v2825_v25 = vld [vmem:[%s3391_s25 + $0x60] sm:$0xff]  ;;  %v2822_v29 = vld [vmem:[%s3391_s25 + $0x48] sm:$0xff]  ;;  %s3175_s9 = smov [#allocation6]  }
  0x67   : > { %1187 = vperm.xlu1 %2933, %v792_v35   ;;  %1104 = vperm.xlu0 %2932, %v800_v37   ;;  %v2836_v26 = vld [vmem:[%s3438_s12 + $0x78] sm:$0xff]  ;;  %v2829_v30 = vld [vmem:[%s3438_s12 + $0x40] sm:$0xff]  ;;  %v2838_v32 = vld [vmem:[%s3448_s13 + $0x48] sm:$0xff]  ;;  %s3115_s0 = sshll.u32 %s3175_s9, 4  ;;  %s3116_s0 = int_to_ptr.vmem [resolvable:$false] %s3115_s0 }
  0x68   : > { %1769 = vmatprep.mubr.f32.mxu1 %v5238_v3  ;;  %v1647_v27 = vmul.f32 0.1, %v2836_v26  ;;  %v1640_v31 = vmul.f32 0.1, %v2829_v30  ;;  %v2830_v33 = vld [vmem:[%s3438_s12 + $0x48] sm:$0xff]  ;;  %v2823_v36 = vld [vmem:[%s3391_s25 + $0x50] sm:$0xff] }
  0x69   : > { %2785 = vmatmul.mubr.msk.f32.gmra.mxu0 %vm810_vm1, %v772_v40  ;;  %v1641_v34 = vmul.f32 0.1, %v2830_v33  ;;  %v2842_v35 = vld [vmem:[%s3448_s13 + $0x68] sm:$0xff]  ;;  %v2844_v37 = vld [vmem:[%s3448_s13 + $0x78] sm:$0xff]  ;;  %v2831_v38 = vld [vmem:[%s3438_s12 + $0x50] sm:$0xff] }
  0x6a   : > { %2851 = vmatmul.mubr.msk.f32.gmra.mxu1 %vm810_vm1, %v1618_v41  ;;  %934 = vmatprep.mubr.f32.mxu0 %v5238_v3  ;;  %v1642_v39 = vmul.f32 0.1, %v2831_v38  ;;  %v2824_v40 = vld [vmem:[%s3391_s25 + $0x58] sm:$0xff]  ;;  %v2826_v45 = vld [vmem:[%s3391_s25 + $0x68] sm:$0xff]  ;;  %v2827_v52 = vld [vmem:[%s3391_s25 + $0x70] sm:$0xff] }
  0x6b   : > { %1197 = vperm.xlu1 %2933, %v794_v43   ;;  %1192 = vperm.xlu0 %2932, %v793_v44   ;;  %v2832_v41 = vld [vmem:[%s3438_s12 + $0x58] sm:$0xff]  ;;  %v2833_v43 = vld [vmem:[%s3438_s12 + $0x60] sm:$0xff]  ;;  %v2834_v47 = vld [vmem:[%s3438_s12 + $0x68] sm:$0xff] }
  0x6c   : > { %1775 = vmatprep.mubr.f32.mxu1 %v5238_v3  ;;  %v1643_v42 = vmul.f32 0.1, %v2832_v41  ;;  %v1644_v44 = vmul.f32 0.1, %v2833_v43  ;;  %v1645_v48 = vmul.f32 0.1, %v2834_v47 }
  0x6d   : > { %2786 = vmatmul.mubr.msk.f32.gmra.mxu0 %vm810_vm1, %v773_v49  ;;  %v3542_v49 = vstv %s1604_s18  ;;  %v2828_v56 = vld [vmem:[%s3391_s25 + $0x78] sm:$0xff]  ;;  %v2837_v59 = vld [vmem:[%s3448_s13 + $0x40] sm:$0xff] }
  0x6e   : > { %2852 = vmatmul.mubr.msk.f32.gmra.mxu1 %vm810_vm1, %v1619_v51  ;;  %940 = vmatprep.mubr.f32.mxu0 %v5238_v3  ;;  %v3546_v51 = vadd.s32 %v3542_v49, %v3473_v53  ;;  %v3553_v58 = vadd.s32 %v3542_v49, %v3499_v6  ;;  %v3559_v53 = vadd.s32 %v3542_v49, %v3483_v60  ;;  %v2841_v63 = vld [vmem:[%s3448_s13 + $0x60] sm:$0xff]  ;;  %v3571_v6 = vand.u32 127, %v756_v9 }
  0x6f   : > { %1207 = vperm.xlu1 %2933, %v796_v54   ;;  %1202 = vperm.xlu0 %2932, %v795_v55   ;;  %v2835_v54 = vld [vmem:[%s3438_s12 + $0x70] sm:$0xff]  ;;  %v753_v4 = vld [vmem:[%s5234_s5] sm:$0x3] }
  0x70   : > { %1781 = vmatprep.mubr.f32.mxu1 %v5238_v3  ;;  %v1646_v55 = vmul.f32 0.1, %v2835_v54  ;;  %5341 = vst [vmem:[#allocation9_spill] sm:$0xff] %v3553_v58  ;;  %5342 = vst [vmem:[#allocation10_spill] sm:$0xff] %v3559_v53  ;;  %vm1042_vm14 = vcmp.ne.s32.totalorder %v3432_v28, %v3571_v6 }
  0x71   : > { %2787 = vmatmul.mubr.msk.f32.gmra.mxu0 %vm810_vm1, %v774_v61  ;;  %v2839_v61 = vld [vmem:[%s3448_s13 + $0x50] sm:$0xff] }
  0x72   : > { %946 = vmatprep.mubr.f32.mxu0 %v5238_v3  ;;  %2853 = vmatmul.mubr.msk.f32.gmra.mxu1 %vm810_vm1, %v1620_v62  ;;  %v2840_v62 = vld [vmem:[%s3448_s13 + $0x58] sm:$0xff] }
  0x73   : > { %1217 = vperm.xlu1 %2933, %v798_v1   ;;  %1212 = vperm.xlu0 %2932, %v797_v2   ;;  %v3564_v1 = vsub.s32 0, %v3413_v19  ;;  %v2843_v2 = vld [vmem:[%s3448_s13 + $0x70] sm:$0xff] }
  0x74   : > { %1787 = vmatprep.mubr.f32.mxu1 %v5238_v3 }
  0x75   : > { %2788 = vmatmul.mubr.msk.f32.gmra.mxu0 %vm810_vm1, %v775_v10  ;;  %v3577_v60 = vrot.slane %v753_v4, %v3564_v1  ;;  %v963_v10 = vadd.s32 %v3420_v22, %v3413_v19 }
  0x76   : > { %2854 = vmatmul.mubr.msk.f32.gmra.mxu1 %vm810_vm1, %v1621_v11  ;;  %v3582_v11 = vadd.s32 128, %v3571_v6  ;;  %vm1044_vm1 = vcmp.ne.s32.totalorder %v3467_v50, %v3571_v6 }
  0x77   : > { %1109 = vperm.xlu1 %2933, %v801_v14   ;;  %1222 = vperm.xlu0 %2932, %v799_v12   ;;  %v3585_v12 = vrot.slane %v753_v4, %v3574_v7  ;;  %vm1038_vm2 = vcmp.ne.s32.totalorder %v963_v10, %v3571_v6 }
  0x78   : > { %vm1039_vm4 = vcmp.ne.s32.totalorder %v963_v10, %v3582_v11  ;;  %vm1043_vm15 = vcmp.ne.s32.totalorder %v3432_v28, %v3582_v11  ;;  %v5348_v28 = vmov 0 }
  0x7b   : > { %1119 = vperm.xlu1 %2933, %v803_v15   ;;  %1114 = vperm.xlu0 %2932, %v802_v16  }
  0x7f   : > { %1129 = vperm.xlu1 %2933, %v805_v17   ;;  %1124 = vperm.xlu0 %2932, %v804_v18  }
  0x83   : > { %1139 = vperm.xlu1 %2933, %v807_v20   ;;  %1134 = vperm.xlu0 %2932, %v806_v21  }
  0x87   : > { %1805 = vperm.xlu1 %2933, %v2821_v23   ;;  %1825 = vperm.xlu0 %2932, %v2825_v25  }
  0x8b   : > { %1810 = vperm.xlu1 %2933, %v2822_v29   ;;  %2032 = vperm.xlu0 %2932, %v1647_v27   ;;  %v955_v27 = vadd.s32 8, %v3413_v19 }
  0x8f   : > { %1997 = vperm.xlu1 %2933, %v1640_v31   ;;  %1930 = vperm.xlu0 %2932, %v2838_v32   ;;  %v964_v31 = vadd.s32 %v3420_v22, %v955_v27 }
  0x91   : > { %vm1040_vm8 = vcmp.ne.s32.totalorder %v964_v31, %v3571_v6  ;;  %vm1041_vm10 = vcmp.ne.s32.totalorder %v964_v31, %v3582_v11 }
  0x93   : > { %2002 = vperm.xlu1 %2933, %v1641_v34   ;;  %1950 = vperm.xlu0 %2932, %v2842_v35  }
  0x97   : > { %1815 = vperm.xlu1 %2933, %v2823_v36   ;;  %1960 = vperm.xlu0 %2932, %v2844_v37  }
  0x9b   : > { %2007 = vperm.xlu1 %2933, %v1642_v39  }
  0x9f   : > { %1820 = vperm.xlu1 %2933, %v2824_v40  }
  0xa3   : > { %2012 = vperm.xlu1 %2933, %v1643_v42  }
  0xa7   : > { %2017 = vperm.xlu1 %2933, %v1644_v44  }
  0xab   : > { %1830 = vperm.xlu1 %2933, %v2826_v45  }
  0xaf   : > { %2022 = vperm.xlu1 %2933, %v1645_v48  }
  0xb3   : > { %1835 = vperm.xlu1 %2933, %v2827_v52  }
  0xb7   : > { %2027 = vperm.xlu1 %2933, %v1646_v55  }
  0xbb   : > { %1840 = vperm.xlu1 %2933, %v2828_v56   ;;  %v5362_v56 = vmov 0 }
  0xbf   : > { %1925 = vperm.xlu1 %2933, %v2837_v59   ;;  %v754_v59 = vld [vmem:[%s5235_s6] sm:$0x3] }
  0xc3   : > { %1935 = vperm.xlu1 %2933, %v2839_v61  }
  0xc7   : > { %1940 = vperm.xlu1 %2933, %v2840_v62   ;;  %v5364_v62 = vmov 0 }
  0xcb   : > { %1945 = vperm.xlu1 %2933, %v2841_v63   ;;  %v755_v63 = vld [vmem:[%s5236_s7] sm:$0x3] }
  0xcf   : > { %1955 = vperm.xlu1 %2933, %v2843_v2   ;;  %v3737_v2 = vrot.slane %v754_v59, %v3564_v1 }
  0xd1   : > { %v984_v14 = vpop.permute.xlu1 %983  ;;  %v974_v15 = vpop.permute.xlu0 %973 }
  0xd2   : > { %vm1022_vm3 = vcmp.eq.f32.partialorder %v974_v15, %v3577_v60  ;;  %vm1023_vm5 = vcmp.eq.f32.partialorder %v974_v15, %v3585_v12  ;;  %vm1026_vm0 = vcmp.eq.f32.partialorder %v984_v14, %v3577_v60 }
  0xd3   : > { %vm1054_vm6 = vmand %vm1022_vm3, %vm1038_vm2  ;;  %vm1027_vm2 = vcmp.eq.f32.partialorder %v984_v14, %v3585_v12  ;;  %vm1045_vm3 = vcmp.ne.s32.totalorder %v3467_v50, %v3582_v11  ;;  %v1795_v50 = vadd.s32 %v3542_v49, %v3413_v19  ;;  %v3747_v14 = vadd.s32 %v3542_v49, %v3424_v24 }
  0xd4   : > { %vm1055_vm7 = vmand %vm1023_vm5, %vm1039_vm4  ;;  %v3592_v17 = vsel %vm1054_vm6, 1.0, %v5238_v3  ;;  %vm1048_vm6 = vcmp.ne.s32.totalorder %v3491_v0, %v3571_v6 }
  0xd5   : > { %5343 = vst [vmem:[#allocation11_spill] sm:$0xff] %v3592_v17  ;;  %v3595_v18 = vsel %vm1055_vm7, 1.0, %v5238_v3 }
  0xd6   : > { %v989_v9 = vpop.permute.xlu1 %988  ;;  %v979_v16 = vpop.permute.xlu0 %978  ;;  %5344 = vst [vmem:[#allocation12_spill] sm:$0xff] %v3595_v18  ;;  %v1316_v20 = vadd.f32 %v3595_v18, %v3592_v17 }
  0xd7   : > { %vm1024_vm9 = vcmp.eq.f32.partialorder %v979_v16, %v3577_v60  ;;  %vm1025_vm11 = vcmp.eq.f32.partialorder %v979_v16, %v3585_v12  ;;  %vm1028_vm4 = vcmp.eq.f32.partialorder %v989_v9, %v3577_v60  ;;  %vm1029_vm5 = vcmp.eq.f32.partialorder %v989_v9, %v3585_v12 }
  0xd8   : > { %1317 = vadd.xlane.f32.xlu0 %v1316_v20  ;;  %vm1056_vm12 = vmand %vm1024_vm9, %vm1040_vm8  ;;  %vm1049_vm9 = vcmp.ne.s32.totalorder %v3491_v0, %v3582_v11  ;;  %v3760_v9 = vrot.slane %v754_v59, %v3574_v7  ;;  %v3763_v16 = vrot.slane %v755_v63, %v3564_v1  ;;  %v3782_v1 = vrot.slane %v755_v63, %v3574_v7 }
  0xd9   : > { %vm1057_vm13 = vmand %vm1025_vm11, %vm1041_vm10  ;;  %v3622_v22 = vsel %vm1056_vm12, 1.0, %v5238_v3 }
  0xda   : > { %v999_v21 = vpop.permute.xlu1 %998  ;;  %v994_v23 = vpop.permute.xlu0 %993  ;;  %5345 = vst [vmem:[#allocation13_spill] sm:$0xff] %v3622_v22  ;;  %v3629_v38 = vsel %vm1057_vm13, 1.0, %v5238_v3  ;;  %vm3658_vm8 = vmand %vm1026_vm0, %vm1042_vm14  ;;  %vm1046_vm14 = vcmp.ne.s32.totalorder %v3496_v5, %v3571_v6 }
  0xdb   : > { %5346 = vst [vmem:[#allocation14_spill] sm:$0xff] %v3629_v38  ;;  %v1319_v39 = vadd.f32 %v3629_v38, %v3622_v22  ;;  %vm1032_vm7 = vcmp.eq.f32.partialorder %v999_v21, %v3577_v60  ;;  %v5349_v28 = vsel %vm3658_vm8, 4294967295, %v5348_v28  ;;  %vm1033_vm10 = vcmp.eq.f32.partialorder %v999_v21, %v3585_v12  ;;  %vm3667_vm11 = vmand %vm1027_vm2, %vm1043_vm15 }
  0xdc   : > { %vm3671_vm12 = vmand %vm1028_vm4, %vm1044_vm1  ;;  %vm1030_vm0 = vcmp.eq.f32.partialorder %v994_v23, %v3577_v60  ;;  %vm1047_vm15 = vcmp.ne.s32.totalorder %v3496_v5, %v3582_v11  ;;  %vm1031_vm1 = vcmp.eq.f32.partialorder %v994_v23, %v3585_v12  ;;  %v1796_v5 = vadd.s32 %v3542_v49, %v955_v27 }
  0xdd   : > { %vm3675_vm13 = vmand %vm1029_vm5, %vm1045_vm3  ;;  %vm1052_vm3 = vcmp.ne.s32.totalorder %v3505_v8, %v3571_v6  ;;  %v3793_v23 = vadd.s32 %v3542_v49, %v3477_v57  ;;  %v3806_v27 = vsel %vm3667_vm11, 1.0, %v5238_v3  ;;  %v3811_v57 = vsel %vm3671_vm12, 1.0, %v5238_v3 }
  0xde   : > { %v3599_v25 = vpop.permute.xlu1 %1008  ;;  %v3601_v26 = vpop.permute.xlu0 %1003  ;;  %vm3684_vm8 = vmand %vm1032_vm7, %vm1048_vm6  ;;  %vm1050_vm6 = vcmp.ne.s32.totalorder %v3512_v13, %v3571_v6  ;;  %5376 = vst [vmem:[#allocation18_spill] sm:$0xff] %v3806_v27  ;;  %v3816_v31 = vsel %vm3675_vm13, 1.0, %v5238_v3  ;;  %vm1863_vm11 = vcmp.ne.s32.totalorder %v3747_v14, %v3571_v6  ;;  %vm5382_vm12 = vcmp.ne.s32.totalorder %v3512_v13, %v3582_v11 }
  0xdf   : > { %vm3693_vm2 = vmand %vm1033_vm10, %vm1049_vm9  ;;  %vm1036_vm4 = vcmp.eq.f32.partialorder %v3599_v25, %v3577_v60  ;;  %vm1860_vm9 = vcmp.ne.s32.totalorder %v1795_v50, %v3582_v11  ;;  %vm5367_vm10 = vcmp.ne.s32.totalorder %v3505_v8, %v3582_v11  ;;  %5377 = vst [vmem:[#allocation19_spill] sm:$0xff] %v3811_v57 }
  0xe0   : > { %vm3701_vm5 = vmand %vm1030_vm0, %vm1046_vm14  ;;  %5378 = vst [vmem:[#allocation20_spill] sm:$0xff] %v3816_v31 }
  0xe1   : > { %vm3707_vm7 = vmand %vm1031_vm1, %vm1047_vm15 }
  0xe2   : > { %v3604_v29 = vpop.permute.xlu1 %1187  ;;  %v3606_v30 = vpop.permute.xlu0 %1104  ;;  %v5363_v56 = vsel %vm3707_vm7, 4294967295, %v5362_v56  ;;  %vm3719_vm0 = vmand %vm1036_vm4, %vm1052_vm3  ;;  %vm1034_vm3 = vcmp.eq.f32.partialorder %v3601_v26, %v3577_v60  ;;  %vm5366_vm4 = vcmp.ne.s32.totalorder %v1795_v50, %v3571_v6  ;;  %vm1861_vm7 = vcmp.ne.s32.totalorder %v1796_v5, %v3571_v6 }
  0xe3   : > { %v5365_v62 = vsel %vm3719_vm0, 4294967295, %v5364_v62  ;;  %v1153_v48 = vmul.f32 %v3763_v16, %v3606_v30  ;;  %v1237_v55 = vmul.f32 %v3760_v9, %v3604_v29 }
  0xe6   : > { %v3609_v32 = vpop.permute.xlu1 %1197  ;;  %v3611_v33 = vpop.permute.xlu0 %1192 }
  0xe7   : > { %v1241_v63 = vmul.f32 %v3760_v9, %v3609_v32 }
  0xea   : > { %v3617_v34 = vpop.permute.xlu1 %1207  ;;  %v3619_v35 = vpop.permute.xlu0 %1202 }
  0xeb   : > { %v1242_v15 = vmul.f32 %v3737_v2, %v3619_v35 }
  0xee   : > { %v3624_v36 = vpop.permute.xlu1 %1217  ;;  %v3626_v37 = vpop.permute.xlu0 %1212 }
  0xef   : > { %v1246_v53 = vmul.f32 %v3737_v2, %v3626_v37  ;;  %v1248_v58 = vmul.f32 %v3737_v2, %v3624_v36 }
  0xf2   : > { %v3633_v40 = vpop.permute.xlu1 %1109  ;;  %v3635_v41 = vpop.permute.xlu0 %1222 }
  0xf3   : > { %5347 = vst [vmem:[#allocation15_spill] sm:$0xff] %v3633_v40  ;;  %1320 = vadd.xlane.f32.xlu1 %v1319_v39  ;;  %v3833_v39 = vsel %vm3693_vm2, 1.0, %v5238_v3  ;;  %vm5383_vm2 = vnez %v5363_v56 }
  0xf4   : > { %5380 = vst [vmem:[#allocation22_spill] sm:$0xff] %v3833_v39  ;;  %v3856_v47 = vsel %vm5383_vm2, 1.0, %v5238_v3 }
  0xf5   : > { %5384 = vst [vmem:[#allocation24_spill] sm:$0xff] %v3856_v47 }
  0xf6   : > { %v3637_v42 = vpop.permute.xlu1 %1119  ;;  %v3639_v43 = vpop.permute.xlu0 %1114 }
  0xfa   : > { %v3648_v44 = vpop.permute.xlu1 %1129  ;;  %v3691_v52 = vpop.permute.xlu0 %1124 }
  0xfe   : > { %v3682_v0 = vpop.permute.xlu1 %1139  ;;  %v3739_v4 = vpop.permute.xlu0 %1134 }
 0x102   : > { %v1806_v61 = vpop.permute.xlu1 %1805  ;;  %v3867_v19 = vpop.permute.xlu0 %1825 }
 0x103   : > { %vm1843_vm15 = vcmp.eq.f32.partialorder %v1806_v61, %v3577_v60  ;;  %vm1844_vm1 = vcmp.eq.f32.partialorder %v1806_v61, %v3585_v12  ;;  %vm1852_vm2 = vcmp.eq.f32.partialorder %v3867_v19, %v3585_v12 }
 0x104   : > { %vm1875_vm14 = vmand %vm1843_vm15, %vm5366_vm4  ;;  %vm5368_vm15 = vcmp.eq.f32.partialorder %v3599_v25, %v3585_v12  ;;  %v3801_v25 = vadd.s32 %v3542_v49, %v3459_v46  ;;  %v3828_v49 = vsel %vm3684_vm8, 1.0, %v5238_v3  ;;  %vm1864_vm8 = vcmp.ne.s32.totalorder %v3747_v14, %v3582_v11 }
 0x105   : > { %vm1876_vm0 = vmand %vm1844_vm1, %vm1860_vm9  ;;  %v3743_v10 = vsel %vm1875_vm14, 1.0, %v5238_v3  ;;  %vm1862_vm9 = vcmp.ne.s32.totalorder %v1796_v5, %v3582_v11  ;;  %vm1035_vm14 = vcmp.eq.f32.partialorder %v3601_v26, %v3585_v12  ;;  %5379 = vst [vmem:[#allocation21_spill] sm:$0xff] %v3828_v49  ;;  %v1236_v26 = vmul.f32 %v3737_v2, %v3604_v29 }
 0x106   : > { %vm3755_vm4 = vmand %vm5368_vm15, %vm5367_vm10  ;;  %v1811_v24 = vpop.permute.xlu1 %1810  ;;  %v3767_v20 = vsel %vm1876_vm0, 1.0, %v5238_v3  ;;  %vm5374_vm15 = vnez %v5349_v28  ;;  %v3838_v28 = vsel %vm3701_vm5, 1.0, %v5238_v3  ;;  %vm5385_vm5 = vnez %v5365_v62 }
 0x107   : > { %5371 = vst [vmem:[#allocation16_spill] sm:$0xff] %v3767_v20  ;;  %vm3777_vm10 = vmand %vm1034_vm3, %vm1050_vm6  ;;  %vm1845_vm1 = vcmp.eq.f32.partialorder %v1811_v24, %v3577_v60  ;;  %vm1846_vm0 = vcmp.eq.f32.partialorder %v1811_v24, %v3585_v12  ;;  %v3789_v21 = vsel %vm5374_vm15, 1.0, %v5238_v3  ;;  %v2115_v7 = vadd.f32 %v3767_v20, %v3743_v10 }
 0x108   : > { %5375 = vst [vmem:[#allocation17_spill] sm:$0xff] %v3789_v21  ;;  %vm1877_vm6 = vmand %vm1845_vm1, %vm1861_vm7  ;;  %v3861_v13 = vsel %vm5385_vm5, 1.0, %v5238_v3  ;;  %v3872_v54 = vsel %vm3755_vm4, 1.0, %v5238_v3  ;;  %v1154_v5 = vmul.f32 %v3782_v1, %v3606_v30  ;;  %v3883_v59 = vsel %vm3777_vm10, 1.0, %v5238_v3 }
 0x109   : > { %vm1878_vm7 = vmand %vm1846_vm0, %vm1862_vm9  ;;  %v3821_v46 = vsel %vm1877_vm6, 1.0, %v5238_v3  ;;  %5381 = vst [vmem:[#allocation23_spill] sm:$0xff] %v3838_v28  ;;  %2116 = vadd.xlane.f32.xlu0 %v2115_v7  ;;  %v1238_v62 = vmul.f32 %v3737_v2, %v3611_v33  ;;  %v1239_v29 = vmul.f32 %v3760_v9, %v3611_v33  ;;  %v1240_v30 = vmul.f32 %v3737_v2, %v3609_v32 }
 0x10a   : > { %vm1067_vm13 = vmand %vm1035_vm14, %vm5382_vm12  ;;  %v3846_v50 = vpop.permute.xlu1 %1997  ;;  %v3849_v45 = vsel %vm1878_vm7, 1.0, %v5238_v3  ;;  %5386 = vst [vmem:[#allocation25_spill] sm:$0xff] %v3861_v13  ;;  %v1243_v24 = vmul.f32 %v3760_v9, %v3619_v35  ;;  %v3903_v7 = vmul.f32 %v3592_v17, %v1153_v48  ;;  %v1244_v33 = vmul.f32 %v3737_v2, %v3617_v34 }
 0x10b   : > { %5387 = vst [vmem:[#allocation26_spill] sm:$0xff] %v3872_v54  ;;  %v2118_v56 = vadd.f32 %v3849_v45, %v3821_v46  ;;  %5388 = vst [vmem:[#allocation27_spill] sm:$0xff] %v3883_v59  ;;  %v3886_v61 = vsel %vm1067_vm13, 1.0, %v5238_v3  ;;  %v1245_v3 = vmul.f32 %v3760_v9, %v3617_v34  ;;  %v3910_v32 = vmul.f32 %v3592_v17, %v1236_v26  ;;  %v3926_v26 = vpop.permute.xlu0 %2032 }
 0x10c   : > { %5389 = vst [vmem:[#allocation28_spill] sm:$0xff] %v3886_v61  ;;  %5390 = vst [vmem:[#allocation29_spill] sm:$0xff] %v3903_v7  ;;  %v1247_v35 = vmul.f32 %v3760_v9, %v3626_v37  ;;  %v3920_v48 = vmul.f32 %v3595_v18, %v1237_v55  ;;  %v1249_v34 = vmul.f32 %v3760_v9, %v3624_v36 }
 0x10d   : > { %2119 = vadd.xlane.f32.xlu1 %v2118_v56  ;;  %v3917_v56 = vmul.f32 %v3595_v18, %v1154_v5  ;;  %v3929_v17 = vmul.f32 %v3622_v22, %v1238_v62  ;;  %v3932_v54 = vmul.f32 %v3629_v38, %v1239_v29  ;;  %v3935_v5 = vmul.f32 %v3789_v21, %v1240_v30 }
 0x10e   : > { %v3900_v8 = vpop.permute.xlu1 %2002  ;;  %v3938_v55 = vmul.f32 %v3806_v27, %v1241_v63  ;;  %v3941_v18 = vmul.f32 %v3811_v57, %v1242_v15  ;;  %v3944_v36 = vmul.f32 %v3816_v31, %v1243_v24  ;;  %v3949_v62 = vmul.f32 %v3838_v28, %v1244_v33 }
 0x10f   : > { %5391 = vst [vmem:[#allocation30_spill] sm:$0xff] %v3917_v56  ;;  %v3952_v29 = vmul.f32 %v3856_v47, %v1245_v3  ;;  %v1250_v30 = vmul.f32 %v3737_v2, %v3635_v41  ;;  %v1159_v63 = vmul.f32 %v3763_v16, %v3637_v42  ;;  %v3966_v24 = vmul.f32 %v3828_v49, %v1246_v53 }
 0x110   : > { %5392 = vst [vmem:[#allocation31_spill] sm:$0xff] %v3949_v62  ;;  %v3969_v33 = vmul.f32 %v3833_v39, %v1247_v35  ;;  %v3973_v3 = vmul.f32 %v3763_v16, %v3633_v40  ;;  %v3985_v53 = vmul.f32 %v3883_v59, %v1248_v58  ;;  %v3988_v35 = vmul.f32 %v3886_v61, %v1249_v34 }
 0x111   : > { %5395 = vst [vmem:[#allocation32_spill] sm:$0xff] %v3966_v24  ;;  %v3992_v40 = vmul.f32 %v3760_v9, %v3635_v41  ;;  %v1158_v14 = vmul.f32 %v3782_v1, %v3639_v43  ;;  %v1163_v38 = vmul.f32 %v3763_v16, %v3648_v44  ;;  %vm1867_vm10 = vcmp.ne.s32.totalorder %v3793_v23, %v3571_v6 }
 0x112   : > { %v1816_v37 = vpop.permute.xlu1 %1815  ;;  %5396 = vst [vmem:[#allocation33_spill] sm:$0xff] %v3969_v33  ;;  %5397 = vst [vmem:[#allocation34_spill] sm:$0xff] %v3973_v3  ;;  %v1160_v3 = vmul.f32 %v3782_v1, %v3637_v42  ;;  %v1161_v34 = vmul.f32 %v3763_v16, %v3691_v52  ;;  %v1162_v41 = vmul.f32 %v3782_v1, %v3691_v52  ;;  %v5404_v24 = vmov 0.0  }
 0x113   : > { %vm1847_vm3 = vcmp.eq.f32.partialorder %v1816_v37, %v3577_v60  ;;  %vm1848_vm4 = vcmp.eq.f32.partialorder %v1816_v37, %v3585_v12  ;;  %v1157_v37 = vmul.f32 %v3763_v16, %v3639_v43  ;;  %5400 = vst [vmem:[#allocation35_spill] sm:$0xff] %v3985_v53  ;;  %5401 = vst [vmem:[#allocation36_spill] sm:$0xff] %v3988_v35 }
 0x114   : > { %vm3961_vm9 = vmand %vm1847_vm3, %vm1863_vm11  ;;  %5402 = vst [vmem:[#allocation37_spill] sm:$0xff] %v3992_v40  ;;  %v1931_v40 = vpop.permute.xlu0 %1930  ;;  %vm1865_vm1 = vcmp.ne.s32.totalorder %v3801_v25, %v3571_v6  ;;  %v4011_v43 = vmul.f32 %v3811_v57, %v1159_v63  ;;  %v4024_v33 = vmul.f32 %v3861_v13, %v1250_v30  ;;  %v1164_v63 = vmul.f32 %v3782_v1, %v3648_v44 }
 0x115   : > { %vm3980_vm14 = vmand %vm1848_vm4, %vm1864_vm8  ;;  %v4016_v35 = vsel %vm3961_vm9, 1.0, %v5404_v24  ;;  %vm1866_vm0 = vcmp.ne.s32.totalorder %v3801_v25, %v3582_v11  ;;  %v4040_v62 = vmul.f32 %v3828_v49, %v1163_v38  ;;  %v1965_v30 = vmul.f32 %v1931_v40, %v3763_v16 }
 0x116   : > { %v2008_v58 = vpop.permute.xlu1 %2007  ;;  %5403 = vst [vmem:[#allocation38_spill] sm:$0xff] %v4011_v43  ;;  %5405 = vst [vmem:[#allocation39_spill] sm:$0xff] %v4016_v35  ;;  %v4021_v52 = vsel %vm3980_vm14, 1.0, %v5404_v24  ;;  %v4046_v44 = vmul.f32 %v3806_v27, %v1158_v14  ;;  %v2035_v38 = vmul.f32 %v3846_v50, %v3737_v2  ;;  %v1165_v14 = vmul.f32 %v3763_v16, %v3739_v4 }
 0x117   : > { %v2039_v53 = vmul.f32 %v2008_v58, %v3737_v2  ;;  %v2040_v42 = vmul.f32 %v2008_v58, %v3760_v9  ;;  %5406 = vst [vmem:[#allocation40_spill] sm:$0xff] %v4021_v52  ;;  %5407 = vst [vmem:[#allocation41_spill] sm:$0xff] %v4024_v33  ;;  %v4027_v58 = vmul.f32 %v3789_v21, %v1157_v37 }
 0x118   : > { %5409 = vst [vmem:[#allocation43_spill] sm:$0xff] %v4040_v62  ;;  %5411 = vst [vmem:[#allocation45_spill] sm:$0xff] %v4046_v44  ;;  %v4049_v33 = vmul.f32 %v3816_v31, %v1160_v3  ;;  %v1168_v31 = vmul.f32 %v3782_v1, %v3682_v0  ;;  %v1166_v27 = vmul.f32 %v3782_v1, %v3739_v4 }
 0x119   : > { %5408 = vst [vmem:[#allocation42_spill] sm:$0xff] %v4027_v58  ;;  %v906_v57 = vpop.f32.mrf.mxu0  ;;  %v4034_v15 = vmul.f32 %v4016_v35, %v2039_v53  ;;  %v4037_v22 = vmul.f32 %v4021_v52, %v2040_v42  ;;  %v4052_v53 = vmul.f32 %v3838_v28, %v1161_v34  ;;  %v1167_v42 = vmul.f32 %v3763_v16, %v3682_v0 }
 0x11a   : > { %v4043_v37 = vpop.f32.mrf.mxu1  ;;  %v1821_v21 = vpop.permute.xlu1 %1820  ;;  %5412 = vst [vmem:[#allocation46_spill] sm:$0xff] %v4049_v33  ;;  %v4059_v35 = vmul.f32 %v3856_v47, %v1162_v41  ;;  %v1966_v52 = vmul.f32 %v1931_v40, %v3782_v1  ;;  %v1412_v3 = vmul.f32 %v3903_v7, %v906_v57  ;;  %v2036_v41 = vmul.f32 %v3846_v50, %v3760_v9 }
 0x11b   : > { %5410 = vst [vmem:[#allocation44_spill] sm:$0xff] %v4043_v37  ;;  %5413 = vst [vmem:[#allocation47_spill] sm:$0xff] %v4052_v53  ;;  %v908_v49 = vpop.f32.mrf.mxu0  ;;  %v4077_v62 = vmul.f32 %v3833_v39, %v1164_v63  ;;  %vm1868_vm15 = vcmp.ne.s32.totalorder %v3793_v23, %v3582_v11  ;;  %vm1851_vm6 = vcmp.eq.f32.partialorder %v3867_v19, %v3577_v60 }
 0x11c   : > { %5414 = vst [vmem:[#allocation48_spill] sm:$0xff] %v4059_v35  ;;  %v1413_v34 = vmul.f32 %v3917_v56, %v908_v49  ;;  %v4066_v28 = vpop.f32.mrf.mxu1  ;;  %v1268_v40 = vsub.f32 %v906_v57, %v3910_v32  ;;  %v4089_v4 = vmul.f32 %v3821_v46, %v1965_v30  ;;  %v2037_v63 = vmul.f32 %v3900_v8, %v3737_v2  ;;  %vm4117_vm11 = vmand %vm1851_vm6, %vm1867_vm10 }
 0x11d   : > { %5415 = vst [vmem:[#allocation49_spill] sm:$0xff] %v4066_v28  ;;  %v4074_v47 = vpop.f32.mrf.mxu0  ;;  %5417 = vst [vmem:[#allocation51_spill] sm:$0xff] %v4077_v62  ;;  %v2051_v7 = vmul.f32 %v3743_v10, %v2035_v38  ;;  %vm1849_vm7 = vcmp.eq.f32.partialorder %v1821_v21, %v3577_v60  ;;  %v1269_v39 = vsub.f32 %v908_v49, %v3920_v48 }
 0x11e   : > { %5416 = vst [vmem:[#allocation50_spill] sm:$0xff] %v4074_v47  ;;  %v4084_v0 = vadd.f32 %v1413_v34, %v1412_v3  ;;  %v4086_v56 = vpop.f32.mrf.mxu1  ;;  %5419 = vst [vmem:[#allocation53_spill] sm:$0xff] %v4089_v4  ;;  %v2013_v50 = vpop.permute.xlu1 %2012  ;;  %v4099_v57 = vmul.f32 %v3861_v13, %v1167_v42  ;;  %v4102_v32 = vmul.f32 %v3883_v59, %v1165_v14  ;;  %v1284_v14 = vmul.f32 1.442695, %v1268_v40  ;;  %v5430_v40 = vld [vmem:[#allocation26_spill] sm:$0xff] }
 0x11f   : > { %v4096_v62 = vpop.f32.mrf.mxu0  ;;  %v2213_v30 = vmul.f32 %v4089_v4, %v4086_v56  ;;  %v4109_v34 = vmul.f32 %v3849_v45, %v1966_v52  ;;  %v2038_v48 = vmul.f32 %v3900_v8, %v3760_v9  ;;  %v2067_v42 = vsub.f32 %v4043_v37, %v2051_v7  ;;  %vm4135_vm8 = vmand %vm1849_vm7, %vm1865_vm1 }
 0x120   : > { %5418 = vst [vmem:[#allocation52_spill] sm:$0xff] %v4084_v0  ;;  %5420 = vst [vmem:[#allocation54_spill] sm:$0xff] %v4096_v62  ;;  %v4106_v3 = vpop.f32.mrf.mxu1  ;;  %vm1850_vm12 = vcmp.eq.f32.partialorder %v1821_v21, %v3585_v12  ;;  %v2052_v52 = vmul.f32 %v3767_v20, %v2036_v41  ;;  %vm1869_vm13 = vcmp.ne.s32.totalorder %v3546_v51, %v3571_v6  ;;  %v1286_v59 = vmul.f32 1.442695, %v1269_v39 }
 0x121   : > { %5421 = vst [vmem:[#allocation55_spill] sm:$0xff] %v4099_v57  ;;  %5422 = vst [vmem:[#allocation56_spill] sm:$0xff] %v4102_v32  ;;  %v4126_v38 = vpop.f32.mrf.mxu0  ;;  %v2214_v8 = vmul.f32 %v4109_v34, %v4106_v3  ;;  %v4146_v0 = vmul.f32 %v3886_v61, %v1166_v27  ;;  %v4149_v13 = vmul.f32 %v5430_v40, %v1168_v31  ;;  %v2083_v49 = vmul.f32 1.442695, %v2067_v42 }
 0x122   : > { %5423 = vst [vmem:[#allocation57_spill] sm:$0xff] %v4109_v34  ;;  %v4141_v7 = vpop.f32.mrf.mxu1  ;;  %v4143_v41 = vpop.permute.xlu1 %2017  ;;  %v2068_v37 = vsub.f32 %v4066_v28, %v2052_v52  ;;  %v2053_v57 = vmul.f32 %v3821_v46, %v2037_v63  ;;  %v4158_v34 = vsel %vm4117_vm11, 1.0, %v5404_v24  ;;  %vm4165_vm5 = vmand %vm1850_vm12, %vm1866_vm0  ;;  %v1270_v31 = vsub.f32 %v4074_v47, %v3929_v17 }
 0x123   : > { %5428 = vst [vmem:[#allocation58_spill] sm:$0xff] %v4141_v7  ;;  %5429 = vst [vmem:[#allocation59_spill] sm:$0xff] %v4146_v0  ;;  %v920_v20 = vpop.f32.mrf.mxu0  ;;  %v2041_v39 = vmul.f32 %v2013_v50, %v3737_v2  ;;  %v4172_v63 = vadd.f32 %v2214_v8, %v2213_v30  ;;  %v4179_v25 = vsel %vm4135_vm8, 1.0, %v5404_v24  ;;  %v2054_v61 = vmul.f32 %v3849_v45, %v2038_v48 }
 0x124   : > { %5431 = vst [vmem:[#allocation26_spill] sm:$0xff] %v4149_v13  ;;  %v4174_v52 = vpop.f32.mrf.mxu1  ;;  %5436 = vst [vmem:[#allocation62_spill] sm:$0xff] %v4179_v25  ;;  %v2069_v21 = vsub.f32 %v4086_v56, %v2053_v57  ;;  %vm1870_vm3 = vcmp.ne.s32.totalorder %v3546_v51, %v3582_v11  ;;  %2935 = vpow2.f32 %v1284_v14  ;;  %v1271_v17 = vsub.f32 %v4096_v62, %v3932_v54  ;;  %v1951_v54 = vpop.permute.xlu0 %1950 }
 0x125   : > { %5434 = vst [vmem:[#allocation60_spill] sm:$0xff] %v4172_v63  ;;  %5435 = vst [vmem:[#allocation61_spill] sm:$0xff] %v4174_v52  ;;  %v4183_v28 = vpop.f32.mrf.mxu0  ;;  %v1416_v30 = vmul.f32 %v4027_v58, %v4126_v38  ;;  %v1417_v4 = vmul.f32 %v4046_v44, %v920_v20  ;;  %v4197_v56 = vsel %vm4165_vm5, 1.0, %v5404_v24  ;;  %2937 = vpow2.f32 %v1286_v59 }
 0x126   : > { %v4192_v42 = vpop.f32.mrf.mxu1  ;;  %v1831_v8 = vpop.permute.xlu1 %1830  ;;  %5438 = vst [vmem:[#allocation64_spill] sm:$0xff] %v4197_v56  ;;  %v2085_v57 = vmul.f32 1.442695, %v2068_v37  ;;  %v2042_v48 = vmul.f32 %v2013_v50, %v3760_v9  ;;  %v1288_v63 = vmul.f32 1.442695, %v1270_v31  ;;  %v2070_v58 = vsub.f32 %v4106_v3, %v2054_v61  ;;  %vm4216_vm4 = vmand %vm1852_vm2, %vm1868_vm15 }
 0x127   : > { %5437 = vst [vmem:[#allocation63_spill] sm:$0xff] %v4192_v42  ;;  %v4200_v14 = vpop.f32.mrf.mxu0  ;;  %v4203_v62 = vadd.f32 %v1417_v4, %v1416_v30  ;;  %v4206_v44 = vmul.f32 %v4179_v25, %v2041_v39  ;;  %2939 = vpow2.f32 %v2083_v49  ;;  %v2087_v37 = vmul.f32 1.442695, %v2069_v21  ;;  %v5467_v25 = vld [vmem:[#allocation12_spill] sm:$0xff] }
 0x128   : > { %v4208_v47 = vpop.f32.mrf.mxu1  ;;  %v1272_v61 = vsub.f32 %v4126_v38, %v3935_v5  ;;  %vm1853_vm9 = vcmp.eq.f32.partialorder %v1831_v8, %v3577_v60  ;;  %v1290_v3 = vmul.f32 1.442695, %v1271_v17  ;;  %v2071_v23 = vsub.f32 %v4141_v7, %v4034_v15  ;;  %v5443_v17 = vld [vmem:[#allocation9_spill] sm:$0xff]  ;;  %v5458_v7 = vld [vmem:[#allocation31_spill] sm:$0xff] }
 0x129   : > { %5439 = vst [vmem:[#allocation65_spill] sm:$0xff] %v4203_v62  ;;  %5440 = vst [vmem:[#allocation66_spill] sm:$0xff] %v4208_v47  ;;  %v4223_v50 = vpop.f32.mrf.mxu0  ;;  %v1273_v27 = vsub.f32 %v920_v20, %v3938_v55  ;;  %v1419_v19 = vmul.f32 %v4049_v33, %v4200_v14  ;;  %v4234_v49 = vmul.f32 %v3926_v26, %v3737_v2  ;;  %2941 = vpow2.f32 %v2085_v57 }
 0x12a   : > { %v4230_v31 = vpop.f32.mrf.mxu1  ;;  %v2023_v39 = vpop.permute.xlu1 %2022  ;;  %v1418_v5 = vmul.f32 %v4011_v43, %v4183_v28  ;;  %v4239_v38 = vmul.f32 %v4197_v56, %v2042_v48  ;;  %v4246_v20 = vsel %vm4216_vm4, 1.0, %v5404_v24  ;;  %v4250_v55 = vmul.f32 %v3926_v26, %v3760_v9  ;;  %vm1885_vm14 = vmand %vm1853_vm9, %vm1869_vm13 }
 0x12b   : > { %v4241_v15 = vpop.f32.mrf.mxu0  ;;  %2943 = vpow2.f32 %v1288_v63  ;;  %v2089_v21 = vmul.f32 1.442695, %v2070_v58  ;;  %vm1871_vm10 = vcmp.ne.s32.totalorder %v5443_v17, %v3571_v6  ;;  %v1292_v30 = vmul.f32 1.442695, %v1272_v61  ;;  %v4266_v58 = vpop.permute.xlu0 %1960 }
 0x12c   : > { %2945 = vpow2.f32 %v2087_v37  ;;  %vm1854_vm1 = vcmp.eq.f32.partialorder %v1831_v8, %v3585_v12  ;;  %v4260_v4 = vadd.f32 %v1419_v19, %v1418_v5  ;;  %v4262_v57 = vpop.f32.mrf.mxu1  ;;  %v2091_v63 = vmul.f32 1.442695, %v2071_v23 }
 0x12d   : > { %v4264_v26 = vpop.f32.mrf.mxu0  ;;  %2947 = vpow2.f32 %v1290_v3  ;;  %v1294_v48 = vmul.f32 1.442695, %v1273_v27  ;;  %v2072_v59 = vsub.f32 %v4174_v52, %v4037_v22  ;;  %v4273_v37 = vsel %vm1885_vm14, 1.0, %v5404_v24  ;;  %vm4289_vm0 = vmand %vm1854_vm1, %vm1870_vm3 }
 0x12e   : > { %5444 = vst [vmem:[#allocation9_spill] sm:$0xff] %v4260_v4  ;;  %v4270_v62 = vpop.permute.xlu1 %1835  ;;  %5445 = vst [vmem:[#allocation67_spill] sm:$0xff] %v4273_v37  ;;  %v1420_v61 = vmul.f32 %v4052_v53, %v4223_v50  ;;  %v2045_v19 = vmul.f32 %v2023_v39, %v3737_v2  ;;  %v1421_v5 = vmul.f32 %v4059_v35, %v4241_v15  ;;  %2949 = vpow2.f32 %v2089_v21  ;;  %v4305_v8 = vpop.f32.mrf.mxu1 }
 0x12f   : > { %v4280_v4 = vpop.f32.mrf.mxu0  ;;  %v1973_v3 = vmul.f32 %v1951_v54, %v3763_v16  ;;  %v1974_v23 = vmul.f32 %v1951_v54, %v3782_v1  ;;  %v1275_v27 = vsub.f32 %v4200_v14, %v3944_v36  ;;  %vm1872_vm15 = vcmp.ne.s32.totalorder %v5443_v17, %v3582_v11 }
 0x130   : > { %v4299_v35 = vmul.f32 %v4266_v58, %v3763_v16  ;;  %2951 = vpow2.f32 %v1292_v30  ;;  %v2044_v51 = vmul.f32 %v4143_v41, %v3760_v9  ;;  %v4303_v54 = vadd.f32 %v1421_v5, %v1420_v61 }
 0x131   : > { %2953 = vpow2.f32 %v1294_v48  ;;  %v2093_v21 = vmul.f32 1.442695, %v2072_v59  ;;  %v1274_v36 = vsub.f32 %v4183_v28, %v3941_v18  ;;  %v4310_v14 = vmul.f32 %v4273_v37, %v1973_v3  ;;  %v4312_v53 = vpop.f32.mrf.mxu0  ;;  %v4314_v43 = vpop.eup %2935  ;;  %v5454_v3 = vld [vmem:[#allocation43_spill] sm:$0xff] }
 0x132   : > { %5448 = vst [vmem:[#allocation68_spill] sm:$0xff] %v4303_v54  ;;  %v2028_v33 = vpop.permute.xlu1 %2027  ;;  %5450 = vst [vmem:[#allocation70_spill] sm:$0xff] %v4314_v43  ;;  %2955 = vpow2.f32 %v2091_v63  ;;  %v4319_v30 = vsel %vm4289_vm0, 1.0, %v5404_v24  ;;  %v2046_v48 = vmul.f32 %v2023_v39, %v3760_v9  ;;  %v4323_v59 = vmul.f32 %v4273_v37, %v2045_v19  ;;  %v4325_v18 = vpop.eup %2937  ;;  %v5453_v63 = vld [vmem:[#allocation10_spill] sm:$0xff] }
 0x133   : > { %5449 = vst [vmem:[#allocation69_spill] sm:$0xff] %v4310_v14  ;;  %5451 = vst [vmem:[#allocation71_spill] sm:$0xff] %v4319_v30  ;;  %v2073_v28 = vsub.f32 %v4192_v42, %v4206_v44  ;;  %v1298_v61 = vmul.f32 1.442695, %v1275_v27  ;;  %v2221_v5 = vmul.f32 %v4310_v14, %v4305_v8  ;;  %vm1855_vm6 = vcmp.eq.f32.partialorder %v4270_v62, %v3577_v60  ;;  %v5455_v44 = vld [vmem:[#allocation51_spill] sm:$0xff]  ;;  %v4343_v54 = vpop.f32.mrf.mxu1  ;;  %v5477_v14 = vld [vmem:[#allocation33_spill] sm:$0xff] }
 0x134   : > { %5452 = vst [vmem:[#allocation72_spill] sm:$0xff] %v4325_v18  ;;  %vm1873_vm7 = vcmp.ne.s32.totalorder %v5453_v63, %v3571_v6  ;;  %v2074_v39 = vsub.f32 %v4208_v47, %v4239_v38  ;;  %v1277_v19 = vsub.f32 %v4241_v15, %v3952_v29  ;;  %v1422_v22 = vmul.f32 %v5454_v3, %v4264_v26  ;;  %v4347_v37 = vpop.eup %2939  ;;  %v4354_v15 = vpop.f32.mrf.mxu0  ;;  %vm4364_vm12 = vmand %vm1855_vm6, %vm1871_vm10 }
 0x135   : > { %v1423_v27 = vmul.f32 %v5455_v44, %v4280_v4  ;;  %vm1874_vm11 = vcmp.ne.s32.totalorder %v5453_v63, %v3582_v11  ;;  %5456 = vst [vmem:[#allocation10_spill] sm:$0xff] %v4347_v37  ;;  %v2043_v52 = vmul.f32 %v4143_v41, %v3737_v2  ;;  %2957 = vpow2.f32 %v2093_v21  ;;  %v4381_v47 = vpop.f32.mrf.mxu1  ;;  %v5479_v63 = vld [vmem:[#allocation55_spill] sm:$0xff] }
 0x136   : > { %v1296_v38 = vmul.f32 1.442695, %v1274_v36  ;;  %v4352_v29 = vmul.f32 %v4319_v30, %v1974_v23  ;;  %v1841_v3 = vpop.permute.xlu1 %1840  ;;  %v1276_v44 = vsub.f32 %v4223_v50, %v5458_v7  ;;  %v4371_v23 = vmul.f32 %v4319_v30, %v2046_v48  ;;  %v4375_v36 = vpop.eup %2941 }
 0x137   : > { %v4368_v41 = vadd.f32 %v1423_v27, %v1422_v22  ;;  %v1340_v21 = vadd.f32 %v4325_v18, %v4314_v43  ;;  %5462 = vst [vmem:[#allocation74_spill] sm:$0xff] %v4375_v36  ;;  %v2095_v7 = vmul.f32 1.442695, %v2073_v28  ;;  %2959 = vpow2.f32 %v1298_v61 }
 0x138   : > { %5457 = vst [vmem:[#allocation73_spill] sm:$0xff] %v4352_v29  ;;  %vm1856_vm13 = vcmp.eq.f32.partialorder %v4270_v62, %v3585_v12  ;;  %v2222_v50 = vmul.f32 %v4352_v29, %v4343_v54  ;;  %v4383_v22 = vpop.eup %2943  ;;  %v2097_v27 = vmul.f32 1.442695, %v2074_v39  ;;  %v1302_v48 = vmul.f32 1.442695, %v1277_v19  ;;  %v5466_v29 = vld [vmem:[#allocation11_spill] sm:$0xff]  ;;  %v4400_v19 = vpop.f32.mrf.mxu0 }
 0x139   : > { %5461 = vst [vmem:[#allocation31_spill] sm:$0xff] %v4368_v41  ;;  %5463 = vst [vmem:[#allocation75_spill] sm:$0xff] %v4383_v22  ;;  %v2060_v41 = vmul.f32 %v4246_v20, %v2044_v51  ;;  %1341 = vadd.xlane.f32.xlu1 %v1340_v21  ;;  %v2047_v30 = vmul.f32 %v2028_v33, %v3737_v2  ;;  %v4387_v42 = vpop.eup %2945  ;;  %v4392_v28 = vsel %vm4364_vm12, 1.0, %v5404_v24  ;;  %2961 = vpow2.f32 %v1296_v38 }
 0x13a   : > { %5464 = vst [vmem:[#allocation76_spill] sm:$0xff] %v4387_v42  ;;  %v4394_v61 = vadd.f32 %v2222_v50, %v2221_v5  ;;  %v1364_v56 = vmul.f32 %v4314_v43, %v5466_v29  ;;  %v1365_v39 = vmul.f32 %v4325_v18, %v5467_v25  ;;  %v4402_v51 = vpop.permute.xlu1 %1925  ;;  %v4404_v2 = vpop.eup %2947  ;;  %vm4412_vm8 = vmand %vm1856_vm13, %vm1872_vm15  ;;  %v1424_v5 = vmul.f32 %v4102_v32, %v4312_v53 }
 0x13b   : > { %5468 = vst [vmem:[#allocation11_spill] sm:$0xff] %v4404_v2  ;;  %v2048_v25 = vmul.f32 %v2028_v33, %v3760_v9  ;;  %v1425_v29 = vmul.f32 %v4146_v0, %v4354_v15  ;;  %v4422_v21 = vmul.f32 %v4392_v28, %v2047_v30  ;;  %v2076_v17 = vsub.f32 %v4262_v57, %v2060_v41  ;;  %v4427_v18 = vpop.f32.mrf.mxu1  ;;  %v4429_v43 = vpop.eup %2949 }
 0x13c   : > { %5465 = vst [vmem:[#allocation77_spill] sm:$0xff] %v4394_v61  ;;  %v1380_v50 = vadd.f32 %v1365_v39, %v1364_v56  ;;  %v2139_v62 = vadd.f32 %v4375_v36, %v4347_v37  ;;  %5471 = vst [vmem:[#allocation12_spill] sm:$0xff] %v4429_v43  ;;  %v1978_v9 = vmul.f32 %v4266_v58, %v3782_v1  ;;  %2963 = vpow2.f32 %v2095_v7  ;;  %v4445_v58 = vpop.f32.mrf.mxu0 }
 0x13d   : > { %v2059_v33 = vmul.f32 %v4158_v34, %v2043_v52  ;;  %v4434_v61 = vadd.f32 %v1425_v29, %v1424_v5  ;;  %v4436_v30 = vpop.eup %2951  ;;  %2965 = vpow2.f32 %v2097_v27  ;;  %v4441_v56 = vsel %vm4412_vm8, 1.0, %v5404_v24 }
 0x13e   : > { %5473 = vst [vmem:[#allocation79_spill] sm:$0xff] %v4436_v30  ;;  %1381 = vadd.xlane.f32.xlu0 %v1380_v50  ;;  %2140 = vadd.xlane.f32.xlu1 %v2139_v62  ;;  %vm1857_vm2 = vcmp.eq.f32.partialorder %v1841_v3, %v3577_v60  ;;  %vm1858_vm5 = vcmp.eq.f32.partialorder %v1841_v3, %v3585_v12  ;;  %v4447_v38 = vpop.eup %2953  ;;  %v1300_v52 = vmul.f32 1.442695, %v1276_v44  ;;  %2967 = vpow2.f32 %v1302_v48  ;;  %v5476_v44 = vld [vmem:[#allocation16_spill] sm:$0xff]  ;;  %v4468_v48 = vpop.f32.mrf.mxu1 }
 0x13f   : > { %5472 = vst [vmem:[#allocation78_spill] sm:$0xff] %v4434_v61  ;;  %5474 = vst [vmem:[#allocation80_spill] sm:$0xff] %v4447_v38  ;;  %v2075_v41 = vsub.f32 %v4230_v31, %v2059_v33  ;;  %v4454_v7 = vmul.f32 %v4441_v56, %v2048_v25  ;;  %v4456_v27 = vpop.eup %2955  ;;  %v2101_v60 = vmul.f32 1.442695, %v2076_v17  ;;  %v2163_v3 = vmul.f32 %v4347_v37, %v3743_v10  ;;  %v4470_v39 = vpop.permute.xlu1 %1935  ;;  %v5478_v25 = vld [vmem:[#allocation36_spill] sm:$0xff]  ;;  %v5483_v37 = vld [vmem:[#allocation35_spill] sm:$0xff] }
 0x140   : > { %vm1889_vm3 = vmand %vm1857_vm2, %vm1873_vm7  ;;  %5475 = vst [vmem:[#allocation81_spill] sm:$0xff] %v4456_v27  ;;  %v2164_v6 = vmul.f32 %v4375_v36, %v5476_v44  ;;  %v1279_v5 = vsub.f32 %v4280_v4, %v5477_v14  ;;  %v1281_v11 = vsub.f32 %v4354_v15, %v5478_v25  ;;  %v1426_v29 = vmul.f32 %v5479_v63, %v4400_v19  ;;  %v5481_v15 = vld [vmem:[#allocation32_spill] sm:$0xff]  ;;  %v4505_v0 = vpop.f32.mrf.mxu1  ;;  %v5507_v61 = vld [vmem:[#allocation49_spill] sm:$0xff] }
 0x141   : > { %vm1890_vm4 = vmand %vm1858_vm5, %vm1874_vm11  ;;  %v4462_v12 = vsel %vm1889_vm3, 1.0, %v5404_v24  ;;  %v1427_v17 = vmul.f32 %v4149_v13, %v4445_v58  ;;  %v1346_v33 = vadd.f32 %v4447_v38, %v4436_v30  ;;  %2969 = vpow2.f32 %v1300_v52 }
 0x142   : > { %v4481_v50 = vsel %vm1890_vm4, 1.0, %v5404_v24  ;;  %v2179_v62 = vadd.f32 %v2164_v6, %v2163_v3  ;;  %v4487_v36 = vmul.f32 %v4462_v12, %v4299_v35  ;;  %v4489_v4 = vpop.eup %2957  ;;  %v1278_v14 = vsub.f32 %v4264_v26, %v5481_v15 }
 0x143   : > { %5480 = vst [vmem:[#allocation16_spill] sm:$0xff] %v4489_v4  ;;  %v4493_v25 = vadd.f32 %v1427_v17, %v1426_v29  ;;  %v4497_v24 = vmul.f32 %v4462_v12, %v4234_v49  ;;  %v2099_v3 = vmul.f32 1.442695, %v2075_v41  ;;  %v2077_v6 = vsub.f32 %v4305_v8, %v4323_v59  ;;  %1347 = vadd.xlane.f32.xlu1 %v1346_v33  ;;  %v4522_v17 = vpop.permute.xlu1 %1940 }
 0x144   : > { %v1280_v35 = vsub.f32 %v4312_v53, %v5483_v37  ;;  %2180 = vadd.xlane.f32.xlu0 %v2179_v62  ;;  %v2225_v52 = vmul.f32 %v4487_v36, %v4468_v48  ;;  %v4507_v26 = vpop.eup %2959  ;;  %2971 = vpow2.f32 %v2101_v60  ;;  %v1306_v29 = vmul.f32 1.442695, %v1279_v5  ;;  %v5485_v5 = vld [vmem:[#allocation41_spill] sm:$0xff] }
 0x145   : > { %5482 = vst [vmem:[#allocation33_spill] sm:$0xff] %v4493_v25  ;;  %5484 = vst [vmem:[#allocation36_spill] sm:$0xff] %v4507_v26  ;;  %v2078_v49 = vsub.f32 %v4343_v54, %v4371_v23  ;;  %v4512_v41 = vmul.f32 %v4481_v50, %v1978_v9  ;;  %v1310_v8 = vmul.f32 1.442695, %v1281_v11  ;;  %v1343_v53 = vadd.f32 %v4404_v2, %v4383_v22  ;;  %v5486_v23 = vld [vmem:[#allocation37_spill] sm:$0xff] }
 0x146   : > { %v4518_v37 = vmul.f32 %v4481_v50, %v4250_v55  ;;  %v2145_v59 = vadd.f32 %v4489_v4, %v4456_v27  ;;  %v1304_v60 = vmul.f32 1.442695, %v1278_v14  ;;  %v1282_v54 = vsub.f32 %v4400_v19, %v5485_v5  ;;  %v4532_v15 = vpop.eup %2961 }
 0x147   : > { %v1267_v9 = vmul.f32 %v5430_v40, %v5486_v23  ;;  %v2226_v11 = vmul.f32 %v4512_v41, %v4505_v0  ;;  %2973 = vpow2.f32 %v2099_v3  ;;  %v2103_v62 = vmul.f32 1.442695, %v2077_v6  ;;  %5487 = vst [vmem:[#allocation32_spill] sm:$0xff] %v4532_v15 }
 0x148   : > { %v1308_v33 = vmul.f32 1.442695, %v1280_v35  ;;  %v2079_v55 = vsub.f32 %v4381_v47, %v4422_v21  ;;  %1344 = vadd.xlane.f32.xlu0 %v1343_v53  ;;  %2146 = vadd.xlane.f32.xlu1 %v2145_v59  ;;  %2975 = vpow2.f32 %v1306_v29  ;;  %v2105_v14 = vmul.f32 1.442695, %v2078_v49  ;;  %v5489_v21 = vld [vmem:[#allocation14_spill] sm:$0xff]  ;;  %v5491_v29 = vld [vmem:[#allocation15_spill] sm:$0xff] }
 0x149   : > { %v1283_v19 = vsub.f32 %v4445_v58, %v1267_v9  ;;  %v4535_v5 = vadd.f32 %v2226_v11, %v2225_v52  ;;  %v4537_v23 = vpop.eup %2963  ;;  %2977 = vpow2.f32 %v1310_v8  ;;  %v2142_v3 = vadd.f32 %v4429_v43, %v4387_v42  ;;  %v5492_v9 = vld [vmem:[#allocation13_spill] sm:$0xff] }
 0x14a   : > { %v1349_v6 = vadd.f32 %v4532_v15, %v4507_v26  ;;  %v1367_v35 = vmul.f32 %v4404_v2, %v5489_v21  ;;  %v4545_v53 = vpop.eup %2965  ;;  %v1156_v49 = vmul.f32 %v3782_v1, %v5491_v29  ;;  %2979 = vpow2.f32 %v1304_v60 }
 0x14b   : > { %5488 = vst [vmem:[#allocation35_spill] sm:$0xff] %v4535_v5  ;;  %5490 = vst [vmem:[#allocation41_spill] sm:$0xff] %v4545_v53  ;;  %v1312_v58 = vmul.f32 1.442695, %v1282_v54  ;;  %v2080_v52 = vsub.f32 %v4427_v18, %v4454_v7  ;;  %v4551_v8 = vpop.eup %2967  ;;  %2981 = vpow2.f32 %v1308_v33  ;;  %v2107_v59 = vmul.f32 1.442695, %v2079_v55  ;;  %v1946_v5 = vpop.permute.xlu1 %1945 }
 0x14c   : > { %2143 = vadd.xlane.f32.xlu0 %v2142_v3  ;;  %1350 = vadd.xlane.f32.xlu1 %v1349_v6  ;;  %v1366_v11 = vmul.f32 %v4383_v22, %v5492_v9  ;;  %2983 = vpow2.f32 %v2103_v62  ;;  %v1314_v25 = vmul.f32 1.442695, %v1283_v19  ;;  %v2148_v60 = vadd.f32 %v4545_v53, %v4537_v23  ;;  %v5493_v54 = vld [vmem:[#allocation34_spill] sm:$0xff] }
 0x14d   : > { %2985 = vpow2.f32 %v2105_v14  ;;  %v2166_v7 = vmul.f32 %v4429_v43, %v3849_v45  ;;  %v4561_v33 = vmul.f32 %v5492_v9, %v5493_v54  ;;  %v4564_v55 = vmul.f32 %v5489_v21, %v1156_v49  ;;  %v5496_v19 = vld [vmem:[#allocation50_spill] sm:$0xff] }
 0x14e   : > { %v1383_v2 = vadd.f32 %v1367_v35, %v1366_v11  ;;  %2987 = vpow2.f32 %v1312_v58  ;;  %v2109_v3 = vmul.f32 1.442695, %v2080_v52  ;;  %v4566_v6 = vpop.eup %2969  ;;  %v2081_v62 = vsub.f32 %v4468_v48, %v4497_v24  ;;  %v5497_v35 = vld [vmem:[#allocation54_spill] sm:$0xff] }
 0x14f   : > { %5494 = vst [vmem:[#allocation37_spill] sm:$0xff] %v4561_v33  ;;  %5495 = vst [vmem:[#allocation14_spill] sm:$0xff] %v4564_v55  ;;  %2989 = vpow2.f32 %v2107_v59  ;;  %v1963_v14 = vmul.f32 %v4402_v51, %v3763_v16  ;;  %v2165_v45 = vmul.f32 %v4387_v42, %v3821_v46  ;;  %v1414_v21 = vmul.f32 %v4561_v33, %v5496_v19  ;;  %v1956_v58 = vpop.permute.xlu1 %1955  ;;  %v5498_v52 = vld [vmem:[#allocation18_spill] sm:$0xff] }
 0x150   : > { %1384 = vadd.xlane.f32.xlu0 %v1383_v2  ;;  %2149 = vadd.xlane.f32.xlu1 %v2148_v60  ;;  %v1415_v29 = vmul.f32 %v4564_v55, %v5497_v35  ;;  %2991 = vpow2.f32 %v1314_v25  ;;  %v1964_v24 = vmul.f32 %v4402_v51, %v3782_v1  ;;  %v1352_v2 = vadd.f32 %v4566_v6, %v4551_v8 }
 0x151   : > { %v4578_v49 = vpop.eup %2971  ;;  %v2182_v48 = vadd.f32 %v2166_v7, %v2165_v45  ;;  %v1369_v46 = vmul.f32 %v4447_v38, %v5498_v52  ;;  %2993 = vpow2.f32 %v2109_v3  ;;  %v1967_v59 = vmul.f32 %v4470_v39, %v3763_v16  ;;  %v5499_v7 = vld [vmem:[#allocation17_spill] sm:$0xff] }
 0x152   : > { %v1968_v25 = vmul.f32 %v4470_v39, %v3782_v1  ;;  %v1969_v9 = vmul.f32 %v4522_v17, %v3763_v16  ;;  %v2111_v11 = vmul.f32 1.442695, %v2081_v62  ;;  %v1979_v51 = vmul.f32 %v3743_v10, %v1963_v14 }
 0x153   : > { %v1970_v60 = vmul.f32 %v4522_v17, %v3782_v1  ;;  %v1368_v54 = vmul.f32 %v4436_v30, %v5499_v7  ;;  %v1971_v45 = vmul.f32 %v1946_v5, %v3763_v16  ;;  %v1972_v39 = vmul.f32 %v1946_v5, %v3782_v1  ;;  %v5501_v30 = vld [vmem:[#allocation39_spill] sm:$0xff] }
 0x154   : > { %2183 = vadd.xlane.f32.xlu0 %v2182_v48  ;;  %1353 = vadd.xlane.f32.xlu1 %v1352_v2  ;;  %v4597_v3 = vpop.eup %2973  ;;  %v1975_v19 = vmul.f32 %v1956_v58, %v3763_v16  ;;  %v1976_v62 = vmul.f32 %v1956_v58, %v3782_v1  ;;  %v1980_v10 = vmul.f32 %v5476_v44, %v1964_v24  ;;  %v5500_v48 = vld [vmem:[#allocation40_spill] sm:$0xff]  ;;  %v5502_v58 = vld [vmem:[#allocation62_spill] sm:$0xff]  ;;  %2995 = vpow2.f32 %v2111_v11 }
 0x155   : > { %v4603_v35 = vpop.eup %2975  ;;  %v1386_v17 = vadd.f32 %v1369_v46, %v1368_v54  ;;  %v2151_v14 = vadd.f32 %v4597_v3, %v4578_v49  ;;  %v2168_v2 = vmul.f32 %v4489_v4, %v5500_v48  ;;  %v2082_v5 = vsub.f32 %v4505_v0, %v4518_v37  ;;  %v5503_v44 = vld [vmem:[#allocation64_spill] sm:$0xff] }
 0x156   : > { %v4610_v38 = vpop.eup %2977  ;;  %v1983_v16 = vmul.f32 %v5501_v30, %v1967_v59  ;;  %v1984_v1 = vmul.f32 %v5500_v48, %v1968_v25  ;;  %v1985_v43 = vmul.f32 %v5502_v58, %v1969_v9  ;;  %v1986_v24 = vmul.f32 %v5503_v44, %v1970_v60  ;;  %v5504_v54 = vld [vmem:[#allocation20_spill] sm:$0xff] }
 0x157   : > { %v4617_v42 = vpop.eup %2979  ;;  %v2167_v46 = vmul.f32 %v4456_v27, %v5501_v30  ;;  %v1371_v4 = vmul.f32 %v4507_v26, %v5504_v54  ;;  %v4627_v37 = vmul.f32 %v4158_v34, %v1971_v45  ;;  %v4630_v59 = vmul.f32 %v4246_v20, %v1972_v39 }
 0x158   : > { %1387 = vadd.xlane.f32.xlu0 %v1386_v17  ;;  %2152 = vadd.xlane.f32.xlu1 %v2151_v14  ;;  %v4624_v0 = vpop.eup %2981  ;;  %v1991_v25 = vmul.f32 %v4392_v28, %v1975_v19  ;;  %v1992_v9 = vmul.f32 %v4441_v56, %v1976_v62  ;;  %v1355_v17 = vadd.f32 %v4617_v42, %v4603_v35  ;;  %v5505_v14 = vld [vmem:[#allocation19_spill] sm:$0xff]  ;;  %v5506_v62 = vld [vmem:[#allocation44_spill] sm:$0xff]  ;;  %v2113_v13 = vmul.f32 1.442695, %v2082_v5 }
 0x159   : > { %v4634_v11 = vpop.eup %2983  ;;  %v2185_v60 = vadd.f32 %v2168_v2, %v2167_v46  ;;  %v1370_v26 = vmul.f32 %v4532_v15, %v5505_v14  ;;  %v1358_v45 = vadd.f32 %v4624_v0, %v4610_v38  ;;  %v2170_v39 = vmul.f32 %v4545_v53, %v5503_v44 }
 0x15a   : > { %v4642_v27 = vpop.eup %2985  ;;  %v4646_v19 = vadd.f32 %v1415_v29, %v1414_v21  ;;  %v2211_v22 = vmul.f32 %v1979_v51, %v5506_v62  ;;  %v2212_v2 = vmul.f32 %v1980_v10, %v5507_v61  ;;  %v4652_v63 = vadd.f32 %v1984_v1, %v1983_v16  ;;  %v5510_v61 = vld [vmem:[#allocation63_spill] sm:$0xff] }
 0x15b   : > { %v4650_v46 = vpop.eup %2987  ;;  %v1389_v15 = vadd.f32 %v1371_v4, %v1370_v26  ;;  %v4654_v32 = vadd.f32 %v1980_v10, %v1979_v51  ;;  %v4660_v21 = vadd.f32 %v1986_v24, %v1985_v43  ;;  %v4664_v29 = vadd.f32 %v4481_v50, %v4462_v12  ;;  %v5512_v26 = vld [vmem:[#allocation69_spill] sm:$0xff]  ;;  %v5514_v10 = vld [vmem:[#allocation58_spill] sm:$0xff] }
 0x15c   : > { %2186 = vadd.xlane.f32.xlu0 %v2185_v60  ;;  %1356 = vadd.xlane.f32.xlu1 %v1355_v17  ;;  %v4656_v55 = vpop.eup %2989  ;;  %v4658_v33 = vadd.f32 %v2212_v2, %v2211_v22  ;;  %v2217_v62 = vmul.f32 %v1985_v43, %v5510_v61  ;;  %v5511_v60 = vld [vmem:[#allocation66_spill] sm:$0xff]  ;;  %v5513_v17 = vld [vmem:[#allocation73_spill] sm:$0xff]  ;;  %v2215_v53 = vmul.f32 %v1983_v16, %v5514_v10  ;;  %2997 = vpow2.f32 %v2113_v13  ;;  %v5519_v10 = vld [vmem:[#allocation23_spill] sm:$0xff] }
 0x15d   : > { %5508 = vst [vmem:[#allocation15_spill] sm:$0xff] %v4660_v21  ;;  %5509 = vst [vmem:[#allocation13_spill] sm:$0xff] %v4664_v29  ;;  %v4667_v5 = vpop.eup %2991  ;;  %v2218_v4 = vmul.f32 %v1986_v24, %v5511_v60  ;;  %v4672_v51 = vadd.f32 %v5513_v17, %v5512_v26  ;;  %v5515_v22 = vld [vmem:[#allocation61_spill] sm:$0xff]  ;;  %v2169_v21 = vmul.f32 %v4537_v23, %v5502_v58  ;;  %v5516_v17 = vld [vmem:[#allocation24_spill] sm:$0xff]  ;;  %vm2539_vm11 = vcmask 7168  }
 0x15e   : > { %v2216_v2 = vmul.f32 %v1984_v1, %v5515_v22  ;;  %v4680_v29 = vadd.f32 %v4512_v41, %v4487_v36  ;;  %v2219_v43 = vmul.f32 %v4627_v37, %v4230_v31  ;;  %v2220_v24 = vmul.f32 %v4630_v59, %v4262_v57  ;;  %v4686_v61 = vpop.eup %2993 }
 0x15f   : > { %v4688_v16 = vadd.f32 %v2218_v4, %v2217_v62  ;;  %v4692_v60 = vadd.f32 %v1992_v9, %v1991_v25  ;;  %v1361_v36 = vadd.f32 %v4667_v5, %v4650_v46  ;;  %v2223_v31 = vmul.f32 %v1991_v25, %v4381_v47 }
 0x160   : > { %1390 = vadd.xlane.f32.xlu0 %v1389_v15  ;;  %1359 = vadd.xlane.f32.xlu1 %v1358_v45  ;;  %v4690_v1 = vadd.f32 %v2216_v2, %v2215_v53  ;;  %v4696_v41 = vadd.f32 %v2220_v24, %v2219_v43  ;;  %v2224_v57 = vmul.f32 %v1992_v9, %v4427_v18  ;;  %v5517_v15 = vld [vmem:[#allocation67_spill] sm:$0xff]  ;;  %v5520_v43 = vld [vmem:[#allocation22_spill] sm:$0xff] }
 0x161   : > { %v2188_v26 = vadd.f32 %v2170_v39, %v2169_v21  ;;  %v1373_v13 = vmul.f32 %v4551_v8, %v5516_v17  ;;  %v2173_v45 = vmul.f32 %v4634_v11, %v5517_v15  ;;  %v5518_v53 = vld [vmem:[#allocation71_spill] sm:$0xff]  ;;  %v1372_v22 = vmul.f32 %v4566_v6, %v5519_v10  ;;  %v4710_v47 = vpop.eup %2995 }
 0x162   : > { %v2174_v62 = vmul.f32 %v4642_v27, %v5518_v53  ;;  %v4706_v4 = vadd.f32 %v2224_v57, %v2223_v31  ;;  %v2172_v9 = vmul.f32 %v4578_v49, %v4246_v20  ;;  %v2171_v39 = vmul.f32 %v4597_v3, %v4158_v34  ;;  %v5521_v57 = vld [vmem:[#allocation21_spill] sm:$0xff] }
 0x163   : > { %v1392_v18 = vadd.f32 %v1373_v13, %v1372_v22  ;;  %v2121_v21 = vadd.f32 %v5500_v48, %v5501_v30  ;;  %v1375_v24 = vmul.f32 %v4603_v35, %v5520_v43  ;;  %v2176_v31 = vmul.f32 %v4686_v61, %v4441_v56  ;;  %v5522_v30 = vld [vmem:[#allocation28_spill] sm:$0xff]  ;;  %v5523_v22 = vld [vmem:[#allocation27_spill] sm:$0xff] }
 0x164   : > { %2189 = vadd.xlane.f32.xlu0 %v2188_v26  ;;  %1362 = vadd.xlane.f32.xlu1 %v1361_v36  ;;  %v2194_v25 = vadd.f32 %v2174_v62, %v2173_v45  ;;  %v2191_v2 = vadd.f32 %v2172_v9, %v2171_v39  ;;  %v2175_v36 = vmul.f32 %v4656_v55, %v4392_v28 }
 0x165   : > { %v1374_v26 = vmul.f32 %v4617_v42, %v5521_v57  ;;  %v1377_v48 = vmul.f32 %v4610_v38, %v5522_v30  ;;  %v1379_v39 = vmul.f32 %v4667_v5, %v5430_v40 }
 0x166   : > { %v2197_v62 = vadd.f32 %v2176_v31, %v2175_v36 }
 0x167   : > { %v1395_v45 = vadd.f32 %v1375_v24, %v1374_v26  ;;  %v5524_v24 = vld [vmem:[#allocation25_spill] sm:$0xff] }
 0x168   : > { %1393 = vadd.xlane.f32.xlu0 %v1392_v18  ;;  %2195 = vadd.xlane.f32.xlu1 %v2194_v25  ;;  %v1376_v18 = vmul.f32 %v4624_v0, %v5523_v22  ;;  %v2124_v25 = vadd.f32 %v5503_v44, %v5502_v58  ;;  %v1378_v36 = vmul.f32 %v4650_v46, %v5524_v24  ;;  %v5525_v44 = vld [vmem:[#allocation29_spill] sm:$0xff] }
 0x169   : > { %v4726_v13 = vpop.eup %2997  ;;  %v2154_v58 = vadd.f32 %v4642_v27, %v4634_v11 }
 0x16a   : > { %v1398_v9 = vadd.f32 %v1377_v48, %v1376_v18  ;;  %v1401_v31 = vadd.f32 %v1379_v39, %v1378_v36  ;;  %v2127_v48 = vadd.f32 %v4246_v20, %v4158_v34  ;;  %v1325_v18 = vadd.f32 %v5504_v54, %v5505_v14  ;;  %v5529_v20 = vld [vmem:[#allocation52_spill] sm:$0xff]  ;;  %v5530_v54 = vld [vmem:[#allocation37_spill] sm:$0xff]  ;;  %v5531_v14 = vld [vmem:[#allocation14_spill] sm:$0xff] }
 0x16b   : > { %v1328_v34 = vadd.f32 %v5516_v17, %v5519_v10  ;;  %v5533_v36 = vld [vmem:[#allocation46_spill] sm:$0xff]  ;;  %v1331_v17 = vadd.f32 %v5520_v43, %v5521_v57  ;;  %v5539_v43 = vld [vmem:[#allocation51_spill] sm:$0xff] }
 0x16c   : > { %2192 = vadd.xlane.f32.xlu0 %v2191_v2  ;;  %2122 = vadd.xlane.f32.xlu1 %v2121_v21  ;;  %v2177_v21 = vmul.f32 %v4710_v47, %v4462_v12  ;;  %v2178_v2 = vmul.f32 %v4726_v13, %v4481_v50  ;;  %v1322_v12 = vadd.f32 %v5498_v52, %v5499_v7 }
 0x16d   : > { %v2157_v50 = vadd.f32 %v4686_v61, %v4656_v55  ;;  %v2160_v52 = vadd.f32 %v4726_v13, %v4710_v47  ;;  %v2130_v7 = vadd.f32 %v5518_v53, %v5517_v15  ;;  %v5534_v15 = vld [vmem:[#allocation53_spill] sm:$0xff] }
 0x16e   : > { %v2200_v26 = vadd.f32 %v2178_v2, %v2177_v21  ;;  %v1455_v21 = vadd.f32 %v5531_v14, %v5530_v54  ;;  %v5532_v2 = vld [vmem:[#allocation38_spill] sm:$0xff]  ;;  %v5535_v53 = vld [vmem:[#allocation57_spill] sm:$0xff] }
 0x16f   : > { %v2254_v10 = vadd.f32 %v5535_v53, %v5534_v15  ;;  %v5549_v14 = vld [vmem:[#allocation78_spill] sm:$0xff] }
 0x170   : > { %1396 = vadd.xlane.f32.xlu0 %v1395_v45  ;;  %2198 = vadd.xlane.f32.xlu1 %v2197_v62  ;;  %v5526_v45 = vld [vmem:[#allocation30_spill] sm:$0xff] }
 0x171   : > { %v1452_v62 = vadd.f32 %v5526_v45, %v5525_v44  ;;  %v1334_v45 = vadd.f32 %v5522_v30, %v5523_v22  ;;  %v1337_v30 = vadd.f32 %v5430_v40, %v5524_v24  ;;  %v5540_v22 = vld [vmem:[#allocation15_spill] sm:$0xff]  ;;  %v5545_v40 = vld [vmem:[#allocation60_spill] sm:$0xff] }
 0x172   : > { %v5546_v24 = vld [vmem:[#allocation55_spill] sm:$0xff] }
 0x174   : > { %1399 = vadd.xlane.f32.xlu0 %v1398_v9  ;;  %2125 = vadd.xlane.f32.xlu1 %v2124_v25  ;;  %v5527_v25 = vld [vmem:[#allocation42_spill] sm:$0xff]  ;;  %v5528_v9 = vld [vmem:[#allocation45_spill] sm:$0xff] }
 0x175   : > { %v1458_v39 = vadd.f32 %v5528_v9, %v5527_v25 }
 0x178   : > { %1402 = vadd.xlane.f32.xlu0 %v1401_v31  ;;  %2201 = vadd.xlane.f32.xlu1 %v2200_v26  ;;  %v1461_v31 = vadd.f32 %v5533_v36, %v5532_v2  ;;  %v2133_v26 = vadd.f32 %v4441_v56, %v4392_v28  ;;  %v5537_v28 = vld [vmem:[#allocation47_spill] sm:$0xff] }
 0x179   : > { %v5538_v56 = vld [vmem:[#allocation43_spill] sm:$0xff] }
 0x17a   : > { %v1467_v57 = vadd.f32 %v5539_v43, %v5538_v56 }
 0x17c   : > { %2155 = vadd.xlane.f32.xlu0 %v2154_v58  ;;  %1453 = vadd.xlane.f32.xlu1 %v1452_v62  ;;  %v5536_v58 = vld [vmem:[#allocation65_spill] sm:$0xff] }
 0x180   : > { %1323 = vadd.xlane.f32.xlu0 %v1322_v12  ;;  %1564 = vadd.xlane.f32.xlu1 %v5525_v44  ;;  %v5542_v12 = vld [vmem:[#allocation68_spill] sm:$0xff] }
 0x184   : > { %2158 = vadd.xlane.f32.xlu0 %v2157_v50  ;;  %2128 = vadd.xlane.f32.xlu1 %v2127_v48  ;;  %v5544_v50 = vld [vmem:[#allocation56_spill] sm:$0xff] }
 0x188   : > { %1326 = vadd.xlane.f32.xlu0 %v1325_v18  ;;  %1459 = vadd.xlane.f32.xlu1 %v1458_v39  ;;  %v5547_v18 = vld [vmem:[#allocation26_spill] sm:$0xff] }
 0x189   : > { %v1473_v9 = vadd.f32 %v5547_v18, %v5546_v24 }
 0x18c   : > { %2161 = vadd.xlane.f32.xlu0 %v2160_v52  ;;  %2131 = vadd.xlane.f32.xlu1 %v2130_v7  ;;  %v5548_v7 = vld [vmem:[#allocation9_spill] sm:$0xff] }
 0x190   : > { %1329 = vadd.xlane.f32.xlu0 %v1328_v34  ;;  %1429 = vadd.xlane.f32.xlu1 %v5529_v20 }
 0x194   : > { %1456 = vadd.xlane.f32.xlu0 %v1455_v21  ;;  %1462 = vadd.xlane.f32.xlu1 %v1461_v31  ;;  %v5550_v31 = vld [vmem:[#allocation59_spill] sm:$0xff] }
 0x198   : > { %1566 = vadd.xlane.f32.xlu0 %v5530_v54  ;;  %2134 = vadd.xlane.f32.xlu1 %v2133_v26  ;;  %v1470_v26 = vadd.f32 %v5550_v31, %v5544_v50 }
 0x19c   : > { %1332 = vadd.xlane.f32.xlu0 %v1331_v17  ;;  %2255 = vadd.xlane.f32.xlu1 %v2254_v10  ;;  %v5551_v17 = vld [vmem:[#allocation77_spill] sm:$0xff] }
 0x1a0   : > { %1568 = vadd.xlane.f32.xlu0 %v5527_v25  ;;  %1435 = vadd.xlane.f32.xlu1 %v5536_v58 }
 0x1a4   : > { %1335 = vadd.xlane.f32.xlu0 %v1334_v45  ;;  %1572 = vadd.xlane.f32.xlu1 %v5537_v28  ;;  %v2263_v45 = vadd.f32 %v4630_v59, %v4627_v37 }
 0x1a8   : > { %1432 = vadd.xlane.f32.xlu0 %v4646_v19  ;;  %2228 = vadd.xlane.f32.xlu1 %v4658_v33  ;;  %v5541_v19 = vld [vmem:[#allocation48_spill] sm:$0xff]  ;;  %v4792_v33 = vpop.xlane.xlu1 %1320 }
 0x1a9   : > { %v1464_v62 = vadd.f32 %v5541_v19, %v5537_v28  ;;  %vm2476_vm4 = vcmp.gt.f32.partialorder %v4792_v33, 0.0 }
 0x1ac   : > { %1570 = vadd.xlane.f32.xlu0 %v5532_v2  ;;  %2258 = vadd.xlane.f32.xlu1 %v4652_v63  ;;  %v5543_v63 = vld [vmem:[#allocation13_spill] sm:$0xff]  ;;  %v4799_v48 = vpop.xlane.xlu1 %2119 }
 0x1ad   : > { %vm2492_vm14 = vcmp.gt.f32.partialorder %v4799_v48, 0.0 }
 0x1b0   : > { %2252 = vadd.xlane.f32.xlu0 %v4654_v32  ;;  %1468 = vadd.xlane.f32.xlu1 %v1467_v57  ;;  %v4797_v32 = vpop.xlane.xlu0 %1317 }
 0x1b1   : > { %vm2475_vm3 = vcmp.gt.f32.partialorder %v4797_v32, 0.0 }
 0x1b4   : > { %1338 = vadd.xlane.f32.xlu0 %v1337_v30  ;;  %2261 = vadd.xlane.f32.xlu1 %v5540_v22  ;;  %v4805_v52 = vpop.xlane.xlu0 %2116  ;;  %v5554_v22 = vld [vmem:[#allocation10_spill] sm:$0xff] }
 0x1b5   : > { %vm2491_vm9 = vcmp.gt.f32.partialorder %v4805_v52, 0.0 }
 0x1b8   : > { %1465 = vadd.xlane.f32.xlu0 %v1464_v62  ;;  %1441 = vadd.xlane.f32.xlu1 %v5542_v12  ;;  %v5555_v62 = vld [vmem:[#allocation74_spill] sm:$0xff] }
 0x1bc   : > { %2137 = vadd.xlane.f32.xlu0 %v5543_v63  ;;  %1576 = vadd.xlane.f32.xlu1 %v5544_v50  ;;  %v5556_v63 = vld [vmem:[#allocation31_spill] sm:$0xff] }
 0x1c0   : > { %2231 = vadd.xlane.f32.xlu0 %v5545_v40  ;;  %2237 = vadd.xlane.f32.xlu1 %v4688_v16 }
 0x1c2   : > { %v1342_v39 = vpop.xlane.xlu1 %1341 }
 0x1c4   : > { %1438 = vadd.xlane.f32.xlu0 %v5548_v7  ;;  %1474 = vadd.xlane.f32.xlu1 %v1473_v9 }
 0x1c7   : > { %v1382_v34 = vpop.xlane.xlu0 %1381  ;;  %v4808_v20 = vpop.xlane.xlu1 %2140 }
 0x1c8   : > { %1574 = vadd.xlane.f32.xlu0 %v5538_v56  ;;  %2267 = vadd.xlane.f32.xlu1 %v4672_v51  ;;  %v4814_v16 = vsub.f32 %v1342_v39, %v1382_v34  ;;  %v5552_v51 = vld [vmem:[#allocation70_spill] sm:$0xff]  ;;  %v5558_v39 = vld [vmem:[#allocation11_spill] sm:$0xff]  ;;  %v5559_v34 = vld [vmem:[#allocation76_spill] sm:$0xff] }
 0x1ca   : > { %v1524_v10 = vadd.f32 %v5552_v51, %v4814_v16  ;;  %v2323_v19 = vadd.f32 %v5554_v22, %v4814_v16  ;;  %v2331_v12 = vadd.f32 %v5555_v62, %v4814_v16 }
 0x1cc   : > { %2234 = vadd.xlane.f32.xlu0 %v4690_v1  ;;  %1447 = vadd.xlane.f32.xlu1 %v5549_v14  ;;  %v1348_v36 = vpop.xlane.xlu1 %1347  ;;  %v5553_v1 = vld [vmem:[#allocation72_spill] sm:$0xff]  ;;  %v2339_v37 = vmul.f32 %v2331_v12, %v2323_v19  ;;  %v5563_v12 = vld [vmem:[#allocation79_spill] sm:$0xff] }
 0x1cd   : > { %v4816_v21 = vpop.xlane.xlu0 %2180  ;;  %v1532_v58 = vadd.f32 %v5553_v1, %v4814_v16  ;;  %v5562_v19 = vld [vmem:[#allocation16_spill] sm:$0xff] }
 0x1cf   : > { %v1540_v30 = vmul.f32 %v1532_v58, %v1524_v10 }
 0x1d0   : > { %1471 = vadd.xlane.f32.xlu0 %v1470_v26  ;;  %2243 = vadd.xlane.f32.xlu1 %v5551_v17  ;;  %v5560_v17 = vld [vmem:[#allocation12_spill] sm:$0xff] }
 0x1d1   : > { %v1345_v15 = vpop.xlane.xlu0 %1344  ;;  %v4821_v53 = vpop.xlane.xlu1 %2146  ;;  %2999 = vlog2.f32 %v1540_v30  ;;  %v5561_v30 = vld [vmem:[#allocation81_spill] sm:$0xff] }
 0x1d2   : > { %3001 = vlog2.f32 %v2339_v37 }
 0x1d4   : > { %2264 = vadd.xlane.f32.xlu0 %v2263_v45  ;;  %2273 = vadd.xlane.f32.xlu1 %v4680_v29  ;;  %v5557_v29 = vld [vmem:[#allocation75_spill] sm:$0xff] }
 0x1d5   : > { %v4830_v43 = vpop.xlane.xlu0 %2143  ;;  %v1351_v57 = vpop.xlane.xlu1 %1350 }
 0x1d8   : > { %1444 = vadd.xlane.f32.xlu0 %v5556_v63 }
 0x1d9   : > { %v1385_v40 = vpop.xlane.xlu0 %1384  ;;  %v4837_v18 = vpop.xlane.xlu1 %2149 }
 0x1da   : > { %v4839_v59 = vsub.f32 %v1345_v15, %v1385_v40 }
 0x1dc   : > { %1578 = vadd.xlane.f32.xlu0 %v5546_v24  ;;  %v1525_v9 = vadd.f32 %v5557_v29, %v4839_v59  ;;  %v1533_v7 = vadd.f32 %v5558_v39, %v4839_v59  ;;  %v2324_v14 = vadd.f32 %v5559_v34, %v4839_v59  ;;  %v2332_v51 = vadd.f32 %v5560_v17, %v4839_v59 }
 0x1dd   : > { %v4848_v31 = vpop.xlane.xlu0 %2183  ;;  %v1354_v26 = vpop.xlane.xlu1 %1353 }
 0x1de   : > { %v1541_v15 = vmul.f32 %v1533_v7, %v1525_v9  ;;  %v2340_v10 = vmul.f32 %v2332_v51, %v2324_v14  ;;  %v3000_v9 = vpop.eup %2999  ;;  %v5565_v7 = vld [vmem:[#allocation33_spill] sm:$0xff] }
 0x1df   : > { %v1549_v17 = vmul.f32 0.6931472, %v3000_v9  ;;  %v3002_v51 = vpop.eup %3001 }
 0x1e0   : > { %2240 = vadd.xlane.f32.xlu0 %v4696_v41  ;;  %3003 = vlog2.f32 %v1541_v15  ;;  %v5564_v41 = vld [vmem:[#allocation80_spill] sm:$0xff] }
 0x1e1   : > { %v1388_v1 = vpop.xlane.xlu0 %1387  ;;  %v4853_v58 = vpop.xlane.xlu1 %2152  ;;  %3005 = vlog2.f32 %v2340_v10  ;;  %v5566_v10 = vld [vmem:[#allocation32_spill] sm:$0xff] }
 0x1e2   : > { %v4855_v45 = vsub.f32 %v1348_v36, %v1388_v1 }
 0x1e4   : > { %2270 = vadd.xlane.f32.xlu0 %v4692_v60  ;;  %v2325_v22 = vadd.f32 %v5561_v30, %v4855_v45  ;;  %v2333_v62 = vadd.f32 %v5562_v19, %v4855_v45  ;;  %v1526_v63 = vadd.f32 %v5563_v12, %v4855_v45  ;;  %v1534_v40 = vadd.f32 %v5564_v41, %v4855_v45  ;;  %v5567_v30 = vld [vmem:[#allocation36_spill] sm:$0xff] }
 0x1e5   : > { %v4866_v37 = vpop.xlane.xlu0 %2186  ;;  %v1357_v29 = vpop.xlane.xlu1 %1356 }
 0x1e6   : > { %v2341_v60 = vmul.f32 %v2333_v62, %v2325_v22  ;;  %v1542_v39 = vmul.f32 %v1534_v40, %v1526_v63  ;;  %v5568_v62 = vld [vmem:[#allocation41_spill] sm:$0xff] }
 0x1e8   : > { %1450 = vadd.xlane.f32.xlu0 %v5565_v7  ;;  %3007 = vlog2.f32 %v2341_v60 }
 0x1e9   : > { %v1391_v34 = vpop.xlane.xlu0 %1390  ;;  %v4871_v14 = vpop.xlane.xlu1 %1359  ;;  %3009 = vlog2.f32 %v1542_v39 }
 0x1ea   : > { %v4873_v15 = vsub.f32 %v1351_v57, %v1391_v34  ;;  %v1580_v57 = vmul.f32 %v1549_v17, %v5525_v44 }
 0x1ec   : > { %2246 = vadd.xlane.f32.xlu0 %v4706_v4  ;;  %v1527_v1 = vadd.f32 %v5566_v10, %v4873_v15  ;;  %v1535_v22 = vadd.f32 %v5567_v30, %v4873_v15  ;;  %v2326_v19 = vadd.f32 %v4537_v23, %v4873_v15  ;;  %v2334_v12 = vadd.f32 %v5568_v62, %v4873_v15 }
 0x1ed   : > { %v3004_v63 = vpop.eup %3003  ;;  %v4884_v41 = vpop.xlane.xlu0 %2189  ;;  %v2348_v4 = vmul.f32 0.6931472, %v3002_v51 }
 0x1ee   : > { %v4886_v40 = vpop.xlane.xlu1 %1362  ;;  %v3006_v9 = vpop.eup %3005  ;;  %v2206_v60 = vsub.f32 %v4837_v18, %v4884_v41  ;;  %v1551_v39 = vmul.f32 0.6931472, %v3004_v63  ;;  %v1543_v7 = vmul.f32 %v1535_v22, %v1527_v1  ;;  %v2342_v34 = vmul.f32 %v2334_v12, %v2326_v19 }
 0x1ef   : > { %v2350_v10 = vmul.f32 0.6931472, %v3006_v9  ;;  %v2363_v17 = vmul.f32 %v2348_v4, %v5525_v44 }
 0x1f0   : > { %1588 = vadd.xlane.f32.xlu0 %v1580_v57  ;;  %v1581_v23 = vmul.f32 %v1551_v39, %v5530_v54  ;;  %3011 = vlog2.f32 %v1543_v7 }
 0x1f1   : > { %v1394_v30 = vpop.xlane.xlu0 %1393  ;;  %3013 = vlog2.f32 %v2342_v34  ;;  %v2364_v51 = vmul.f32 %v2350_v10, %v5530_v54 }
 0x1f2   : > { %v4892_v62 = vpop.xlane.xlu1 %2195  ;;  %v4894_v36 = vsub.f32 %v1354_v26, %v1394_v30  ;;  %1590 = vadd.xlane.f32.xlu1 %v1581_v23 }
 0x1f4   : > { %2371 = vadd.xlane.f32.xlu0 %v2363_v17  ;;  %v2327_v1 = vadd.f32 %v4597_v3, %v4894_v36  ;;  %v2335_v22 = vadd.f32 %v4578_v49, %v4894_v36  ;;  %v1528_v19 = vadd.f32 %v4566_v6, %v4894_v36  ;;  %v1536_v12 = vadd.f32 %v4551_v8, %v4894_v36 }
 0x1f5   : > { %v3008_v26 = vpop.eup %3007  ;;  %v4906_v63 = vpop.xlane.xlu0 %2192  ;;  %v1476_v49 = vadd.f32 1.0, %v4814_v16 }
 0x1f6   : > { %v4908_v57 = vpop.xlane.xlu1 %2122  ;;  %v3010_v44 = vpop.eup %3009  ;;  %v2207_v54 = vsub.f32 %v4853_v58, %v4906_v63  ;;  %2373 = vadd.xlane.f32.xlu1 %v2364_v51  ;;  %v2352_v3 = vmul.f32 0.6931472, %v3008_v26  ;;  %v2343_v4 = vmul.f32 %v2335_v22, %v2327_v1  ;;  %v1544_v39 = vmul.f32 %v1536_v12, %v1528_v19 }
 0x1f7   : > { %v1553_v9 = vmul.f32 0.6931472, %v3010_v44  ;;  %vm2493_vm0 = vcmp.gt.f32.partialorder %v4908_v57, 0.0 }
 0x1f8   : > { %v2365_v6 = vmul.f32 %v2352_v3, %v5527_v25  ;;  %3015 = vlog2.f32 %v2343_v4 }
 0x1f9   : > { %v1397_v7 = vpop.xlane.xlu0 %1396  ;;  %v1582_v8 = vmul.f32 %v1553_v9, %v5527_v25  ;;  %3017 = vlog2.f32 %v1476_v49 }
 0x1fa   : > { %v4915_v34 = vpop.xlane.xlu1 %2198  ;;  %v4917_v10 = vsub.f32 %v1357_v29, %v1397_v7  ;;  %2375 = vadd.xlane.f32.xlu0 %v2365_v6  ;;  %3019 = vlog2.f32 %v1544_v39 }
 0x1fb   : > { %1592 = vadd.xlane.f32.xlu1 %v1582_v8 }
 0x1fc   : > { %v1529_v23 = vadd.f32 %v4617_v42, %v4917_v10  ;;  %v1537_v16 = vadd.f32 %v4603_v35, %v4917_v10  ;;  %v2328_v30 = vadd.f32 %v4634_v11, %v4917_v10  ;;  %v2336_v25 = vadd.f32 %v4642_v27, %v4917_v10 }
 0x1fd   : > { %v3012_v17 = vpop.eup %3011  ;;  %v1400_v51 = vpop.xlane.xlu0 %1399 }
 0x1fe   : > { %v4927_v29 = vpop.xlane.xlu1 %2125  ;;  %v3014_v1 = vpop.eup %3013  ;;  %v4930_v22 = vsub.f32 %v4871_v14, %v1400_v51  ;;  %v1555_v19 = vmul.f32 0.6931472, %v3012_v17  ;;  %v1545_v12 = vmul.f32 %v1537_v16, %v1529_v23  ;;  %v2344_v26 = vmul.f32 %v2336_v25, %v2328_v30 }
 0x1ff   : > { %v2354_v42 = vmul.f32 0.6931472, %v3014_v1  ;;  %vm2494_vm10 = vcmp.gt.f32.partialorder %v4927_v29, 0.0 }
 0x200   : > { %v1583_v35 = vmul.f32 %v1555_v19, %v5532_v2  ;;  %v2329_v11 = vadd.f32 %v4656_v55, %v4930_v22  ;;  %v2337_v27 = vadd.f32 %v4686_v61, %v4930_v22  ;;  %3021 = vlog2.f32 %v1545_v12 }
 0x201   : > { %v1403_v44 = vpop.xlane.xlu0 %1402  ;;  %v2366_v3 = vmul.f32 %v2354_v42, %v5532_v2  ;;  %v1530_v14 = vadd.f32 %v4624_v0, %v4930_v22  ;;  %v1538_v49 = vadd.f32 %v4610_v38, %v4930_v22  ;;  %3023 = vlog2.f32 %v2344_v26 }
 0x202   : > { %v4938_v4 = vpop.xlane.xlu1 %2201  ;;  %v4945_v9 = vsub.f32 %v4886_v40, %v1403_v44  ;;  %1594 = vadd.xlane.f32.xlu0 %v1583_v35  ;;  %v2345_v55 = vmul.f32 %v2337_v27, %v2329_v11  ;;  %v2204_v11 = vsub.f32 %v4830_v43, %v4848_v31 }
 0x203   : > { %2377 = vadd.xlane.f32.xlu1 %v2366_v3  ;;  %v1546_v61 = vmul.f32 %v1538_v49, %v1530_v14 }
 0x204   : > { %3025 = vlog2.f32 %v2345_v55  ;;  %v1531_v2 = vadd.f32 %v4650_v46, %v4945_v9  ;;  %v1539_v39 = vadd.f32 %v4667_v5, %v4945_v9  ;;  %v2330_v0 = vadd.f32 %v4710_v47, %v4945_v9 }
 0x205   : > { %v4953_v6 = vpop.xlane.xlu0 %2155  ;;  %3027 = vlog2.f32 %v1546_v61  ;;  %v2338_v40 = vadd.f32 %v4726_v13, %v4945_v9  ;;  %v3016_v7 = vpop.eup %3015 }
 0x206   : > { %v1454_v38 = vpop.xlane.xlu1 %1453  ;;  %v2208_v8 = vsub.f32 %v4953_v6, %v4892_v62  ;;  %v1547_v23 = vmul.f32 %v1539_v39, %v1531_v2  ;;  %v3018_v16 = vpop.eup %3017  ;;  %v2356_v46 = vmul.f32 0.6931472, %v3016_v7  ;;  %v2501_v62 = vsel %vm2493_vm0, %v4908_v57, 1.0 }
 0x207   : > { %v2346_v30 = vmul.f32 %v2338_v40, %v2330_v0  ;;  %v3020_v25 = vpop.eup %3019  ;;  %v1485_v19 = vmul.f32 0.6931472, %v3018_v16 }
 0x208   : > { %3029 = vlog2.f32 %v1547_v23  ;;  %v2367_v47 = vmul.f32 %v2356_v46, %v5537_v28  ;;  %v1557_v17 = vmul.f32 0.6931472, %v3020_v25 }
 0x209   : > { %v4959_v5 = vpop.xlane.xlu0 %1323  ;;  %3031 = vlog2.f32 %v2346_v30 }
 0x20a   : > { %v1565_v51 = vpop.xlane.xlu1 %1564  ;;  %2379 = vadd.xlane.f32.xlu0 %v2367_v47  ;;  %v1584_v13 = vmul.f32 %v1557_v17, %v5537_v28  ;;  %v1477_v28 = vadd.f32 1.0, %v4839_v59  ;;  %v1478_v17 = vadd.f32 1.0, %v4855_v45 }
 0x20b   : > { %v2395_v1 = vsub.f32 %v1454_v38, %v1565_v51  ;;  %v2276_v38 = vadd.f32 1.0, %v2204_v11 }
 0x20c   : > { %1596 = vadd.xlane.f32.xlu1 %v1584_v13  ;;  %3033 = vlog2.f32 %v1477_v28  ;;  %v2203_v28 = vsub.f32 %v4808_v20, %v4816_v21 }
 0x20d   : > { %v2403_v12 = vmul.f32 4.0, %v2395_v1  ;;  %v4963_v42 = vpop.xlane.xlu0 %2158  ;;  %v3022_v35 = vpop.eup %3021  ;;  %3035 = vlog2.f32 %v2276_v38 }
 0x20e   : > { %v4965_v26 = vpop.xlane.xlu1 %2128  ;;  %v2209_v44 = vsub.f32 %v4963_v42, %v4915_v34  ;;  %v3024_v3 = vpop.eup %3023  ;;  %v1559_v14 = vmul.f32 0.6931472, %v3022_v35  ;;  %3037 = vlog2.f32 %v1478_v17 }
 0x20f   : > { %v4969_v27 = vmul.f32 %v2403_v12, %v1485_v19  ;;  %v2358_v49 = vmul.f32 0.6931472, %v3024_v3  ;;  %v5569_v19 = vld [vmem:[#allocation35_spill] sm:$0xff]  ;;  %vm2495_vm13 = vcmp.gt.f32.partialorder %v4965_v26, 0.0 }
 0x210   : > { %v1585_v2 = vmul.f32 %v1559_v14, %v5538_v56 }
 0x211   : > { %v3026_v55 = vpop.eup %3025  ;;  %v4974_v61 = vpop.xlane.xlu0 %1326  ;;  %v2368_v43 = vmul.f32 %v2358_v49, %v5538_v56 }
 0x212   : > { %v1460_v39 = vpop.xlane.xlu1 %1459  ;;  %v3028_v0 = vpop.eup %3027  ;;  %v2360_v31 = vmul.f32 0.6931472, %v3026_v55  ;;  %1598 = vadd.xlane.f32.xlu0 %v1585_v2 }
 0x213   : > { %v1561_v40 = vmul.f32 0.6931472, %v3028_v0  ;;  %2381 = vadd.xlane.f32.xlu1 %v2368_v43  ;;  %v1479_v43 = vadd.f32 1.0, %v4873_v15 }
 0x214   : > { %v2369_v7 = vmul.f32 %v2360_v31, %v5544_v50 }
 0x215   : > { %v3030_v23 = vpop.eup %3029  ;;  %v4979_v16 = vpop.xlane.xlu0 %2161  ;;  %v1586_v59 = vmul.f32 %v1561_v40, %v5544_v50  ;;  %3039 = vlog2.f32 %v1479_v43 }
 0x216   : > { %v4982_v46 = vpop.xlane.xlu1 %2131  ;;  %v2210_v30 = vsub.f32 %v4979_v16, %v4938_v4  ;;  %v1563_v25 = vmul.f32 0.6931472, %v3030_v23  ;;  %v3032_v56 = vpop.eup %3031  ;;  %2383 = vadd.xlane.f32.xlu0 %v2369_v7  ;;  %v2275_v7 = vadd.f32 1.0, %v2203_v28 }
 0x217   : > { %1600 = vadd.xlane.f32.xlu1 %v1586_v59  ;;  %v2362_v50 = vmul.f32 0.6931472, %v3032_v56  ;;  %vm2496_vm15 = vcmp.gt.f32.partialorder %v4982_v46, 0.0 }
 0x218   : > { %v1587_v47 = vmul.f32 %v1563_v25, %v5546_v24  ;;  %3041 = vlog2.f32 %v2275_v7 }
 0x219   : > { %v4988_v51 = vpop.xlane.xlu0 %1329  ;;  %v2370_v3 = vmul.f32 %v2362_v50, %v5546_v24  ;;  %v3034_v14 = vpop.eup %3033 }
 0x21a   : > { %v1430_v1 = vpop.xlane.xlu1 %1429  ;;  %2249 = vadd.xlane.f32.xlu0 %v5569_v19  ;;  %v3036_v2 = vpop.eup %3035  ;;  %v1487_v0 = vmul.f32 0.6931472, %v3034_v14 }
 0x21b   : > { %v4990_v13 = vmul.f32 4.0, %v1430_v1  ;;  %1602 = vadd.xlane.f32.xlu1 %v1587_v47  ;;  %v2286_v24 = vmul.f32 0.6931472, %v3036_v2  ;;  %v3038_v56 = vpop.eup %3037  ;;  %v2278_v2 = vadd.f32 1.0, %v2206_v60 }
 0x21c   : > { %v1489_v17 = vmul.f32 0.6931472, %v3038_v56 }
 0x21d   : > { %v2419_v12 = vsub.f32 %v4990_v13, %v4969_v27  ;;  %v1457_v35 = vpop.xlane.xlu0 %1456 }
 0x21e   : > { %v1463_v11 = vpop.xlane.xlu1 %1462 }
 0x21f   : > { %2385 = vadd.xlane.f32.xlu1 %v2370_v3  ;;  %v2499_v3 = vsel %vm2491_vm9, %v4805_v52, 1.0  ;;  %vm2477_vm9 = vcmp.gt.f32.partialorder %v4959_v5, 0.0 }
 0x220   : > { %3043 = vrcp.f32 %v2499_v3  ;;  %v3095_v3 = vld [vmem:[%s3391_s25 + $0x40] sm:$0xff] }
 0x221   : > { %v1567_v45 = vpop.xlane.xlu0 %1566  ;;  %vm2299_vm1 = vcmp.ne.f32.partialorder %v3095_v3, 0.0 }
 0x222   : > { %v4996_v49 = vpop.xlane.xlu1 %2134  ;;  %v2396_v55 = vsub.f32 %v1457_v35, %v1567_v45  ;;  %v1480_v45 = vadd.f32 1.0, %v4894_v36 }
 0x223   : > { %vm2497_vm2 = vcmp.gt.f32.partialorder %v4996_v49, 0.0 }
 0x224   : > { %v2404_v38 = vmul.f32 4.0, %v2396_v55  ;;  %3045 = vlog2.f32 %v1480_v45 }
 0x225   : > { %v5001_v31 = vpop.xlane.xlu0 %1332  ;;  %3047 = vlog2.f32 %v2278_v2  ;;  %v5570_v2 = vsub.f32 %v4821_v53, %v4866_v37 }
 0x226   : > { %v2256_v40 = vpop.xlane.xlu1 %2255  ;;  %v5003_v23 = vmul.f32 %v2404_v38, %v1487_v0  ;;  %v3040_v38 = vpop.eup %3039 }
 0x227   : > { %v2452_v59 = vmul.f32 4.0, %v2256_v40  ;;  %v3042_v7 = vpop.eup %3041  ;;  %v1491_v36 = vmul.f32 0.6931472, %v3040_v38  ;;  %v2277_v38 = vadd.f32 1.0, %v5570_v2  ;;  %v3096_v2 = vld [vmem:[%s3391_s25 + $0x48] sm:$0xff] }
 0x228   : > { %v2284_v41 = vmul.f32 0.6931472, %v3042_v7  ;;  %vm2300_vm6 = vcmp.ne.f32.partialorder %v3096_v2, 0.0 }
 0x229   : > { %v5005_v25 = vmul.f32 %v2452_v59, %v2286_v24  ;;  %v1569_v47 = vpop.xlane.xlu0 %1568 }
 0x22a   : > { %v1436_v20 = vpop.xlane.xlu1 %1435  ;;  %v2397_v21 = vsub.f32 %v1460_v39, %v1569_v47  ;;  %v2500_v47 = vsel %vm2492_vm14, %v4799_v48, 1.0  ;;  %v5571_v48 = vmov 0.0  }
 0x22b   : > { %v5012_v35 = vmul.f32 4.0, %v1436_v20  ;;  %3049 = vrcp.f32 %v2500_v47 }
 0x22c   : > { %v2405_v15 = vmul.f32 4.0, %v2397_v21  ;;  %v2502_v21 = vsel %vm2494_vm10, %v4927_v29, 1.0  ;;  %vm2478_vm10 = vcmp.gt.f32.partialorder %v4974_v61, 0.0 }
 0x22d   : > { %v5008_v1 = vpop.xlane.xlu0 %1335  ;;  %3051 = vrcp.f32 %v2502_v21 }
 0x22e   : > { %v1573_v50 = vpop.xlane.xlu1 %1572  ;;  %v5010_v19 = vmul.f32 %v2405_v15, %v1489_v17  ;;  %3053 = vlog2.f32 %v2277_v38 }
 0x230   : > { %v2421_v14 = vsub.f32 %v5012_v35, %v5010_v19 }
 0x231   : > { %v1433_v28 = vpop.xlane.xlu0 %1432 }
 0x232   : > { %v2229_v39 = vpop.xlane.xlu1 %2228  ;;  %v5018_v55 = vmul.f32 4.0, %v1433_v28  ;;  %v3044_v28 = vpop.eup %3043 }
 0x233   : > { %v2443_v20 = vmul.f32 4.0, %v2229_v39  ;;  %v2871_v39 = vsel %vm2299_vm1, 1.0, %v5571_v48 }
 0x234   : > { %v2420_v0 = vsub.f32 %v5018_v55, %v5003_v23 }
 0x235   : > { %v1571_v52 = vpop.xlane.xlu0 %1570 }
 0x236   : > { %v5025_v43 = vpop.xlane.xlu1 %2258  ;;  %v2398_v40 = vsub.f32 %v1463_v11, %v1571_v52 }
 0x238   : > { %v2406_v24 = vmul.f32 4.0, %v2398_v40  ;;  %v3046_v40 = vpop.eup %3045 }
 0x239   : > { %v2253_v59 = vpop.xlane.xlu0 %2252  ;;  %v3048_v53 = vpop.eup %3047 }
 0x23a   : > { %v5028_v56 = vpop.xlane.xlu1 %1468  ;;  %v5031_v18 = vmul.f32 %v2406_v24, %v1491_v36  ;;  %v2451_v60 = vmul.f32 4.0, %v2253_v59  ;;  %v2280_v59 = vadd.f32 1.0, %v2208_v8  ;;  %v3050_v38 = vpop.eup %3049 }
 0x23c   : > { %v2459_v11 = vmul.f32 %v2451_v60, %v2284_v41  ;;  %v1493_v60 = vmul.f32 0.6931472, %v3046_v40  ;;  %3055 = vlog2.f32 %v2280_v59 }
 0x23d   : > { %v5035_v17 = vpop.xlane.xlu0 %1338  ;;  %3057 = vrcp.f32 %v2501_v62 }
 0x23e   : > { %v2262_v15 = vpop.xlane.xlu1 %2261  ;;  %v2467_v45 = vsub.f32 %v2443_v20, %v2459_v11 }
 0x23f   : > { %v2454_v11 = vmul.f32 4.0, %v2262_v15 }
 0x240   : > { %v2565_v52 = vmul.f32 %v3044_v28, %v2467_v45 }
 0x241   : > { %v1466_v7 = vpop.xlane.xlu0 %1465 }
 0x242   : > { %v5042_v36 = vpop.xlane.xlu1 %1441  ;;  %v2580_v29 = vsub.f32 0.0, %v2565_v52  ;;  %v2399_v24 = vsub.f32 %v1466_v7, %v1573_v50  ;;  %v2290_v50 = vmul.f32 0.6931472, %v3048_v53  ;;  %v3097_v52 = vld [vmem:[%s3391_s25 + $0x58] sm:$0xff]  ;;  %v2504_v7 = vsel %vm2496_vm15, %v4982_v46, 1.0 }
 0x243   : > { %vm2302_vm7 = vcmp.ne.f32.partialorder %v3097_v52, 0.0  ;;  %3059 = vrcp.f32 %v2504_v7 }
 0x244   : > { %v2588_v41 = vmul.f32 %v2871_v39, %v2580_v29  ;;  %v2407_v47 = vmul.f32 4.0, %v2399_v24  ;;  %v2462_v3 = vmul.f32 %v2454_v11, %v2290_v50  ;;  %v3052_v39 = vpop.eup %3051  ;;  %v2874_v53 = vsel %vm2302_vm7, 1.0, %v5571_v48 }
 0x245   : > { %v5047_v37 = vpop.xlane.xlu0 %2137  ;;  %v3054_v11 = vpop.eup %3053  ;;  %vm2480_vm7 = vcmp.gt.f32.partialorder %v5001_v31, 0.0 }
 0x246   : > { %v5049_v20 = vpop.xlane.xlu1 %1576  ;;  %v5052_v21 = vmul.f32 %v2407_v47, %v1493_v60  ;;  %v2872_v47 = vsel %vm2300_vm6, 1.0, %v5571_v48  ;;  %v2288_v2 = vmul.f32 0.6931472, %v3054_v11  ;;  %vm2479_vm6 = vcmp.gt.f32.partialorder %v4988_v51, 0.0 }
 0x249   : > { %v2232_v6 = vpop.xlane.xlu0 %2231 }
 0x24a   : > { %v2238_v8 = vpop.xlane.xlu1 %2237  ;;  %v2444_v45 = vmul.f32 4.0, %v2232_v6 }
 0x24b   : > { %v2446_v28 = vmul.f32 4.0, %v2238_v8  ;;  %v2453_v8 = vmul.f32 4.0, %v5025_v43 }
 0x24c   : > { %v2468_v15 = vsub.f32 %v2444_v45, %v5005_v25 }
 0x24d   : > { %v2470_v40 = vsub.f32 %v2446_v28, %v2462_v3  ;;  %v1439_v57 = vpop.xlane.xlu0 %1438  ;;  %v2279_v28 = vadd.f32 1.0, %v2207_v54 }
 0x24e   : > { %v5060_v29 = vpop.xlane.xlu1 %1474  ;;  %v2567_v24 = vmul.f32 %v3050_v38, %v2468_v15  ;;  %v5062_v60 = vmul.f32 4.0, %v1439_v57  ;;  %v2596_v38 = vsel %vm2539_vm11, %v2588_v41, 0.0  ;;  %v3056_v15 = vpop.eup %3055  ;;  %v2461_v57 = vmul.f32 %v2453_v8, %v2288_v2  ;;  %v3099_v8 = vld [vmem:[%s3391_s25 + $0x68] sm:$0xff] }
 0x24f   : > { %v2571_v59 = vmul.f32 %v3052_v39, %v2470_v40  ;;  %3061 = vlog2.f32 %v2279_v28  ;;  %v3058_v63 = vpop.eup %3057  ;;  %vm2304_vm8 = vcmp.ne.f32.partialorder %v3099_v8, 0.0  ;;  %v2503_v28 = vsel %vm2495_vm13, %v4965_v26, 1.0 }
 0x250   : > { %v2581_v50 = vsub.f32 0.0, %v2567_v24  ;;  %v2422_v25 = vsub.f32 %v5062_v60, %v5031_v18  ;;  %v3060_v2 = vpop.eup %3059  ;;  %3063 = vrcp.f32 %v2503_v28  ;;  %vm2481_vm13 = vcmp.gt.f32.partialorder %v5008_v1, 0.0 }
 0x251   : > { %v2583_v62 = vsub.f32 0.0, %v2571_v59  ;;  %v5068_v46 = vpop.xlane.xlu0 %1574  ;;  %v3098_v59 = vld [vmem:[%s3391_s25 + $0x50] sm:$0xff]  ;;  %v2489_v18 = vsel %vm2481_vm13, %v5008_v1, 1.0  ;;  %v2391_v60 = vmul.f32 4.0, %v5042_v36 }
 0x252   : > { %v2268_v6 = vpop.xlane.xlu1 %2267  ;;  %v2589_v3 = vmul.f32 %v2872_v47, %v2581_v50  ;;  %vm2301_vm12 = vcmp.ne.f32.partialorder %v3098_v59, 0.0  ;;  %v2294_v47 = vmul.f32 0.6931472, %v3056_v15  ;;  %v2400_v16 = vsub.f32 %v5028_v56, %v5068_v46 }
 0x253   : > { %v2591_v45 = vmul.f32 %v2874_v53, %v2583_v62  ;;  %v2456_v24 = vmul.f32 4.0, %v2268_v6  ;;  %v2873_v62 = vsel %vm2301_vm12, 1.0, %v5571_v48 }
 0x254   : > { %v2597_v52 = vsel %vm2539_vm11, %v2589_v3, 0.0  ;;  %v2408_v46 = vmul.f32 4.0, %v2400_v16 }
 0x255   : > { %v2598_v40 = vadd.f32 %v2597_v52, %v2596_v38  ;;  %v2235_v39 = vpop.xlane.xlu0 %2234  ;;  %v2464_v53 = vmul.f32 %v2456_v24, %v2294_v47 }
 0x256   : > { %v5076_v7 = vpop.xlane.xlu1 %1447  ;;  %v2445_v43 = vmul.f32 4.0, %v2235_v39  ;;  %v2876_v39 = vsel %vm2304_vm8, 1.0, %v5571_v48  ;;  %vm2498_vm8 = vcmp.gt.f32.partialorder %v5047_v37, 0.0 }
 0x257   : > { %v2506_v1 = vsel %vm2498_vm8, %v5047_v37, 1.0 }
 0x258   : > { %v2469_v58 = vsub.f32 %v2445_v43, %v2461_v57  ;;  %v2281_v57 = vadd.f32 1.0, %v2209_v44  ;;  %v2505_v44 = vsel %vm2497_vm2, %v4996_v49, 1.0  ;;  %v2483_v49 = vsel %vm2475_vm3, %v4797_v32, 1.0 }
 0x259   : > { %v5079_v54 = vpop.xlane.xlu0 %1471 }
 0x25a   : > { %v2244_v41 = vpop.xlane.xlu1 %2243  ;;  %v2569_v11 = vmul.f32 %v3058_v63, %v2469_v58  ;;  %v2601_v58 = vsel %vm2539_vm11, %v2591_v45, 0.0  ;;  %3065 = vlog2.f32 %v2281_v57  ;;  %v2484_v57 = vsel %vm2476_vm4, %v4792_v33, 1.0 }
 0x25b   : > { %v2448_v50 = vmul.f32 4.0, %v2244_v41  ;;  %3067 = vrcp.f32 %v2505_v44  ;;  %v2485_v33 = vsel %vm2477_vm9, %v4959_v5, 1.0  ;;  %v2486_v5 = vsel %vm2478_vm10, %v4974_v61, 1.0 }
 0x25c   : > { %v2582_v6 = vsub.f32 0.0, %v2569_v11  ;;  %v3062_v41 = vpop.eup %3061  ;;  %3069 = vrcp.f32 %v2483_v49 }
 0x25d   : > { %v2472_v3 = vsub.f32 %v2448_v50, %v2464_v53  ;;  %v2265_v38 = vpop.xlane.xlu0 %2264  ;;  %v2292_v42 = vmul.f32 0.6931472, %v3062_v41  ;;  %v3064_v45 = vpop.eup %3063  ;;  %3071 = vrcp.f32 %v2484_v57 }
 0x25e   : > { %v2590_v52 = vmul.f32 %v2873_v62, %v2582_v6  ;;  %v2455_v34 = vmul.f32 4.0, %v2265_v38  ;;  %3073 = vrcp.f32 %v2485_v33  ;;  %v1481_v33 = vadd.f32 1.0, %v4917_v10 }
 0x25f   : > { %v2575_v15 = vmul.f32 %v3060_v2, %v2472_v3  ;;  %3075 = vrcp.f32 %v2486_v5 }
 0x260   : > { %v2599_v24 = vsel %vm2539_vm11, %v2590_v52, 0.0  ;;  %v2463_v50 = vmul.f32 %v2455_v34, %v2292_v42  ;;  %v5108_v42 = vpop.xlane.xlu1 %2273  ;;  %3077 = vlog2.f32 %v1481_v33 }
 0x261   : > { %v2585_v43 = vsub.f32 0.0, %v2575_v15  ;;  %v2600_v59 = vadd.f32 %v2599_v24, %v2598_v40  ;;  %v5090_v47 = vpop.xlane.xlu0 %1444  ;;  %v3100_v40 = vld [vmem:[%s3391_s25 + $0x60] sm:$0xff] }
 0x262   : > { %vm2303_vm5 = vcmp.ne.f32.partialorder %v3100_v40, 0.0 }
 0x263   : > { %v2593_v26 = vmul.f32 %v2876_v39, %v2585_v43  ;;  %v2602_v63 = vadd.f32 %v2601_v58, %v2600_v59  ;;  %v2875_v2 = vsel %vm2303_vm5, 1.0, %v5571_v48  ;;  %vm2482_vm5 = vcmp.gt.f32.partialorder %v5035_v17, 0.0 }
 0x264   : > { %v2490_v33 = vsel %vm2482_vm5, %v5035_v17, 1.0  ;;  %v2458_v17 = vmul.f32 4.0, %v5108_v42 }
 0x265   : > { %v5093_v53 = vpop.xlane.xlu0 %1578  ;;  %v2605_v32 = vsel %vm2539_vm11, %v2593_v26, 0.0 }
 0x267   : > { %v3066_v38 = vpop.eup %3065 }
 0x268   : > { %v2296_v43 = vmul.f32 0.6931472, %v3066_v38 }
 0x269   : > { %v2241_v11 = vpop.xlane.xlu0 %2240 }
 0x26a   : > { %v2447_v62 = vmul.f32 4.0, %v2241_v11  ;;  %v3101_v11 = vld [vmem:[%s3391_s25 + $0x70] sm:$0xff] }
 0x26b   : > { %vm2305_vm14 = vcmp.ne.f32.partialorder %v3101_v11, 0.0 }
 0x26c   : > { %v2471_v8 = vsub.f32 %v2447_v62, %v2463_v50  ;;  %v3068_v62 = vpop.eup %3067 }
 0x26d   : > { %v2271_v6 = vpop.xlane.xlu0 %2270  ;;  %v3070_v57 = vpop.eup %3069 }
 0x26e   : > { %v2573_v3 = vmul.f32 %v3064_v45, %v2471_v8  ;;  %v2457_v39 = vmul.f32 4.0, %v2271_v6  ;;  %v2877_v45 = vsel %vm2305_vm14, 1.0, %v5571_v48 }
 0x270   : > { %v2584_v28 = vsub.f32 0.0, %v2573_v3  ;;  %v2465_v41 = vmul.f32 %v2457_v39, %v2296_v43  ;;  %v3103_v43 = vld [vmem:[%s3391_s25 + $0x8] sm:$0xff] }
 0x271   : > { %v5102_v52 = vpop.xlane.xlu0 %1450  ;;  %vm1501_vm0 = vcmp.ne.f32.partialorder %v3103_v43, 0.0  ;;  %v1483_v43 = vadd.f32 1.0, %v4945_v9 }
 0x272   : > { %v2592_v15 = vmul.f32 %v2875_v2, %v2584_v28  ;;  %v3102_v28 = vld [vmem:[%s3391_s25] sm:$0xff] }
 0x273   : > { %vm1500_vm1 = vcmp.ne.f32.partialorder %v3102_v28, 0.0 }
 0x274   : > { %v2603_v24 = vsel %vm2539_vm11, %v2592_v15, 0.0  ;;  %v2805_v61 = vsel %vm1500_vm1, 1.0, %v5571_v48 }
 0x275   : > { %v2247_v59 = vpop.xlane.xlu0 %2246  ;;  %v2604_v58 = vadd.f32 %v2603_v24, %v2602_v63 }
 0x276   : > { %v2449_v34 = vmul.f32 4.0, %v2247_v59 }
 0x277   : > { %v2606_v44 = vadd.f32 %v2605_v32, %v2604_v58  ;;  %v2806_v32 = vsel %vm1501_vm0, 1.0, %v5571_v48 }
 0x278   : > { %v2473_v50 = vsub.f32 %v2449_v34, %v2465_v41  ;;  %v3072_v41 = vpop.eup %3071 }
 0x279   : > { %v1589_v40 = vpop.xlane.xlu0 %1588  ;;  %v3074_v55 = vpop.eup %3073 }
 0x27a   : > { %v2577_v8 = vmul.f32 %v3068_v62, %v2473_v50  ;;  %v3076_v5 = vpop.eup %3075 }
 0x27b   : > { %v1591_v63 = vpop.xlane.xlu1 %1590 }
 0x27c   : > { %v2586_v6 = vsub.f32 0.0, %v2577_v8 }
 0x27d   : > { %v2372_v26 = vpop.xlane.xlu0 %2371 }
 0x27e   : > { %v2594_v3 = vmul.f32 %v2877_v45, %v2586_v6  ;;  %v2427_v2 = vadd.f32 %v2372_v26, %v1589_v40 }
 0x27f   : > { %v2374_v38 = vpop.xlane.xlu1 %2373 }
 0x280   : > { %v2435_v49 = vsub.f32 %v2419_v12, %v2427_v2  ;;  %v2428_v15 = vadd.f32 %v2374_v38, %v1591_v63  ;;  %v2607_v39 = vsel %vm2539_vm11, %v2594_v3, 0.0  ;;  %v2487_v63 = vsel %vm2479_vm6, %v4988_v51, 1.0 }
 0x281   : > { %v5120_v24 = vadd.f32 %v2607_v39, %v2606_v44  ;;  %v3104_v44 = vld [vmem:[%s3391_s25 + $0x10] sm:$0xff]  ;;  %v2282_v51 = vadd.f32 1.0, %v2210_v30 }
 0x282   : > { %v2508_v59 = vmul.f32 %v3070_v57, %v2435_v49  ;;  %v2436_v58 = vsub.f32 %v2420_v0, %v2428_v15  ;;  %vm1502_vm15 = vcmp.ne.f32.partialorder %v3104_v44, 0.0  ;;  %v1482_v0 = vadd.f32 1.0, %v4930_v22 }
 0x283   : > { %v2376_v27 = vpop.xlane.xlu0 %2375  ;;  %v2807_v8 = vsel %vm1502_vm15, 1.0, %v5571_v48  ;;  %v2488_v15 = vsel %vm2480_vm7, %v5001_v31, 1.0 }
 0x284   : > { %v2523_v13 = vsub.f32 0.0, %v2508_v59  ;;  %v2510_v12 = vmul.f32 %v3072_v41, %v2436_v58  ;;  %v1593_v34 = vpop.xlane.xlu1 %1592  ;;  %3079 = vlog2.f32 %v1482_v0  ;;  %v3078_v59 = vpop.eup %3077  ;;  %v2423_v58 = vsub.f32 %v2391_v60, %v5052_v21  ;;  %v3109_v60 = vld [vmem:[%s3391_s25 + $0x78] sm:$0xff] }
 0x285   : > { %v2429_v11 = vadd.f32 %v2376_v27, %v1593_v34  ;;  %3081 = vrcp.f32 %v2487_v63  ;;  %v3106_v27 = vld [vmem:[%s3391_s25 + $0x20] sm:$0xff]  ;;  %v2392_v21 = vmul.f32 4.0, %v5090_v47  ;;  %v2393_v47 = vmul.f32 4.0, %v5076_v7 }
 0x286   : > { %v2531_v50 = vmul.f32 %v2805_v61, %v2523_v13  ;;  %v2524_v62 = vsub.f32 0.0, %v2510_v12  ;;  %3083 = vlog2.f32 %v2282_v51  ;;  %vm1504_vm2 = vcmp.ne.f32.partialorder %v3106_v27, 0.0 }
 0x287   : > { %v2437_v23 = vsub.f32 %v2421_v14, %v2429_v11  ;;  %v3105_v14 = vld [vmem:[%s3391_s25 + $0x18] sm:$0xff]  ;;  %3085 = vrcp.f32 %v2488_v15  ;;  %v2402_v63 = vsub.f32 %v5060_v29, %v5093_v53  ;;  %vm2306_vm9 = vcmp.ne.f32.partialorder %v3109_v60, 0.0 }
 0x288   : > { %v2532_v40 = vmul.f32 %v2806_v32, %v2524_v62  ;;  %v2540_v10 = vsel %vm2539_vm11, %v2531_v50, 0.0  ;;  %vm1503_vm12 = vcmp.ne.f32.partialorder %v3105_v14, 0.0  ;;  %3087 = vlog2.f32 %v1483_v43 }
 0x289   : > { %v2512_v45 = vmul.f32 %v3074_v55, %v2437_v23  ;;  %v2808_v57 = vsel %vm1503_vm12, 1.0, %v5571_v48  ;;  %3089 = vrcp.f32 %v2489_v18  ;;  %v2809_v32 = vsel %vm1504_vm2, 1.0, %v5571_v48 }
 0x28a   : > { %v2541_v6 = vsel %vm2539_vm11, %v2532_v40, 0.0  ;;  %3091 = vrcp.f32 %v2506_v1  ;;  %v3107_v40 = vld [vmem:[%s3391_s25 + $0x28] sm:$0xff]  ;;  %v2410_v29 = vmul.f32 4.0, %v2402_v63 }
 0x28b   : > { %v2542_v26 = vadd.f32 %v2541_v6, %v2540_v10  ;;  %v2525_v3 = vsub.f32 0.0, %v2512_v45  ;;  %v1595_v2 = vpop.xlane.xlu0 %1594  ;;  %vm1505_vm3 = vcmp.ne.f32.partialorder %v3107_v40, 0.0  ;;  %3093 = vrcp.f32 %v2490_v33 }
 0x28c   : > { %v2378_v19 = vpop.xlane.xlu1 %2377 }
 0x28d   : > { %v2533_v35 = vmul.f32 %v2807_v8, %v2525_v3  ;;  %v2430_v22 = vadd.f32 %v2378_v19, %v1595_v2 }
 0x28f   : > { %v2543_v28 = vsel %vm2539_vm11, %v2533_v35, 0.0  ;;  %v2438_v38 = vsub.f32 %v2422_v25, %v2430_v22  ;;  %v2401_v25 = vsub.f32 %v5079_v54, %v5049_v20  ;;  %v1495_v20 = vmul.f32 0.6931472, %v3078_v59 }
 0x290   : > { %v2544_v49 = vadd.f32 %v2543_v28, %v2542_v26  ;;  %v2810_v28 = vsel %vm1505_vm3, 1.0, %v5571_v48 }
 0x291   : > { %v2514_v39 = vmul.f32 %v3076_v5, %v2438_v38  ;;  %v3080_v36 = vpop.eup %3079  ;;  %v2409_v54 = vmul.f32 4.0, %v2401_v25  ;;  %v2416_v11 = vmul.f32 %v2408_v46, %v1495_v20  ;;  %v3108_v38 = vld [vmem:[%s3391_s25 + $0x30] sm:$0xff]  ;;  %v2878_v46 = vsel %vm2306_vm9, 1.0, %v5571_v48 }
 0x292   : > { %v3082_v12 = vpop.eup %3081  ;;  %v1497_v37 = vmul.f32 0.6931472, %v3080_v36  ;;  %vm1506_vm4 = vcmp.ne.f32.partialorder %v3108_v38, 0.0 }
 0x293   : > { %v2526_v4 = vsub.f32 0.0, %v2514_v39  ;;  %v2380_v30 = vpop.xlane.xlu0 %2379  ;;  %v2424_v55 = vsub.f32 %v2392_v21, %v2416_v11  ;;  %v3084_v45 = vpop.eup %3083  ;;  %v2811_v18 = vsel %vm1506_vm4, 1.0, %v5571_v48 }
 0x294   : > { %v2417_v23 = vmul.f32 %v2409_v54, %v1497_v37  ;;  %v3086_v26 = vpop.eup %3085  ;;  %v2298_v7 = vmul.f32 0.6931472, %v3084_v45 }
 0x295   : > { %v2534_v31 = vmul.f32 %v2808_v57, %v2526_v4  ;;  %v1597_v9 = vpop.xlane.xlu1 %1596  ;;  %v3088_v51 = vpop.eup %3087  ;;  %v2394_v4 = vmul.f32 4.0, %v5102_v52 }
 0x296   : > { %v2431_v56 = vadd.f32 %v2380_v30, %v1597_v9  ;;  %v2425_v35 = vsub.f32 %v2393_v47, %v2417_v23  ;;  %v3090_v42 = vpop.eup %3089  ;;  %v2466_v15 = vmul.f32 %v2458_v17, %v2298_v7  ;;  %v1499_v43 = vmul.f32 0.6931472, %v3088_v51 }
 0x297   : > { %v2545_v41 = vsel %vm2539_vm11, %v2534_v31, 0.0  ;;  %v3092_v25 = vpop.eup %3091 }
 0x298   : > { %v2546_v61 = vadd.f32 %v2545_v41, %v2544_v49  ;;  %v2439_v13 = vsub.f32 %v2423_v58, %v2431_v56  ;;  %v2418_v9 = vmul.f32 %v2410_v29, %v1499_v43  ;;  %v3094_v54 = vpop.eup %3093 }
 0x29a   : > { %v2516_v34 = vmul.f32 %v3082_v12, %v2439_v13  ;;  %v3110_v13 = vld [vmem:[%s3391_s25 + $0x38] sm:$0xff]  ;;  %s2777_s25 = sshll.u32 %s3381_s23, 3 }
 0x29b   : > { %v1599_v44 = vpop.xlane.xlu0 %1598  ;;  %vm1507_vm14 = vcmp.ne.f32.partialorder %v3110_v13, 0.0  ;;  %s747_s12 = scalar_lea.vmem [#allocation6], %s2777_s25  ;;  %s3117_s25 = scalar_lea.vmem %s3116_s0, 256 }
 0x29c   : > { %v2527_v50 = vsub.f32 0.0, %v2516_v34  ;;  %v2382_v62 = vpop.xlane.xlu1 %2381  ;;  %v2812_v11 = vsel %vm1507_vm14, 1.0, %v5571_v48  ;;  %s2638_s13 = sshll.u32 %s747_s12, 4  ;;  %s2639_s13 = int_to_ptr.vmem [resolvable:$true] %s2638_s13 }
 0x29d   : > { %v2432_v0 = vadd.f32 %v2382_v62, %v1599_v44  ;;  %s3111_s24 = scalar_lea.vmem %s2639_s13, 128  ;;  %p3118_p2 = scmp.lt.s32.totalorder %s2639_s13, %s3116_s0 }
 0x29e   : > { %v2535_v8 = vmul.f32 %v2809_v32, %v2527_v50  ;;  %p3112_p13 = scmp.ne.s32.totalorder %s2639_s13, %s3111_s24  ;;  %p3119_p3 = scmp.lt.s32.totalorder %s3117_s25, %s3111_s24 }
 0x29f   : > { %v2440_v10 = vsub.f32 %v2424_v55, %v2432_v0  ;;  %v2384_v6 = vpop.xlane.xlu0 %2383 }
 0x2a0   : > { %v2547_v3 = vsel %vm2539_vm11, %v2535_v8, 0.0  ;;  %v1601_v2 = vpop.xlane.xlu1 %1600  ;;  %p3113_p0 = pnand %p3112_p13, %p3264_p6  ;;  %p3120_p4 = por %p3119_p3, %p3118_p2 }
 0x2a1   : > { %v2518_v19 = vmul.f32 %v3086_v26, %v2440_v10  ;;  %v2433_v22 = vadd.f32 %v2384_v6, %v1601_v2  ;;  %v2548_v14 = vadd.f32 %v2547_v3, %v2546_v61  ;;  %v2426_v61 = vsub.f32 %v2394_v4, %v2418_v9 }
 0x2a2   : > { %p3114_p1 = pneg %p3113_p0 }
 0x2a3   : > { %v2528_v53 = vsub.f32 0.0, %v2518_v19  ;;  %v2441_v5 = vsub.f32 %v2425_v35, %v2433_v22  ;;  %v2250_v49 = vpop.xlane.xlu0 %2249 }
 0x2a4   : > { %v2450_v39 = vmul.f32 4.0, %v2250_v49  ;;  %v1603_v57 = vpop.xlane.xlu1 %1602  ;;  %p3121_p5 = pnand %p3120_p4, %p3114_p1 }
 0x2a5   : > { %v2536_v16 = vmul.f32 %v2810_v28, %v2528_v53  ;;  %v2520_v30 = vmul.f32 %v3090_v42, %v2441_v5 }
 0x2a6   : > { %v2474_v31 = vsub.f32 %v2450_v39, %v2466_v15 }
 0x2a7   : > { %v2529_v59 = vsub.f32 0.0, %v2520_v30  ;;  %v2549_v58 = vsel %vm2539_vm11, %v2536_v16, 0.0 }
 0x2a8   : > { %v2579_v41 = vmul.f32 %v3092_v25, %v2474_v31  ;;  %v2386_v56 = vpop.xlane.xlu1 %2385  ;;  %v2550_v1 = vadd.f32 %v2549_v58, %v2548_v14 }
 0x2a9   : > { %v2537_v52 = vmul.f32 %v2811_v18, %v2529_v59  ;;  %v2434_v36 = vadd.f32 %v2386_v56, %v1603_v57 }
 0x2aa   : > { %v2587_v27 = vsub.f32 0.0, %v2579_v41 }
 0x2ab   : > { %v2442_v12 = vsub.f32 %v2426_v61, %v2434_v36  ;;  %v2551_v20 = vsel %vm2539_vm11, %v2537_v52, 0.0 }
 0x2ac   : > { %v2595_v21 = vmul.f32 %v2878_v46, %v2587_v27  ;;  %v2552_v34 = vadd.f32 %v2551_v20, %v2550_v1 }
 0x2ad   : > { %v2522_v32 = vmul.f32 %v3094_v54, %v2442_v12 }
 0x2ae   : > { %v2609_v37 = vsel %vm2539_vm11, %v2595_v21, 0.0 }
 0x2af   : > { %v2530_v44 = vsub.f32 0.0, %v2522_v32  ;;  %v2610_v33 = vadd.f32 %v2609_v37, %v5120_v24 }
 0x2b1   : > { %2611 = vadd.xlane.f32.xlu1 %v2610_v33  ;;  %v2538_v50 = vmul.f32 %v2812_v11, %v2530_v44 }
 0x2b3   : > { %v2553_v62 = vsel %vm2539_vm11, %v2538_v50, 0.0 }
 0x2b4   : > { %v2554_v23 = vadd.f32 %v2553_v62, %v2552_v34 }
 0x2b6   : > { %2555 = vadd.xlane.f32.xlu0 %v2554_v23 }
 0x33a   : > { %v2612_v55 = vpop.xlane.xlu1 %2611 }
 0x33b   : > { %v2613_v0 = vrot.slane %v2612_v55, 4 }
 0x33d   : > { %v2614_v40 = vadd.f32 %v2613_v0, %v2612_v55 }
 0x33f   : > { %v2615_v8 = vrot.slane %v2614_v40, 2  ;;  %v2556_v45 = vpop.xlane.xlu0 %2555 }
 0x340   : > { %v2557_v47 = vrot.slane %v2556_v45, 4 }
 0x341   : > { %v2616_v63 = vadd.f32 %v2615_v8, %v2614_v40 }
 0x342   : > { %v2558_v48 = vadd.f32 %v2557_v47, %v2556_v45 }
 0x343   : > { %v2617_v26 = vrot.slane %v2616_v63, 1 }
 0x344   : > { %v2559_v10 = vrot.slane %v2558_v48, 2 }
 0x345   : > { %v2618_v3 = vadd.f32 %v2617_v26, %v2616_v63 }
 0x346   : > { %v2560_v6 = vadd.f32 %v2559_v10, %v2558_v48 }
 0x348   : > { %v2561_v24 = vrot.slane %v2560_v6, 1 }
 0x34a   : > { %v2562_v17 = vadd.f32 %v2561_v24, %v2560_v6 }
 0x34c   : > { %2887 = vpush %v2562_v17 }
 0x34d   : > { %2889 = vpush %v2618_v3 }
 0x37d   : > { %s2888_s10 = spop %2887 }
 0x37e   : > { %s2890_s18 = spop %2889 }
 0x37f   : > { %s2620_s19 = sadd.f32 %s2890_s18, %s2888_s10 }
 0x381   : > { %v2621_v2 = vstv %s2620_s19 }
 0x382   : > { %2623 = vst [vmem:[%s747_s12] sm:$0xff] %v2621_v2 }
 0x383   : > { %3124 = shalt.err (!%p3121_p5)
}
 0x384   : > { %s3125_s26 = scalar_lea.hbm %s5192_s21, 128  ;;  %s3129_s12 = scalar_lea.hbm %s5237_s8, 256 }
 0x385   : > { %p3126_p7 = scmp.ne.s32.totalorder %s5192_s21, %s3125_s26  ;;  %p3130_p12 = scmp.lt.s32.totalorder %s5192_s21, %s5237_s8 }
 0x386   : > { %p3131_p13 = scmp.lt.s32.totalorder %s3129_s12, %s3125_s26 }
 0x387   : > { %p3127_p10 = pnand %p3126_p7, %p3264_p6 }
 0x388   : > { %p3132_p0 = por %p3131_p13, %p3130_p12 }
 0x389   : > { %p3128_p11 = pneg %p3127_p10 }
 0x38b   : > { %p3133_p1 = pnand %p3132_p0, %p3128_p11 }
 0x38d   : > { %3136 = shalt.err (!%p3133_p1)
}
 0x38e   : > { %2891 = dma.vmem_to_hbm [thread:$0]  (%p3264_p6), %s2639_s13, 128, %s5192_s21, %s2625_s22  }
 0x38f PF: > { %s2650_s0 = sand.u32 1, %s3159_s27   ;;  %p2894_p2 = pnand %p2759_p9, %p3268_p8 }
 0x390   : > { %s2651_s20 = scalar_lea.sflag [#allocation7], %s2650_s0 }
 0x391   : > { %p2895_p3 = pneg %p2894_p2 }
 0x393   : > { %3154 = dma.done.wait (%p2895_p3), %s2651_s20, 128  }
 0x394   : > { %3156 = vsyncadd (%p2895_p3), %s2651_s20, 4294967168  ;;  %p18_p4 = scmp.ge.s32.totalorder %s3246_s11, 4   ;;  %s5572_s27 = smov %s3163_s28 }
 0x395   : > { %s5573_s28 = smov %s3167_s29  ;;  %s5574_s29 = smov %s3258_s14 }
 0x396   : > { %s5575_s30 = smov %s3246_s11  ;;  %20 = sbr.rel (!%p18_p4) target bundleno = 5 (0x5), region = 272 }
 0x39b   :  { %2656 = vsyncpa [#allocation7], 1 }
 0x39c   :  { %2658 = vsyncpa [#allocation7 + $0x1], 1 }

</bundles_post_ra>
